<compile_context>
chip_gen: v7x
topology: tpu7x:2x2x1
jax: 0.10.0
libtpu: 0.0.40
codegen_flags: <defaults>
</compile_context>

<pallas_src>
import jax
import jax.numpy as jnp
from jax.experimental import pallas as pl
from jax.experimental.pallas import tpu as pltpu

CFGS = [[32, 64, 1], [64, 128, 2], [128, 128, 1], [128, 256, 2], [256, 256, 1],
        [256, 512, 2], [512, 512, 1], [512, 512, 1], [512, 512, 1],
        [512, 512, 1], [512, 512, 1], [512, 1024, 2], [1024, 1024, 1]]


def _out_size(h, stride):
    # kernel=3, padding=1
    return (h + 2 - 3) // stride + 1


# ---------------------------------------------------------------------------
# Pallas kernels
# ---------------------------------------------------------------------------

def _matmul_bn_relu_kernel(x_ref, w_ref, scale_ref, bias_ref, o_ref):
    """o = relu((x @ w) * scale + bias); x:(tm,K) bf16, w:(K,N) bf16."""
    y = jnp.dot(x_ref[...], w_ref[...], preferred_element_type=jnp.float32)
    y = y * scale_ref[...] + bias_ref[...]
    o_ref[...] = jnp.maximum(y, 0.0).astype(o_ref.dtype)


def _make_dsconv_kernel(stride, Ho, Wo, Cin, Cout):
    """Fused depthwise 3x3 conv + BN + ReLU + pointwise 1x1 conv + BN + ReLU.

    Activation inputs:
      stride 1: one padded NHWC block (1, H+2, W+2, Cin)
      stride 2: four spatial-parity sub-grids of the padded input, so all
                in-kernel tap slices are unit-stride.
    """
    n_act = 1 if stride == 1 else 4

    def kernel(*refs):
        x_refs = refs[:n_act]
        (wdw_ref, sdw_ref, bdw_ref,
         wpw_ref, spw_ref, bpw_ref, o_ref) = refs[n_act:]

        wdw = wdw_ref[...]                               # (9, Cin), loaded once
        acc = jnp.zeros((Ho, Wo, Cin), jnp.float32)
        k = 0
        for kh in range(3):
            for kw in range(3):
                if stride == 1:
                    tap = x_refs[0][0, pl.ds(kh, Ho), pl.ds(kw, Wo), :]
                else:  # pick the right parity sub-grid, unit-stride slice
                    r = x_refs[(kh % 2) * 2 + (kw % 2)]
                    tap = r[0, pl.ds(kh // 2, Ho), pl.ds(kw // 2, Wo), :]
                acc = acc + tap * wdw[k:k + 1]           # (Ho,Wo,Cin)*(1,Cin)
                k += 1

        # depthwise BN + ReLU (f32); intermediate stays on-chip
        y = jnp.maximum(acc * sdw_ref[...] + bdw_ref[...], 0.0)
        y2 = y.reshape(Ho * Wo, Cin).astype(jnp.bfloat16)

        # pointwise 1x1 conv on the MXU (bf16 operands, f32 accumulation)
        z = jnp.dot(y2, wpw_ref[...], preferred_element_type=jnp.float32)
        z = jnp.maximum(z * spw_ref[...] + bpw_ref[...], 0.0)
        o_ref[0] = z.astype(o_ref.dtype)

    return kernel


def _pool_fc_kernel(x_ref, w_ref, b_ref, o_ref):
    """Global average pool over spatial axis + linear classifier."""
    x = x_ref[...]                                       # (N, HW, C) f32
    pooled = jnp.sum(x, axis=1) * (1.0 / x.shape[1])     # (N, C)
    y = jnp.dot(pooled.astype(jnp.bfloat16), w_ref[...],
                preferred_element_type=jnp.float32)
    o_ref[...] = (y + b_ref[...]).astype(o_ref.dtype)


# ---------------------------------------------------------------------------
# pallas_call wrappers
# ---------------------------------------------------------------------------

def matmul_bn_relu(x2d, w, scale, bias, tile_m=None):
    M, K = x2d.shape
    Nc = w.shape[1]
    if tile_m is None or tile_m <= 0 or M % tile_m != 0 or tile_m % 8 != 0:
        tile_m = M
    # NOTE: for much larger M, also set vmem_limit_bytes via CompilerParams.
    return pl.pallas_call(
        _matmul_bn_relu_kernel,
        grid=(M // tile_m,),
        in_specs=[pl.BlockSpec((tile_m, K), lambda i: (i, 0)),
                  pl.BlockSpec((K, Nc), lambda i: (0, 0)),
                  pl.BlockSpec((1, Nc), lambda i: (0, 0)),
                  pl.BlockSpec((1, Nc), lambda i: (0, 0))],
        out_specs=pl.BlockSpec((tile_m, Nc), lambda i: (i, 0)),
        out_shape=jax.ShapeDtypeStruct((M, Nc), jnp.float32),
        compiler_params=pltpu.CompilerParams(
            dimension_semantics=("parallel",)),
    )(x2d, w, scale, bias)


def dsconv_block(x_nhwc, p):
    """One fused DSConv block. Returns ((N, Ho*Wo, Cout) f32, Ho, Wo)."""
    N, H, W, Cin = x_nhwc.shape
    stride = p['stride']
    Ho, Wo = _out_size(H, stride), _out_size(W, stride)
    Cout = p['pw_w'].shape[1]

    xp = jnp.pad(x_nhwc, ((0, 0), (1, 1), (1, 1), (0, 0)))
    if stride == 1:
        acts = [xp]
    else:
        # 4 spatial-parity sub-grids -> only unit-stride slices inside kernel
        acts = [xp[:, ph::2, pw::2, :] for ph in (0, 1) for pw in (0, 1)]

    def act_spec(a):
        return pl.BlockSpec((1,) + a.shape[1:], lambda n: (n, 0, 0, 0))

    def full_spec(a):
        nd = a.ndim
        return pl.BlockSpec(a.shape, lambda n: (0,) * nd)

    weights = [p['dw_w'], p['dw_scale'], p['dw_bias'],
               p['pw_w'], p['pw_scale'], p['pw_bias']]

    out = pl.pallas_call(
        _make_dsconv_kernel(stride, Ho, Wo, Cin, Cout),
        grid=(N,),   # batch-parallel: uses both TensorCores on v7x
        in_specs=[act_spec(a) for a in acts] + [full_spec(w) for w in weights],
        out_specs=pl.BlockSpec((1, Ho * Wo, Cout), lambda n: (n, 0, 0)),
        out_shape=jax.ShapeDtypeStruct((N, Ho * Wo, Cout), jnp.float32),
        compiler_params=pltpu.CompilerParams(
            dimension_semantics=("parallel",)),
    )(*acts, *weights)
    return out, Ho, Wo


def pool_fc(x3d, w, b):
    Nb = x3d.shape[0]
    nc = w.shape[1]
    return pl.pallas_call(
        _pool_fc_kernel,
        out_shape=jax.ShapeDtypeStruct((Nb, nc), jnp.float32),
    )(x3d, w, b)


# ---------------------------------------------------------------------------
# Glue: stem im2col (one small layer; K padded to 32, bf16 operands)
# TODO(synk): stem patches are still materialized host-side (small, one-off).
# ---------------------------------------------------------------------------

def im2col_3x3(x_nhwc, stride, k_pad=None):
    N, H, W, Cin = x_nhwc.shape
    Ho, Wo = _out_size(H, stride), _out_size(W, stride)
    xp = jnp.pad(x_nhwc, ((0, 0), (1, 1), (1, 1), (0, 0)))
    cols = []
    for kh in range(3):
        for kw in range(3):
            cols.append(xp[:, kh:kh + (Ho - 1) * stride + 1:stride,
                           kw:kw + (Wo - 1) * stride + 1:stride, :])
    patches = jnp.concatenate(cols, axis=-1).reshape(N * Ho * Wo, 9 * Cin)
    if k_pad is not None and k_pad > 9 * Cin:
        patches = jnp.pad(patches, ((0, 0), (0, k_pad - 9 * Cin)))
    return patches.astype(jnp.bfloat16), Ho, Wo


# ---------------------------------------------------------------------------
# Model: parameter init + forward
# ---------------------------------------------------------------------------

def init_params(key, ratio=0.25, num_classes=16):
    eps = 1e-5
    keys = iter(jax.random.split(key, 64))

    def bn(k, c):
        kg, kb = jax.random.split(k)
        gamma = 1.0 + 0.1 * jax.random.normal(kg, (c,), jnp.float32)
        beta = 0.1 * jax.random.normal(kb, (c,), jnp.float32)
        running_mean = jnp.zeros((c,), jnp.float32)
        running_var = jnp.ones((c,), jnp.float32)
        scale = gamma / jnp.sqrt(running_var + eps)
        bias = beta - running_mean * scale
        return scale.reshape(1, c), bias.reshape(1, c)

    params = {}

    # stem: Conv2d(3 -> 32*ratio, k=3, s=2, p=1, bias=False) + BN + ReLU
    c_stem = int(32 * ratio)
    w = jax.random.normal(next(keys), (c_stem, 3, 3, 3), jnp.float32) / (27.0 ** 0.5)
    # OIHW -> (kh, kw, cin, cout) -> (27, cout); pad K 27->32 (sublane aligned)
    w = jnp.transpose(w, (2, 3, 1, 0)).reshape(27, c_stem)
    w = jnp.pad(w, ((0, 5), (0, 0))).astype(jnp.bfloat16)
    s, b = bn(next(keys), c_stem)
    params['stem'] = dict(w=w, scale=s, bias=b)

    # DSConv blocks
    blocks = []
    for in_c, out_c, stride in CFGS:
        cin, cout = int(ratio * in_c), int(ratio * out_c)
        # depthwise: torch (cin,1,3,3) -> (9, cin), tap order (kh, kw)
        wdw = jax.random.normal(next(keys), (cin, 3, 3), jnp.float32) / 3.0
        wdw = jnp.transpose(wdw, (1, 2, 0)).reshape(9, cin)
        sdw, bdw = bn(next(keys), cin)
        # pointwise: torch (cout,cin,1,1) -> (cin, cout), stored bf16 for MXU
        wpw = jax.random.normal(next(keys), (cout, cin), jnp.float32) / (cin ** 0.5)
        wpw = wpw.T.astype(jnp.bfloat16)
        spw, bpw = bn(next(keys), cout)
        blocks.append(dict(stride=stride,
                           dw_w=wdw, dw_scale=sdw, dw_bias=bdw,
                           pw_w=wpw, pw_scale=spw, pw_bias=bpw))
    params['blocks'] = blocks

    # classifier: Linear(1024*ratio -> num_classes)
    c_final = int(ratio * 1024)
    wfc = jax.random.normal(next(keys), (num_classes, c_final), jnp.float32) / (c_final ** 0.5)
    bfc = 0.01 * jax.random.normal(next(keys), (num_classes,), jnp.float32)
    params['fc'] = dict(w=wfc.T.astype(jnp.bfloat16), b=bfc.reshape(1, num_classes))
    return params


def mobilenet_forward(x_nchw, params):
    # NCHW (PyTorch convention) -> NHWC (kernel layout), exactly once.
    x = jnp.transpose(x_nchw, (0, 2, 3, 1)).astype(jnp.float32)
    N = x.shape[0]

    # stem
    pstem = params['stem']
    patches, Ho, Wo = im2col_3x3(x, stride=2, k_pad=pstem['w'].shape[0])
    tile_m = Ho * Wo if (Ho * Wo) % 8 == 0 else None
    y = matmul_bn_relu(patches, pstem['w'], pstem['scale'], pstem['bias'],
                       tile_m=tile_m)
    x = y.reshape(N, Ho, Wo, pstem['w'].shape[1])

    # DSConv blocks: one fused pallas_call each
    for blk in params['blocks']:
        out, Ho, Wo = dsconv_block(x, blk)
        x = out.reshape(N, Ho, Wo, blk['pw_w'].shape[1])

    # global avg pool + (eval-mode) dropout identity + classifier
    x3 = x.reshape(N, Ho * Wo, x.shape[3])
    return pool_fc(x3, params['fc']['w'], params['fc']['b'])


# ---------------------------------------------------------------------------

if __name__ == "__main__":
    key = jax.random.PRNGKey(0)
    kx, kp = jax.random.split(key)

    ratio = 0.25          # width multiplier to keep the synthetic test small
    num_classes = 16
    x = jax.random.normal(kx, (2, 3, 32, 32), jnp.float32)   # NCHW like PyTorch

    params = init_params(kp, ratio=ratio, num_classes=num_classes)

    # jit with params closed over: weights become compile-time constants and
    # Python ints (strides) stay static, so per-block kernel specialization
    # and the minimal XLA glue between fused blocks are preserved.
    fwd = jax.jit(lambda xin: mobilenet_forward(xin, params))
    out = jax.block_until_ready(fwd(x))

    assert out.shape == (2, num_classes), out.shape
    assert bool(jnp.all(jnp.isfinite(out)))
    print("KERNEL_OK")
</pallas_src>

<mosaic_0001>
module attributes {stable_mosaic.version = 11 : i64} {
  func.func @_matmul_bn_relu_kernel(%arg0: i32, %arg1: memref<256x32xbf16, #tpu.memory_space<vmem>>, %arg2: memref<32x8xbf16, #tpu.memory_space<vmem>>, %arg3: memref<1x8xf32, #tpu.memory_space<vmem>>, %arg4: memref<1x8xf32, #tpu.memory_space<vmem>>, %arg5: memref<256x8xf32, #tpu.memory_space<vmem>>) attributes {dimension_semantics = [#tpu.dimension_semantics<parallel>], iteration_bounds = array<i64: 2>, scalar_prefetch = 0 : i64, scratch_operands = 0 : i64, tpu.core_type = #tpu.core_type<tc>, window_params = [{transform_indices = @transform_0, window_bounds = array<i64: 256, 32>}, {pipeline_mode = #tpu.pipeline_mode<synchronous>, transform_indices = @transform_1, window_bounds = array<i64: 32, 8>}, {pipeline_mode = #tpu.pipeline_mode<synchronous>, transform_indices = @transform_2, window_bounds = array<i64: 1, 8>}, {pipeline_mode = #tpu.pipeline_mode<synchronous>, transform_indices = @transform_3, window_bounds = array<i64: 1, 8>}, {transform_indices = @transform_4, window_bounds = array<i64: 256, 8>}]} {
    %c0 = arith.constant 0 : index
    %c0_0 = arith.constant 0 : index
    %0 = vector.load %arg1[%c0, %c0_0] : memref<256x32xbf16, #tpu.memory_space<vmem>>, vector<256x32xbf16>
    %c0_1 = arith.constant 0 : index
    %c0_2 = arith.constant 0 : index
    %1 = vector.load %arg2[%c0_1, %c0_2] : memref<32x8xbf16, #tpu.memory_space<vmem>>, vector<32x8xbf16>
    %cst = arith.constant dense<0.000000e+00> : vector<256x8xf32>
    %2 = tpu.matmul %0, %1, %cst {dimension_numbers = #tpu.dot_dimension_numbers<[1], [0], [0], [1], [0, 0, 1, 1], [], []>} : vector<256x32xbf16>, vector<32x8xbf16>, vector<256x8xf32> -> vector<256x8xf32>
    %c0_3 = arith.constant 0 : index
    %c0_4 = arith.constant 0 : index
    %3 = vector.load %arg3[%c0_3, %c0_4] : memref<1x8xf32, #tpu.memory_space<vmem>>, vector<1x8xf32>
    %4 = vector.broadcast %3 : vector<1x8xf32> to vector<256x8xf32>
    %5 = arith.mulf %2, %4 : vector<256x8xf32>
    %c0_5 = arith.constant 0 : index
    %c0_6 = arith.constant 0 : index
    %6 = vector.load %arg4[%c0_5, %c0_6] : memref<1x8xf32, #tpu.memory_space<vmem>>, vector<1x8xf32>
    %7 = vector.broadcast %6 : vector<1x8xf32> to vector<256x8xf32>
    %8 = arith.addf %5, %7 : vector<256x8xf32>
    %cst_7 = arith.constant 0.000000e+00 : f32
    %9 = vector.broadcast %cst_7 : f32 to vector<256x8xf32>
    %10 = arith.maximumf %8, %9 : vector<256x8xf32>
    %c0_8 = arith.constant 0 : index
    %c0_9 = arith.constant 0 : index
    %11 = vector.load %arg5[%c0_8, %c0_9] : memref<256x8xf32, #tpu.memory_space<vmem>>, vector<256x8xf32>
    tpu.vector_store %arg5[%c0_8, %c0_9], %10 {strides = array<i32>} : memref<256x8xf32, #tpu.memory_space<vmem>>, vector<256x8xf32>,
    return
  }
  func.func @transform_0(%arg0: i32) -> (i32, i32) {
    %c0_i32 = arith.constant 0 : i32
    %c0_i32_0 = arith.constant 0 : i32
    return %arg0, %c0_i32 : i32, i32
  }
  func.func @transform_1(%arg0: i32) -> (i32, i32) {
    %c0_i32 = arith.constant 0 : i32
    %c0_i32_0 = arith.constant 0 : i32
    %c0_i32_1 = arith.constant 0 : i32
    return %c0_i32, %c0_i32_0 : i32, i32
  }
  func.func @transform_2(%arg0: i32) -> (i32, i32) {
    %c0_i32 = arith.constant 0 : i32
    %c0_i32_0 = arith.constant 0 : i32
    %c0_i32_1 = arith.constant 0 : i32
    return %c0_i32, %c0_i32_0 : i32, i32
  }
  func.func @transform_3(%arg0: i32) -> (i32, i32) {
    %c0_i32 = arith.constant 0 : i32
    %c0_i32_0 = arith.constant 0 : i32
    %c0_i32_1 = arith.constant 0 : i32
    return %c0_i32, %c0_i32_0 : i32, i32
  }
  func.func @transform_4(%arg0: i32) -> (i32, i32) {
    %c0_i32 = arith.constant 0 : i32
    %c0_i32_0 = arith.constant 0 : i32
    return %arg0, %c0_i32 : i32, i32
  }
}

module attributes {stable_mosaic.version = 11 : i64} {
  func.func @kernel(%arg0: i32, %arg1: memref<1x18x18x8xf32, #tpu.memory_space<vmem>>, %arg2: memref<9x8xf32, #tpu.memory_space<vmem>>, %arg3: memref<1x8xf32, #tpu.memory_space<vmem>>, %arg4: memref<1x8xf32, #tpu.memory_space<vmem>>, %arg5: memref<8x16xbf16, #tpu.memory_space<vmem>>, %arg6: memref<1x16xf32, #tpu.memory_space<vmem>>, %arg7: memref<1x16xf32, #tpu.memory_space<vmem>>, %arg8: memref<1x256x16xf32, #tpu.memory_space<vmem>>) attributes {dimension_semantics = [#tpu.dimension_semantics<parallel>], iteration_bounds = array<i64: 2>, scalar_prefetch = 0 : i64, scratch_operands = 0 : i64, tpu.core_type = #tpu.core_type<tc>, window_params = [{transform_indices = @transform_0, window_bounds = array<i64: 1, 18, 18, 8>}, {pipeline_mode = #tpu.pipeline_mode<synchronous>, transform_indices = @transform_1, window_bounds = array<i64: 9, 8>}, {pipeline_mode = #tpu.pipeline_mode<synchronous>, transform_indices = @transform_2, window_bounds = array<i64: 1, 8>}, {pipeline_mode = #tpu.pipeline_mode<synchronous>, transform_indices = @transform_3, window_bounds = array<i64: 1, 8>}, {pipeline_mode = #tpu.pipeline_mode<synchronous>, transform_indices = @transform_4, window_bounds = array<i64: 8, 16>}, {pipeline_mode = #tpu.pipeline_mode<synchronous>, transform_indices = @transform_5, window_bounds = array<i64: 1, 16>}, {pipeline_mode = #tpu.pipeline_mode<synchronous>, transform_indices = @transform_6, window_bounds = array<i64: 1, 16>}, {transform_indices = @transform_7, window_bounds = array<i64: 1, 256, 16>}]} {
    %c0 = arith.constant 0 : index
    %c0_0 = arith.constant 0 : index
    %0 = vector.load %arg2[%c0, %c0_0] : memref<9x8xf32, #tpu.memory_space<vmem>>, vector<9x8xf32>
    %cst = arith.constant 0.000000e+00 : f32
    %1 = vector.broadcast %cst : f32 to vector<16x16x8xf32>
    %c0_1 = arith.constant 0 : index
    %c0_2 = arith.constant 0 : index
    %c0_3 = arith.constant 0 : index
    %c0_4 = arith.constant 0 : index
    %2 = vector.load %arg1[%c0_1, %c0_2, %c0_3, %c0_4] : memref<1x18x18x8xf32, #tpu.memory_space<vmem>>, vector<1x16x16x8xf32>
    %3 = vector.shape_cast %2 : vector<1x16x16x8xf32> to vector<16x16x8xf32>
    %4 = vector.extract_strided_slice %0 {offsets = [0, 0], sizes = [1, 8], strides = [1, 1]} : vector<9x8xf32> to vector<1x8xf32>
    %5 = vector.shape_cast %4 : vector<1x8xf32> to vector<1x1x8xf32>
    %6 = vector.broadcast %5 : vector<1x1x8xf32> to vector<16x16x8xf32>
    %7 = arith.mulf %3, %6 : vector<16x16x8xf32>
    %8 = arith.addf %1, %7 : vector<16x16x8xf32>
    %c0_5 = arith.constant 0 : index
    %c0_6 = arith.constant 0 : index
    %c1 = arith.constant 1 : index
    %c0_7 = arith.constant 0 : index
    %9 = vector.load %arg1[%c0_5, %c0_6, %c1, %c0_7] : memref<1x18x18x8xf32, #tpu.memory_space<vmem>>, vector<1x16x16x8xf32>
    %10 = vector.shape_cast %9 : vector<1x16x16x8xf32> to vector<16x16x8xf32>
    %11 = vector.extract_strided_slice %0 {offsets = [1, 0], sizes = [1, 8], strides = [1, 1]} : vector<9x8xf32> to vector<1x8xf32>
    %12 = vector.shape_cast %11 : vector<1x8xf32> to vector<1x1x8xf32>
    %13 = vector.broadcast %12 : vector<1x1x8xf32> to vector<16x16x8xf32>
    %14 = arith.mulf %10, %13 : vector<16x16x8xf32>
    %15 = arith.addf %8, %14 : vector<16x16x8xf32>
    %c0_8 = arith.constant 0 : index
    %c0_9 = arith.constant 0 : index
    %c2 = arith.constant 2 : index
    %c0_10 = arith.constant 0 : index
    %16 = vector.load %arg1[%c0_8, %c0_9, %c2, %c0_10] : memref<1x18x18x8xf32, #tpu.memory_space<vmem>>, vector<1x16x16x8xf32>
    %17 = vector.shape_cast %16 : vector<1x16x16x8xf32> to vector<16x16x8xf32>
    %18 = vector.extract_strided_slice %0 {offsets = [2, 0], sizes = [1, 8], strides = [1, 1]} : vector<9x8xf32> to vector<1x8xf32>
    %19 = vector.shape_cast %18 : vector<1x8xf32> to vector<1x1x8xf32>
    %20 = vector.broadcast %19 : vector<1x1x8xf32> to vector<16x16x8xf32>
    %21 = arith.mulf %17, %20 : vector<16x16x8xf32>
    %22 = arith.addf %15, %21 : vector<16x16x8xf32>
    %c0_11 = arith.constant 0 : index
    %c1_12 = arith.constant 1 : index
    %c0_13 = arith.constant 0 : index
    %c0_14 = arith.constant 0 : index
    %23 = vector.load %arg1[%c0_11, %c1_12, %c0_13, %c0_14] : memref<1x18x18x8xf32, #tpu.memory_space<vmem>>, vector<1x16x16x8xf32>
    %24 = vector.shape_cast %23 : vector<1x16x16x8xf32> to vector<16x16x8xf32>
    %25 = vector.extract_strided_slice %0 {offsets = [3, 0], sizes = [1, 8], strides = [1, 1]} : vector<9x8xf32> to vector<1x8xf32>
    %26 = vector.shape_cast %25 : vector<1x8xf32> to vector<1x1x8xf32>
    %27 = vector.broadcast %26 : vector<1x1x8xf32> to vector<16x16x8xf32>
    %28 = arith.mulf %24, %27 : vector<16x16x8xf32>
    %29 = arith.addf %22, %28 : vector<16x16x8xf32>
    %c0_15 = arith.constant 0 : index
    %c1_16 = arith.constant 1 : index
    %c1_17 = arith.constant 1 : index
    %c0_18 = arith.constant 0 : index
    %30 = vector.load %arg1[%c0_15, %c1_16, %c1_17, %c0_18] : memref<1x18x18x8xf32, #tpu.memory_space<vmem>>, vector<1x16x16x8xf32>
    %31 = vector.shape_cast %30 : vector<1x16x16x8xf32> to vector<16x16x8xf32>
    %32 = vector.extract_strided_slice %0 {offsets = [4, 0], sizes = [1, 8], strides = [1, 1]} : vector<9x8xf32> to vector<1x8xf32>
    %33 = vector.shape_cast %32 : vector<1x8xf32> to vector<1x1x8xf32>
    %34 = vector.broadcast %33 : vector<1x1x8xf32> to vector<16x16x8xf32>
    %35 = arith.mulf %31, %34 : vector<16x16x8xf32>
    %36 = arith.addf %29, %35 : vector<16x16x8xf32>
    %c0_19 = arith.constant 0 : index
    %c1_20 = arith.constant 1 : index
    %c2_21 = arith.constant 2 : index
    %c0_22 = arith.constant 0 : index
    %37 = vector.load %arg1[%c0_19, %c1_20, %c2_21, %c0_22] : memref<1x18x18x8xf32, #tpu.memory_space<vmem>>, vector<1x16x16x8xf32>
    %38 = vector.shape_cast %37 : vector<1x16x16x8xf32> to vector<16x16x8xf32>
    %39 = vector.extract_strided_slice %0 {offsets = [5, 0], sizes = [1, 8], strides = [1, 1]} : vector<9x8xf32> to vector<1x8xf32>
    %40 = vector.shape_cast %39 : vector<1x8xf32> to vector<1x1x8xf32>
    %41 = vector.broadcast %40 : vector<1x1x8xf32> to vector<16x16x8xf32>
    %42 = arith.mulf %38, %41 : vector<16x16x8xf32>
    %43 = arith.addf %36, %42 : vector<16x16x8xf32>
    %c0_23 = arith.constant 0 : index
    %c2_24 = arith.constant 2 : index
    %c0_25 = arith.constant 0 : index
    %c0_26 = arith.constant 0 : index
    %44 = vector.load %arg1[%c0_23, %c2_24, %c0_25, %c0_26] : memref<1x18x18x8xf32, #tpu.memory_space<vmem>>, vector<1x16x16x8xf32>
    %45 = vector.shape_cast %44 : vector<1x16x16x8xf32> to vector<16x16x8xf32>
    %46 = vector.extract_strided_slice %0 {offsets = [6, 0], sizes = [1, 8], strides = [1, 1]} : vector<9x8xf32> to vector<1x8xf32>
    %47 = vector.shape_cast %46 : vector<1x8xf32> to vector<1x1x8xf32>
    %48 = vector.broadcast %47 : vector<1x1x8xf32> to vector<16x16x8xf32>
    %49 = arith.mulf %45, %48 : vector<16x16x8xf32>
    %50 = arith.addf %43, %49 : vector<16x16x8xf32>
    %c0_27 = arith.constant 0 : index
    %c2_28 = arith.constant 2 : index
    %c1_29 = arith.constant 1 : index
    %c0_30 = arith.constant 0 : index
    %51 = vector.load %arg1[%c0_27, %c2_28, %c1_29, %c0_30] : memref<1x18x18x8xf32, #tpu.memory_space<vmem>>, vector<1x16x16x8xf32>
    %52 = vector.shape_cast %51 : vector<1x16x16x8xf32> to vector<16x16x8xf32>
    %53 = vector.extract_strided_slice %0 {offsets = [7, 0], sizes = [1, 8], strides = [1, 1]} : vector<9x8xf32> to vector<1x8xf32>
    %54 = vector.shape_cast %53 : vector<1x8xf32> to vector<1x1x8xf32>
    %55 = vector.broadcast %54 : vector<1x1x8xf32> to vector<16x16x8xf32>
    %56 = arith.mulf %52, %55 : vector<16x16x8xf32>
    %57 = arith.addf %50, %56 : vector<16x16x8xf32>
    %c0_31 = arith.constant 0 : index
    %c2_32 = arith.constant 2 : index
    %c2_33 = arith.constant 2 : index
    %c0_34 = arith.constant 0 : index
    %58 = vector.load %arg1[%c0_31, %c2_32, %c2_33, %c0_34] : memref<1x18x18x8xf32, #tpu.memory_space<vmem>>, vector<1x16x16x8xf32>
    %59 = vector.shape_cast %58 : vector<1x16x16x8xf32> to vector<16x16x8xf32>
    %60 = vector.extract_strided_slice %0 {offsets = [8, 0], sizes = [1, 8], strides = [1, 1]} : vector<9x8xf32> to vector<1x8xf32>
    %61 = vector.shape_cast %60 : vector<1x8xf32> to vector<1x1x8xf32>
    %62 = vector.broadcast %61 : vector<1x1x8xf32> to vector<16x16x8xf32>
    %63 = arith.mulf %59, %62 : vector<16x16x8xf32>
    %64 = arith.addf %57, %63 : vector<16x16x8xf32>
    %c0_35 = arith.constant 0 : index
    %c0_36 = arith.constant 0 : index
    %65 = vector.load %arg3[%c0_35, %c0_36] : memref<1x8xf32, #tpu.memory_space<vmem>>, vector<1x8xf32>
    %66 = vector.shape_cast %65 : vector<1x8xf32> to vector<1x1x8xf32>
    %67 = vector.broadcast %66 : vector<1x1x8xf32> to vector<16x16x8xf32>
    %68 = arith.mulf %64, %67 : vector<16x16x8xf32>
    %c0_37 = arith.constant 0 : index
    %c0_38 = arith.constant 0 : index
    %69 = vector.load %arg4[%c0_37, %c0_38] : memref<1x8xf32, #tpu.memory_space<vmem>>, vector<1x8xf32>
    %70 = vector.shape_cast %69 : vector<1x8xf32> to vector<1x1x8xf32>
    %71 = vector.broadcast %70 : vector<1x1x8xf32> to vector<16x16x8xf32>
    %72 = arith.addf %68, %71 : vector<16x16x8xf32>
    %cst_39 = arith.constant 0.000000e+00 : f32
    %73 = vector.broadcast %cst_39 : f32 to vector<16x16x8xf32>
    %74 = arith.maximumf %72, %73 : vector<16x16x8xf32>
    %75 = vector.shape_cast %74 : vector<16x16x8xf32> to vector<256x8xf32>
    %76 = arith.truncf %75 : vector<256x8xf32> to vector<256x8xbf16>
    %c0_40 = arith.constant 0 : index
    %c0_41 = arith.constant 0 : index
    %77 = vector.load %arg5[%c0_40, %c0_41] : memref<8x16xbf16, #tpu.memory_space<vmem>>, vector<8x16xbf16>
    %cst_42 = arith.constant dense<0.000000e+00> : vector<256x16xf32>
    %78 = tpu.matmul %76, %77, %cst_42 {dimension_numbers = #tpu.dot_dimension_numbers<[1], [0], [0], [1], [0, 0, 1, 1], [], []>} : vector<256x8xbf16>, vector<8x16xbf16>, vector<256x16xf32> -> vector<256x16xf32>
    %c0_43 = arith.constant 0 : index
    %c0_44 = arith.constant 0 : index
    %79 = vector.load %arg6[%c0_43, %c0_44] : memref<1x16xf32, #tpu.memory_space<vmem>>, vector<1x16xf32>
    %80 = vector.broadcast %79 : vector<1x16xf32> to vector<256x16xf32>
    %81 = arith.mulf %78, %80 : vector<256x16xf32>
    %c0_45 = arith.constant 0 : index
    %c0_46 = arith.constant 0 : index
    %82 = vector.load %arg7[%c0_45, %c0_46] : memref<1x16xf32, #tpu.memory_space<vmem>>, vector<1x16xf32>
    %83 = vector.broadcast %82 : vector<1x16xf32> to vector<256x16xf32>
    %84 = arith.addf %81, %83 : vector<256x16xf32>
    %cst_47 = arith.constant 0.000000e+00 : f32
    %85 = vector.broadcast %cst_47 : f32 to vector<256x16xf32>
    %86 = arith.maximumf %84, %85 : vector<256x16xf32>
    %c0_48 = arith.constant 0 : index
    %c0_49 = arith.constant 0 : index
    %c0_50 = arith.constant 0 : index
    %87 = vector.load %arg8[%c0_48, %c0_49, %c0_50] : memref<1x256x16xf32, #tpu.memory_space<vmem>>, vector<1x256x16xf32>
    %88 = vector.shape_cast %87 : vector<1x256x16xf32> to vector<256x16xf32>
    %89 = vector.shape_cast %86 : vector<256x16xf32> to vector<1x256x16xf32>
    tpu.vector_store %arg8[%c0_48, %c0_49, %c0_50], %89 {strides = array<i32>} : memref<1x256x16xf32, #tpu.memory_space<vmem>>, vector<1x256x16xf32>,
    return
  }
  func.func @transform_0(%arg0: i32) -> (i32, i32, i32, i32) {
    %c0_i32 = arith.constant 0 : i32
    %c0_i32_0 = arith.constant 0 : i32
    %c0_i32_1 = arith.constant 0 : i32
    %c0_i32_2 = arith.constant 0 : i32
    return %arg0, %c0_i32, %c0_i32_0, %c0_i32_1 : i32, i32, i32, i32
  }
  func.func @transform_1(%arg0: i32) -> (i32, i32) {
    %c0_i32 = arith.constant 0 : i32
    %c0_i32_0 = arith.constant 0 : i32
    %c0_i32_1 = arith.constant 0 : i32
    return %c0_i32, %c0_i32_0 : i32, i32
  }
  func.func @transform_2(%arg0: i32) -> (i32, i32) {
    %c0_i32 = arith.constant 0 : i32
    %c0_i32_0 = arith.constant 0 : i32
    %c0_i32_1 = arith.constant 0 : i32
    return %c0_i32, %c0_i32_0 : i32, i32
  }
  func.func @transform_3(%arg0: i32) -> (i32, i32) {
    %c0_i32 = arith.constant 0 : i32
    %c0_i32_0 = arith.constant 0 : i32
    %c0_i32_1 = arith.constant 0 : i32
    return %c0_i32, %c0_i32_0 : i32, i32
  }
  func.func @transform_4(%arg0: i32) -> (i32, i32) {
    %c0_i32 = arith.constant 0 : i32
    %c0_i32_0 = arith.constant 0 : i32
    %c0_i32_1 = arith.constant 0 : i32
    return %c0_i32, %c0_i32_0 : i32, i32
  }
  func.func @transform_5(%arg0: i32) -> (i32, i32) {
    %c0_i32 = arith.constant 0 : i32
    %c0_i32_0 = arith.constant 0 : i32
    %c0_i32_1 = arith.constant 0 : i32
    return %c0_i32, %c0_i32_0 : i32, i32
  }
  func.func @transform_6(%arg0: i32) -> (i32, i32) {
    %c0_i32 = arith.constant 0 : i32
    %c0_i32_0 = arith.constant 0 : i32
    %c0_i32_1 = arith.constant 0 : i32
    return %c0_i32, %c0_i32_0 : i32, i32
  }
  func.func @transform_7(%arg0: i32) -> (i32, i32, i32) {
    %c0_i32 = arith.constant 0 : i32
    %c0_i32_0 = arith.constant 0 : i32
    %c0_i32_1 = arith.constant 0 : i32
    return %arg0, %c0_i32, %c0_i32_0 : i32, i32, i32
  }
}

module attributes {stable_mosaic.version = 11 : i64} {
  func.func @kernel(%arg0: i32, %arg1: memref<1x9x9x16xf32, #tpu.memory_space<vmem>>, %arg2: memref<1x9x9x16xf32, #tpu.memory_space<vmem>>, %arg3: memref<1x9x9x16xf32, #tpu.memory_space<vmem>>, %arg4: memref<1x9x9x16xf32, #tpu.memory_space<vmem>>, %arg5: memref<9x16xf32, #tpu.memory_space<vmem>>, %arg6: memref<1x16xf32, #tpu.memory_space<vmem>>, %arg7: memref<1x16xf32, #tpu.memory_space<vmem>>, %arg8: memref<16x32xbf16, #tpu.memory_space<vmem>>, %arg9: memref<1x32xf32, #tpu.memory_space<vmem>>, %arg10: memref<1x32xf32, #tpu.memory_space<vmem>>, %arg11: memref<1x64x32xf32, #tpu.memory_space<vmem>>) attributes {dimension_semantics = [#tpu.dimension_semantics<parallel>], iteration_bounds = array<i64: 2>, scalar_prefetch = 0 : i64, scratch_operands = 0 : i64, tpu.core_type = #tpu.core_type<tc>, window_params = [{transform_indices = @transform_0, window_bounds = array<i64: 1, 9, 9, 16>}, {transform_indices = @transform_1, window_bounds = array<i64: 1, 9, 9, 16>}, {transform_indices = @transform_2, window_bounds = array<i64: 1, 9, 9, 16>}, {transform_indices = @transform_3, window_bounds = array<i64: 1, 9, 9, 16>}, {pipeline_mode = #tpu.pipeline_mode<synchronous>, transform_indices = @transform_4, window_bounds = array<i64: 9, 16>}, {pipeline_mode = #tpu.pipeline_mode<synchronous>, transform_indices = @transform_5, window_bounds = array<i64: 1, 16>}, {pipeline_mode = #tpu.pipeline_mode<synchronous>, transform_indices = @transform_6, window_bounds = array<i64: 1, 16>}, {pipeline_mode = #tpu.pipeline_mode<synchronous>, transform_indices = @transform_7, window_bounds = array<i64: 16, 32>}, {pipeline_mode = #tpu.pipeline_mode<synchronous>, transform_indices = @transform_8, window_bounds = array<i64: 1, 32>}, {pipeline_mode = #tpu.pipeline_mode<synchronous>, transform_indices = @transform_9, window_bounds = array<i64: 1, 32>}, {transform_indices = @transform_10, window_bounds = array<i64: 1, 64, 32>}]} {
    %c0 = arith.constant 0 : index
    %c0_0 = arith.constant 0 : index
    %0 = vector.load %arg5[%c0, %c0_0] : memref<9x16xf32, #tpu.memory_space<vmem>>, vector<9x16xf32>
    %cst = arith.constant 0.000000e+00 : f32
    %1 = vector.broadcast %cst : f32 to vector<8x8x16xf32>
    %c0_1 = arith.constant 0 : index
    %c0_2 = arith.constant 0 : index
    %c0_3 = arith.constant 0 : index
    %c0_4 = arith.constant 0 : index
    %2 = vector.load %arg1[%c0_1, %c0_2, %c0_3, %c0_4] : memref<1x9x9x16xf32, #tpu.memory_space<vmem>>, vector<1x8x8x16xf32>
    %3 = vector.shape_cast %2 : vector<1x8x8x16xf32> to vector<8x8x16xf32>
    %4 = vector.extract_strided_slice %0 {offsets = [0, 0], sizes = [1, 16], strides = [1, 1]} : vector<9x16xf32> to vector<1x16xf32>
    %5 = vector.shape_cast %4 : vector<1x16xf32> to vector<1x1x16xf32>
    %6 = vector.broadcast %5 : vector<1x1x16xf32> to vector<8x8x16xf32>
    %7 = arith.mulf %3, %6 : vector<8x8x16xf32>
    %8 = arith.addf %1, %7 : vector<8x8x16xf32>
    %c0_5 = arith.constant 0 : index
    %c0_6 = arith.constant 0 : index
    %c0_7 = arith.constant 0 : index
    %c0_8 = arith.constant 0 : index
    %9 = vector.load %arg2[%c0_5, %c0_6, %c0_7, %c0_8] : memref<1x9x9x16xf32, #tpu.memory_space<vmem>>, vector<1x8x8x16xf32>
    %10 = vector.shape_cast %9 : vector<1x8x8x16xf32> to vector<8x8x16xf32>
    %11 = vector.extract_strided_slice %0 {offsets = [1, 0], sizes = [1, 16], strides = [1, 1]} : vector<9x16xf32> to vector<1x16xf32>
    %12 = vector.shape_cast %11 : vector<1x16xf32> to vector<1x1x16xf32>
    %13 = vector.broadcast %12 : vector<1x1x16xf32> to vector<8x8x16xf32>
    %14 = arith.mulf %10, %13 : vector<8x8x16xf32>
    %15 = arith.addf %8, %14 : vector<8x8x16xf32>
    %c0_9 = arith.constant 0 : index
    %c0_10 = arith.constant 0 : index
    %c1 = arith.constant 1 : index
    %c0_11 = arith.constant 0 : index
    %16 = vector.load %arg1[%c0_9, %c0_10, %c1, %c0_11] : memref<1x9x9x16xf32, #tpu.memory_space<vmem>>, vector<1x8x8x16xf32>
    %17 = vector.shape_cast %16 : vector<1x8x8x16xf32> to vector<8x8x16xf32>
    %18 = vector.extract_strided_slice %0 {offsets = [2, 0], sizes = [1, 16], strides = [1, 1]} : vector<9x16xf32> to vector<1x16xf32>
    %19 = vector.shape_cast %18 : vector<1x16xf32> to vector<1x1x16xf32>
    %20 = vector.broadcast %19 : vector<1x1x16xf32> to vector<8x8x16xf32>
    %21 = arith.mulf %17, %20 : vector<8x8x16xf32>
    %22 = arith.addf %15, %21 : vector<8x8x16xf32>
    %c0_12 = arith.constant 0 : index
    %c0_13 = arith.constant 0 : index
    %c0_14 = arith.constant 0 : index
    %c0_15 = arith.constant 0 : index
    %23 = vector.load %arg3[%c0_12, %c0_13, %c0_14, %c0_15] : memref<1x9x9x16xf32, #tpu.memory_space<vmem>>, vector<1x8x8x16xf32>
    %24 = vector.shape_cast %23 : vector<1x8x8x16xf32> to vector<8x8x16xf32>
    %25 = vector.extract_strided_slice %0 {offsets = [3, 0], sizes = [1, 16], strides = [1, 1]} : vector<9x16xf32> to vector<1x16xf32>
    %26 = vector.shape_cast %25 : vector<1x16xf32> to vector<1x1x16xf32>
    %27 = vector.broadcast %26 : vector<1x1x16xf32> to vector<8x8x16xf32>
    %28 = arith.mulf %24, %27 : vector<8x8x16xf32>
    %29 = arith.addf %22, %28 : vector<8x8x16xf32>
    %c0_16 = arith.constant 0 : index
    %c0_17 = arith.constant 0 : index
    %c0_18 = arith.constant 0 : index
    %c0_19 = arith.constant 0 : index
    %30 = vector.load %arg4[%c0_16, %c0_17, %c0_18, %c0_19] : memref<1x9x9x16xf32, #tpu.memory_space<vmem>>, vector<1x8x8x16xf32>
    %31 = vector.shape_cast %30 : vector<1x8x8x16xf32> to vector<8x8x16xf32>
    %32 = vector.extract_strided_slice %0 {offsets = [4, 0], sizes = [1, 16], strides = [1, 1]} : vector<9x16xf32> to vector<1x16xf32>
    %33 = vector.shape_cast %32 : vector<1x16xf32> to vector<1x1x16xf32>
    %34 = vector.broadcast %33 : vector<1x1x16xf32> to vector<8x8x16xf32>
    %35 = arith.mulf %31, %34 : vector<8x8x16xf32>
    %36 = arith.addf %29, %35 : vector<8x8x16xf32>
    %c0_20 = arith.constant 0 : index
    %c0_21 = arith.constant 0 : index
    %c1_22 = arith.constant 1 : index
    %c0_23 = arith.constant 0 : index
    %37 = vector.load %arg3[%c0_20, %c0_21, %c1_22, %c0_23] : memref<1x9x9x16xf32, #tpu.memory_space<vmem>>, vector<1x8x8x16xf32>
    %38 = vector.shape_cast %37 : vector<1x8x8x16xf32> to vector<8x8x16xf32>
    %39 = vector.extract_strided_slice %0 {offsets = [5, 0], sizes = [1, 16], strides = [1, 1]} : vector<9x16xf32> to vector<1x16xf32>
    %40 = vector.shape_cast %39 : vector<1x16xf32> to vector<1x1x16xf32>
    %41 = vector.broadcast %40 : vector<1x1x16xf32> to vector<8x8x16xf32>
    %42 = arith.mulf %38, %41 : vector<8x8x16xf32>
    %43 = arith.addf %36, %42 : vector<8x8x16xf32>
    %c0_24 = arith.constant 0 : index
    %c1_25 = arith.constant 1 : index
    %c0_26 = arith.constant 0 : index
    %c0_27 = arith.constant 0 : index
    %44 = vector.load %arg1[%c0_24, %c1_25, %c0_26, %c0_27] : memref<1x9x9x16xf32, #tpu.memory_space<vmem>>, vector<1x8x8x16xf32>
    %45 = vector.shape_cast %44 : vector<1x8x8x16xf32> to vector<8x8x16xf32>
    %46 = vector.extract_strided_slice %0 {offsets = [6, 0], sizes = [1, 16], strides = [1, 1]} : vector<9x16xf32> to vector<1x16xf32>
    %47 = vector.shape_cast %46 : vector<1x16xf32> to vector<1x1x16xf32>
    %48 = vector.broadcast %47 : vector<1x1x16xf32> to vector<8x8x16xf32>
    %49 = arith.mulf %45, %48 : vector<8x8x16xf32>
    %50 = arith.addf %43, %49 : vector<8x8x16xf32>
    %c0_28 = arith.constant 0 : index
    %c1_29 = arith.constant 1 : index
    %c0_30 = arith.constant 0 : index
    %c0_31 = arith.constant 0 : index
    %51 = vector.load %arg2[%c0_28, %c1_29, %c0_30, %c0_31] : memref<1x9x9x16xf32, #tpu.memory_space<vmem>>, vector<1x8x8x16xf32>
    %52 = vector.shape_cast %51 : vector<1x8x8x16xf32> to vector<8x8x16xf32>
    %53 = vector.extract_strided_slice %0 {offsets = [7, 0], sizes = [1, 16], strides = [1, 1]} : vector<9x16xf32> to vector<1x16xf32>
    %54 = vector.shape_cast %53 : vector<1x16xf32> to vector<1x1x16xf32>
    %55 = vector.broadcast %54 : vector<1x1x16xf32> to vector<8x8x16xf32>
    %56 = arith.mulf %52, %55 : vector<8x8x16xf32>
    %57 = arith.addf %50, %56 : vector<8x8x16xf32>
    %c0_32 = arith.constant 0 : index
    %c1_33 = arith.constant 1 : index
    %c1_34 = arith.constant 1 : index
    %c0_35 = arith.constant 0 : index
    %58 = vector.load %arg1[%c0_32, %c1_33, %c1_34, %c0_35] : memref<1x9x9x16xf32, #tpu.memory_space<vmem>>, vector<1x8x8x16xf32>
    %59 = vector.shape_cast %58 : vector<1x8x8x16xf32> to vector<8x8x16xf32>
    %60 = vector.extract_strided_slice %0 {offsets = [8, 0], sizes = [1, 16], strides = [1, 1]} : vector<9x16xf32> to vector<1x16xf32>
    %61 = vector.shape_cast %60 : vector<1x16xf32> to vector<1x1x16xf32>
    %62 = vector.broadcast %61 : vector<1x1x16xf32> to vector<8x8x16xf32>
    %63 = arith.mulf %59, %62 : vector<8x8x16xf32>
    %64 = arith.addf %57, %63 : vector<8x8x16xf32>
    %c0_36 = arith.constant 0 : index
    %c0_37 = arith.constant 0 : index
    %65 = vector.load %arg6[%c0_36, %c0_37] : memref<1x16xf32, #tpu.memory_space<vmem>>, vector<1x16xf32>
    %66 = vector.shape_cast %65 : vector<1x16xf32> to vector<1x1x16xf32>
    %67 = vector.broadcast %66 : vector<1x1x16xf32> to vector<8x8x16xf32>
    %68 = arith.mulf %64, %67 : vector<8x8x16xf32>
    %c0_38 = arith.constant 0 : index
    %c0_39 = arith.constant 0 : index
    %69 = vector.load %arg7[%c0_38, %c0_39] : memref<1x16xf32, #tpu.memory_space<vmem>>, vector<1x16xf32>
    %70 = vector.shape_cast %69 : vector<1x16xf32> to vector<1x1x16xf32>
    %71 = vector.broadcast %70 : vector<1x1x16xf32> to vector<8x8x16xf32>
    %72 = arith.addf %68, %71 : vector<8x8x16xf32>
    %cst_40 = arith.constant 0.000000e+00 : f32
    %73 = vector.broadcast %cst_40 : f32 to vector<8x8x16xf32>
    %74 = arith.maximumf %72, %73 : vector<8x8x16xf32>
    %75 = vector.shape_cast %74 : vector<8x8x16xf32> to vector<64x16xf32>
    %76 = arith.truncf %75 : vector<64x16xf32> to vector<64x16xbf16>
    %c0_41 = arith.constant 0 : index
    %c0_42 = arith.constant 0 : index
    %77 = vector.load %arg8[%c0_41, %c0_42] : memref<16x32xbf16, #tpu.memory_space<vmem>>, vector<16x32xbf16>
    %cst_43 = arith.constant dense<0.000000e+00> : vector<64x32xf32>
    %78 = tpu.matmul %76, %77, %cst_43 {dimension_numbers = #tpu.dot_dimension_numbers<[1], [0], [0], [1], [0, 0, 1, 1], [], []>} : vector<64x16xbf16>, vector<16x32xbf16>, vector<64x32xf32> -> vector<64x32xf32>
    %c0_44 = arith.constant 0 : index
    %c0_45 = arith.constant 0 : index
    %79 = vector.load %arg9[%c0_44, %c0_45] : memref<1x32xf32, #tpu.memory_space<vmem>>, vector<1x32xf32>
    %80 = vector.broadcast %79 : vector<1x32xf32> to vector<64x32xf32>
    %81 = arith.mulf %78, %80 : vector<64x32xf32>
    %c0_46 = arith.constant 0 : index
    %c0_47 = arith.constant 0 : index
    %82 = vector.load %arg10[%c0_46, %c0_47] : memref<1x32xf32, #tpu.memory_space<vmem>>, vector<1x32xf32>
    %83 = vector.broadcast %82 : vector<1x32xf32> to vector<64x32xf32>
    %84 = arith.addf %81, %83 : vector<64x32xf32>
    %cst_48 = arith.constant 0.000000e+00 : f32
    %85 = vector.broadcast %cst_48 : f32 to vector<64x32xf32>
    %86 = arith.maximumf %84, %85 : vector<64x32xf32>
    %c0_49 = arith.constant 0 : index
    %c0_50 = arith.constant 0 : index
    %c0_51 = arith.constant 0 : index
    %87 = vector.load %arg11[%c0_49, %c0_50, %c0_51] : memref<1x64x32xf32, #tpu.memory_space<vmem>>, vector<1x64x32xf32>
    %88 = vector.shape_cast %87 : vector<1x64x32xf32> to vector<64x32xf32>
    %89 = vector.shape_cast %86 : vector<64x32xf32> to vector<1x64x32xf32>
    tpu.vector_store %arg11[%c0_49, %c0_50, %c0_51], %89 {strides = array<i32>} : memref<1x64x32xf32, #tpu.memory_space<vmem>>, vector<1x64x32xf32>,
    return
  }
  func.func @transform_0(%arg0: i32) -> (i32, i32, i32, i32) {
    %c0_i32 = arith.constant 0 : i32
    %c0_i32_0 = arith.constant 0 : i32
    %c0_i32_1 = arith.constant 0 : i32
    %c0_i32_2 = arith.constant 0 : i32
    return %arg0, %c0_i32, %c0_i32_0, %c0_i32_1 : i32, i32, i32, i32
  }
  func.func @transform_1(%arg0: i32) -> (i32, i32, i32, i32) {
    %c0_i32 = arith.constant 0 : i32
    %c0_i32_0 = arith.constant 0 : i32
    %c0_i32_1 = arith.constant 0 : i32
    %c0_i32_2 = arith.constant 0 : i32
    return %arg0, %c0_i32, %c0_i32_0, %c0_i32_1 : i32, i32, i32, i32
  }
  func.func @transform_2(%arg0: i32) -> (i32, i32, i32, i32) {
    %c0_i32 = arith.constant 0 : i32
    %c0_i32_0 = arith.constant 0 : i32
    %c0_i32_1 = arith.constant 0 : i32
    %c0_i32_2 = arith.constant 0 : i32
    return %arg0, %c0_i32, %c0_i32_0, %c0_i32_1 : i32, i32, i32, i32
  }
  func.func @transform_3(%arg0: i32) -> (i32, i32, i32, i32) {
    %c0_i32 = arith.constant 0 : i32
    %c0_i32_0 = arith.constant 0 : i32
    %c0_i32_1 = arith.constant 0 : i32
    %c0_i32_2 = arith.constant 0 : i32
    return %arg0, %c0_i32, %c0_i32_0, %c0_i32_1 : i32, i32, i32, i32
  }
  func.func @transform_4(%arg0: i32) -> (i32, i32) {
    %c0_i32 = arith.constant 0 : i32
    %c0_i32_0 = arith.constant 0 : i32
    %c0_i32_1 = arith.constant 0 : i32
    return %c0_i32, %c0_i32_0 : i32, i32
  }
  func.func @transform_5(%arg0: i32) -> (i32, i32) {
    %c0_i32 = arith.constant 0 : i32
    %c0_i32_0 = arith.constant 0 : i32
    %c0_i32_1 = arith.constant 0 : i32
    return %c0_i32, %c0_i32_0 : i32, i32
  }
  func.func @transform_6(%arg0: i32) -> (i32, i32) {
    %c0_i32 = arith.constant 0 : i32
    %c0_i32_0 = arith.constant 0 : i32
    %c0_i32_1 = arith.constant 0 : i32
    return %c0_i32, %c0_i32_0 : i32, i32
  }
  func.func @transform_7(%arg0: i32) -> (i32, i32) {
    %c0_i32 = arith.constant 0 : i32
    %c0_i32_0 = arith.constant 0 : i32
    %c0_i32_1 = arith.constant 0 : i32
    return %c0_i32, %c0_i32_0 : i32, i32
  }
  func.func @transform_8(%arg0: i32) -> (i32, i32) {
    %c0_i32 = arith.constant 0 : i32
    %c0_i32_0 = arith.constant 0 : i32
    %c0_i32_1 = arith.constant 0 : i32
    return %c0_i32, %c0_i32_0 : i32, i32
  }
  func.func @transform_9(%arg0: i32) -> (i32, i32) {
    %c0_i32 = arith.constant 0 : i32
    %c0_i32_0 = arith.constant 0 : i32
    %c0_i32_1 = arith.constant 0 : i32
    return %c0_i32, %c0_i32_0 : i32, i32
  }
  func.func @transform_10(%arg0: i32) -> (i32, i32, i32) {
    %c0_i32 = arith.constant 0 : i32
    %c0_i32_0 = arith.constant 0 : i32
    %c0_i32_1 = arith.constant 0 : i32
    return %arg0, %c0_i32, %c0_i32_0 : i32, i32, i32
  }
}

module attributes {stable_mosaic.version = 11 : i64} {
  func.func @kernel(%arg0: i32, %arg1: memref<1x10x10x32xf32, #tpu.memory_space<vmem>>, %arg2: memref<9x32xf32, #tpu.memory_space<vmem>>, %arg3: memref<1x32xf32, #tpu.memory_space<vmem>>, %arg4: memref<1x32xf32, #tpu.memory_space<vmem>>, %arg5: memref<32x32xbf16, #tpu.memory_space<vmem>>, %arg6: memref<1x32xf32, #tpu.memory_space<vmem>>, %arg7: memref<1x32xf32, #tpu.memory_space<vmem>>, %arg8: memref<1x64x32xf32, #tpu.memory_space<vmem>>) attributes {dimension_semantics = [#tpu.dimension_semantics<parallel>], iteration_bounds = array<i64: 2>, scalar_prefetch = 0 : i64, scratch_operands = 0 : i64, tpu.core_type = #tpu.core_type<tc>, window_params = [{transform_indices = @transform_0, window_bounds = array<i64: 1, 10, 10, 32>}, {pipeline_mode = #tpu.pipeline_mode<synchronous>, transform_indices = @transform_1, window_bounds = array<i64: 9, 32>}, {pipeline_mode = #tpu.pipeline_mode<synchronous>, transform_indices = @transform_2, window_bounds = array<i64: 1, 32>}, {pipeline_mode = #tpu.pipeline_mode<synchronous>, transform_indices = @transform_3, window_bounds = array<i64: 1, 32>}, {pipeline_mode = #tpu.pipeline_mode<synchronous>, transform_indices = @transform_4, window_bounds = array<i64: 32, 32>}, {pipeline_mode = #tpu.pipeline_mode<synchronous>, transform_indices = @transform_5, window_bounds = array<i64: 1, 32>}, {pipeline_mode = #tpu.pipeline_mode<synchronous>, transform_indices = @transform_6, window_bounds = array<i64: 1, 32>}, {transform_indices = @transform_7, window_bounds = array<i64: 1, 64, 32>}]} {
    %c0 = arith.constant 0 : index
    %c0_0 = arith.constant 0 : index
    %0 = vector.load %arg2[%c0, %c0_0] : memref<9x32xf32, #tpu.memory_space<vmem>>, vector<9x32xf32>
    %cst = arith.constant 0.000000e+00 : f32
    %1 = vector.broadcast %cst : f32 to vector<8x8x32xf32>
    %c0_1 = arith.constant 0 : index
    %c0_2 = arith.constant 0 : index
    %c0_3 = arith.constant 0 : index
    %c0_4 = arith.constant 0 : index
    %2 = vector.load %arg1[%c0_1, %c0_2, %c0_3, %c0_4] : memref<1x10x10x32xf32, #tpu.memory_space<vmem>>, vector<1x8x8x32xf32>
    %3 = vector.shape_cast %2 : vector<1x8x8x32xf32> to vector<8x8x32xf32>
    %4 = vector.extract_strided_slice %0 {offsets = [0, 0], sizes = [1, 32], strides = [1, 1]} : vector<9x32xf32> to vector<1x32xf32>
    %5 = vector.shape_cast %4 : vector<1x32xf32> to vector<1x1x32xf32>
    %6 = vector.broadcast %5 : vector<1x1x32xf32> to vector<8x8x32xf32>
    %7 = arith.mulf %3, %6 : vector<8x8x32xf32>
    %8 = arith.addf %1, %7 : vector<8x8x32xf32>
    %c0_5 = arith.constant 0 : index
    %c0_6 = arith.constant 0 : index
    %c1 = arith.constant 1 : index
    %c0_7 = arith.constant 0 : index
    %9 = vector.load %arg1[%c0_5, %c0_6, %c1, %c0_7] : memref<1x10x10x32xf32, #tpu.memory_space<vmem>>, vector<1x8x8x32xf32>
    %10 = vector.shape_cast %9 : vector<1x8x8x32xf32> to vector<8x8x32xf32>
    %11 = vector.extract_strided_slice %0 {offsets = [1, 0], sizes = [1, 32], strides = [1, 1]} : vector<9x32xf32> to vector<1x32xf32>
    %12 = vector.shape_cast %11 : vector<1x32xf32> to vector<1x1x32xf32>
    %13 = vector.broadcast %12 : vector<1x1x32xf32> to vector<8x8x32xf32>
    %14 = arith.mulf %10, %13 : vector<8x8x32xf32>
    %15 = arith.addf %8, %14 : vector<8x8x32xf32>
    %c0_8 = arith.constant 0 : index
    %c0_9 = arith.constant 0 : index
    %c2 = arith.constant 2 : index
    %c0_10 = arith.constant 0 : index
    %16 = vector.load %arg1[%c0_8, %c0_9, %c2, %c0_10] : memref<1x10x10x32xf32, #tpu.memory_space<vmem>>, vector<1x8x8x32xf32>
    %17 = vector.shape_cast %16 : vector<1x8x8x32xf32> to vector<8x8x32xf32>
    %18 = vector.extract_strided_slice %0 {offsets = [2, 0], sizes = [1, 32], strides = [1, 1]} : vector<9x32xf32> to vector<1x32xf32>
    %19 = vector.shape_cast %18 : vector<1x32xf32> to vector<1x1x32xf32>
    %20 = vector.broadcast %19 : vector<1x1x32xf32> to vector<8x8x32xf32>
    %21 = arith.mulf %17, %20 : vector<8x8x32xf32>
    %22 = arith.addf %15, %21 : vector<8x8x32xf32>
    %c0_11 = arith.constant 0 : index
    %c1_12 = arith.constant 1 : index
    %c0_13 = arith.constant 0 : index
    %c0_14 = arith.constant 0 : index
    %23 = vector.load %arg1[%c0_11, %c1_12, %c0_13, %c0_14] : memref<1x10x10x32xf32, #tpu.memory_space<vmem>>, vector<1x8x8x32xf32>
    %24 = vector.shape_cast %23 : vector<1x8x8x32xf32> to vector<8x8x32xf32>
    %25 = vector.extract_strided_slice %0 {offsets = [3, 0], sizes = [1, 32], strides = [1, 1]} : vector<9x32xf32> to vector<1x32xf32>
    %26 = vector.shape_cast %25 : vector<1x32xf32> to vector<1x1x32xf32>
    %27 = vector.broadcast %26 : vector<1x1x32xf32> to vector<8x8x32xf32>
    %28 = arith.mulf %24, %27 : vector<8x8x32xf32>
    %29 = arith.addf %22, %28 : vector<8x8x32xf32>
    %c0_15 = arith.constant 0 : index
    %c1_16 = arith.constant 1 : index
    %c1_17 = arith.constant 1 : index
    %c0_18 = arith.constant 0 : index
    %30 = vector.load %arg1[%c0_15, %c1_16, %c1_17, %c0_18] : memref<1x10x10x32xf32, #tpu.memory_space<vmem>>, vector<1x8x8x32xf32>
    %31 = vector.shape_cast %30 : vector<1x8x8x32xf32> to vector<8x8x32xf32>
    %32 = vector.extract_strided_slice %0 {offsets = [4, 0], sizes = [1, 32], strides = [1, 1]} : vector<9x32xf32> to vector<1x32xf32>
    %33 = vector.shape_cast %32 : vector<1x32xf32> to vector<1x1x32xf32>
    %34 = vector.broadcast %33 : vector<1x1x32xf32> to vector<8x8x32xf32>
    %35 = arith.mulf %31, %34 : vector<8x8x32xf32>
    %36 = arith.addf %29, %35 : vector<8x8x32xf32>
    %c0_19 = arith.constant 0 : index
    %c1_20 = arith.constant 1 : index
    %c2_21 = arith.constant 2 : index
    %c0_22 = arith.constant 0 : index
    %37 = vector.load %arg1[%c0_19, %c1_20, %c2_21, %c0_22] : memref<1x10x10x32xf32, #tpu.memory_space<vmem>>, vector<1x8x8x32xf32>
    %38 = vector.shape_cast %37 : vector<1x8x8x32xf32> to vector<8x8x32xf32>
    %39 = vector.extract_strided_slice %0 {offsets = [5, 0], sizes = [1, 32], strides = [1, 1]} : vector<9x32xf32> to vector<1x32xf32>
    %40 = vector.shape_cast %39 : vector<1x32xf32> to vector<1x1x32xf32>
    %41 = vector.broadcast %40 : vector<1x1x32xf32> to vector<8x8x32xf32>
    %42 = arith.mulf %38, %41 : vector<8x8x32xf32>
    %43 = arith.addf %36, %42 : vector<8x8x32xf32>
    %c0_23 = arith.constant 0 : index
    %c2_24 = arith.constant 2 : index
    %c0_25 = arith.constant 0 : index
    %c0_26 = arith.constant 0 : index
    %44 = vector.load %arg1[%c0_23, %c2_24, %c0_25, %c0_26] : memref<1x10x10x32xf32, #tpu.memory_space<vmem>>, vector<1x8x8x32xf32>
    %45 = vector.shape_cast %44 : vector<1x8x8x32xf32> to vector<8x8x32xf32>
    %46 = vector.extract_strided_slice %0 {offsets = [6, 0], sizes = [1, 32], strides = [1, 1]} : vector<9x32xf32> to vector<1x32xf32>
    %47 = vector.shape_cast %46 : vector<1x32xf32> to vector<1x1x32xf32>
    %48 = vector.broadcast %47 : vector<1x1x32xf32> to vector<8x8x32xf32>
    %49 = arith.mulf %45, %48 : vector<8x8x32xf32>
    %50 = arith.addf %43, %49 : vector<8x8x32xf32>
    %c0_27 = arith.constant 0 : index
    %c2_28 = arith.constant 2 : index
    %c1_29 = arith.constant 1 : index
    %c0_30 = arith.constant 0 : index
    %51 = vector.load %arg1[%c0_27, %c2_28, %c1_29, %c0_30] : memref<1x10x10x32xf32, #tpu.memory_space<vmem>>, vector<1x8x8x32xf32>
    %52 = vector.shape_cast %51 : vector<1x8x8x32xf32> to vector<8x8x32xf32>
    %53 = vector.extract_strided_slice %0 {offsets = [7, 0], sizes = [1, 32], strides = [1, 1]} : vector<9x32xf32> to vector<1x32xf32>
    %54 = vector.shape_cast %53 : vector<1x32xf32> to vector<1x1x32xf32>
    %55 = vector.broadcast %54 : vector<1x1x32xf32> to vector<8x8x32xf32>
    %56 = arith.mulf %52, %55 : vector<8x8x32xf32>
    %57 = arith.addf %50, %56 : vector<8x8x32xf32>
    %c0_31 = arith.constant 0 : index
    %c2_32 = arith.constant 2 : index
    %c2_33 = arith.constant 2 : index
    %c0_34 = arith.constant 0 : index
    %58 = vector.load %arg1[%c0_31, %c2_32, %c2_33, %c0_34] : memref<1x10x10x32xf32, #tpu.memory_space<vmem>>, vector<1x8x8x32xf32>
    %59 = vector.shape_cast %58 : vector<1x8x8x32xf32> to vector<8x8x32xf32>
    %60 = vector.extract_strided_slice %0 {offsets = [8, 0], sizes = [1, 32], strides = [1, 1]} : vector<9x32xf32> to vector<1x32xf32>
    %61 = vector.shape_cast %60 : vector<1x32xf32> to vector<1x1x32xf32>
    %62 = vector.broadcast %61 : vector<1x1x32xf32> to vector<8x8x32xf32>
    %63 = arith.mulf %59, %62 : vector<8x8x32xf32>
    %64 = arith.addf %57, %63 : vector<8x8x32xf32>
    %c0_35 = arith.constant 0 : index
    %c0_36 = arith.constant 0 : index
    %65 = vector.load %arg3[%c0_35, %c0_36] : memref<1x32xf32, #tpu.memory_space<vmem>>, vector<1x32xf32>
    %66 = vector.shape_cast %65 : vector<1x32xf32> to vector<1x1x32xf32>
    %67 = vector.broadcast %66 : vector<1x1x32xf32> to vector<8x8x32xf32>
    %68 = arith.mulf %64, %67 : vector<8x8x32xf32>
    %c0_37 = arith.constant 0 : index
    %c0_38 = arith.constant 0 : index
    %69 = vector.load %arg4[%c0_37, %c0_38] : memref<1x32xf32, #tpu.memory_space<vmem>>, vector<1x32xf32>
    %70 = vector.shape_cast %69 : vector<1x32xf32> to vector<1x1x32xf32>
    %71 = vector.broadcast %70 : vector<1x1x32xf32> to vector<8x8x32xf32>
    %72 = arith.addf %68, %71 : vector<8x8x32xf32>
    %cst_39 = arith.constant 0.000000e+00 : f32
    %73 = vector.broadcast %cst_39 : f32 to vector<8x8x32xf32>
    %74 = arith.maximumf %72, %73 : vector<8x8x32xf32>
    %75 = vector.shape_cast %74 : vector<8x8x32xf32> to vector<64x32xf32>
    %76 = arith.truncf %75 : vector<64x32xf32> to vector<64x32xbf16>
    %c0_40 = arith.constant 0 : index
    %c0_41 = arith.constant 0 : index
    %77 = vector.load %arg5[%c0_40, %c0_41] : memref<32x32xbf16, #tpu.memory_space<vmem>>, vector<32x32xbf16>
    %cst_42 = arith.constant dense<0.000000e+00> : vector<64x32xf32>
    %78 = tpu.matmul %76, %77, %cst_42 {dimension_numbers = #tpu.dot_dimension_numbers<[1], [0], [0], [1], [0, 0, 1, 1], [], []>} : vector<64x32xbf16>, vector<32x32xbf16>, vector<64x32xf32> -> vector<64x32xf32>
    %c0_43 = arith.constant 0 : index
    %c0_44 = arith.constant 0 : index
    %79 = vector.load %arg6[%c0_43, %c0_44] : memref<1x32xf32, #tpu.memory_space<vmem>>, vector<1x32xf32>
    %80 = vector.broadcast %79 : vector<1x32xf32> to vector<64x32xf32>
    %81 = arith.mulf %78, %80 : vector<64x32xf32>
    %c0_45 = arith.constant 0 : index
    %c0_46 = arith.constant 0 : index
    %82 = vector.load %arg7[%c0_45, %c0_46] : memref<1x32xf32, #tpu.memory_space<vmem>>, vector<1x32xf32>
    %83 = vector.broadcast %82 : vector<1x32xf32> to vector<64x32xf32>
    %84 = arith.addf %81, %83 : vector<64x32xf32>
    %cst_47 = arith.constant 0.000000e+00 : f32
    %85 = vector.broadcast %cst_47 : f32 to vector<64x32xf32>
    %86 = arith.maximumf %84, %85 : vector<64x32xf32>
    %c0_48 = arith.constant 0 : index
    %c0_49 = arith.constant 0 : index
    %c0_50 = arith.constant 0 : index
    %87 = vector.load %arg8[%c0_48, %c0_49, %c0_50] : memref<1x64x32xf32, #tpu.memory_space<vmem>>, vector<1x64x32xf32>
    %88 = vector.shape_cast %87 : vector<1x64x32xf32> to vector<64x32xf32>
    %89 = vector.shape_cast %86 : vector<64x32xf32> to vector<1x64x32xf32>
    tpu.vector_store %arg8[%c0_48, %c0_49, %c0_50], %89 {strides = array<i32>} : memref<1x64x32xf32, #tpu.memory_space<vmem>>, vector<1x64x32xf32>,
    return
  }
  func.func @transform_0(%arg0: i32) -> (i32, i32, i32, i32) {
    %c0_i32 = arith.constant 0 : i32
    %c0_i32_0 = arith.constant 0 : i32
    %c0_i32_1 = arith.constant 0 : i32
    %c0_i32_2 = arith.constant 0 : i32
    return %arg0, %c0_i32, %c0_i32_0, %c0_i32_1 : i32, i32, i32, i32
  }
  func.func @transform_1(%arg0: i32) -> (i32, i32) {
    %c0_i32 = arith.constant 0 : i32
    %c0_i32_0 = arith.constant 0 : i32
    %c0_i32_1 = arith.constant 0 : i32
    return %c0_i32, %c0_i32_0 : i32, i32
  }
  func.func @transform_2(%arg0: i32) -> (i32, i32) {
    %c0_i32 = arith.constant 0 : i32
    %c0_i32_0 = arith.constant 0 : i32
    %c0_i32_1 = arith.constant 0 : i32
    return %c0_i32, %c0_i32_0 : i32, i32
  }
  func.func @transform_3(%arg0: i32) -> (i32, i32) {
    %c0_i32 = arith.constant 0 : i32
    %c0_i32_0 = arith.constant 0 : i32
    %c0_i32_1 = arith.constant 0 : i32
    return %c0_i32, %c0_i32_0 : i32, i32
  }
  func.func @transform_4(%arg0: i32) -> (i32, i32) {
    %c0_i32 = arith.constant 0 : i32
    %c0_i32_0 = arith.constant 0 : i32
    %c0_i32_1 = arith.constant 0 : i32
    return %c0_i32, %c0_i32_0 : i32, i32
  }
  func.func @transform_5(%arg0: i32) -> (i32, i32) {
    %c0_i32 = arith.constant 0 : i32
    %c0_i32_0 = arith.constant 0 : i32
    %c0_i32_1 = arith.constant 0 : i32
    return %c0_i32, %c0_i32_0 : i32, i32
  }
  func.func @transform_6(%arg0: i32) -> (i32, i32) {
    %c0_i32 = arith.constant 0 : i32
    %c0_i32_0 = arith.constant 0 : i32
    %c0_i32_1 = arith.constant 0 : i32
    return %c0_i32, %c0_i32_0 : i32, i32
  }
  func.func @transform_7(%arg0: i32) -> (i32, i32, i32) {
    %c0_i32 = arith.constant 0 : i32
    %c0_i32_0 = arith.constant 0 : i32
    %c0_i32_1 = arith.constant 0 : i32
    return %arg0, %c0_i32, %c0_i32_0 : i32, i32, i32
  }
}

module attributes {stable_mosaic.version = 11 : i64} {
  func.func @kernel(%arg0: i32, %arg1: memref<1x5x5x32xf32, #tpu.memory_space<vmem>>, %arg2: memref<1x5x5x32xf32, #tpu.memory_space<vmem>>, %arg3: memref<1x5x5x32xf32, #tpu.memory_space<vmem>>, %arg4: memref<1x5x5x32xf32, #tpu.memory_space<vmem>>, %arg5: memref<9x32xf32, #tpu.memory_space<vmem>>, %arg6: memref<1x32xf32, #tpu.memory_space<vmem>>, %arg7: memref<1x32xf32, #tpu.memory_space<vmem>>, %arg8: memref<32x64xbf16, #tpu.memory_space<vmem>>, %arg9: memref<1x64xf32, #tpu.memory_space<vmem>>, %arg10: memref<1x64xf32, #tpu.memory_space<vmem>>, %arg11: memref<1x16x64xf32, #tpu.memory_space<vmem>>) attributes {dimension_semantics = [#tpu.dimension_semantics<parallel>], iteration_bounds = array<i64: 2>, scalar_prefetch = 0 : i64, scratch_operands = 0 : i64, tpu.core_type = #tpu.core_type<tc>, window_params = [{transform_indices = @transform_0, window_bounds = array<i64: 1, 5, 5, 32>}, {transform_indices = @transform_1, window_bounds = array<i64: 1, 5, 5, 32>}, {transform_indices = @transform_2, window_bounds = array<i64: 1, 5, 5, 32>}, {transform_indices = @transform_3, window_bounds = array<i64: 1, 5, 5, 32>}, {pipeline_mode = #tpu.pipeline_mode<synchronous>, transform_indices = @transform_4, window_bounds = array<i64: 9, 32>}, {pipeline_mode = #tpu.pipeline_mode<synchronous>, transform_indices = @transform_5, window_bounds = array<i64: 1, 32>}, {pipeline_mode = #tpu.pipeline_mode<synchronous>, transform_indices = @transform_6, window_bounds = array<i64: 1, 32>}, {pipeline_mode = #tpu.pipeline_mode<synchronous>, transform_indices = @transform_7, window_bounds = array<i64: 32, 64>}, {pipeline_mode = #tpu.pipeline_mode<synchronous>, transform_indices = @transform_8, window_bounds = array<i64: 1, 64>}, {pipeline_mode = #tpu.pipeline_mode<synchronous>, transform_indices = @transform_9, window_bounds = array<i64: 1, 64>}, {transform_indices = @transform_10, window_bounds = array<i64: 1, 16, 64>}]} {
    %c0 = arith.constant 0 : index
    %c0_0 = arith.constant 0 : index
    %0 = vector.load %arg5[%c0, %c0_0] : memref<9x32xf32, #tpu.memory_space<vmem>>, vector<9x32xf32>
    %cst = arith.constant 0.000000e+00 : f32
    %1 = vector.broadcast %cst : f32 to vector<4x4x32xf32>
    %c0_1 = arith.constant 0 : index
    %c0_2 = arith.constant 0 : index
    %c0_3 = arith.constant 0 : index
    %c0_4 = arith.constant 0 : index
    %2 = vector.load %arg1[%c0_1, %c0_2, %c0_3, %c0_4] : memref<1x5x5x32xf32, #tpu.memory_space<vmem>>, vector<1x4x4x32xf32>
    %3 = vector.shape_cast %2 : vector<1x4x4x32xf32> to vector<4x4x32xf32>
    %4 = vector.extract_strided_slice %0 {offsets = [0, 0], sizes = [1, 32], strides = [1, 1]} : vector<9x32xf32> to vector<1x32xf32>
    %5 = vector.shape_cast %4 : vector<1x32xf32> to vector<1x1x32xf32>
    %6 = vector.broadcast %5 : vector<1x1x32xf32> to vector<4x4x32xf32>
    %7 = arith.mulf %3, %6 : vector<4x4x32xf32>
    %8 = arith.addf %1, %7 : vector<4x4x32xf32>
    %c0_5 = arith.constant 0 : index
    %c0_6 = arith.constant 0 : index
    %c0_7 = arith.constant 0 : index
    %c0_8 = arith.constant 0 : index
    %9 = vector.load %arg2[%c0_5, %c0_6, %c0_7, %c0_8] : memref<1x5x5x32xf32, #tpu.memory_space<vmem>>, vector<1x4x4x32xf32>
    %10 = vector.shape_cast %9 : vector<1x4x4x32xf32> to vector<4x4x32xf32>
    %11 = vector.extract_strided_slice %0 {offsets = [1, 0], sizes = [1, 32], strides = [1, 1]} : vector<9x32xf32> to vector<1x32xf32>
    %12 = vector.shape_cast %11 : vector<1x32xf32> to vector<1x1x32xf32>
    %13 = vector.broadcast %12 : vector<1x1x32xf32> to vector<4x4x32xf32>
    %14 = arith.mulf %10, %13 : vector<4x4x32xf32>
    %15 = arith.addf %8, %14 : vector<4x4x32xf32>
    %c0_9 = arith.constant 0 : index
    %c0_10 = arith.constant 0 : index
    %c1 = arith.constant 1 : index
    %c0_11 = arith.constant 0 : index
    %16 = vector.load %arg1[%c0_9, %c0_10, %c1, %c0_11] : memref<1x5x5x32xf32, #tpu.memory_space<vmem>>, vector<1x4x4x32xf32>
    %17 = vector.shape_cast %16 : vector<1x4x4x32xf32> to vector<4x4x32xf32>
    %18 = vector.extract_strided_slice %0 {offsets = [2, 0], sizes = [1, 32], strides = [1, 1]} : vector<9x32xf32> to vector<1x32xf32>
    %19 = vector.shape_cast %18 : vector<1x32xf32> to vector<1x1x32xf32>
    %20 = vector.broadcast %19 : vector<1x1x32xf32> to vector<4x4x32xf32>
    %21 = arith.mulf %17, %20 : vector<4x4x32xf32>
    %22 = arith.addf %15, %21 : vector<4x4x32xf32>
    %c0_12 = arith.constant 0 : index
    %c0_13 = arith.constant 0 : index
    %c0_14 = arith.constant 0 : index
    %c0_15 = arith.constant 0 : index
    %23 = vector.load %arg3[%c0_12, %c0_13, %c0_14, %c0_15] : memref<1x5x5x32xf32, #tpu.memory_space<vmem>>, vector<1x4x4x32xf32>
    %24 = vector.shape_cast %23 : vector<1x4x4x32xf32> to vector<4x4x32xf32>
    %25 = vector.extract_strided_slice %0 {offsets = [3, 0], sizes = [1, 32], strides = [1, 1]} : vector<9x32xf32> to vector<1x32xf32>
    %26 = vector.shape_cast %25 : vector<1x32xf32> to vector<1x1x32xf32>
    %27 = vector.broadcast %26 : vector<1x1x32xf32> to vector<4x4x32xf32>
    %28 = arith.mulf %24, %27 : vector<4x4x32xf32>
    %29 = arith.addf %22, %28 : vector<4x4x32xf32>
    %c0_16 = arith.constant 0 : index
    %c0_17 = arith.constant 0 : index
    %c0_18 = arith.constant 0 : index
    %c0_19 = arith.constant 0 : index
    %30 = vector.load %arg4[%c0_16, %c0_17, %c0_18, %c0_19] : memref<1x5x5x32xf32, #tpu.memory_space<vmem>>, vector<1x4x4x32xf32>
    %31 = vector.shape_cast %30 : vector<1x4x4x32xf32> to vector<4x4x32xf32>
    %32 = vector.extract_strided_slice %0 {offsets = [4, 0], sizes = [1, 32], strides = [1, 1]} : vector<9x32xf32> to vector<1x32xf32>
    %33 = vector.shape_cast %32 : vector<1x32xf32> to vector<1x1x32xf32>
    %34 = vector.broadcast %33 : vector<1x1x32xf32> to vector<4x4x32xf32>
    %35 = arith.mulf %31, %34 : vector<4x4x32xf32>
    %36 = arith.addf %29, %35 : vector<4x4x32xf32>
    %c0_20 = arith.constant 0 : index
    %c0_21 = arith.constant 0 : index
    %c1_22 = arith.constant 1 : index
    %c0_23 = arith.constant 0 : index
    %37 = vector.load %arg3[%c0_20, %c0_21, %c1_22, %c0_23] : memref<1x5x5x32xf32, #tpu.memory_space<vmem>>, vector<1x4x4x32xf32>
    %38 = vector.shape_cast %37 : vector<1x4x4x32xf32> to vector<4x4x32xf32>
    %39 = vector.extract_strided_slice %0 {offsets = [5, 0], sizes = [1, 32], strides = [1, 1]} : vector<9x32xf32> to vector<1x32xf32>
    %40 = vector.shape_cast %39 : vector<1x32xf32> to vector<1x1x32xf32>
    %41 = vector.broadcast %40 : vector<1x1x32xf32> to vector<4x4x32xf32>
    %42 = arith.mulf %38, %41 : vector<4x4x32xf32>
    %43 = arith.addf %36, %42 : vector<4x4x32xf32>
    %c0_24 = arith.constant 0 : index
    %c1_25 = arith.constant 1 : index
    %c0_26 = arith.constant 0 : index
    %c0_27 = arith.constant 0 : index
    %44 = vector.load %arg1[%c0_24, %c1_25, %c0_26, %c0_27] : memref<1x5x5x32xf32, #tpu.memory_space<vmem>>, vector<1x4x4x32xf32>
    %45 = vector.shape_cast %44 : vector<1x4x4x32xf32> to vector<4x4x32xf32>
    %46 = vector.extract_strided_slice %0 {offsets = [6, 0], sizes = [1, 32], strides = [1, 1]} : vector<9x32xf32> to vector<1x32xf32>
    %47 = vector.shape_cast %46 : vector<1x32xf32> to vector<1x1x32xf32>
    %48 = vector.broadcast %47 : vector<1x1x32xf32> to vector<4x4x32xf32>
    %49 = arith.mulf %45, %48 : vector<4x4x32xf32>
    %50 = arith.addf %43, %49 : vector<4x4x32xf32>
    %c0_28 = arith.constant 0 : index
    %c1_29 = arith.constant 1 : index
    %c0_30 = arith.constant 0 : index
    %c0_31 = arith.constant 0 : index
    %51 = vector.load %arg2[%c0_28, %c1_29, %c0_30, %c0_31] : memref<1x5x5x32xf32, #tpu.memory_space<vmem>>, vector<1x4x4x32xf32>
    %52 = vector.shape_cast %51 : vector<1x4x4x32xf32> to vector<4x4x32xf32>
    %53 = vector.extract_strided_slice %0 {offsets = [7, 0], sizes = [1, 32], strides = [1, 1]} : vector<9x32xf32> to vector<1x32xf32>
    %54 = vector.shape_cast %53 : vector<1x32xf32> to vector<1x1x32xf32>
    %55 = vector.broadcast %54 : vector<1x1x32xf32> to vector<4x4x32xf32>
    %56 = arith.mulf %52, %55 : vector<4x4x32xf32>
    %57 = arith.addf %50, %56 : vector<4x4x32xf32>
    %c0_32 = arith.constant 0 : index
    %c1_33 = arith.constant 1 : index
    %c1_34 = arith.constant 1 : index
    %c0_35 = arith.constant 0 : index
    %58 = vector.load %arg1[%c0_32, %c1_33, %c1_34, %c0_35] : memref<1x5x5x32xf32, #tpu.memory_space<vmem>>, vector<1x4x4x32xf32>
    %59 = vector.shape_cast %58 : vector<1x4x4x32xf32> to vector<4x4x32xf32>
    %60 = vector.extract_strided_slice %0 {offsets = [8, 0], sizes = [1, 32], strides = [1, 1]} : vector<9x32xf32> to vector<1x32xf32>
    %61 = vector.shape_cast %60 : vector<1x32xf32> to vector<1x1x32xf32>
    %62 = vector.broadcast %61 : vector<1x1x32xf32> to vector<4x4x32xf32>
    %63 = arith.mulf %59, %62 : vector<4x4x32xf32>
    %64 = arith.addf %57, %63 : vector<4x4x32xf32>
    %c0_36 = arith.constant 0 : index
    %c0_37 = arith.constant 0 : index
    %65 = vector.load %arg6[%c0_36, %c0_37] : memref<1x32xf32, #tpu.memory_space<vmem>>, vector<1x32xf32>
    %66 = vector.shape_cast %65 : vector<1x32xf32> to vector<1x1x32xf32>
    %67 = vector.broadcast %66 : vector<1x1x32xf32> to vector<4x4x32xf32>
    %68 = arith.mulf %64, %67 : vector<4x4x32xf32>
    %c0_38 = arith.constant 0 : index
    %c0_39 = arith.constant 0 : index
    %69 = vector.load %arg7[%c0_38, %c0_39] : memref<1x32xf32, #tpu.memory_space<vmem>>, vector<1x32xf32>
    %70 = vector.shape_cast %69 : vector<1x32xf32> to vector<1x1x32xf32>
    %71 = vector.broadcast %70 : vector<1x1x32xf32> to vector<4x4x32xf32>
    %72 = arith.addf %68, %71 : vector<4x4x32xf32>
    %cst_40 = arith.constant 0.000000e+00 : f32
    %73 = vector.broadcast %cst_40 : f32 to vector<4x4x32xf32>
    %74 = arith.maximumf %72, %73 : vector<4x4x32xf32>
    %75 = vector.shape_cast %74 : vector<4x4x32xf32> to vector<16x32xf32>
    %76 = arith.truncf %75 : vector<16x32xf32> to vector<16x32xbf16>
    %c0_41 = arith.constant 0 : index
    %c0_42 = arith.constant 0 : index
    %77 = vector.load %arg8[%c0_41, %c0_42] : memref<32x64xbf16, #tpu.memory_space<vmem>>, vector<32x64xbf16>
    %cst_43 = arith.constant dense<0.000000e+00> : vector<16x64xf32>
    %78 = tpu.matmul %76, %77, %cst_43 {dimension_numbers = #tpu.dot_dimension_numbers<[1], [0], [0], [1], [0, 0, 1, 1], [], []>} : vector<16x32xbf16>, vector<32x64xbf16>, vector<16x64xf32> -> vector<16x64xf32>
    %c0_44 = arith.constant 0 : index
    %c0_45 = arith.constant 0 : index
    %79 = vector.load %arg9[%c0_44, %c0_45] : memref<1x64xf32, #tpu.memory_space<vmem>>, vector<1x64xf32>
    %80 = vector.broadcast %79 : vector<1x64xf32> to vector<16x64xf32>
    %81 = arith.mulf %78, %80 : vector<16x64xf32>
    %c0_46 = arith.constant 0 : index
    %c0_47 = arith.constant 0 : index
    %82 = vector.load %arg10[%c0_46, %c0_47] : memref<1x64xf32, #tpu.memory_space<vmem>>, vector<1x64xf32>
    %83 = vector.broadcast %82 : vector<1x64xf32> to vector<16x64xf32>
    %84 = arith.addf %81, %83 : vector<16x64xf32>
    %cst_48 = arith.constant 0.000000e+00 : f32
    %85 = vector.broadcast %cst_48 : f32 to vector<16x64xf32>
    %86 = arith.maximumf %84, %85 : vector<16x64xf32>
    %c0_49 = arith.constant 0 : index
    %c0_50 = arith.constant 0 : index
    %c0_51 = arith.constant 0 : index
    %87 = vector.load %arg11[%c0_49, %c0_50, %c0_51] : memref<1x16x64xf32, #tpu.memory_space<vmem>>, vector<1x16x64xf32>
    %88 = vector.shape_cast %87 : vector<1x16x64xf32> to vector<16x64xf32>
    %89 = vector.shape_cast %86 : vector<16x64xf32> to vector<1x16x64xf32>
    tpu.vector_store %arg11[%c0_49, %c0_50, %c0_51], %89 {strides = array<i32>} : memref<1x16x64xf32, #tpu.memory_space<vmem>>, vector<1x16x64xf32>,
    return
  }
  func.func @transform_0(%arg0: i32) -> (i32, i32, i32, i32) {
    %c0_i32 = arith.constant 0 : i32
    %c0_i32_0 = arith.constant 0 : i32
    %c0_i32_1 = arith.constant 0 : i32
    %c0_i32_2 = arith.constant 0 : i32
    return %arg0, %c0_i32, %c0_i32_0, %c0_i32_1 : i32, i32, i32, i32
  }
  func.func @transform_1(%arg0: i32) -> (i32, i32, i32, i32) {
    %c0_i32 = arith.constant 0 : i32
    %c0_i32_0 = arith.constant 0 : i32
    %c0_i32_1 = arith.constant 0 : i32
    %c0_i32_2 = arith.constant 0 : i32
    return %arg0, %c0_i32, %c0_i32_0, %c0_i32_1 : i32, i32, i32, i32
  }
  func.func @transform_2(%arg0: i32) -> (i32, i32, i32, i32) {
    %c0_i32 = arith.constant 0 : i32
    %c0_i32_0 = arith.constant 0 : i32
    %c0_i32_1 = arith.constant 0 : i32
    %c0_i32_2 = arith.constant 0 : i32
    return %arg0, %c0_i32, %c0_i32_0, %c0_i32_1 : i32, i32, i32, i32
  }
  func.func @transform_3(%arg0: i32) -> (i32, i32, i32, i32) {
    %c0_i32 = arith.constant 0 : i32
    %c0_i32_0 = arith.constant 0 : i32
    %c0_i32_1 = arith.constant 0 : i32
    %c0_i32_2 = arith.constant 0 : i32
    return %arg0, %c0_i32, %c0_i32_0, %c0_i32_1 : i32, i32, i32, i32
  }
  func.func @transform_4(%arg0: i32) -> (i32, i32) {
    %c0_i32 = arith.constant 0 : i32
    %c0_i32_0 = arith.constant 0 : i32
    %c0_i32_1 = arith.constant 0 : i32
    return %c0_i32, %c0_i32_0 : i32, i32
  }
  func.func @transform_5(%arg0: i32) -> (i32, i32) {
    %c0_i32 = arith.constant 0 : i32
    %c0_i32_0 = arith.constant 0 : i32
    %c0_i32_1 = arith.constant 0 : i32
    return %c0_i32, %c0_i32_0 : i32, i32
  }
  func.func @transform_6(%arg0: i32) -> (i32, i32) {
    %c0_i32 = arith.constant 0 : i32
    %c0_i32_0 = arith.constant 0 : i32
    %c0_i32_1 = arith.constant 0 : i32
    return %c0_i32, %c0_i32_0 : i32, i32
  }
  func.func @transform_7(%arg0: i32) -> (i32, i32) {
    %c0_i32 = arith.constant 0 : i32
    %c0_i32_0 = arith.constant 0 : i32
    %c0_i32_1 = arith.constant 0 : i32
    return %c0_i32, %c0_i32_0 : i32, i32
  }
  func.func @transform_8(%arg0: i32) -> (i32, i32) {
    %c0_i32 = arith.constant 0 : i32
    %c0_i32_0 = arith.constant 0 : i32
    %c0_i32_1 = arith.constant 0 : i32
    return %c0_i32, %c0_i32_0 : i32, i32
  }
  func.func @transform_9(%arg0: i32) -> (i32, i32) {
    %c0_i32 = arith.constant 0 : i32
    %c0_i32_0 = arith.constant 0 : i32
    %c0_i32_1 = arith.constant 0 : i32
    return %c0_i32, %c0_i32_0 : i32, i32
  }
  func.func @transform_10(%arg0: i32) -> (i32, i32, i32) {
    %c0_i32 = arith.constant 0 : i32
    %c0_i32_0 = arith.constant 0 : i32
    %c0_i32_1 = arith.constant 0 : i32
    return %arg0, %c0_i32, %c0_i32_0 : i32, i32, i32
  }
}

module attributes {stable_mosaic.version = 11 : i64} {
  func.func @kernel(%arg0: i32, %arg1: memref<1x6x6x64xf32, #tpu.memory_space<vmem>>, %arg2: memref<9x64xf32, #tpu.memory_space<vmem>>, %arg3: memref<1x64xf32, #tpu.memory_space<vmem>>, %arg4: memref<1x64xf32, #tpu.memory_space<vmem>>, %arg5: memref<64x64xbf16, #tpu.memory_space<vmem>>, %arg6: memref<1x64xf32, #tpu.memory_space<vmem>>, %arg7: memref<1x64xf32, #tpu.memory_space<vmem>>, %arg8: memref<1x16x64xf32, #tpu.memory_space<vmem>>) attributes {dimension_semantics = [#tpu.dimension_semantics<parallel>], iteration_bounds = array<i64: 2>, scalar_prefetch = 0 : i64, scratch_operands = 0 : i64, tpu.core_type = #tpu.core_type<tc>, window_params = [{transform_indices = @transform_0, window_bounds = array<i64: 1, 6, 6, 64>}, {pipeline_mode = #tpu.pipeline_mode<synchronous>, transform_indices = @transform_1, window_bounds = array<i64: 9, 64>}, {pipeline_mode = #tpu.pipeline_mode<synchronous>, transform_indices = @transform_2, window_bounds = array<i64: 1, 64>}, {pipeline_mode = #tpu.pipeline_mode<synchronous>, transform_indices = @transform_3, window_bounds = array<i64: 1, 64>}, {pipeline_mode = #tpu.pipeline_mode<synchronous>, transform_indices = @transform_4, window_bounds = array<i64: 64, 64>}, {pipeline_mode = #tpu.pipeline_mode<synchronous>, transform_indices = @transform_5, window_bounds = array<i64: 1, 64>}, {pipeline_mode = #tpu.pipeline_mode<synchronous>, transform_indices = @transform_6, window_bounds = array<i64: 1, 64>}, {transform_indices = @transform_7, window_bounds = array<i64: 1, 16, 64>}]} {
    %c0 = arith.constant 0 : index
    %c0_0 = arith.constant 0 : index
    %0 = vector.load %arg2[%c0, %c0_0] : memref<9x64xf32, #tpu.memory_space<vmem>>, vector<9x64xf32>
    %cst = arith.constant 0.000000e+00 : f32
    %1 = vector.broadcast %cst : f32 to vector<4x4x64xf32>
    %c0_1 = arith.constant 0 : index
    %c0_2 = arith.constant 0 : index
    %c0_3 = arith.constant 0 : index
    %c0_4 = arith.constant 0 : index
    %2 = vector.load %arg1[%c0_1, %c0_2, %c0_3, %c0_4] : memref<1x6x6x64xf32, #tpu.memory_space<vmem>>, vector<1x4x4x64xf32>
    %3 = vector.shape_cast %2 : vector<1x4x4x64xf32> to vector<4x4x64xf32>
    %4 = vector.extract_strided_slice %0 {offsets = [0, 0], sizes = [1, 64], strides = [1, 1]} : vector<9x64xf32> to vector<1x64xf32>
    %5 = vector.shape_cast %4 : vector<1x64xf32> to vector<1x1x64xf32>
    %6 = vector.broadcast %5 : vector<1x1x64xf32> to vector<4x4x64xf32>
    %7 = arith.mulf %3, %6 : vector<4x4x64xf32>
    %8 = arith.addf %1, %7 : vector<4x4x64xf32>
    %c0_5 = arith.constant 0 : index
    %c0_6 = arith.constant 0 : index
    %c1 = arith.constant 1 : index
    %c0_7 = arith.constant 0 : index
    %9 = vector.load %arg1[%c0_5, %c0_6, %c1, %c0_7] : memref<1x6x6x64xf32, #tpu.memory_space<vmem>>, vector<1x4x4x64xf32>
    %10 = vector.shape_cast %9 : vector<1x4x4x64xf32> to vector<4x4x64xf32>
    %11 = vector.extract_strided_slice %0 {offsets = [1, 0], sizes = [1, 64], strides = [1, 1]} : vector<9x64xf32> to vector<1x64xf32>
    %12 = vector.shape_cast %11 : vector<1x64xf32> to vector<1x1x64xf32>
    %13 = vector.broadcast %12 : vector<1x1x64xf32> to vector<4x4x64xf32>
    %14 = arith.mulf %10, %13 : vector<4x4x64xf32>
    %15 = arith.addf %8, %14 : vector<4x4x64xf32>
    %c0_8 = arith.constant 0 : index
    %c0_9 = arith.constant 0 : index
    %c2 = arith.constant 2 : index
    %c0_10 = arith.constant 0 : index
    %16 = vector.load %arg1[%c0_8, %c0_9, %c2, %c0_10] : memref<1x6x6x64xf32, #tpu.memory_space<vmem>>, vector<1x4x4x64xf32>
    %17 = vector.shape_cast %16 : vector<1x4x4x64xf32> to vector<4x4x64xf32>
    %18 = vector.extract_strided_slice %0 {offsets = [2, 0], sizes = [1, 64], strides = [1, 1]} : vector<9x64xf32> to vector<1x64xf32>
    %19 = vector.shape_cast %18 : vector<1x64xf32> to vector<1x1x64xf32>
    %20 = vector.broadcast %19 : vector<1x1x64xf32> to vector<4x4x64xf32>
    %21 = arith.mulf %17, %20 : vector<4x4x64xf32>
    %22 = arith.addf %15, %21 : vector<4x4x64xf32>
    %c0_11 = arith.constant 0 : index
    %c1_12 = arith.constant 1 : index
    %c0_13 = arith.constant 0 : index
    %c0_14 = arith.constant 0 : index
    %23 = vector.load %arg1[%c0_11, %c1_12, %c0_13, %c0_14] : memref<1x6x6x64xf32, #tpu.memory_space<vmem>>, vector<1x4x4x64xf32>
    %24 = vector.shape_cast %23 : vector<1x4x4x64xf32> to vector<4x4x64xf32>
    %25 = vector.extract_strided_slice %0 {offsets = [3, 0], sizes = [1, 64], strides = [1, 1]} : vector<9x64xf32> to vector<1x64xf32>
    %26 = vector.shape_cast %25 : vector<1x64xf32> to vector<1x1x64xf32>
    %27 = vector.broadcast %26 : vector<1x1x64xf32> to vector<4x4x64xf32>
    %28 = arith.mulf %24, %27 : vector<4x4x64xf32>
    %29 = arith.addf %22, %28 : vector<4x4x64xf32>
    %c0_15 = arith.constant 0 : index
    %c1_16 = arith.constant 1 : index
    %c1_17 = arith.constant 1 : index
    %c0_18 = arith.constant 0 : index
    %30 = vector.load %arg1[%c0_15, %c1_16, %c1_17, %c0_18] : memref<1x6x6x64xf32, #tpu.memory_space<vmem>>, vector<1x4x4x64xf32>
    %31 = vector.shape_cast %30 : vector<1x4x4x64xf32> to vector<4x4x64xf32>
    %32 = vector.extract_strided_slice %0 {offsets = [4, 0], sizes = [1, 64], strides = [1, 1]} : vector<9x64xf32> to vector<1x64xf32>
    %33 = vector.shape_cast %32 : vector<1x64xf32> to vector<1x1x64xf32>
    %34 = vector.broadcast %33 : vector<1x1x64xf32> to vector<4x4x64xf32>
    %35 = arith.mulf %31, %34 : vector<4x4x64xf32>
    %36 = arith.addf %29, %35 : vector<4x4x64xf32>
    %c0_19 = arith.constant 0 : index
    %c1_20 = arith.constant 1 : index
    %c2_21 = arith.constant 2 : index
    %c0_22 = arith.constant 0 : index
    %37 = vector.load %arg1[%c0_19, %c1_20, %c2_21, %c0_22] : memref<1x6x6x64xf32, #tpu.memory_space<vmem>>, vector<1x4x4x64xf32>
    %38 = vector.shape_cast %37 : vector<1x4x4x64xf32> to vector<4x4x64xf32>
    %39 = vector.extract_strided_slice %0 {offsets = [5, 0], sizes = [1, 64], strides = [1, 1]} : vector<9x64xf32> to vector<1x64xf32>
    %40 = vector.shape_cast %39 : vector<1x64xf32> to vector<1x1x64xf32>
    %41 = vector.broadcast %40 : vector<1x1x64xf32> to vector<4x4x64xf32>
    %42 = arith.mulf %38, %41 : vector<4x4x64xf32>
    %43 = arith.addf %36, %42 : vector<4x4x64xf32>
    %c0_23 = arith.constant 0 : index
    %c2_24 = arith.constant 2 : index
    %c0_25 = arith.constant 0 : index
    %c0_26 = arith.constant 0 : index
    %44 = vector.load %arg1[%c0_23, %c2_24, %c0_25, %c0_26] : memref<1x6x6x64xf32, #tpu.memory_space<vmem>>, vector<1x4x4x64xf32>
    %45 = vector.shape_cast %44 : vector<1x4x4x64xf32> to vector<4x4x64xf32>
    %46 = vector.extract_strided_slice %0 {offsets = [6, 0], sizes = [1, 64], strides = [1, 1]} : vector<9x64xf32> to vector<1x64xf32>
    %47 = vector.shape_cast %46 : vector<1x64xf32> to vector<1x1x64xf32>
    %48 = vector.broadcast %47 : vector<1x1x64xf32> to vector<4x4x64xf32>
    %49 = arith.mulf %45, %48 : vector<4x4x64xf32>
    %50 = arith.addf %43, %49 : vector<4x4x64xf32>
    %c0_27 = arith.constant 0 : index
    %c2_28 = arith.constant 2 : index
    %c1_29 = arith.constant 1 : index
    %c0_30 = arith.constant 0 : index
    %51 = vector.load %arg1[%c0_27, %c2_28, %c1_29, %c0_30] : memref<1x6x6x64xf32, #tpu.memory_space<vmem>>, vector<1x4x4x64xf32>
    %52 = vector.shape_cast %51 : vector<1x4x4x64xf32> to vector<4x4x64xf32>
    %53 = vector.extract_strided_slice %0 {offsets = [7, 0], sizes = [1, 64], strides = [1, 1]} : vector<9x64xf32> to vector<1x64xf32>
    %54 = vector.shape_cast %53 : vector<1x64xf32> to vector<1x1x64xf32>
    %55 = vector.broadcast %54 : vector<1x1x64xf32> to vector<4x4x64xf32>
    %56 = arith.mulf %52, %55 : vector<4x4x64xf32>
    %57 = arith.addf %50, %56 : vector<4x4x64xf32>
    %c0_31 = arith.constant 0 : index
    %c2_32 = arith.constant 2 : index
    %c2_33 = arith.constant 2 : index
    %c0_34 = arith.constant 0 : index
    %58 = vector.load %arg1[%c0_31, %c2_32, %c2_33, %c0_34] : memref<1x6x6x64xf32, #tpu.memory_space<vmem>>, vector<1x4x4x64xf32>
    %59 = vector.shape_cast %58 : vector<1x4x4x64xf32> to vector<4x4x64xf32>
    %60 = vector.extract_strided_slice %0 {offsets = [8, 0], sizes = [1, 64], strides = [1, 1]} : vector<9x64xf32> to vector<1x64xf32>
    %61 = vector.shape_cast %60 : vector<1x64xf32> to vector<1x1x64xf32>
    %62 = vector.broadcast %61 : vector<1x1x64xf32> to vector<4x4x64xf32>
    %63 = arith.mulf %59, %62 : vector<4x4x64xf32>
    %64 = arith.addf %57, %63 : vector<4x4x64xf32>
    %c0_35 = arith.constant 0 : index
    %c0_36 = arith.constant 0 : index
    %65 = vector.load %arg3[%c0_35, %c0_36] : memref<1x64xf32, #tpu.memory_space<vmem>>, vector<1x64xf32>
    %66 = vector.shape_cast %65 : vector<1x64xf32> to vector<1x1x64xf32>
    %67 = vector.broadcast %66 : vector<1x1x64xf32> to vector<4x4x64xf32>
    %68 = arith.mulf %64, %67 : vector<4x4x64xf32>
    %c0_37 = arith.constant 0 : index
    %c0_38 = arith.constant 0 : index
    %69 = vector.load %arg4[%c0_37, %c0_38] : memref<1x64xf32, #tpu.memory_space<vmem>>, vector<1x64xf32>
    %70 = vector.shape_cast %69 : vector<1x64xf32> to vector<1x1x64xf32>
    %71 = vector.broadcast %70 : vector<1x1x64xf32> to vector<4x4x64xf32>
    %72 = arith.addf %68, %71 : vector<4x4x64xf32>
    %cst_39 = arith.constant 0.000000e+00 : f32
    %73 = vector.broadcast %cst_39 : f32 to vector<4x4x64xf32>
    %74 = arith.maximumf %72, %73 : vector<4x4x64xf32>
    %75 = vector.shape_cast %74 : vector<4x4x64xf32> to vector<16x64xf32>
    %76 = arith.truncf %75 : vector<16x64xf32> to vector<16x64xbf16>
    %c0_40 = arith.constant 0 : index
    %c0_41 = arith.constant 0 : index
    %77 = vector.load %arg5[%c0_40, %c0_41] : memref<64x64xbf16, #tpu.memory_space<vmem>>, vector<64x64xbf16>
    %cst_42 = arith.constant dense<0.000000e+00> : vector<16x64xf32>
    %78 = tpu.matmul %76, %77, %cst_42 {dimension_numbers = #tpu.dot_dimension_numbers<[1], [0], [0], [1], [0, 0, 1, 1], [], []>} : vector<16x64xbf16>, vector<64x64xbf16>, vector<16x64xf32> -> vector<16x64xf32>
    %c0_43 = arith.constant 0 : index
    %c0_44 = arith.constant 0 : index
    %79 = vector.load %arg6[%c0_43, %c0_44] : memref<1x64xf32, #tpu.memory_space<vmem>>, vector<1x64xf32>
    %80 = vector.broadcast %79 : vector<1x64xf32> to vector<16x64xf32>
    %81 = arith.mulf %78, %80 : vector<16x64xf32>
    %c0_45 = arith.constant 0 : index
    %c0_46 = arith.constant 0 : index
    %82 = vector.load %arg7[%c0_45, %c0_46] : memref<1x64xf32, #tpu.memory_space<vmem>>, vector<1x64xf32>
    %83 = vector.broadcast %82 : vector<1x64xf32> to vector<16x64xf32>
    %84 = arith.addf %81, %83 : vector<16x64xf32>
    %cst_47 = arith.constant 0.000000e+00 : f32
    %85 = vector.broadcast %cst_47 : f32 to vector<16x64xf32>
    %86 = arith.maximumf %84, %85 : vector<16x64xf32>
    %c0_48 = arith.constant 0 : index
    %c0_49 = arith.constant 0 : index
    %c0_50 = arith.constant 0 : index
    %87 = vector.load %arg8[%c0_48, %c0_49, %c0_50] : memref<1x16x64xf32, #tpu.memory_space<vmem>>, vector<1x16x64xf32>
    %88 = vector.shape_cast %87 : vector<1x16x64xf32> to vector<16x64xf32>
    %89 = vector.shape_cast %86 : vector<16x64xf32> to vector<1x16x64xf32>
    tpu.vector_store %arg8[%c0_48, %c0_49, %c0_50], %89 {strides = array<i32>} : memref<1x16x64xf32, #tpu.memory_space<vmem>>, vector<1x16x64xf32>,
    return
  }
  func.func @transform_0(%arg0: i32) -> (i32, i32, i32, i32) {
    %c0_i32 = arith.constant 0 : i32
    %c0_i32_0 = arith.constant 0 : i32
    %c0_i32_1 = arith.constant 0 : i32
    %c0_i32_2 = arith.constant 0 : i32
    return %arg0, %c0_i32, %c0_i32_0, %c0_i32_1 : i32, i32, i32, i32
  }
  func.func @transform_1(%arg0: i32) -> (i32, i32) {
    %c0_i32 = arith.constant 0 : i32
    %c0_i32_0 = arith.constant 0 : i32
    %c0_i32_1 = arith.constant 0 : i32
    return %c0_i32, %c0_i32_0 : i32, i32
  }
  func.func @transform_2(%arg0: i32) -> (i32, i32) {
    %c0_i32 = arith.constant 0 : i32
    %c0_i32_0 = arith.constant 0 : i32
    %c0_i32_1 = arith.constant 0 : i32
    return %c0_i32, %c0_i32_0 : i32, i32
  }
  func.func @transform_3(%arg0: i32) -> (i32, i32) {
    %c0_i32 = arith.constant 0 : i32
    %c0_i32_0 = arith.constant 0 : i32
    %c0_i32_1 = arith.constant 0 : i32
    return %c0_i32, %c0_i32_0 : i32, i32
  }
  func.func @transform_4(%arg0: i32) -> (i32, i32) {
    %c0_i32 = arith.constant 0 : i32
    %c0_i32_0 = arith.constant 0 : i32
    %c0_i32_1 = arith.constant 0 : i32
    return %c0_i32, %c0_i32_0 : i32, i32
  }
  func.func @transform_5(%arg0: i32) -> (i32, i32) {
    %c0_i32 = arith.constant 0 : i32
    %c0_i32_0 = arith.constant 0 : i32
    %c0_i32_1 = arith.constant 0 : i32
    return %c0_i32, %c0_i32_0 : i32, i32
  }
  func.func @transform_6(%arg0: i32) -> (i32, i32) {
    %c0_i32 = arith.constant 0 : i32
    %c0_i32_0 = arith.constant 0 : i32
    %c0_i32_1 = arith.constant 0 : i32
    return %c0_i32, %c0_i32_0 : i32, i32
  }
  func.func @transform_7(%arg0: i32) -> (i32, i32, i32) {
    %c0_i32 = arith.constant 0 : i32
    %c0_i32_0 = arith.constant 0 : i32
    %c0_i32_1 = arith.constant 0 : i32
    return %arg0, %c0_i32, %c0_i32_0 : i32, i32, i32
  }
}

module attributes {stable_mosaic.version = 11 : i64} {
  func.func @kernel(%arg0: i32, %arg1: memref<1x3x3x64xf32, #tpu.memory_space<vmem>>, %arg2: memref<1x3x3x64xf32, #tpu.memory_space<vmem>>, %arg3: memref<1x3x3x64xf32, #tpu.memory_space<vmem>>, %arg4: memref<1x3x3x64xf32, #tpu.memory_space<vmem>>, %arg5: memref<9x64xf32, #tpu.memory_space<vmem>>, %arg6: memref<1x64xf32, #tpu.memory_space<vmem>>, %arg7: memref<1x64xf32, #tpu.memory_space<vmem>>, %arg8: memref<64x128xbf16, #tpu.memory_space<vmem>>, %arg9: memref<1x128xf32, #tpu.memory_space<vmem>>, %arg10: memref<1x128xf32, #tpu.memory_space<vmem>>, %arg11: memref<1x4x128xf32, #tpu.memory_space<vmem>>) attributes {dimension_semantics = [#tpu.dimension_semantics<parallel>], iteration_bounds = array<i64: 2>, scalar_prefetch = 0 : i64, scratch_operands = 0 : i64, tpu.core_type = #tpu.core_type<tc>, window_params = [{transform_indices = @transform_0, window_bounds = array<i64: 1, 3, 3, 64>}, {transform_indices = @transform_1, window_bounds = array<i64: 1, 3, 3, 64>}, {transform_indices = @transform_2, window_bounds = array<i64: 1, 3, 3, 64>}, {transform_indices = @transform_3, window_bounds = array<i64: 1, 3, 3, 64>}, {pipeline_mode = #tpu.pipeline_mode<synchronous>, transform_indices = @transform_4, window_bounds = array<i64: 9, 64>}, {pipeline_mode = #tpu.pipeline_mode<synchronous>, transform_indices = @transform_5, window_bounds = array<i64: 1, 64>}, {pipeline_mode = #tpu.pipeline_mode<synchronous>, transform_indices = @transform_6, window_bounds = array<i64: 1, 64>}, {pipeline_mode = #tpu.pipeline_mode<synchronous>, transform_indices = @transform_7, window_bounds = array<i64: 64, 128>}, {pipeline_mode = #tpu.pipeline_mode<synchronous>, transform_indices = @transform_8, window_bounds = array<i64: 1, 128>}, {pipeline_mode = #tpu.pipeline_mode<synchronous>, transform_indices = @transform_9, window_bounds = array<i64: 1, 128>}, {transform_indices = @transform_10, window_bounds = array<i64: 1, 4, 128>}]} {
    %c0 = arith.constant 0 : index
    %c0_0 = arith.constant 0 : index
    %0 = vector.load %arg5[%c0, %c0_0] : memref<9x64xf32, #tpu.memory_space<vmem>>, vector<9x64xf32>
    %cst = arith.constant 0.000000e+00 : f32
    %1 = vector.broadcast %cst : f32 to vector<2x2x64xf32>
    %c0_1 = arith.constant 0 : index
    %c0_2 = arith.constant 0 : index
    %c0_3 = arith.constant 0 : index
    %c0_4 = arith.constant 0 : index
    %2 = vector.load %arg1[%c0_1, %c0_2, %c0_3, %c0_4] : memref<1x3x3x64xf32, #tpu.memory_space<vmem>>, vector<1x2x2x64xf32>
    %3 = vector.shape_cast %2 : vector<1x2x2x64xf32> to vector<2x2x64xf32>
    %4 = vector.extract_strided_slice %0 {offsets = [0, 0], sizes = [1, 64], strides = [1, 1]} : vector<9x64xf32> to vector<1x64xf32>
    %5 = vector.shape_cast %4 : vector<1x64xf32> to vector<1x1x64xf32>
    %6 = vector.broadcast %5 : vector<1x1x64xf32> to vector<2x2x64xf32>
    %7 = arith.mulf %3, %6 : vector<2x2x64xf32>
    %8 = arith.addf %1, %7 : vector<2x2x64xf32>
    %c0_5 = arith.constant 0 : index
    %c0_6 = arith.constant 0 : index
    %c0_7 = arith.constant 0 : index
    %c0_8 = arith.constant 0 : index
    %9 = vector.load %arg2[%c0_5, %c0_6, %c0_7, %c0_8] : memref<1x3x3x64xf32, #tpu.memory_space<vmem>>, vector<1x2x2x64xf32>
    %10 = vector.shape_cast %9 : vector<1x2x2x64xf32> to vector<2x2x64xf32>
    %11 = vector.extract_strided_slice %0 {offsets = [1, 0], sizes = [1, 64], strides = [1, 1]} : vector<9x64xf32> to vector<1x64xf32>
    %12 = vector.shape_cast %11 : vector<1x64xf32> to vector<1x1x64xf32>
    %13 = vector.broadcast %12 : vector<1x1x64xf32> to vector<2x2x64xf32>
    %14 = arith.mulf %10, %13 : vector<2x2x64xf32>
    %15 = arith.addf %8, %14 : vector<2x2x64xf32>
    %c0_9 = arith.constant 0 : index
    %c0_10 = arith.constant 0 : index
    %c1 = arith.constant 1 : index
    %c0_11 = arith.constant 0 : index
    %16 = vector.load %arg1[%c0_9, %c0_10, %c1, %c0_11] : memref<1x3x3x64xf32, #tpu.memory_space<vmem>>, vector<1x2x2x64xf32>
    %17 = vector.shape_cast %16 : vector<1x2x2x64xf32> to vector<2x2x64xf32>
    %18 = vector.extract_strided_slice %0 {offsets = [2, 0], sizes = [1, 64], strides = [1, 1]} : vector<9x64xf32> to vector<1x64xf32>
    %19 = vector.shape_cast %18 : vector<1x64xf32> to vector<1x1x64xf32>
    %20 = vector.broadcast %19 : vector<1x1x64xf32> to vector<2x2x64xf32>
    %21 = arith.mulf %17, %20 : vector<2x2x64xf32>
    %22 = arith.addf %15, %21 : vector<2x2x64xf32>
    %c0_12 = arith.constant 0 : index
    %c0_13 = arith.constant 0 : index
    %c0_14 = arith.constant 0 : index
    %c0_15 = arith.constant 0 : index
    %23 = vector.load %arg3[%c0_12, %c0_13, %c0_14, %c0_15] : memref<1x3x3x64xf32, #tpu.memory_space<vmem>>, vector<1x2x2x64xf32>
    %24 = vector.shape_cast %23 : vector<1x2x2x64xf32> to vector<2x2x64xf32>
    %25 = vector.extract_strided_slice %0 {offsets = [3, 0], sizes = [1, 64], strides = [1, 1]} : vector<9x64xf32> to vector<1x64xf32>
    %26 = vector.shape_cast %25 : vector<1x64xf32> to vector<1x1x64xf32>
    %27 = vector.broadcast %26 : vector<1x1x64xf32> to vector<2x2x64xf32>
    %28 = arith.mulf %24, %27 : vector<2x2x64xf32>
    %29 = arith.addf %22, %28 : vector<2x2x64xf32>
    %c0_16 = arith.constant 0 : index
    %c0_17 = arith.constant 0 : index
    %c0_18 = arith.constant 0 : index
    %c0_19 = arith.constant 0 : index
    %30 = vector.load %arg4[%c0_16, %c0_17, %c0_18, %c0_19] : memref<1x3x3x64xf32, #tpu.memory_space<vmem>>, vector<1x2x2x64xf32>
    %31 = vector.shape_cast %30 : vector<1x2x2x64xf32> to vector<2x2x64xf32>
    %32 = vector.extract_strided_slice %0 {offsets = [4, 0], sizes = [1, 64], strides = [1, 1]} : vector<9x64xf32> to vector<1x64xf32>
    %33 = vector.shape_cast %32 : vector<1x64xf32> to vector<1x1x64xf32>
    %34 = vector.broadcast %33 : vector<1x1x64xf32> to vector<2x2x64xf32>
    %35 = arith.mulf %31, %34 : vector<2x2x64xf32>
    %36 = arith.addf %29, %35 : vector<2x2x64xf32>
    %c0_20 = arith.constant 0 : index
    %c0_21 = arith.constant 0 : index
    %c1_22 = arith.constant 1 : index
    %c0_23 = arith.constant 0 : index
    %37 = vector.load %arg3[%c0_20, %c0_21, %c1_22, %c0_23] : memref<1x3x3x64xf32, #tpu.memory_space<vmem>>, vector<1x2x2x64xf32>
    %38 = vector.shape_cast %37 : vector<1x2x2x64xf32> to vector<2x2x64xf32>
    %39 = vector.extract_strided_slice %0 {offsets = [5, 0], sizes = [1, 64], strides = [1, 1]} : vector<9x64xf32> to vector<1x64xf32>
    %40 = vector.shape_cast %39 : vector<1x64xf32> to vector<1x1x64xf32>
    %41 = vector.broadcast %40 : vector<1x1x64xf32> to vector<2x2x64xf32>
    %42 = arith.mulf %38, %41 : vector<2x2x64xf32>
    %43 = arith.addf %36, %42 : vector<2x2x64xf32>
    %c0_24 = arith.constant 0 : index
    %c1_25 = arith.constant 1 : index
    %c0_26 = arith.constant 0 : index
    %c0_27 = arith.constant 0 : index
    %44 = vector.load %arg1[%c0_24, %c1_25, %c0_26, %c0_27] : memref<1x3x3x64xf32, #tpu.memory_space<vmem>>, vector<1x2x2x64xf32>
    %45 = vector.shape_cast %44 : vector<1x2x2x64xf32> to vector<2x2x64xf32>
    %46 = vector.extract_strided_slice %0 {offsets = [6, 0], sizes = [1, 64], strides = [1, 1]} : vector<9x64xf32> to vector<1x64xf32>
    %47 = vector.shape_cast %46 : vector<1x64xf32> to vector<1x1x64xf32>
    %48 = vector.broadcast %47 : vector<1x1x64xf32> to vector<2x2x64xf32>
    %49 = arith.mulf %45, %48 : vector<2x2x64xf32>
    %50 = arith.addf %43, %49 : vector<2x2x64xf32>
    %c0_28 = arith.constant 0 : index
    %c1_29 = arith.constant 1 : index
    %c0_30 = arith.constant 0 : index
    %c0_31 = arith.constant 0 : index
    %51 = vector.load %arg2[%c0_28, %c1_29, %c0_30, %c0_31] : memref<1x3x3x64xf32, #tpu.memory_space<vmem>>, vector<1x2x2x64xf32>
    %52 = vector.shape_cast %51 : vector<1x2x2x64xf32> to vector<2x2x64xf32>
    %53 = vector.extract_strided_slice %0 {offsets = [7, 0], sizes = [1, 64], strides = [1, 1]} : vector<9x64xf32> to vector<1x64xf32>
    %54 = vector.shape_cast %53 : vector<1x64xf32> to vector<1x1x64xf32>
    %55 = vector.broadcast %54 : vector<1x1x64xf32> to vector<2x2x64xf32>
    %56 = arith.mulf %52, %55 : vector<2x2x64xf32>
    %57 = arith.addf %50, %56 : vector<2x2x64xf32>
    %c0_32 = arith.constant 0 : index
    %c1_33 = arith.constant 1 : index
    %c1_34 = arith.constant 1 : index
    %c0_35 = arith.constant 0 : index
    %58 = vector.load %arg1[%c0_32, %c1_33, %c1_34, %c0_35] : memref<1x3x3x64xf32, #tpu.memory_space<vmem>>, vector<1x2x2x64xf32>
    %59 = vector.shape_cast %58 : vector<1x2x2x64xf32> to vector<2x2x64xf32>
    %60 = vector.extract_strided_slice %0 {offsets = [8, 0], sizes = [1, 64], strides = [1, 1]} : vector<9x64xf32> to vector<1x64xf32>
    %61 = vector.shape_cast %60 : vector<1x64xf32> to vector<1x1x64xf32>
    %62 = vector.broadcast %61 : vector<1x1x64xf32> to vector<2x2x64xf32>
    %63 = arith.mulf %59, %62 : vector<2x2x64xf32>
    %64 = arith.addf %57, %63 : vector<2x2x64xf32>
    %c0_36 = arith.constant 0 : index
    %c0_37 = arith.constant 0 : index
    %65 = vector.load %arg6[%c0_36, %c0_37] : memref<1x64xf32, #tpu.memory_space<vmem>>, vector<1x64xf32>
    %66 = vector.shape_cast %65 : vector<1x64xf32> to vector<1x1x64xf32>
    %67 = vector.broadcast %66 : vector<1x1x64xf32> to vector<2x2x64xf32>
    %68 = arith.mulf %64, %67 : vector<2x2x64xf32>
    %c0_38 = arith.constant 0 : index
    %c0_39 = arith.constant 0 : index
    %69 = vector.load %arg7[%c0_38, %c0_39] : memref<1x64xf32, #tpu.memory_space<vmem>>, vector<1x64xf32>
    %70 = vector.shape_cast %69 : vector<1x64xf32> to vector<1x1x64xf32>
    %71 = vector.broadcast %70 : vector<1x1x64xf32> to vector<2x2x64xf32>
    %72 = arith.addf %68, %71 : vector<2x2x64xf32>
    %cst_40 = arith.constant 0.000000e+00 : f32
    %73 = vector.broadcast %cst_40 : f32 to vector<2x2x64xf32>
    %74 = arith.maximumf %72, %73 : vector<2x2x64xf32>
    %75 = vector.shape_cast %74 : vector<2x2x64xf32> to vector<4x64xf32>
    %76 = arith.truncf %75 : vector<4x64xf32> to vector<4x64xbf16>
    %c0_41 = arith.constant 0 : index
    %c0_42 = arith.constant 0 : index
    %77 = vector.load %arg8[%c0_41, %c0_42] : memref<64x128xbf16, #tpu.memory_space<vmem>>, vector<64x128xbf16>
    %cst_43 = arith.constant dense<0.000000e+00> : vector<4x128xf32>
    %78 = tpu.matmul %76, %77, %cst_43 {dimension_numbers = #tpu.dot_dimension_numbers<[1], [0], [0], [1], [0, 0, 1, 1], [], []>} : vector<4x64xbf16>, vector<64x128xbf16>, vector<4x128xf32> -> vector<4x128xf32>
    %c0_44 = arith.constant 0 : index
    %c0_45 = arith.constant 0 : index
    %79 = vector.load %arg9[%c0_44, %c0_45] : memref<1x128xf32, #tpu.memory_space<vmem>>, vector<1x128xf32>
    %80 = vector.broadcast %79 : vector<1x128xf32> to vector<4x128xf32>
    %81 = arith.mulf %78, %80 : vector<4x128xf32>
    %c0_46 = arith.constant 0 : index
    %c0_47 = arith.constant 0 : index
    %82 = vector.load %arg10[%c0_46, %c0_47] : memref<1x128xf32, #tpu.memory_space<vmem>>, vector<1x128xf32>
    %83 = vector.broadcast %82 : vector<1x128xf32> to vector<4x128xf32>
    %84 = arith.addf %81, %83 : vector<4x128xf32>
    %cst_48 = arith.constant 0.000000e+00 : f32
    %85 = vector.broadcast %cst_48 : f32 to vector<4x128xf32>
    %86 = arith.maximumf %84, %85 : vector<4x128xf32>
    %c0_49 = arith.constant 0 : index
    %c0_50 = arith.constant 0 : index
    %c0_51 = arith.constant 0 : index
    %87 = vector.load %arg11[%c0_49, %c0_50, %c0_51] : memref<1x4x128xf32, #tpu.memory_space<vmem>>, vector<1x4x128xf32>
    %88 = vector.shape_cast %87 : vector<1x4x128xf32> to vector<4x128xf32>
    %89 = vector.shape_cast %86 : vector<4x128xf32> to vector<1x4x128xf32>
    tpu.vector_store %arg11[%c0_49, %c0_50, %c0_51], %89 {strides = array<i32>} : memref<1x4x128xf32, #tpu.memory_space<vmem>>, vector<1x4x128xf32>,
    return
  }
  func.func @transform_0(%arg0: i32) -> (i32, i32, i32, i32) {
    %c0_i32 = arith.constant 0 : i32
    %c0_i32_0 = arith.constant 0 : i32
    %c0_i32_1 = arith.constant 0 : i32
    %c0_i32_2 = arith.constant 0 : i32
    return %arg0, %c0_i32, %c0_i32_0, %c0_i32_1 : i32, i32, i32, i32
  }
  func.func @transform_1(%arg0: i32) -> (i32, i32, i32, i32) {
    %c0_i32 = arith.constant 0 : i32
    %c0_i32_0 = arith.constant 0 : i32
    %c0_i32_1 = arith.constant 0 : i32
    %c0_i32_2 = arith.constant 0 : i32
    return %arg0, %c0_i32, %c0_i32_0, %c0_i32_1 : i32, i32, i32, i32
  }
  func.func @transform_2(%arg0: i32) -> (i32, i32, i32, i32) {
    %c0_i32 = arith.constant 0 : i32
    %c0_i32_0 = arith.constant 0 : i32
    %c0_i32_1 = arith.constant 0 : i32
    %c0_i32_2 = arith.constant 0 : i32
    return %arg0, %c0_i32, %c0_i32_0, %c0_i32_1 : i32, i32, i32, i32
  }
  func.func @transform_3(%arg0: i32) -> (i32, i32, i32, i32) {
    %c0_i32 = arith.constant 0 : i32
    %c0_i32_0 = arith.constant 0 : i32
    %c0_i32_1 = arith.constant 0 : i32
    %c0_i32_2 = arith.constant 0 : i32
    return %arg0, %c0_i32, %c0_i32_0, %c0_i32_1 : i32, i32, i32, i32
  }
  func.func @transform_4(%arg0: i32) -> (i32, i32) {
    %c0_i32 = arith.constant 0 : i32
    %c0_i32_0 = arith.constant 0 : i32
    %c0_i32_1 = arith.constant 0 : i32
    return %c0_i32, %c0_i32_0 : i32, i32
  }
  func.func @transform_5(%arg0: i32) -> (i32, i32) {
    %c0_i32 = arith.constant 0 : i32
    %c0_i32_0 = arith.constant 0 : i32
    %c0_i32_1 = arith.constant 0 : i32
    return %c0_i32, %c0_i32_0 : i32, i32
  }
  func.func @transform_6(%arg0: i32) -> (i32, i32) {
    %c0_i32 = arith.constant 0 : i32
    %c0_i32_0 = arith.constant 0 : i32
    %c0_i32_1 = arith.constant 0 : i32
    return %c0_i32, %c0_i32_0 : i32, i32
  }
  func.func @transform_7(%arg0: i32) -> (i32, i32) {
    %c0_i32 = arith.constant 0 : i32
    %c0_i32_0 = arith.constant 0 : i32
    %c0_i32_1 = arith.constant 0 : i32
    return %c0_i32, %c0_i32_0 : i32, i32
  }
  func.func @transform_8(%arg0: i32) -> (i32, i32) {
    %c0_i32 = arith.constant 0 : i32
    %c0_i32_0 = arith.constant 0 : i32
    %c0_i32_1 = arith.constant 0 : i32
    return %c0_i32, %c0_i32_0 : i32, i32
  }
  func.func @transform_9(%arg0: i32) -> (i32, i32) {
    %c0_i32 = arith.constant 0 : i32
    %c0_i32_0 = arith.constant 0 : i32
    %c0_i32_1 = arith.constant 0 : i32
    return %c0_i32, %c0_i32_0 : i32, i32
  }
  func.func @transform_10(%arg0: i32) -> (i32, i32, i32) {
    %c0_i32 = arith.constant 0 : i32
    %c0_i32_0 = arith.constant 0 : i32
    %c0_i32_1 = arith.constant 0 : i32
    return %arg0, %c0_i32, %c0_i32_0 : i32, i32, i32
  }
}

module attributes {stable_mosaic.version = 11 : i64} {
  func.func @kernel(%arg0: i32, %arg1: memref<1x4x4x128xf32, #tpu.memory_space<vmem>>, %arg2: memref<9x128xf32, #tpu.memory_space<vmem>>, %arg3: memref<1x128xf32, #tpu.memory_space<vmem>>, %arg4: memref<1x128xf32, #tpu.memory_space<vmem>>, %arg5: memref<128x128xbf16, #tpu.memory_space<vmem>>, %arg6: memref<1x128xf32, #tpu.memory_space<vmem>>, %arg7: memref<1x128xf32, #tpu.memory_space<vmem>>, %arg8: memref<1x4x128xf32, #tpu.memory_space<vmem>>) attributes {dimension_semantics = [#tpu.dimension_semantics<parallel>], iteration_bounds = array<i64: 2>, scalar_prefetch = 0 : i64, scratch_operands = 0 : i64, tpu.core_type = #tpu.core_type<tc>, window_params = [{transform_indices = @transform_0, window_bounds = array<i64: 1, 4, 4, 128>}, {pipeline_mode = #tpu.pipeline_mode<synchronous>, transform_indices = @transform_1, window_bounds = array<i64: 9, 128>}, {pipeline_mode = #tpu.pipeline_mode<synchronous>, transform_indices = @transform_2, window_bounds = array<i64: 1, 128>}, {pipeline_mode = #tpu.pipeline_mode<synchronous>, transform_indices = @transform_3, window_bounds = array<i64: 1, 128>}, {pipeline_mode = #tpu.pipeline_mode<synchronous>, transform_indices = @transform_4, window_bounds = array<i64: 128, 128>}, {pipeline_mode = #tpu.pipeline_mode<synchronous>, transform_indices = @transform_5, window_bounds = array<i64: 1, 128>}, {pipeline_mode = #tpu.pipeline_mode<synchronous>, transform_indices = @transform_6, window_bounds = array<i64: 1, 128>}, {transform_indices = @transform_7, window_bounds = array<i64: 1, 4, 128>}]} {
    %c0 = arith.constant 0 : index
    %c0_0 = arith.constant 0 : index
    %0 = vector.load %arg2[%c0, %c0_0] : memref<9x128xf32, #tpu.memory_space<vmem>>, vector<9x128xf32>
    %cst = arith.constant 0.000000e+00 : f32
    %1 = vector.broadcast %cst : f32 to vector<2x2x128xf32>
    %c0_1 = arith.constant 0 : index
    %c0_2 = arith.constant 0 : index
    %c0_3 = arith.constant 0 : index
    %c0_4 = arith.constant 0 : index
    %2 = vector.load %arg1[%c0_1, %c0_2, %c0_3, %c0_4] : memref<1x4x4x128xf32, #tpu.memory_space<vmem>>, vector<1x2x2x128xf32>
    %3 = vector.shape_cast %2 : vector<1x2x2x128xf32> to vector<2x2x128xf32>
    %4 = vector.extract_strided_slice %0 {offsets = [0, 0], sizes = [1, 128], strides = [1, 1]} : vector<9x128xf32> to vector<1x128xf32>
    %5 = vector.shape_cast %4 : vector<1x128xf32> to vector<1x1x128xf32>
    %6 = vector.broadcast %5 : vector<1x1x128xf32> to vector<2x2x128xf32>
    %7 = arith.mulf %3, %6 : vector<2x2x128xf32>
    %8 = arith.addf %1, %7 : vector<2x2x128xf32>
    %c0_5 = arith.constant 0 : index
    %c0_6 = arith.constant 0 : index
    %c1 = arith.constant 1 : index
    %c0_7 = arith.constant 0 : index
    %9 = vector.load %arg1[%c0_5, %c0_6, %c1, %c0_7] : memref<1x4x4x128xf32, #tpu.memory_space<vmem>>, vector<1x2x2x128xf32>
    %10 = vector.shape_cast %9 : vector<1x2x2x128xf32> to vector<2x2x128xf32>
    %11 = vector.extract_strided_slice %0 {offsets = [1, 0], sizes = [1, 128], strides = [1, 1]} : vector<9x128xf32> to vector<1x128xf32>
    %12 = vector.shape_cast %11 : vector<1x128xf32> to vector<1x1x128xf32>
    %13 = vector.broadcast %12 : vector<1x1x128xf32> to vector<2x2x128xf32>
    %14 = arith.mulf %10, %13 : vector<2x2x128xf32>
    %15 = arith.addf %8, %14 : vector<2x2x128xf32>
    %c0_8 = arith.constant 0 : index
    %c0_9 = arith.constant 0 : index
    %c2 = arith.constant 2 : index
    %c0_10 = arith.constant 0 : index
    %16 = vector.load %arg1[%c0_8, %c0_9, %c2, %c0_10] : memref<1x4x4x128xf32, #tpu.memory_space<vmem>>, vector<1x2x2x128xf32>
    %17 = vector.shape_cast %16 : vector<1x2x2x128xf32> to vector<2x2x128xf32>
    %18 = vector.extract_strided_slice %0 {offsets = [2, 0], sizes = [1, 128], strides = [1, 1]} : vector<9x128xf32> to vector<1x128xf32>
    %19 = vector.shape_cast %18 : vector<1x128xf32> to vector<1x1x128xf32>
    %20 = vector.broadcast %19 : vector<1x1x128xf32> to vector<2x2x128xf32>
    %21 = arith.mulf %17, %20 : vector<2x2x128xf32>
    %22 = arith.addf %15, %21 : vector<2x2x128xf32>
    %c0_11 = arith.constant 0 : index
    %c1_12 = arith.constant 1 : index
    %c0_13 = arith.constant 0 : index
    %c0_14 = arith.constant 0 : index
    %23 = vector.load %arg1[%c0_11, %c1_12, %c0_13, %c0_14] : memref<1x4x4x128xf32, #tpu.memory_space<vmem>>, vector<1x2x2x128xf32>
    %24 = vector.shape_cast %23 : vector<1x2x2x128xf32> to vector<2x2x128xf32>
    %25 = vector.extract_strided_slice %0 {offsets = [3, 0], sizes = [1, 128], strides = [1, 1]} : vector<9x128xf32> to vector<1x128xf32>
    %26 = vector.shape_cast %25 : vector<1x128xf32> to vector<1x1x128xf32>
    %27 = vector.broadcast %26 : vector<1x1x128xf32> to vector<2x2x128xf32>
    %28 = arith.mulf %24, %27 : vector<2x2x128xf32>
    %29 = arith.addf %22, %28 : vector<2x2x128xf32>
    %c0_15 = arith.constant 0 : index
    %c1_16 = arith.constant 1 : index
    %c1_17 = arith.constant 1 : index
    %c0_18 = arith.constant 0 : index
    %30 = vector.load %arg1[%c0_15, %c1_16, %c1_17, %c0_18] : memref<1x4x4x128xf32, #tpu.memory_space<vmem>>, vector<1x2x2x128xf32>
    %31 = vector.shape_cast %30 : vector<1x2x2x128xf32> to vector<2x2x128xf32>
    %32 = vector.extract_strided_slice %0 {offsets = [4, 0], sizes = [1, 128], strides = [1, 1]} : vector<9x128xf32> to vector<1x128xf32>
    %33 = vector.shape_cast %32 : vector<1x128xf32> to vector<1x1x128xf32>
    %34 = vector.broadcast %33 : vector<1x1x128xf32> to vector<2x2x128xf32>
    %35 = arith.mulf %31, %34 : vector<2x2x128xf32>
    %36 = arith.addf %29, %35 : vector<2x2x128xf32>
    %c0_19 = arith.constant 0 : index
    %c1_20 = arith.constant 1 : index
    %c2_21 = arith.constant 2 : index
    %c0_22 = arith.constant 0 : index
    %37 = vector.load %arg1[%c0_19, %c1_20, %c2_21, %c0_22] : memref<1x4x4x128xf32, #tpu.memory_space<vmem>>, vector<1x2x2x128xf32>
    %38 = vector.shape_cast %37 : vector<1x2x2x128xf32> to vector<2x2x128xf32>
    %39 = vector.extract_strided_slice %0 {offsets = [5, 0], sizes = [1, 128], strides = [1, 1]} : vector<9x128xf32> to vector<1x128xf32>
    %40 = vector.shape_cast %39 : vector<1x128xf32> to vector<1x1x128xf32>
    %41 = vector.broadcast %40 : vector<1x1x128xf32> to vector<2x2x128xf32>
    %42 = arith.mulf %38, %41 : vector<2x2x128xf32>
    %43 = arith.addf %36, %42 : vector<2x2x128xf32>
    %c0_23 = arith.constant 0 : index
    %c2_24 = arith.constant 2 : index
    %c0_25 = arith.constant 0 : index
    %c0_26 = arith.constant 0 : index
    %44 = vector.load %arg1[%c0_23, %c2_24, %c0_25, %c0_26] : memref<1x4x4x128xf32, #tpu.memory_space<vmem>>, vector<1x2x2x128xf32>
    %45 = vector.shape_cast %44 : vector<1x2x2x128xf32> to vector<2x2x128xf32>
    %46 = vector.extract_strided_slice %0 {offsets = [6, 0], sizes = [1, 128], strides = [1, 1]} : vector<9x128xf32> to vector<1x128xf32>
    %47 = vector.shape_cast %46 : vector<1x128xf32> to vector<1x1x128xf32>
    %48 = vector.broadcast %47 : vector<1x1x128xf32> to vector<2x2x128xf32>
    %49 = arith.mulf %45, %48 : vector<2x2x128xf32>
    %50 = arith.addf %43, %49 : vector<2x2x128xf32>
    %c0_27 = arith.constant 0 : index
    %c2_28 = arith.constant 2 : index
    %c1_29 = arith.constant 1 : index
    %c0_30 = arith.constant 0 : index
    %51 = vector.load %arg1[%c0_27, %c2_28, %c1_29, %c0_30] : memref<1x4x4x128xf32, #tpu.memory_space<vmem>>, vector<1x2x2x128xf32>
    %52 = vector.shape_cast %51 : vector<1x2x2x128xf32> to vector<2x2x128xf32>
    %53 = vector.extract_strided_slice %0 {offsets = [7, 0], sizes = [1, 128], strides = [1, 1]} : vector<9x128xf32> to vector<1x128xf32>
    %54 = vector.shape_cast %53 : vector<1x128xf32> to vector<1x1x128xf32>
    %55 = vector.broadcast %54 : vector<1x1x128xf32> to vector<2x2x128xf32>
    %56 = arith.mulf %52, %55 : vector<2x2x128xf32>
    %57 = arith.addf %50, %56 : vector<2x2x128xf32>
    %c0_31 = arith.constant 0 : index
    %c2_32 = arith.constant 2 : index
    %c2_33 = arith.constant 2 : index
    %c0_34 = arith.constant 0 : index
    %58 = vector.load %arg1[%c0_31, %c2_32, %c2_33, %c0_34] : memref<1x4x4x128xf32, #tpu.memory_space<vmem>>, vector<1x2x2x128xf32>
    %59 = vector.shape_cast %58 : vector<1x2x2x128xf32> to vector<2x2x128xf32>
    %60 = vector.extract_strided_slice %0 {offsets = [8, 0], sizes = [1, 128], strides = [1, 1]} : vector<9x128xf32> to vector<1x128xf32>
    %61 = vector.shape_cast %60 : vector<1x128xf32> to vector<1x1x128xf32>
    %62 = vector.broadcast %61 : vector<1x1x128xf32> to vector<2x2x128xf32>
    %63 = arith.mulf %59, %62 : vector<2x2x128xf32>
    %64 = arith.addf %57, %63 : vector<2x2x128xf32>
    %c0_35 = arith.constant 0 : index
    %c0_36 = arith.constant 0 : index
    %65 = vector.load %arg3[%c0_35, %c0_36] : memref<1x128xf32, #tpu.memory_space<vmem>>, vector<1x128xf32>
    %66 = vector.shape_cast %65 : vector<1x128xf32> to vector<1x1x128xf32>
    %67 = vector.broadcast %66 : vector<1x1x128xf32> to vector<2x2x128xf32>
    %68 = arith.mulf %64, %67 : vector<2x2x128xf32>
    %c0_37 = arith.constant 0 : index
    %c0_38 = arith.constant 0 : index
    %69 = vector.load %arg4[%c0_37, %c0_38] : memref<1x128xf32, #tpu.memory_space<vmem>>, vector<1x128xf32>
    %70 = vector.shape_cast %69 : vector<1x128xf32> to vector<1x1x128xf32>
    %71 = vector.broadcast %70 : vector<1x1x128xf32> to vector<2x2x128xf32>
    %72 = arith.addf %68, %71 : vector<2x2x128xf32>
    %cst_39 = arith.constant 0.000000e+00 : f32
    %73 = vector.broadcast %cst_39 : f32 to vector<2x2x128xf32>
    %74 = arith.maximumf %72, %73 : vector<2x2x128xf32>
    %75 = vector.shape_cast %74 : vector<2x2x128xf32> to vector<4x128xf32>
    %76 = arith.truncf %75 : vector<4x128xf32> to vector<4x128xbf16>
    %c0_40 = arith.constant 0 : index
    %c0_41 = arith.constant 0 : index
    %77 = vector.load %arg5[%c0_40, %c0_41] : memref<128x128xbf16, #tpu.memory_space<vmem>>, vector<128x128xbf16>
    %cst_42 = arith.constant dense<0.000000e+00> : vector<4x128xf32>
    %78 = tpu.matmul %76, %77, %cst_42 {dimension_numbers = #tpu.dot_dimension_numbers<[1], [0], [0], [1], [0, 0, 1, 1], [], []>} : vector<4x128xbf16>, vector<128x128xbf16>, vector<4x128xf32> -> vector<4x128xf32>
    %c0_43 = arith.constant 0 : index
    %c0_44 = arith.constant 0 : index
    %79 = vector.load %arg6[%c0_43, %c0_44] : memref<1x128xf32, #tpu.memory_space<vmem>>, vector<1x128xf32>
    %80 = vector.broadcast %79 : vector<1x128xf32> to vector<4x128xf32>
    %81 = arith.mulf %78, %80 : vector<4x128xf32>
    %c0_45 = arith.constant 0 : index
    %c0_46 = arith.constant 0 : index
    %82 = vector.load %arg7[%c0_45, %c0_46] : memref<1x128xf32, #tpu.memory_space<vmem>>, vector<1x128xf32>
    %83 = vector.broadcast %82 : vector<1x128xf32> to vector<4x128xf32>
    %84 = arith.addf %81, %83 : vector<4x128xf32>
    %cst_47 = arith.constant 0.000000e+00 : f32
    %85 = vector.broadcast %cst_47 : f32 to vector<4x128xf32>
    %86 = arith.maximumf %84, %85 : vector<4x128xf32>
    %c0_48 = arith.constant 0 : index
    %c0_49 = arith.constant 0 : index
    %c0_50 = arith.constant 0 : index
    %87 = vector.load %arg8[%c0_48, %c0_49, %c0_50] : memref<1x4x128xf32, #tpu.memory_space<vmem>>, vector<1x4x128xf32>
    %88 = vector.shape_cast %87 : vector<1x4x128xf32> to vector<4x128xf32>
    %89 = vector.shape_cast %86 : vector<4x128xf32> to vector<1x4x128xf32>
    tpu.vector_store %arg8[%c0_48, %c0_49, %c0_50], %89 {strides = array<i32>} : memref<1x4x128xf32, #tpu.memory_space<vmem>>, vector<1x4x128xf32>,
    return
  }
  func.func @transform_0(%arg0: i32) -> (i32, i32, i32, i32) {
    %c0_i32 = arith.constant 0 : i32
    %c0_i32_0 = arith.constant 0 : i32
    %c0_i32_1 = arith.constant 0 : i32
    %c0_i32_2 = arith.constant 0 : i32
    return %arg0, %c0_i32, %c0_i32_0, %c0_i32_1 : i32, i32, i32, i32
  }
  func.func @transform_1(%arg0: i32) -> (i32, i32) {
    %c0_i32 = arith.constant 0 : i32
    %c0_i32_0 = arith.constant 0 : i32
    %c0_i32_1 = arith.constant 0 : i32
    return %c0_i32, %c0_i32_0 : i32, i32
  }
  func.func @transform_2(%arg0: i32) -> (i32, i32) {
    %c0_i32 = arith.constant 0 : i32
    %c0_i32_0 = arith.constant 0 : i32
    %c0_i32_1 = arith.constant 0 : i32
    return %c0_i32, %c0_i32_0 : i32, i32
  }
  func.func @transform_3(%arg0: i32) -> (i32, i32) {
    %c0_i32 = arith.constant 0 : i32
    %c0_i32_0 = arith.constant 0 : i32
    %c0_i32_1 = arith.constant 0 : i32
    return %c0_i32, %c0_i32_0 : i32, i32
  }
  func.func @transform_4(%arg0: i32) -> (i32, i32) {
    %c0_i32 = arith.constant 0 : i32
    %c0_i32_0 = arith.constant 0 : i32
    %c0_i32_1 = arith.constant 0 : i32
    return %c0_i32, %c0_i32_0 : i32, i32
  }
  func.func @transform_5(%arg0: i32) -> (i32, i32) {
    %c0_i32 = arith.constant 0 : i32
    %c0_i32_0 = arith.constant 0 : i32
    %c0_i32_1 = arith.constant 0 : i32
    return %c0_i32, %c0_i32_0 : i32, i32
  }
  func.func @transform_6(%arg0: i32) -> (i32, i32) {
    %c0_i32 = arith.constant 0 : i32
    %c0_i32_0 = arith.constant 0 : i32
    %c0_i32_1 = arith.constant 0 : i32
    return %c0_i32, %c0_i32_0 : i32, i32
  }
  func.func @transform_7(%arg0: i32) -> (i32, i32, i32) {
    %c0_i32 = arith.constant 0 : i32
    %c0_i32_0 = arith.constant 0 : i32
    %c0_i32_1 = arith.constant 0 : i32
    return %arg0, %c0_i32, %c0_i32_0 : i32, i32, i32
  }
}

module attributes {stable_mosaic.version = 11 : i64} {
  func.func @kernel(%arg0: i32, %arg1: memref<1x2x2x128xf32, #tpu.memory_space<vmem>>, %arg2: memref<1x2x2x128xf32, #tpu.memory_space<vmem>>, %arg3: memref<1x2x2x128xf32, #tpu.memory_space<vmem>>, %arg4: memref<1x2x2x128xf32, #tpu.memory_space<vmem>>, %arg5: memref<9x128xf32, #tpu.memory_space<vmem>>, %arg6: memref<1x128xf32, #tpu.memory_space<vmem>>, %arg7: memref<1x128xf32, #tpu.memory_space<vmem>>, %arg8: memref<128x256xbf16, #tpu.memory_space<vmem>>, %arg9: memref<1x256xf32, #tpu.memory_space<vmem>>, %arg10: memref<1x256xf32, #tpu.memory_space<vmem>>, %arg11: memref<1x1x256xf32, #tpu.memory_space<vmem>>) attributes {dimension_semantics = [#tpu.dimension_semantics<parallel>], iteration_bounds = array<i64: 2>, scalar_prefetch = 0 : i64, scratch_operands = 0 : i64, tpu.core_type = #tpu.core_type<tc>, window_params = [{transform_indices = @transform_0, window_bounds = array<i64: 1, 2, 2, 128>}, {transform_indices = @transform_1, window_bounds = array<i64: 1, 2, 2, 128>}, {transform_indices = @transform_2, window_bounds = array<i64: 1, 2, 2, 128>}, {transform_indices = @transform_3, window_bounds = array<i64: 1, 2, 2, 128>}, {pipeline_mode = #tpu.pipeline_mode<synchronous>, transform_indices = @transform_4, window_bounds = array<i64: 9, 128>}, {pipeline_mode = #tpu.pipeline_mode<synchronous>, transform_indices = @transform_5, window_bounds = array<i64: 1, 128>}, {pipeline_mode = #tpu.pipeline_mode<synchronous>, transform_indices = @transform_6, window_bounds = array<i64: 1, 128>}, {pipeline_mode = #tpu.pipeline_mode<synchronous>, transform_indices = @transform_7, window_bounds = array<i64: 128, 256>}, {pipeline_mode = #tpu.pipeline_mode<synchronous>, transform_indices = @transform_8, window_bounds = array<i64: 1, 256>}, {pipeline_mode = #tpu.pipeline_mode<synchronous>, transform_indices = @transform_9, window_bounds = array<i64: 1, 256>}, {transform_indices = @transform_10, window_bounds = array<i64: 1, 1, 256>}]} {
    %c0 = arith.constant 0 : index
    %c0_0 = arith.constant 0 : index
    %0 = vector.load %arg5[%c0, %c0_0] : memref<9x128xf32, #tpu.memory_space<vmem>>, vector<9x128xf32>
    %cst = arith.constant 0.000000e+00 : f32
    %1 = vector.broadcast %cst : f32 to vector<1x1x128xf32>
    %c0_1 = arith.constant 0 : index
    %c0_2 = arith.constant 0 : index
    %c0_3 = arith.constant 0 : index
    %c0_4 = arith.constant 0 : index
    %2 = vector.load %arg1[%c0_1, %c0_2, %c0_3, %c0_4] : memref<1x2x2x128xf32, #tpu.memory_space<vmem>>, vector<1x1x1x128xf32>
    %3 = vector.shape_cast %2 : vector<1x1x1x128xf32> to vector<1x1x128xf32>
    %4 = vector.extract_strided_slice %0 {offsets = [0, 0], sizes = [1, 128], strides = [1, 1]} : vector<9x128xf32> to vector<1x128xf32>
    %5 = vector.shape_cast %4 : vector<1x128xf32> to vector<1x1x128xf32>
    %6 = arith.mulf %3, %5 : vector<1x1x128xf32>
    %7 = arith.addf %1, %6 : vector<1x1x128xf32>
    %c0_5 = arith.constant 0 : index
    %c0_6 = arith.constant 0 : index
    %c0_7 = arith.constant 0 : index
    %c0_8 = arith.constant 0 : index
    %8 = vector.load %arg2[%c0_5, %c0_6, %c0_7, %c0_8] : memref<1x2x2x128xf32, #tpu.memory_space<vmem>>, vector<1x1x1x128xf32>
    %9 = vector.shape_cast %8 : vector<1x1x1x128xf32> to vector<1x1x128xf32>
    %10 = vector.extract_strided_slice %0 {offsets = [1, 0], sizes = [1, 128], strides = [1, 1]} : vector<9x128xf32> to vector<1x128xf32>
    %11 = vector.shape_cast %10 : vector<1x128xf32> to vector<1x1x128xf32>
    %12 = arith.mulf %9, %11 : vector<1x1x128xf32>
    %13 = arith.addf %7, %12 : vector<1x1x128xf32>
    %c0_9 = arith.constant 0 : index
    %c0_10 = arith.constant 0 : index
    %c1 = arith.constant 1 : index
    %c0_11 = arith.constant 0 : index
    %14 = vector.load %arg1[%c0_9, %c0_10, %c1, %c0_11] : memref<1x2x2x128xf32, #tpu.memory_space<vmem>>, vector<1x1x1x128xf32>
    %15 = vector.shape_cast %14 : vector<1x1x1x128xf32> to vector<1x1x128xf32>
    %16 = vector.extract_strided_slice %0 {offsets = [2, 0], sizes = [1, 128], strides = [1, 1]} : vector<9x128xf32> to vector<1x128xf32>
    %17 = vector.shape_cast %16 : vector<1x128xf32> to vector<1x1x128xf32>
    %18 = arith.mulf %15, %17 : vector<1x1x128xf32>
    %19 = arith.addf %13, %18 : vector<1x1x128xf32>
    %c0_12 = arith.constant 0 : index
    %c0_13 = arith.constant 0 : index
    %c0_14 = arith.constant 0 : index
    %c0_15 = arith.constant 0 : index
    %20 = vector.load %arg3[%c0_12, %c0_13, %c0_14, %c0_15] : memref<1x2x2x128xf32, #tpu.memory_space<vmem>>, vector<1x1x1x128xf32>
    %21 = vector.shape_cast %20 : vector<1x1x1x128xf32> to vector<1x1x128xf32>
    %22 = vector.extract_strided_slice %0 {offsets = [3, 0], sizes = [1, 128], strides = [1, 1]} : vector<9x128xf32> to vector<1x128xf32>
    %23 = vector.shape_cast %22 : vector<1x128xf32> to vector<1x1x128xf32>
    %24 = arith.mulf %21, %23 : vector<1x1x128xf32>
    %25 = arith.addf %19, %24 : vector<1x1x128xf32>
    %c0_16 = arith.constant 0 : index
    %c0_17 = arith.constant 0 : index
    %c0_18 = arith.constant 0 : index
    %c0_19 = arith.constant 0 : index
    %26 = vector.load %arg4[%c0_16, %c0_17, %c0_18, %c0_19] : memref<1x2x2x128xf32, #tpu.memory_space<vmem>>, vector<1x1x1x128xf32>
    %27 = vector.shape_cast %26 : vector<1x1x1x128xf32> to vector<1x1x128xf32>
    %28 = vector.extract_strided_slice %0 {offsets = [4, 0], sizes = [1, 128], strides = [1, 1]} : vector<9x128xf32> to vector<1x128xf32>
    %29 = vector.shape_cast %28 : vector<1x128xf32> to vector<1x1x128xf32>
    %30 = arith.mulf %27, %29 : vector<1x1x128xf32>
    %31 = arith.addf %25, %30 : vector<1x1x128xf32>
    %c0_20 = arith.constant 0 : index
    %c0_21 = arith.constant 0 : index
    %c1_22 = arith.constant 1 : index
    %c0_23 = arith.constant 0 : index
    %32 = vector.load %arg3[%c0_20, %c0_21, %c1_22, %c0_23] : memref<1x2x2x128xf32, #tpu.memory_space<vmem>>, vector<1x1x1x128xf32>
    %33 = vector.shape_cast %32 : vector<1x1x1x128xf32> to vector<1x1x128xf32>
    %34 = vector.extract_strided_slice %0 {offsets = [5, 0], sizes = [1, 128], strides = [1, 1]} : vector<9x128xf32> to vector<1x128xf32>
    %35 = vector.shape_cast %34 : vector<1x128xf32> to vector<1x1x128xf32>
    %36 = arith.mulf %33, %35 : vector<1x1x128xf32>
    %37 = arith.addf %31, %36 : vector<1x1x128xf32>
    %c0_24 = arith.constant 0 : index
    %c1_25 = arith.constant 1 : index
    %c0_26 = arith.constant 0 : index
    %c0_27 = arith.constant 0 : index
    %38 = vector.load %arg1[%c0_24, %c1_25, %c0_26, %c0_27] : memref<1x2x2x128xf32, #tpu.memory_space<vmem>>, vector<1x1x1x128xf32>
    %39 = vector.shape_cast %38 : vector<1x1x1x128xf32> to vector<1x1x128xf32>
    %40 = vector.extract_strided_slice %0 {offsets = [6, 0], sizes = [1, 128], strides = [1, 1]} : vector<9x128xf32> to vector<1x128xf32>
    %41 = vector.shape_cast %40 : vector<1x128xf32> to vector<1x1x128xf32>
    %42 = arith.mulf %39, %41 : vector<1x1x128xf32>
    %43 = arith.addf %37, %42 : vector<1x1x128xf32>
    %c0_28 = arith.constant 0 : index
    %c1_29 = arith.constant 1 : index
    %c0_30 = arith.constant 0 : index
    %c0_31 = arith.constant 0 : index
    %44 = vector.load %arg2[%c0_28, %c1_29, %c0_30, %c0_31] : memref<1x2x2x128xf32, #tpu.memory_space<vmem>>, vector<1x1x1x128xf32>
    %45 = vector.shape_cast %44 : vector<1x1x1x128xf32> to vector<1x1x128xf32>
    %46 = vector.extract_strided_slice %0 {offsets = [7, 0], sizes = [1, 128], strides = [1, 1]} : vector<9x128xf32> to vector<1x128xf32>
    %47 = vector.shape_cast %46 : vector<1x128xf32> to vector<1x1x128xf32>
    %48 = arith.mulf %45, %47 : vector<1x1x128xf32>
    %49 = arith.addf %43, %48 : vector<1x1x128xf32>
    %c0_32 = arith.constant 0 : index
    %c1_33 = arith.constant 1 : index
    %c1_34 = arith.constant 1 : index
    %c0_35 = arith.constant 0 : index
    %50 = vector.load %arg1[%c0_32, %c1_33, %c1_34, %c0_35] : memref<1x2x2x128xf32, #tpu.memory_space<vmem>>, vector<1x1x1x128xf32>
    %51 = vector.shape_cast %50 : vector<1x1x1x128xf32> to vector<1x1x128xf32>
    %52 = vector.extract_strided_slice %0 {offsets = [8, 0], sizes = [1, 128], strides = [1, 1]} : vector<9x128xf32> to vector<1x128xf32>
    %53 = vector.shape_cast %52 : vector<1x128xf32> to vector<1x1x128xf32>
    %54 = arith.mulf %51, %53 : vector<1x1x128xf32>
    %55 = arith.addf %49, %54 : vector<1x1x128xf32>
    %c0_36 = arith.constant 0 : index
    %c0_37 = arith.constant 0 : index
    %56 = vector.load %arg6[%c0_36, %c0_37] : memref<1x128xf32, #tpu.memory_space<vmem>>, vector<1x128xf32>
    %57 = vector.shape_cast %56 : vector<1x128xf32> to vector<1x1x128xf32>
    %58 = arith.mulf %55, %57 : vector<1x1x128xf32>
    %c0_38 = arith.constant 0 : index
    %c0_39 = arith.constant 0 : index
    %59 = vector.load %arg7[%c0_38, %c0_39] : memref<1x128xf32, #tpu.memory_space<vmem>>, vector<1x128xf32>
    %60 = vector.shape_cast %59 : vector<1x128xf32> to vector<1x1x128xf32>
    %61 = arith.addf %58, %60 : vector<1x1x128xf32>
    %cst_40 = arith.constant 0.000000e+00 : f32
    %62 = vector.broadcast %cst_40 : f32 to vector<1x1x128xf32>
    %63 = arith.maximumf %61, %62 : vector<1x1x128xf32>
    %64 = vector.shape_cast %63 : vector<1x1x128xf32> to vector<1x128xf32>
    %65 = arith.truncf %64 : vector<1x128xf32> to vector<1x128xbf16>
    %c0_41 = arith.constant 0 : index
    %c0_42 = arith.constant 0 : index
    %66 = vector.load %arg8[%c0_41, %c0_42] : memref<128x256xbf16, #tpu.memory_space<vmem>>, vector<128x256xbf16>
    %cst_43 = arith.constant dense<0.000000e+00> : vector<1x256xf32>
    %67 = tpu.matmul %65, %66, %cst_43 {dimension_numbers = #tpu.dot_dimension_numbers<[1], [0], [0], [1], [0, 0, 1, 1], [], []>} : vector<1x128xbf16>, vector<128x256xbf16>, vector<1x256xf32> -> vector<1x256xf32>
    %c0_44 = arith.constant 0 : index
    %c0_45 = arith.constant 0 : index
    %68 = vector.load %arg9[%c0_44, %c0_45] : memref<1x256xf32, #tpu.memory_space<vmem>>, vector<1x256xf32>
    %69 = arith.mulf %67, %68 : vector<1x256xf32>
    %c0_46 = arith.constant 0 : index
    %c0_47 = arith.constant 0 : index
    %70 = vector.load %arg10[%c0_46, %c0_47] : memref<1x256xf32, #tpu.memory_space<vmem>>, vector<1x256xf32>
    %71 = arith.addf %69, %70 : vector<1x256xf32>
    %cst_48 = arith.constant 0.000000e+00 : f32
    %72 = vector.broadcast %cst_48 : f32 to vector<1x256xf32>
    %73 = arith.maximumf %71, %72 : vector<1x256xf32>
    %c0_49 = arith.constant 0 : index
    %c0_50 = arith.constant 0 : index
    %c0_51 = arith.constant 0 : index
    %74 = vector.load %arg11[%c0_49, %c0_50, %c0_51] : memref<1x1x256xf32, #tpu.memory_space<vmem>>, vector<1x1x256xf32>
    %75 = vector.shape_cast %74 : vector<1x1x256xf32> to vector<1x256xf32>
    %76 = vector.shape_cast %73 : vector<1x256xf32> to vector<1x1x256xf32>
    tpu.vector_store %arg11[%c0_49, %c0_50, %c0_51], %76 {strides = array<i32>} : memref<1x1x256xf32, #tpu.memory_space<vmem>>, vector<1x1x256xf32>,
    return
  }
  func.func @transform_0(%arg0: i32) -> (i32, i32, i32, i32) {
    %c0_i32 = arith.constant 0 : i32
    %c0_i32_0 = arith.constant 0 : i32
    %c0_i32_1 = arith.constant 0 : i32
    %c0_i32_2 = arith.constant 0 : i32
    return %arg0, %c0_i32, %c0_i32_0, %c0_i32_1 : i32, i32, i32, i32
  }
  func.func @transform_1(%arg0: i32) -> (i32, i32, i32, i32) {
    %c0_i32 = arith.constant 0 : i32
    %c0_i32_0 = arith.constant 0 : i32
    %c0_i32_1 = arith.constant 0 : i32
    %c0_i32_2 = arith.constant 0 : i32
    return %arg0, %c0_i32, %c0_i32_0, %c0_i32_1 : i32, i32, i32, i32
  }
  func.func @transform_2(%arg0: i32) -> (i32, i32, i32, i32) {
    %c0_i32 = arith.constant 0 : i32
    %c0_i32_0 = arith.constant 0 : i32
    %c0_i32_1 = arith.constant 0 : i32
    %c0_i32_2 = arith.constant 0 : i32
    return %arg0, %c0_i32, %c0_i32_0, %c0_i32_1 : i32, i32, i32, i32
  }
  func.func @transform_3(%arg0: i32) -> (i32, i32, i32, i32) {
    %c0_i32 = arith.constant 0 : i32
    %c0_i32_0 = arith.constant 0 : i32
    %c0_i32_1 = arith.constant 0 : i32
    %c0_i32_2 = arith.constant 0 : i32
    return %arg0, %c0_i32, %c0_i32_0, %c0_i32_1 : i32, i32, i32, i32
  }
  func.func @transform_4(%arg0: i32) -> (i32, i32) {
    %c0_i32 = arith.constant 0 : i32
    %c0_i32_0 = arith.constant 0 : i32
    %c0_i32_1 = arith.constant 0 : i32
    return %c0_i32, %c0_i32_0 : i32, i32
  }
  func.func @transform_5(%arg0: i32) -> (i32, i32) {
    %c0_i32 = arith.constant 0 : i32
    %c0_i32_0 = arith.constant 0 : i32
    %c0_i32_1 = arith.constant 0 : i32
    return %c0_i32, %c0_i32_0 : i32, i32
  }
  func.func @transform_6(%arg0: i32) -> (i32, i32) {
    %c0_i32 = arith.constant 0 : i32
    %c0_i32_0 = arith.constant 0 : i32
    %c0_i32_1 = arith.constant 0 : i32
    return %c0_i32, %c0_i32_0 : i32, i32
  }
  func.func @transform_7(%arg0: i32) -> (i32, i32) {
    %c0_i32 = arith.constant 0 : i32
    %c0_i32_0 = arith.constant 0 : i32
    %c0_i32_1 = arith.constant 0 : i32
    return %c0_i32, %c0_i32_0 : i32, i32
  }
  func.func @transform_8(%arg0: i32) -> (i32, i32) {
    %c0_i32 = arith.constant 0 : i32
    %c0_i32_0 = arith.constant 0 : i32
    %c0_i32_1 = arith.constant 0 : i32
    return %c0_i32, %c0_i32_0 : i32, i32
  }
  func.func @transform_9(%arg0: i32) -> (i32, i32) {
    %c0_i32 = arith.constant 0 : i32
    %c0_i32_0 = arith.constant 0 : i32
    %c0_i32_1 = arith.constant 0 : i32
    return %c0_i32, %c0_i32_0 : i32, i32
  }
  func.func @transform_10(%arg0: i32) -> (i32, i32, i32) {
    %c0_i32 = arith.constant 0 : i32
    %c0_i32_0 = arith.constant 0 : i32
    %c0_i32_1 = arith.constant 0 : i32
    return %arg0, %c0_i32, %c0_i32_0 : i32, i32, i32
  }
}

module attributes {stable_mosaic.version = 11 : i64} {
  func.func @_pool_fc_kernel(%arg0: memref<2x1x256xf32, #tpu.memory_space<vmem>>, %arg1: memref<256x16xbf16, #tpu.memory_space<vmem>>, %arg2: memref<1x16xf32, #tpu.memory_space<vmem>>, %arg3: memref<2x16xf32, #tpu.memory_space<vmem>>) attributes {dimension_semantics = [], scalar_prefetch = 0 : i64, scratch_operands = 0 : i64, tpu.core_type = #tpu.core_type<tc>} {
    %c0 = arith.constant 0 : index
    %c0_0 = arith.constant 0 : index
    %c0_1 = arith.constant 0 : index
    %0 = vector.load %arg0[%c0, %c0_0, %c0_1] : memref<2x1x256xf32, #tpu.memory_space<vmem>>, vector<2x1x256xf32>
    %cst = arith.constant dense<0.000000e+00> : vector<2x256xf32>
    %1 = vector.multi_reduction <add>, %0, %cst [1] : vector<2x1x256xf32> to vector<2x256xf32>
    %cst_2 = arith.constant 1.000000e+00 : f32
    %2 = vector.broadcast %cst_2 : f32 to vector<2x256xf32>
    %3 = arith.mulf %1, %2 : vector<2x256xf32>
    %4 = arith.truncf %3 : vector<2x256xf32> to vector<2x256xbf16>
    %c0_3 = arith.constant 0 : index
    %c0_4 = arith.constant 0 : index
    %5 = vector.load %arg1[%c0_3, %c0_4] : memref<256x16xbf16, #tpu.memory_space<vmem>>, vector<256x16xbf16>
    %cst_5 = arith.constant dense<0.000000e+00> : vector<2x16xf32>
    %6 = tpu.matmul %4, %5, %cst_5 {dimension_numbers = #tpu.dot_dimension_numbers<[1], [0], [0], [1], [0, 0, 1, 1], [], []>} : vector<2x256xbf16>, vector<256x16xbf16>, vector<2x16xf32> -> vector<2x16xf32>
    %c0_6 = arith.constant 0 : index
    %c0_7 = arith.constant 0 : index
    %7 = vector.load %arg2[%c0_6, %c0_7] : memref<1x16xf32, #tpu.memory_space<vmem>>, vector<1x16xf32>
    %8 = vector.broadcast %7 : vector<1x16xf32> to vector<2x16xf32>
    %9 = arith.addf %6, %8 : vector<2x16xf32>
    %c0_8 = arith.constant 0 : index
    %c0_9 = arith.constant 0 : index
    %10 = vector.load %arg3[%c0_8, %c0_9] : memref<2x16xf32, #tpu.memory_space<vmem>>, vector<2x16xf32>
    tpu.vector_store %arg3[%c0_8, %c0_9], %9 {strides = array<i32>} : memref<2x16xf32, #tpu.memory_space<vmem>>, vector<2x16xf32>,
    return
  }
}

module attributes {stable_mosaic.version = 11 : i64} {
  func.func @kernel(%arg0: i32, %arg1: memref<1x3x3x256xf32, #tpu.memory_space<vmem>>, %arg2: memref<9x256xf32, #tpu.memory_space<vmem>>, %arg3: memref<1x256xf32, #tpu.memory_space<vmem>>, %arg4: memref<1x256xf32, #tpu.memory_space<vmem>>, %arg5: memref<256x256xbf16, #tpu.memory_space<vmem>>, %arg6: memref<1x256xf32, #tpu.memory_space<vmem>>, %arg7: memref<1x256xf32, #tpu.memory_space<vmem>>, %arg8: memref<1x1x256xf32, #tpu.memory_space<vmem>>) attributes {dimension_semantics = [#tpu.dimension_semantics<parallel>], iteration_bounds = array<i64: 2>, scalar_prefetch = 0 : i64, scratch_operands = 0 : i64, tpu.core_type = #tpu.core_type<tc>, window_params = [{transform_indices = @transform_0, window_bounds = array<i64: 1, 3, 3, 256>}, {pipeline_mode = #tpu.pipeline_mode<synchronous>, transform_indices = @transform_1, window_bounds = array<i64: 9, 256>}, {pipeline_mode = #tpu.pipeline_mode<synchronous>, transform_indices = @transform_2, window_bounds = array<i64: 1, 256>}, {pipeline_mode = #tpu.pipeline_mode<synchronous>, transform_indices = @transform_3, window_bounds = array<i64: 1, 256>}, {pipeline_mode = #tpu.pipeline_mode<synchronous>, transform_indices = @transform_4, window_bounds = array<i64: 256, 256>}, {pipeline_mode = #tpu.pipeline_mode<synchronous>, transform_indices = @transform_5, window_bounds = array<i64: 1, 256>}, {pipeline_mode = #tpu.pipeline_mode<synchronous>, transform_indices = @transform_6, window_bounds = array<i64: 1, 256>}, {transform_indices = @transform_7, window_bounds = array<i64: 1, 1, 256>}]} {
    %c0 = arith.constant 0 : index
    %c0_0 = arith.constant 0 : index
    %0 = vector.load %arg2[%c0, %c0_0] : memref<9x256xf32, #tpu.memory_space<vmem>>, vector<9x256xf32>
    %cst = arith.constant 0.000000e+00 : f32
    %1 = vector.broadcast %cst : f32 to vector<1x1x256xf32>
    %c0_1 = arith.constant 0 : index
    %c0_2 = arith.constant 0 : index
    %c0_3 = arith.constant 0 : index
    %c0_4 = arith.constant 0 : index
    %2 = vector.load %arg1[%c0_1, %c0_2, %c0_3, %c0_4] : memref<1x3x3x256xf32, #tpu.memory_space<vmem>>, vector<1x1x1x256xf32>
    %3 = vector.shape_cast %2 : vector<1x1x1x256xf32> to vector<1x1x256xf32>
    %4 = vector.extract_strided_slice %0 {offsets = [0, 0], sizes = [1, 256], strides = [1, 1]} : vector<9x256xf32> to vector<1x256xf32>
    %5 = vector.shape_cast %4 : vector<1x256xf32> to vector<1x1x256xf32>
    %6 = arith.mulf %3, %5 : vector<1x1x256xf32>
    %7 = arith.addf %1, %6 : vector<1x1x256xf32>
    %c0_5 = arith.constant 0 : index
    %c0_6 = arith.constant 0 : index
    %c1 = arith.constant 1 : index
    %c0_7 = arith.constant 0 : index
    %8 = vector.load %arg1[%c0_5, %c0_6, %c1, %c0_7] : memref<1x3x3x256xf32, #tpu.memory_space<vmem>>, vector<1x1x1x256xf32>
    %9 = vector.shape_cast %8 : vector<1x1x1x256xf32> to vector<1x1x256xf32>
    %10 = vector.extract_strided_slice %0 {offsets = [1, 0], sizes = [1, 256], strides = [1, 1]} : vector<9x256xf32> to vector<1x256xf32>
    %11 = vector.shape_cast %10 : vector<1x256xf32> to vector<1x1x256xf32>
    %12 = arith.mulf %9, %11 : vector<1x1x256xf32>
    %13 = arith.addf %7, %12 : vector<1x1x256xf32>
    %c0_8 = arith.constant 0 : index
    %c0_9 = arith.constant 0 : index
    %c2 = arith.constant 2 : index
    %c0_10 = arith.constant 0 : index
    %14 = vector.load %arg1[%c0_8, %c0_9, %c2, %c0_10] : memref<1x3x3x256xf32, #tpu.memory_space<vmem>>, vector<1x1x1x256xf32>
    %15 = vector.shape_cast %14 : vector<1x1x1x256xf32> to vector<1x1x256xf32>
    %16 = vector.extract_strided_slice %0 {offsets = [2, 0], sizes = [1, 256], strides = [1, 1]} : vector<9x256xf32> to vector<1x256xf32>
    %17 = vector.shape_cast %16 : vector<1x256xf32> to vector<1x1x256xf32>
    %18 = arith.mulf %15, %17 : vector<1x1x256xf32>
    %19 = arith.addf %13, %18 : vector<1x1x256xf32>
    %c0_11 = arith.constant 0 : index
    %c1_12 = arith.constant 1 : index
    %c0_13 = arith.constant 0 : index
    %c0_14 = arith.constant 0 : index
    %20 = vector.load %arg1[%c0_11, %c1_12, %c0_13, %c0_14] : memref<1x3x3x256xf32, #tpu.memory_space<vmem>>, vector<1x1x1x256xf32>
    %21 = vector.shape_cast %20 : vector<1x1x1x256xf32> to vector<1x1x256xf32>
    %22 = vector.extract_strided_slice %0 {offsets = [3, 0], sizes = [1, 256], strides = [1, 1]} : vector<9x256xf32> to vector<1x256xf32>
    %23 = vector.shape_cast %22 : vector<1x256xf32> to vector<1x1x256xf32>
    %24 = arith.mulf %21, %23 : vector<1x1x256xf32>
    %25 = arith.addf %19, %24 : vector<1x1x256xf32>
    %c0_15 = arith.constant 0 : index
    %c1_16 = arith.constant 1 : index
    %c1_17 = arith.constant 1 : index
    %c0_18 = arith.constant 0 : index
    %26 = vector.load %arg1[%c0_15, %c1_16, %c1_17, %c0_18] : memref<1x3x3x256xf32, #tpu.memory_space<vmem>>, vector<1x1x1x256xf32>
    %27 = vector.shape_cast %26 : vector<1x1x1x256xf32> to vector<1x1x256xf32>
    %28 = vector.extract_strided_slice %0 {offsets = [4, 0], sizes = [1, 256], strides = [1, 1]} : vector<9x256xf32> to vector<1x256xf32>
    %29 = vector.shape_cast %28 : vector<1x256xf32> to vector<1x1x256xf32>
    %30 = arith.mulf %27, %29 : vector<1x1x256xf32>
    %31 = arith.addf %25, %30 : vector<1x1x256xf32>
    %c0_19 = arith.constant 0 : index
    %c1_20 = arith.constant 1 : index
    %c2_21 = arith.constant 2 : index
    %c0_22 = arith.constant 0 : index
    %32 = vector.load %arg1[%c0_19, %c1_20, %c2_21, %c0_22] : memref<1x3x3x256xf32, #tpu.memory_space<vmem>>, vector<1x1x1x256xf32>
    %33 = vector.shape_cast %32 : vector<1x1x1x256xf32> to vector<1x1x256xf32>
    %34 = vector.extract_strided_slice %0 {offsets = [5, 0], sizes = [1, 256], strides = [1, 1]} : vector<9x256xf32> to vector<1x256xf32>
    %35 = vector.shape_cast %34 : vector<1x256xf32> to vector<1x1x256xf32>
    %36 = arith.mulf %33, %35 : vector<1x1x256xf32>
    %37 = arith.addf %31, %36 : vector<1x1x256xf32>
    %c0_23 = arith.constant 0 : index
    %c2_24 = arith.constant 2 : index
    %c0_25 = arith.constant 0 : index
    %c0_26 = arith.constant 0 : index
    %38 = vector.load %arg1[%c0_23, %c2_24, %c0_25, %c0_26] : memref<1x3x3x256xf32, #tpu.memory_space<vmem>>, vector<1x1x1x256xf32>
    %39 = vector.shape_cast %38 : vector<1x1x1x256xf32> to vector<1x1x256xf32>
    %40 = vector.extract_strided_slice %0 {offsets = [6, 0], sizes = [1, 256], strides = [1, 1]} : vector<9x256xf32> to vector<1x256xf32>
    %41 = vector.shape_cast %40 : vector<1x256xf32> to vector<1x1x256xf32>
    %42 = arith.mulf %39, %41 : vector<1x1x256xf32>
    %43 = arith.addf %37, %42 : vector<1x1x256xf32>
    %c0_27 = arith.constant 0 : index
    %c2_28 = arith.constant 2 : index
    %c1_29 = arith.constant 1 : index
    %c0_30 = arith.constant 0 : index
    %44 = vector.load %arg1[%c0_27, %c2_28, %c1_29, %c0_30] : memref<1x3x3x256xf32, #tpu.memory_space<vmem>>, vector<1x1x1x256xf32>
    %45 = vector.shape_cast %44 : vector<1x1x1x256xf32> to vector<1x1x256xf32>
    %46 = vector.extract_strided_slice %0 {offsets = [7, 0], sizes = [1, 256], strides = [1, 1]} : vector<9x256xf32> to vector<1x256xf32>
    %47 = vector.shape_cast %46 : vector<1x256xf32> to vector<1x1x256xf32>
    %48 = arith.mulf %45, %47 : vector<1x1x256xf32>
    %49 = arith.addf %43, %48 : vector<1x1x256xf32>
    %c0_31 = arith.constant 0 : index
    %c2_32 = arith.constant 2 : index
    %c2_33 = arith.constant 2 : index
    %c0_34 = arith.constant 0 : index
    %50 = vector.load %arg1[%c0_31, %c2_32, %c2_33, %c0_34] : memref<1x3x3x256xf32, #tpu.memory_space<vmem>>, vector<1x1x1x256xf32>
    %51 = vector.shape_cast %50 : vector<1x1x1x256xf32> to vector<1x1x256xf32>
    %52 = vector.extract_strided_slice %0 {offsets = [8, 0], sizes = [1, 256], strides = [1, 1]} : vector<9x256xf32> to vector<1x256xf32>
    %53 = vector.shape_cast %52 : vector<1x256xf32> to vector<1x1x256xf32>
    %54 = arith.mulf %51, %53 : vector<1x1x256xf32>
    %55 = arith.addf %49, %54 : vector<1x1x256xf32>
    %c0_35 = arith.constant 0 : index
    %c0_36 = arith.constant 0 : index
    %56 = vector.load %arg3[%c0_35, %c0_36] : memref<1x256xf32, #tpu.memory_space<vmem>>, vector<1x256xf32>
    %57 = vector.shape_cast %56 : vector<1x256xf32> to vector<1x1x256xf32>
    %58 = arith.mulf %55, %57 : vector<1x1x256xf32>
    %c0_37 = arith.constant 0 : index
    %c0_38 = arith.constant 0 : index
    %59 = vector.load %arg4[%c0_37, %c0_38] : memref<1x256xf32, #tpu.memory_space<vmem>>, vector<1x256xf32>
    %60 = vector.shape_cast %59 : vector<1x256xf32> to vector<1x1x256xf32>
    %61 = arith.addf %58, %60 : vector<1x1x256xf32>
    %cst_39 = arith.constant 0.000000e+00 : f32
    %62 = vector.broadcast %cst_39 : f32 to vector<1x1x256xf32>
    %63 = arith.maximumf %61, %62 : vector<1x1x256xf32>
    %64 = vector.shape_cast %63 : vector<1x1x256xf32> to vector<1x256xf32>
    %65 = arith.truncf %64 : vector<1x256xf32> to vector<1x256xbf16>
    %c0_40 = arith.constant 0 : index
    %c0_41 = arith.constant 0 : index
    %66 = vector.load %arg5[%c0_40, %c0_41] : memref<256x256xbf16, #tpu.memory_space<vmem>>, vector<256x256xbf16>
    %cst_42 = arith.constant dense<0.000000e+00> : vector<1x256xf32>
    %67 = tpu.matmul %65, %66, %cst_42 {dimension_numbers = #tpu.dot_dimension_numbers<[1], [0], [0], [1], [0, 0, 1, 1], [], []>} : vector<1x256xbf16>, vector<256x256xbf16>, vector<1x256xf32> -> vector<1x256xf32>
    %c0_43 = arith.constant 0 : index
    %c0_44 = arith.constant 0 : index
    %68 = vector.load %arg6[%c0_43, %c0_44] : memref<1x256xf32, #tpu.memory_space<vmem>>, vector<1x256xf32>
    %69 = arith.mulf %67, %68 : vector<1x256xf32>
    %c0_45 = arith.constant 0 : index
    %c0_46 = arith.constant 0 : index
    %70 = vector.load %arg7[%c0_45, %c0_46] : memref<1x256xf32, #tpu.memory_space<vmem>>, vector<1x256xf32>
    %71 = arith.addf %69, %70 : vector<1x256xf32>
    %cst_47 = arith.constant 0.000000e+00 : f32
    %72 = vector.broadcast %cst_47 : f32 to vector<1x256xf32>
    %73 = arith.maximumf %71, %72 : vector<1x256xf32>
    %c0_48 = arith.constant 0 : index
    %c0_49 = arith.constant 0 : index
    %c0_50 = arith.constant 0 : index
    %74 = vector.load %arg8[%c0_48, %c0_49, %c0_50] : memref<1x1x256xf32, #tpu.memory_space<vmem>>, vector<1x1x256xf32>
    %75 = vector.shape_cast %74 : vector<1x1x256xf32> to vector<1x256xf32>
    %76 = vector.shape_cast %73 : vector<1x256xf32> to vector<1x1x256xf32>
    tpu.vector_store %arg8[%c0_48, %c0_49, %c0_50], %76 {strides = array<i32>} : memref<1x1x256xf32, #tpu.memory_space<vmem>>, vector<1x1x256xf32>,
    return
  }
  func.func @transform_0(%arg0: i32) -> (i32, i32, i32, i32) {
    %c0_i32 = arith.constant 0 : i32
    %c0_i32_0 = arith.constant 0 : i32
    %c0_i32_1 = arith.constant 0 : i32
    %c0_i32_2 = arith.constant 0 : i32
    return %arg0, %c0_i32, %c0_i32_0, %c0_i32_1 : i32, i32, i32, i32
  }
  func.func @transform_1(%arg0: i32) -> (i32, i32) {
    %c0_i32 = arith.constant 0 : i32
    %c0_i32_0 = arith.constant 0 : i32
    %c0_i32_1 = arith.constant 0 : i32
    return %c0_i32, %c0_i32_0 : i32, i32
  }
  func.func @transform_2(%arg0: i32) -> (i32, i32) {
    %c0_i32 = arith.constant 0 : i32
    %c0_i32_0 = arith.constant 0 : i32
    %c0_i32_1 = arith.constant 0 : i32
    return %c0_i32, %c0_i32_0 : i32, i32
  }
  func.func @transform_3(%arg0: i32) -> (i32, i32) {
    %c0_i32 = arith.constant 0 : i32
    %c0_i32_0 = arith.constant 0 : i32
    %c0_i32_1 = arith.constant 0 : i32
    return %c0_i32, %c0_i32_0 : i32, i32
  }
  func.func @transform_4(%arg0: i32) -> (i32, i32) {
    %c0_i32 = arith.constant 0 : i32
    %c0_i32_0 = arith.constant 0 : i32
    %c0_i32_1 = arith.constant 0 : i32
    return %c0_i32, %c0_i32_0 : i32, i32
  }
  func.func @transform_5(%arg0: i32) -> (i32, i32) {
    %c0_i32 = arith.constant 0 : i32
    %c0_i32_0 = arith.constant 0 : i32
    %c0_i32_1 = arith.constant 0 : i32
    return %c0_i32, %c0_i32_0 : i32, i32
  }
  func.func @transform_6(%arg0: i32) -> (i32, i32) {
    %c0_i32 = arith.constant 0 : i32
    %c0_i32_0 = arith.constant 0 : i32
    %c0_i32_1 = arith.constant 0 : i32
    return %c0_i32, %c0_i32_0 : i32, i32
  }
  func.func @transform_7(%arg0: i32) -> (i32, i32, i32) {
    %c0_i32 = arith.constant 0 : i32
    %c0_i32_0 = arith.constant 0 : i32
    %c0_i32_1 = arith.constant 0 : i32
    return %arg0, %c0_i32, %c0_i32_0 : i32, i32, i32
  }
}

</mosaic_0001>

<bundles_post_ra>
// kernel: _lambda_.15
= control target key start
LH: loop header
LB: loop body
LE: loop exit
PB: predicated region body
PF: predicated region fallthrough
CT: control target
= control target key end

     0   :  { %s903_s15 = smov 0   ;;  %s1104_s0 = inlined_call_operand.vmem [shape: bf16[512,32], index: 0, kind: input, shape index: {}]   ;;  %s1105_s1 = inlined_call_operand.vmem [shape: bf16[32,8], index: 1, kind: input, shape index: {}]   ;;  %s1106_s2 = inlined_call_operand.vmem [shape: f32[1,8], index: 2, kind: input, shape index: {}]   ;;  %s1107_s3 = inlined_call_operand.vmem [shape: f32[1,8], index: 3, kind: input, shape index: {}]   ;;  %s1108_s4 = inlined_call_operand.vmem [shape: f32[512,8], index: 4, kind: output, shape index: {}]  }
   0x1 LB: > { %s739_s16 = sadd.s32 4294967295, %s876_s15   ;;  %p743_p0 = scmp.ge.s32.totalorder %s876_s15, 1  ;;  %s876_s15 = sphi %s903_s15, %s14_s15  }
   0x2   : > { %p163_p1 = scmp.lt.s32.totalorder %s876_s15, 3 }
   0x4   : > { %p164_p2 = pnand %p743_p0, %p163_p1 }
   0x5   : > { %v852_v0 = vld [vmem:[%s1105_s1] sm:$0xff] (!%p164_p2)   ;;  %s744_s19 = sshll.u32 (!%p164_p2), %s739_s16, 5  ;;  %v853_v1 = vld [vmem:[%s1105_s1 + $0x8] sm:$0xff] (!%p164_p2)   ;;  %vm330_vm0 = vcmask (!%p164_p2), 261120   ;;  %vm650_vm1 = vcmask (!%p164_p2), 64512  }
   0x6   : > { %167 = sbr.rel (%p164_p2) target bundleno = 265 (0x109), region = 36  ;;  %p190_p3 = scmp.lt.s32.totalorder (!%p164_p2), %s744_s19, 63  ;;  %804 = vmatprep.subr.bf16.mxu0 (!%p164_p2), %v852_v0  ;;  %840 = vmatprep.subr.bf16.mxu1 (!%p164_p2), %v852_v0  ;;  %v960_v18 = vld [vmem:[%s1106_s2] ss:$0 sm:$0xff] (!%p164_p2) }
   0x7   : > { %805 = vmatpush3.bf16.msra.mxu0 (!%p164_p2), %v852_v0  ;;  %842 = vmatpush3.bf16.msra.mxu1 (!%p164_p2), %v852_v0  ;;  %v965_v20 = vld [vmem:[%s1107_s3] ss:$0 sm:$0xff] (!%p164_p2) }
   0x8   : > { %806 = vmatprep.subr.bf16.mxu0 (!%p164_p2), %v853_v1  ;;  %841 = vmatprep.subr.bf16.mxu1 (!%p164_p2), %v853_v1 }
   0xb   : > { %807 = vmatpush3.bf16.msra.mxu0 (!%p164_p2), %v853_v1  ;;  %843 = vmatpush3.bf16.msra.mxu1 (!%p164_p2), %v853_v1 }
   0xd   : > { %s1110_s19 = smov (!%p190_p3, %s744_s19), 63 }
   0xe   : > { %s745_s22 = sshll.u32 %s1110_s19, 2  ;;  %s747_s30 = sshll.u32 %s1110_s19, 3 }
   0xf   : > { %s923_s25 = scalar_lea.vmem %s1104_s0, %s745_s22  ;;  %s977_s7 = scalar_lea.vmem %s1108_s4, %s747_s30 }
  0x10   : > { %v854_v2 = vld [vmem:[%s923_s25] sm:$0xff]   ;;  %v856_v4 = vld [vmem:[%s923_s25 + $0x8] sm:$0xff]   ;;  %v858_v6 = vld [vmem:[%s923_s25 + $0x10] sm:$0xff]  }
  0x11   : > { %v855_v3 = vld [vmem:[%s923_s25 + $0x40] sm:$0xff]   ;;  %808 = vmatprep.mubr.msk.bf16.mxu0 %vm330_vm0, %v854_v2  ;;  %v857_v5 = vld [vmem:[%s923_s25 + $0x48] sm:$0xff]   ;;  %v859_v7 = vld [vmem:[%s923_s25 + $0x50] sm:$0xff]  }
  0x12   : > { %824 = vmatprep.mubr.msk.bf16.mxu1 %vm330_vm0, %v855_v3  ;;  %809 = vmatmul.mubr.msk.bf16.vlgmr.msra.gmra.mrb[0].mxu0 %vm330_vm0, %v856_v4  ;;  %v860_v8 = vld [vmem:[%s923_s25 + $0x18] sm:$0xff]   ;;  %v862_v10 = vld [vmem:[%s923_s25 + $0x20] sm:$0xff]   ;;  %v864_v12 = vld [vmem:[%s923_s25 + $0x28] sm:$0xff]  }
  0x13   : > { %825 = vmatmul.mubr.msk.bf16.vlgmr.msra.gmra.mrb[0].mxu1 %vm330_vm0, %v857_v5  ;;  %812 = vmatprep.mubr.msk.bf16.mxu0 %vm330_vm0, %v858_v6  ;;  %v861_v9 = vld [vmem:[%s923_s25 + $0x58] sm:$0xff]   ;;  %v863_v11 = vld [vmem:[%s923_s25 + $0x60] sm:$0xff]   ;;  %v865_v13 = vld [vmem:[%s923_s25 + $0x68] sm:$0xff]  }
  0x14   : > { %828 = vmatprep.mubr.msk.bf16.mxu1 %vm330_vm0, %v859_v7  ;;  %v866_v14 = vld [vmem:[%s923_s25 + $0x30] sm:$0xff]   ;;  %v868_v16 = vld [vmem:[%s923_s25 + $0x38] sm:$0xff]  }
  0x15   : > { %v867_v15 = vld [vmem:[%s923_s25 + $0x70] sm:$0xff]   ;;  %v869_v17 = vld [vmem:[%s923_s25 + $0x78] sm:$0xff]  }
  0x1a   : > { %813 = vmatmul.mubr.msk.bf16.gmra.mrb[4].mxu0 %vm330_vm0, %v860_v8 }
  0x1b   : > { %829 = vmatmul.mubr.msk.bf16.gmra.mrb[4].mxu1 %vm330_vm0, %v861_v9  ;;  %816 = vmatprep.mubr.msk.bf16.mxu0 %vm330_vm0, %v862_v10 }
  0x1c   : > { %832 = vmatprep.mubr.msk.bf16.mxu1 %vm330_vm0, %v863_v11 }
  0x22   : > { %817 = vmatmul.mubr.msk.bf16.gmra.mrb[8].mxu0 %vm330_vm0, %v864_v12 }
  0x23   : > { %833 = vmatmul.mubr.msk.bf16.gmra.mrb[8].mxu1 %vm330_vm0, %v865_v13  ;;  %820 = vmatprep.mubr.msk.bf16.mxu0 %vm330_vm0, %v866_v14 }
  0x24   : > { %836 = vmatprep.mubr.msk.bf16.mxu1 %vm330_vm0, %v867_v15 }
  0x2a   : > { %821 = vmatmul.mubr.msk.bf16.gmra.mrb[12].mxu0 %vm330_vm0, %v868_v16 }
  0x2b   : > { %837 = vmatmul.mubr.msk.bf16.gmra.mrb[12].mxu1 %vm330_vm0, %v869_v17 }
  0xe5   : > { %v810_v19 = vpop.f32.mrb[0].mxu0 }
  0xe6   : > { %v549_v21 = vmul.f32 %v810_v19, %v960_v18  ;;  %v826_v22 = vpop.f32.mrb[0].mxu1  ;;  %v413_v23 = vpop.f32.mrb[1].mxu0 }
  0xe7   : > { %v565_v24 = vmul.f32 %v826_v22, %v960_v18  ;;  %v547_v25 = vmul.f32 %v960_v18, %v413_v23  ;;  %v477_v26 = vpop.f32.mrb[1].mxu1  ;;  %v811_v27 = vpop.f32.mrb[2].mxu0 }
  0xe8   : > { %v588_v28 = vadd.f32 %v965_v20, %v549_v21  ;;  %v563_v29 = vmul.f32 %v960_v18, %v477_v26  ;;  %v550_v30 = vmul.f32 %v811_v27, %v960_v18  ;;  %v827_v31 = vpop.f32.mrb[2].mxu1  ;;  %v416_v32 = vpop.f32.mrb[3].mxu0 }
  0xe9   : > { %v604_v33 = vadd.f32 %v965_v20, %v565_v24  ;;  %v586_v34 = vadd.f32 %v965_v20, %v547_v25  ;;  %v566_v35 = vmul.f32 %v827_v31, %v960_v18  ;;  %v548_v36 = vmul.f32 %v960_v18, %v416_v32  ;;  %v480_v37 = vpop.f32.mrb[3].mxu1 }
  0xea   : > { %v620_v38 = vmax.f32 %v588_v28, 0.0  ;;  %v602_v39 = vadd.f32 %v965_v20, %v563_v29  ;;  %v589_v40 = vadd.f32 %v965_v20, %v550_v30  ;;  %v564_v41 = vmul.f32 %v960_v18, %v480_v37 }
  0xeb   : > { %v636_v42 = vmax.f32 %v604_v33, 0.0  ;;  %v618_v43 = vmax.f32 %v586_v34, 0.0  ;;  %v605_v44 = vadd.f32 %v965_v20, %v566_v35  ;;  %v587_v45 = vadd.f32 %v965_v20, %v548_v36 }
  0xec   : > { %653 = vst.msk [vmem:[%s977_s7 + $0x10] sm:$0xff] %vm650_vm1, %v620_v38  ;;  %v634_v46 = vmax.f32 %v602_v39, 0.0  ;;  %v621_v47 = vmax.f32 %v589_v40, 0.0  ;;  %v603_v48 = vadd.f32 %v965_v20, %v564_v41 }
  0xed   : > { %669 = vst.msk [vmem:[%s977_s7 + $0x90] sm:$0xff] %vm650_vm1, %v636_v42  ;;  %651 = vst.msk [vmem:[%s977_s7] sm:$0xff] %vm650_vm1, %v618_v43  ;;  %v637_v49 = vmax.f32 %v605_v44, 0.0  ;;  %v619_v50 = vmax.f32 %v587_v45, 0.0  ;;  %v814_v51 = vpop.f32.mrb[4].mxu0 }
  0xee   : > { %667 = vst.msk [vmem:[%s977_s7 + $0x80] sm:$0xff] %vm650_vm1, %v634_v46  ;;  %654 = vst.msk [vmem:[%s977_s7 + $0x18] sm:$0xff] %vm650_vm1, %v621_v47  ;;  %v635_v52 = vmax.f32 %v603_v48, 0.0  ;;  %v553_v53 = vmul.f32 %v814_v51, %v960_v18  ;;  %v830_v54 = vpop.f32.mrb[4].mxu1  ;;  %v429_v55 = vpop.f32.mrb[5].mxu0 }
  0xef   : > { %670 = vst.msk [vmem:[%s977_s7 + $0x98] sm:$0xff] %vm650_vm1, %v637_v49  ;;  %652 = vst.msk [vmem:[%s977_s7 + $0x8] sm:$0xff] %vm650_vm1, %v619_v50  ;;  %v569_v56 = vmul.f32 %v830_v54, %v960_v18  ;;  %v551_v57 = vmul.f32 %v960_v18, %v429_v55  ;;  %v493_v58 = vpop.f32.mrb[5].mxu1  ;;  %v815_v59 = vpop.f32.mrb[6].mxu0 }
  0xf0   : > { %668 = vst.msk [vmem:[%s977_s7 + $0x88] sm:$0xff] %vm650_vm1, %v635_v52  ;;  %v592_v60 = vadd.f32 %v965_v20, %v553_v53  ;;  %v567_v61 = vmul.f32 %v960_v18, %v493_v58  ;;  %v554_v62 = vmul.f32 %v815_v59, %v960_v18  ;;  %v831_v63 = vpop.f32.mrb[6].mxu1  ;;  %v432_v0 = vpop.f32.mrb[7].mxu0 }
  0xf1   : > { %v608_v1 = vadd.f32 %v965_v20, %v569_v56  ;;  %v590_v2 = vadd.f32 %v965_v20, %v551_v57  ;;  %v570_v3 = vmul.f32 %v831_v63, %v960_v18  ;;  %v552_v4 = vmul.f32 %v960_v18, %v432_v0  ;;  %v496_v5 = vpop.f32.mrb[7].mxu1 }
  0xf2   : > { %v624_v6 = vmax.f32 %v592_v60, 0.0  ;;  %v606_v7 = vadd.f32 %v965_v20, %v567_v61  ;;  %v593_v8 = vadd.f32 %v965_v20, %v554_v62  ;;  %v568_v9 = vmul.f32 %v960_v18, %v496_v5 }
  0xf3   : > { %v640_v10 = vmax.f32 %v608_v1, 0.0  ;;  %v622_v11 = vmax.f32 %v590_v2, 0.0  ;;  %v609_v12 = vadd.f32 %v965_v20, %v570_v3  ;;  %v591_v13 = vadd.f32 %v965_v20, %v552_v4 }
  0xf4   : > { %657 = vst.msk [vmem:[%s977_s7 + $0x30] sm:$0xff] %vm650_vm1, %v624_v6  ;;  %v638_v14 = vmax.f32 %v606_v7, 0.0  ;;  %v625_v15 = vmax.f32 %v593_v8, 0.0  ;;  %v607_v16 = vadd.f32 %v965_v20, %v568_v9 }
  0xf5   : > { %673 = vst.msk [vmem:[%s977_s7 + $0xb0] sm:$0xff] %vm650_vm1, %v640_v10  ;;  %655 = vst.msk [vmem:[%s977_s7 + $0x20] sm:$0xff] %vm650_vm1, %v622_v11  ;;  %v641_v17 = vmax.f32 %v609_v12, 0.0  ;;  %v623_v19 = vmax.f32 %v591_v13, 0.0  ;;  %v818_v21 = vpop.f32.mrb[8].mxu0 }
  0xf6   : > { %671 = vst.msk [vmem:[%s977_s7 + $0xa0] sm:$0xff] %vm650_vm1, %v638_v14  ;;  %658 = vst.msk [vmem:[%s977_s7 + $0x38] sm:$0xff] %vm650_vm1, %v625_v15  ;;  %v639_v22 = vmax.f32 %v607_v16, 0.0  ;;  %v557_v23 = vmul.f32 %v818_v21, %v960_v18  ;;  %v834_v24 = vpop.f32.mrb[8].mxu1  ;;  %v445_v25 = vpop.f32.mrb[9].mxu0 }
  0xf7   : > { %674 = vst.msk [vmem:[%s977_s7 + $0xb8] sm:$0xff] %vm650_vm1, %v641_v17  ;;  %656 = vst.msk [vmem:[%s977_s7 + $0x28] sm:$0xff] %vm650_vm1, %v623_v19  ;;  %v573_v26 = vmul.f32 %v834_v24, %v960_v18  ;;  %v555_v27 = vmul.f32 %v960_v18, %v445_v25  ;;  %v509_v28 = vpop.f32.mrb[9].mxu1  ;;  %v819_v29 = vpop.f32.mrb[10].mxu0 }
  0xf8   : > { %672 = vst.msk [vmem:[%s977_s7 + $0xa8] sm:$0xff] %vm650_vm1, %v639_v22  ;;  %v596_v30 = vadd.f32 %v965_v20, %v557_v23  ;;  %v571_v31 = vmul.f32 %v960_v18, %v509_v28  ;;  %v558_v32 = vmul.f32 %v819_v29, %v960_v18  ;;  %v835_v33 = vpop.f32.mrb[10].mxu1  ;;  %v448_v34 = vpop.f32.mrb[11].mxu0 }
  0xf9   : > { %v612_v35 = vadd.f32 %v965_v20, %v573_v26  ;;  %v594_v36 = vadd.f32 %v965_v20, %v555_v27  ;;  %v574_v37 = vmul.f32 %v835_v33, %v960_v18  ;;  %v556_v38 = vmul.f32 %v960_v18, %v448_v34  ;;  %v512_v39 = vpop.f32.mrb[11].mxu1 }
  0xfa   : > { %v628_v40 = vmax.f32 %v596_v30, 0.0  ;;  %v610_v41 = vadd.f32 %v965_v20, %v571_v31  ;;  %v597_v42 = vadd.f32 %v965_v20, %v558_v32  ;;  %v572_v43 = vmul.f32 %v960_v18, %v512_v39 }
  0xfb   : > { %v644_v44 = vmax.f32 %v612_v35, 0.0  ;;  %v626_v45 = vmax.f32 %v594_v36, 0.0  ;;  %v613_v46 = vadd.f32 %v965_v20, %v574_v37  ;;  %v595_v47 = vadd.f32 %v965_v20, %v556_v38 }
  0xfc   : > { %661 = vst.msk [vmem:[%s977_s7 + $0x50] sm:$0xff] %vm650_vm1, %v628_v40  ;;  %v642_v48 = vmax.f32 %v610_v41, 0.0  ;;  %v629_v49 = vmax.f32 %v597_v42, 0.0  ;;  %v611_v50 = vadd.f32 %v965_v20, %v572_v43 }
  0xfd   : > { %677 = vst.msk [vmem:[%s977_s7 + $0xd0] sm:$0xff] %vm650_vm1, %v644_v44  ;;  %659 = vst.msk [vmem:[%s977_s7 + $0x40] sm:$0xff] %vm650_vm1, %v626_v45  ;;  %v645_v51 = vmax.f32 %v613_v46, 0.0  ;;  %v627_v52 = vmax.f32 %v595_v47, 0.0  ;;  %v822_v53 = vpop.f32.mrb[12].mxu0 }
  0xfe   : > { %675 = vst.msk [vmem:[%s977_s7 + $0xc0] sm:$0xff] %vm650_vm1, %v642_v48  ;;  %662 = vst.msk [vmem:[%s977_s7 + $0x58] sm:$0xff] %vm650_vm1, %v629_v49  ;;  %v643_v54 = vmax.f32 %v611_v50, 0.0  ;;  %v561_v55 = vmul.f32 %v822_v53, %v960_v18  ;;  %v838_v56 = vpop.f32.mrb[12].mxu1  ;;  %v461_v57 = vpop.f32.mrb[13].mxu0 }
  0xff   : > { %678 = vst.msk [vmem:[%s977_s7 + $0xd8] sm:$0xff] %vm650_vm1, %v645_v51  ;;  %660 = vst.msk [vmem:[%s977_s7 + $0x48] sm:$0xff] %vm650_vm1, %v627_v52  ;;  %v577_v58 = vmul.f32 %v838_v56, %v960_v18  ;;  %v559_v59 = vmul.f32 %v960_v18, %v461_v57  ;;  %v525_v60 = vpop.f32.mrb[13].mxu1  ;;  %v823_v61 = vpop.f32.mrb[14].mxu0 }
 0x100   : > { %676 = vst.msk [vmem:[%s977_s7 + $0xc8] sm:$0xff] %vm650_vm1, %v643_v54  ;;  %v600_v62 = vadd.f32 %v965_v20, %v561_v55  ;;  %v575_v63 = vmul.f32 %v960_v18, %v525_v60  ;;  %v562_v0 = vmul.f32 %v823_v61, %v960_v18  ;;  %v839_v1 = vpop.f32.mrb[14].mxu1  ;;  %v464_v2 = vpop.f32.mrb[15].mxu0 }
 0x101   : > { %v616_v3 = vadd.f32 %v965_v20, %v577_v58  ;;  %v598_v4 = vadd.f32 %v965_v20, %v559_v59  ;;  %v578_v5 = vmul.f32 %v839_v1, %v960_v18  ;;  %v560_v6 = vmul.f32 %v960_v18, %v464_v2  ;;  %v528_v7 = vpop.f32.mrb[15].mxu1 }
 0x102   : > { %v632_v8 = vmax.f32 %v600_v62, 0.0  ;;  %v614_v9 = vadd.f32 %v965_v20, %v575_v63  ;;  %v601_v10 = vadd.f32 %v965_v20, %v562_v0  ;;  %v576_v11 = vmul.f32 %v960_v18, %v528_v7 }
 0x103   : > { %v648_v12 = vmax.f32 %v616_v3, 0.0  ;;  %v630_v13 = vmax.f32 %v598_v4, 0.0  ;;  %v617_v14 = vadd.f32 %v965_v20, %v578_v5  ;;  %v599_v15 = vadd.f32 %v965_v20, %v560_v6 }
 0x104   : > { %665 = vst.msk [vmem:[%s977_s7 + $0x70] sm:$0xff] %vm650_vm1, %v632_v8  ;;  %v646_v16 = vmax.f32 %v614_v9, 0.0  ;;  %v633_v17 = vmax.f32 %v601_v10, 0.0  ;;  %v615_v19 = vadd.f32 %v965_v20, %v576_v11 }
 0x105   : > { %681 = vst.msk [vmem:[%s977_s7 + $0xf0] sm:$0xff] %vm650_vm1, %v648_v12  ;;  %663 = vst.msk [vmem:[%s977_s7 + $0x60] sm:$0xff] %vm650_vm1, %v630_v13  ;;  %v649_v18 = vmax.f32 %v617_v14, 0.0  ;;  %v631_v21 = vmax.f32 %v599_v15, 0.0 }
 0x106   : > { %679 = vst.msk [vmem:[%s977_s7 + $0xe0] sm:$0xff] %vm650_vm1, %v646_v16  ;;  %666 = vst.msk [vmem:[%s977_s7 + $0x78] sm:$0xff] %vm650_vm1, %v633_v17  ;;  %v647_v22 = vmax.f32 %v615_v19, 0.0 }
 0x107   : > { %682 = vst.msk [vmem:[%s977_s7 + $0xf8] sm:$0xff] %vm650_vm1, %v649_v18  ;;  %664 = vst.msk [vmem:[%s977_s7 + $0x68] sm:$0xff] %vm650_vm1, %v631_v21 }
 0x108   : > { %680 = vst.msk [vmem:[%s977_s7 + $0xe8] sm:$0xff] %vm650_vm1, %v647_v22 }
 0x109 PF: > { %s14_s15 = sadd.s32 1, %s876_s15  }
 0x10a   : > { %p11_p4 = scmp.ge.s32.totalorder %s14_s15, 4  }
 0x10c   :  { %13 = sbr.rel (!%p11_p4) target bundleno = 1 (0x1), region = 66 }

// kernel: _lambda_.16
= control target key start
LH: loop header
LB: loop body
LE: loop exit
PB: predicated region body
PF: predicated region fallthrough
CT: control target
= control target key end

     0   :  { %s2062_s24 = smov 0   ;;  %s3224_s0 = inlined_call_operand.vmem [shape: f32[2,18,18,8], index: 0, kind: input, shape index: {}]   ;;  %s3225_s1 = inlined_call_operand.vmem [shape: f32[9,8], index: 1, kind: input, shape index: {}]   ;;  %s3226_s2 = inlined_call_operand.vmem [shape: f32[1,8], index: 2, kind: input, shape index: {}]   ;;  %s3227_s3 = inlined_call_operand.vmem [shape: f32[1,8], index: 3, kind: input, shape index: {}]   ;;  %s3228_s4 = inlined_call_operand.vmem [shape: bf16[8,16], index: 4, kind: input, shape index: {}]   ;;  %s3229_s5 = inlined_call_operand.vmem [shape: f32[1,16], index: 5, kind: input, shape index: {}]   ;;  %s3230_s6 = inlined_call_operand.vmem [shape: f32[1,16], index: 6, kind: input, shape index: {}]   ;;  %s3231_s7 = inlined_call_operand.vmem [shape: f32[2,256,16], index: 7, kind: output, shape index: {}]  }
   0x1 LB: > { %s1723_s25 = sadd.s32 4294967295, %s2020_s24   ;;  %p1727_p0 = scmp.ge.s32.totalorder %s2020_s24, 1  ;;  %s2020_s24 = sphi %s2062_s24, %s17_s24  }
   0x2   : > { %p237_p1 = scmp.lt.s32.totalorder %s2020_s24, 3 }
   0x4   : > { %p238_p2 = pnand %p1727_p0, %p237_p1 }
   0x5   : > { %v1310_v0 = vld [vmem:[%s3228_s4] sm:$0xf] (!%p238_p2)  ;;  %vm1360_vm0 = vcmask (!%p238_p2), 1043456   ;;  %p269_p3 = scmp.lt.s32.totalorder (!%p238_p2), %s1723_s25, 1  ;;  %v314_v1 = vlaneseq (!%p238_p2)  ;;  %v2104_v23 = vld [vmem:[%s3225_s1 + $0x8] ss:$0 sm:$0xff] (!%p238_p2) }
   0x6   : > { %241 = sbr.rel (%p238_p2) target bundleno = 417 (0x1a1), region = 48  ;;  %2000 = vmatprep.subr.msk.bf16.mxu0 (!%p238_p2), %vm1360_vm0, %v1310_v0  ;;  %2001 = vmatprep.subr.msk.bf16.mxu1 (!%p238_p2), %vm1360_vm0, %v1310_v0  ;;  %v1362_v2 = vsel (!%p238_p2), %vm1360_vm0, %v1310_v0, 0  ;;  %v280_v4 = vld [vmem:[%s3225_s1] sm:$0xff] (!%p238_p2)  ;;  %vm1311_vm1 = vcmask (!%p238_p2), 64512   ;;  %vm1635_vm2 = vcmask (!%p238_p2), 130048  }
   0x7   : > { %1965 = vmatpush3.bf16.msra.mxu0 (!%p238_p2), %v1362_v2  ;;  %1999 = vmatpush3.bf16.msra.mxu1 (!%p238_p2), %v1362_v2  ;;  %v315_v3 = vshrl.u32 (!%p238_p2), %v314_v1, 7 }
   0x9   : > { %v316_v5 = vsub.s32 (!%p238_p2), 0, %v315_v3  ;;  %v416_v6 = vsub.s32 (!%p238_p2), 1, %v315_v3  ;;  %v516_v7 = vsub.s32 (!%p238_p2), 2, %v315_v3  ;;  %v617_v8 = vsub.s32 (!%p238_p2), 3, %v315_v3 }
   0xa   : > { %v717_v9 = vsub.s32 (!%p238_p2), 4, %v315_v3  ;;  %v817_v10 = vsub.s32 (!%p238_p2), 5, %v315_v3  ;;  %v918_v11 = vsub.s32 (!%p238_p2), 6, %v315_v3  ;;  %v1018_v12 = vsub.s32 (!%p238_p2), 7, %v315_v3 }
   0xb   : > { %v2084_v13 = vrot.slane (!%p238_p2), %v280_v4, %v316_v5  ;;  %v2086_v14 = vrot.slane (!%p238_p2), %v280_v4, %v416_v6  ;;  %v2088_v15 = vrot.slane (!%p238_p2), %v280_v4, %v516_v7  ;;  %v2090_v16 = vrot.slane (!%p238_p2), %v280_v4, %v617_v8 }
   0xc   : > { %v2095_v20 = vrot.slane (!%p238_p2), %v280_v4, %v717_v9  ;;  %v2097_v21 = vrot.slane (!%p238_p2), %v280_v4, %v817_v10  ;;  %v2099_v22 = vrot.slane (!%p238_p2), %v280_v4, %v918_v11  ;;  %v2112_v30 = vrot.slane (!%p238_p2), %v280_v4, %v1018_v12 }
   0xd   : > { %s3233_s25 = smov (!%p269_p3, %s1723_s25), 1 }
   0xe   : > { %s2002_s30 = smul.u32 432, %s3233_s25  ;;  %s1946_s29 = sshll.u32 %s3233_s25, 8 }
   0xf   : > { %s3095_s9 = scalar_lea.vmem %s3231_s7, %s1946_s29 }
  0x10   : > { %s2082_s10 = scalar_lea.vmem %s3224_s0, %s2002_s30 }
  0x11   : > { %v282_v17 = vld [vmem:[%s2082_s10] sm:$0xff]  ;;  %v283_v18 = vld [vmem:[%s2082_s10 + $0x8] sm:$0xff]  ;;  %v2118_v34 = vld [vmem:[%s2082_s10 + $0x18] sm:$0xff] }
  0x12   : > { %v382_v19 = vld [vmem:[%s2082_s10 + $0x1] sm:$0xff]  ;;  %v318_v24 = vmul.f32 %v2084_v13, %v282_v17  ;;  %v319_v25 = vmul.f32 %v2084_v13, %v283_v18  ;;  %v383_v26 = vld [vmem:[%s2082_s10 + $0x9] sm:$0xff]  ;;  %v2124_v36 = vld [vmem:[%s2082_s10 + $0x19] sm:$0xff]  ;;  %v619_v38 = vmul.f32 %v2118_v34, %v2090_v16 }
  0x13   : > { %v418_v27 = vmul.f32 %v2086_v14, %v382_v19  ;;  %v482_v28 = vld [vmem:[%s2082_s10 + $0x2] sm:$0xff]  ;;  %v483_v29 = vld [vmem:[%s2082_s10 + $0xa] sm:$0xff]  ;;  %v419_v31 = vmul.f32 %v2086_v14, %v383_v26  ;;  %v719_v41 = vmul.f32 %v2124_v36, %v2095_v20  ;;  %v2136_v42 = vld [vmem:[%s2082_s10 + $0x1a] sm:$0xff] }
  0x14   : > { %v518_v32 = vmul.f32 %v2088_v15, %v482_v28  ;;  %v519_v33 = vmul.f32 %v2088_v15, %v483_v29  ;;  %v2121_v35 = vld [vmem:[%s2082_s10 + $0x20] sm:$0xff]  ;;  %v819_v46 = vmul.f32 %v2136_v42, %v2097_v21  ;;  %v2148_v48 = vld [vmem:[%s2082_s10 + $0x30] sm:$0xff]  ;;  %v2151_v49 = vld [vmem:[%s2082_s10 + $0x38] sm:$0xff] }
  0x15   : > { %v450_v37 = vadd.f32 %v418_v27, %v318_v24  ;;  %v620_v39 = vmul.f32 %v2121_v35, %v2090_v16  ;;  %v2131_v40 = vld [vmem:[%s2082_s10 + $0x21] sm:$0xff]  ;;  %v451_v44 = vadd.f32 %v419_v31, %v319_v25  ;;  %v2154_v50 = vld [vmem:[%s2082_s10 + $0x31] sm:$0xff]  ;;  %v920_v52 = vmul.f32 %v2148_v48, %v2099_v22  ;;  %v2161_v54 = vld [vmem:[%s2082_s10 + $0x39] sm:$0xff] }
  0x16   : > { %v2139_v43 = vld [vmem:[%s2082_s10 + $0x22] sm:$0xff]  ;;  %v720_v45 = vmul.f32 %v2131_v40, %v2095_v20  ;;  %v921_v53 = vmul.f32 %v2151_v49, %v2099_v22  ;;  %v1020_v55 = vmul.f32 %v2154_v50, %v2112_v30  ;;  %v2166_v56 = vld [vmem:[%s2082_s10 + $0x32] sm:$0xff]  ;;  %v2169_v57 = vld [vmem:[%s2082_s10 + $0x3a] sm:$0xff]  ;;  %v1021_v59 = vmul.f32 %v2161_v54, %v2112_v30 }
  0x17   : > { %v820_v47 = vmul.f32 %v2139_v43, %v2097_v21  ;;  %v550_v51 = vadd.f32 %v518_v32, %v450_v37  ;;  %v551_v58 = vadd.f32 %v519_v33, %v451_v44  ;;  %v1120_v60 = vmul.f32 %v2104_v23, %v2166_v56  ;;  %v298_v62 = vld [vmem:[%s2082_s10 + $0xc0] sm:$0xff]  ;;  %v299_v63 = vld [vmem:[%s2082_s10 + $0xc8] sm:$0xff]  ;;  %v2192_v12 = vld [vmem:[%s2082_s10 + $0xd8] sm:$0xff] }
  0x18   : > { %v2177_v61 = vmul.f32 %v2104_v23, %v2169_v57  ;;  %v398_v0 = vld [vmem:[%s2082_s10 + $0xc1] sm:$0xff]  ;;  %v334_v2 = vmul.f32 %v2084_v13, %v298_v62  ;;  %v335_v3 = vmul.f32 %v2084_v13, %v299_v63  ;;  %v399_v4 = vld [vmem:[%s2082_s10 + $0xc9] sm:$0xff]  ;;  %v635_v24 = vmul.f32 %v2192_v12, %v2090_v16  ;;  %v2202_v26 = vld [vmem:[%s2082_s10 + $0xd9] sm:$0xff] }
  0x19   : > { %v651_v1 = vadd.f32 %v619_v38, %v550_v51  ;;  %v434_v5 = vmul.f32 %v2086_v14, %v398_v0  ;;  %v498_v6 = vld [vmem:[%s2082_s10 + $0xc2] sm:$0xff]  ;;  %v499_v7 = vld [vmem:[%s2082_s10 + $0xca] sm:$0xff]  ;;  %v652_v8 = vadd.f32 %v620_v39, %v551_v58  ;;  %v435_v9 = vmul.f32 %v2086_v14, %v399_v4  ;;  %v2212_v33 = vld [vmem:[%s2082_s10 + $0xda] sm:$0xff] }
  0x1a   : > { %v534_v10 = vmul.f32 %v2088_v15, %v498_v6  ;;  %v535_v11 = vmul.f32 %v2088_v15, %v499_v7  ;;  %v2195_v17 = vld [vmem:[%s2082_s10 + $0xe0] sm:$0xff]  ;;  %v735_v31 = vmul.f32 %v2202_v26, %v2095_v20  ;;  %v2225_v51 = vld [vmem:[%s2082_s10 + $0xf8] sm:$0xff] }
  0x1b   : > { %v751_v18 = vadd.f32 %v719_v41, %v651_v1  ;;  %v466_v19 = vadd.f32 %v434_v5, %v334_v2  ;;  %v636_v25 = vmul.f32 %v2195_v17, %v2090_v16  ;;  %v2205_v27 = vld [vmem:[%s2082_s10 + $0xe1] sm:$0xff]  ;;  %v752_v28 = vadd.f32 %v720_v45, %v652_v8  ;;  %v2222_v45 = vld [vmem:[%s2082_s10 + $0xf0] sm:$0xff]  ;;  %v2235_v1 = vld [vmem:[%s2082_s10 + $0xf9] sm:$0xff] }
  0x1c   : > { %v467_v29 = vadd.f32 %v435_v9, %v335_v3  ;;  %v736_v32 = vmul.f32 %v2205_v27, %v2095_v20  ;;  %v2215_v37 = vld [vmem:[%s2082_s10 + $0xe2] sm:$0xff]  ;;  %v835_v41 = vmul.f32 %v2212_v33, %v2097_v21  ;;  %v936_v63 = vmul.f32 %v2222_v45, %v2099_v22  ;;  %v2232_v0 = vld [vmem:[%s2082_s10 + $0xf1] sm:$0xff]  ;;  %v2245_v6 = vld [vmem:[%s2082_s10 + $0xfa] sm:$0xff] }
  0x1d   : > { %v851_v38 = vadd.f32 %v819_v46, %v751_v18  ;;  %v566_v39 = vadd.f32 %v534_v10, %v466_v19  ;;  %v836_v44 = vmul.f32 %v2215_v37, %v2097_v21  ;;  %v852_v58 = vadd.f32 %v820_v47, %v752_v28  ;;  %v2242_v47 = vld [vmem:[%s2082_s10 + $0xf2] sm:$0xff] }
  0x1e   : > { %v567_v62 = vadd.f32 %v535_v11, %v467_v29  ;;  %v937_v46 = vmul.f32 %v2225_v51, %v2099_v22  ;;  %v1036_v4 = vmul.f32 %v2232_v0, %v2112_v30  ;;  %v1037_v5 = vmul.f32 %v2235_v1, %v2112_v30 }
  0x1f   : > { %v952_v2 = vadd.f32 %v920_v52, %v851_v38  ;;  %v667_v3 = vadd.f32 %v635_v24, %v566_v39  ;;  %v953_v7 = vadd.f32 %v921_v53, %v852_v58  ;;  %v1136_v9 = vmul.f32 %v2104_v23, %v2242_v47  ;;  %v2258_v53 = vld [vmem:[%s3226_s2] ss:$0 sm:$0xff] }
  0x20   : > { %v668_v8 = vadd.f32 %v636_v25, %v567_v62  ;;  %v1137_v10 = vmul.f32 %v2104_v23, %v2245_v6  ;;  %v320_v18 = vmul.f32 %v2118_v34, %v2084_v13  ;;  %v321_v19 = vmul.f32 %v2121_v35, %v2084_v13 }
  0x21   : > { %v1052_v52 = vadd.f32 %v1020_v55, %v952_v2  ;;  %v767_v11 = vadd.f32 %v735_v31, %v667_v3  ;;  %v1053_v24 = vadd.f32 %v1021_v59, %v953_v7  ;;  %v420_v28 = vmul.f32 %v2124_v36, %v2086_v14 }
  0x22   : > { %v768_v25 = vadd.f32 %v736_v32, %v668_v8  ;;  %v421_v55 = vmul.f32 %v2131_v40, %v2086_v14  ;;  %v520_v34 = vmul.f32 %v2136_v42, %v2088_v15  ;;  %v521_v35 = vmul.f32 %v2139_v43, %v2088_v15  ;;  %v2272_v32 = vld [vmem:[%s3227_s3] ss:$0 sm:$0xff] }
  0x23   : > { %v1152_v29 = vadd.f32 %v1120_v60, %v1052_v52  ;;  %v867_v31 = vadd.f32 %v835_v41, %v767_v11  ;;  %v1153_v59 = vadd.f32 %v2177_v61, %v1053_v24  ;;  %v452_v38 = vadd.f32 %v420_v28, %v320_v18 }
  0x24   : > { %v868_v36 = vadd.f32 %v836_v44, %v768_v25  ;;  %v453_v39 = vadd.f32 %v421_v55, %v321_v19  ;;  %v621_v41 = vmul.f32 %v2148_v48, %v2090_v16  ;;  %v622_v42 = vmul.f32 %v2151_v49, %v2090_v16 }
  0x25   : > { %v1191_v40 = vmul.f32 %v2258_v53, %v1152_v29  ;;  %v968_v60 = vadd.f32 %v936_v63, %v867_v31  ;;  %v1192_v43 = vmul.f32 %v2258_v53, %v1153_v59  ;;  %v552_v58 = vadd.f32 %v520_v34, %v452_v38  ;;  %v2291_v29 = vld [vmem:[%s2082_s10 + $0x48] sm:$0xff] }
  0x26   : > { %v969_v61 = vadd.f32 %v937_v46, %v868_v36  ;;  %v553_v62 = vadd.f32 %v521_v35, %v453_v39  ;;  %v721_v3 = vmul.f32 %v2154_v50, %v2095_v20  ;;  %v722_v63 = vmul.f32 %v2161_v54, %v2095_v20  ;;  %v2297_v31 = vld [vmem:[%s2082_s10 + $0x49] sm:$0xff] }
  0x27   : > { %v1230_v2 = vadd.f32 %v2272_v32, %v1191_v40  ;;  %v1068_v44 = vadd.f32 %v1036_v4, %v968_v60  ;;  %v1231_v7 = vadd.f32 %v2272_v32, %v1192_v43  ;;  %v653_v52 = vadd.f32 %v621_v41, %v552_v58  ;;  %v2308_v40 = vld [vmem:[%s2082_s10 + $0x51] sm:$0xff] }
  0x28   : > { %v1069_v8 = vadd.f32 %v1037_v5, %v969_v61  ;;  %v654_v11 = vadd.f32 %v622_v42, %v553_v62  ;;  %v821_v19 = vmul.f32 %v2166_v56, %v2097_v21  ;;  %v822_v4 = vmul.f32 %v2169_v57, %v2097_v21  ;;  %v2294_v5 = vld [vmem:[%s2082_s10 + $0x50] sm:$0xff] }
  0x29   : > { %v1262_v46 = vmax.f32 %v1230_v2, 0.0  ;;  %v1168_v18 = vadd.f32 %v1136_v9, %v1068_v44  ;;  %v1263_v24 = vmax.f32 %v1231_v7, 0.0  ;;  %v753_v28 = vadd.f32 %v721_v3, %v653_v52  ;;  %v2311_v60 = vld [vmem:[%s2082_s10 + $0x4a] sm:$0xff]  ;;  %v2314_v41 = vld [vmem:[%s2082_s10 + $0x52] sm:$0xff] }
  0x2a   : > { %v1169_v25 = vadd.f32 %v1137_v10, %v1069_v8  ;;  %v754_v55 = vadd.f32 %v722_v63, %v654_v11  ;;  %v922_v34 = vmul.f32 %v2291_v29, %v2099_v22  ;;  %v923_v35 = vmul.f32 %v2294_v5, %v2099_v22 }
  0x2b   : > { %v1207_v9 = vmul.f32 %v2258_v53, %v1168_v18  ;;  %v1022_v10 = vmul.f32 %v2297_v31, %v2112_v30  ;;  %v1294_v59 = vpack.c.bf16 %v1263_v24, %v1262_v46  ;;  %v853_v38 = vadd.f32 %v821_v19, %v753_v28 }
  0x2c   : > { %v1208_v36 = vmul.f32 %v2258_v53, %v1169_v25  ;;  %v854_v39 = vadd.f32 %v822_v4, %v754_v55  ;;  %v1023_v43 = vmul.f32 %v2308_v40, %v2112_v30  ;;  %v1122_v61 = vmul.f32 %v2104_v23, %v2311_v60 }
  0x2d   : > { %v1246_v42 = vadd.f32 %v2272_v32, %v1207_v9  ;;  %v1123_v58 = vmul.f32 %v2104_v23, %v2314_v41  ;;  %1966 = vmatprep.mubr.msk.bf16.mxu0 %vm1311_vm1, %v1294_v59  ;;  %v954_v2 = vadd.f32 %v922_v34, %v853_v38  ;;  %v336_v3 = vmul.f32 %v2192_v12, %v2084_v13  ;;  %v2356_v38 = vld [vmem:[%s2082_s10 + $0x110] sm:$0xff] }
  0x2e   : > { %v1247_v62 = vadd.f32 %v2272_v32, %v1208_v36  ;;  %v955_v44 = vadd.f32 %v923_v35, %v854_v39  ;;  %v337_v7 = vmul.f32 %v2195_v17, %v2084_v13  ;;  %v436_v8 = vmul.f32 %v2202_v26, %v2086_v14  ;;  %v2353_v36 = vld [vmem:[%s2082_s10 + $0x108] sm:$0xff] }
  0x2f   : > { %v1278_v63 = vmax.f32 %v1246_v42, 0.0  ;;  %v437_v52 = vmul.f32 %v2205_v27, %v2086_v14  ;;  %v1054_v46 = vadd.f32 %v1022_v10, %v954_v2  ;;  %v536_v19 = vmul.f32 %v2212_v33, %v2088_v15 }
  0x30   : > { %v1279_v11 = vmax.f32 %v1247_v62, 0.0  ;;  %v1055_v18 = vadd.f32 %v1023_v43, %v955_v44  ;;  %v468_v4 = vadd.f32 %v436_v8, %v336_v3  ;;  %v537_v12 = vmul.f32 %v2215_v37, %v2088_v15  ;;  %v2366_v62 = vld [vmem:[%s2082_s10 + $0x111] sm:$0xff] }
  0x31   : > { %v469_v24 = vadd.f32 %v437_v52, %v337_v7  ;;  %v637_v17 = vmul.f32 %v2222_v45, %v2090_v16  ;;  %v1154_v25 = vadd.f32 %v1122_v61, %v1054_v46  ;;  %v638_v27 = vmul.f32 %v2225_v51, %v2090_v16  ;;  %v2375_v7 = vld [vmem:[%s2082_s10 + $0x10a] sm:$0xff]  ;;  %v2378_v8 = vld [vmem:[%s2082_s10 + $0x112] sm:$0xff] }
  0x32   : > { %v1302_v26 = vpack.c.bf16 %v1279_v11, %v1278_v63  ;;  %v1155_v28 = vadd.f32 %v1123_v58, %v1055_v18  ;;  %v568_v55 = vadd.f32 %v536_v19, %v468_v4  ;;  %v737_v9 = vmul.f32 %v2232_v0, %v2095_v20  ;;  %v2363_v58 = vld [vmem:[%s2082_s10 + $0x109] sm:$0xff] }
  0x33   : > { %v569_v33 = vadd.f32 %v537_v12, %v469_v24  ;;  %v738_v37 = vmul.f32 %v2235_v1, %v2095_v20  ;;  %v1193_v34 = vmul.f32 %v2258_v53, %v1154_v25  ;;  %v837_v10 = vmul.f32 %v2242_v47, %v2097_v21 }
  0x34   : > { %1982 = vmatprep.mubr.msk.bf16.mxu1 %vm1311_vm1, %v1302_v26  ;;  %v1194_v35 = vmul.f32 %v2258_v53, %v1155_v28  ;;  %v838_v59 = vmul.f32 %v2245_v6, %v2097_v21  ;;  %v669_v39 = vadd.f32 %v637_v17, %v568_v55  ;;  %v938_v43 = vmul.f32 %v2353_v36, %v2099_v22 }
  0x35   : > { %v670_v42 = vadd.f32 %v638_v27, %v569_v33  ;;  %v939_v61 = vmul.f32 %v2356_v38, %v2099_v22  ;;  %v1232_v2 = vadd.f32 %v2272_v32, %v1193_v34  ;;  %v1038_v3 = vmul.f32 %v2363_v58, %v2112_v30 }
  0x36   : > { %v1233_v44 = vadd.f32 %v2272_v32, %v1194_v35  ;;  %v1039_v63 = vmul.f32 %v2366_v62, %v2112_v30  ;;  %v769_v52 = vadd.f32 %v737_v9, %v669_v39  ;;  %v1138_v46 = vmul.f32 %v2104_v23, %v2375_v7 }
  0x37   : > { %v770_v11 = vadd.f32 %v738_v37, %v670_v42  ;;  %v1139_v18 = vmul.f32 %v2104_v23, %v2378_v8  ;;  %v1264_v19 = vmax.f32 %v1232_v2, 0.0  ;;  %v322_v24 = vmul.f32 %v2148_v48, %v2084_v13  ;;  %v2408_v42 = vld [vmem:[%s2082_s10 + $0x60] sm:$0xff] }
  0x38   : > { %v1265_v4 = vmax.f32 %v1233_v44, 0.0  ;;  %v323_v12 = vmul.f32 %v2151_v49, %v2084_v13  ;;  %v869_v17 = vadd.f32 %v837_v10, %v769_v52  ;;  %v422_v25 = vmul.f32 %v2154_v50, %v2086_v14 }
  0x39   : > { %v870_v26 = vadd.f32 %v838_v59, %v770_v11  ;;  %v423_v28 = vmul.f32 %v2161_v54, %v2086_v14  ;;  %v522_v55 = vmul.f32 %v2166_v56, %v2088_v15  ;;  %v523_v33 = vmul.f32 %v2169_v57, %v2088_v15 }
  0x3a   : > { %v1295_v27 = vpack.c.bf16 %v1265_v4, %v1264_v19  ;;  %v623_v48 = vmul.f32 %v2291_v29, %v2090_v16  ;;  %v970_v49 = vadd.f32 %v938_v43, %v869_v17  ;;  %v454_v37 = vadd.f32 %v422_v25, %v322_v24  ;;  %v2411_v43 = vld [vmem:[%s2082_s10 + $0x68] sm:$0xff] }
  0x3b   : > { %v971_v9 = vadd.f32 %v939_v61, %v870_v26  ;;  %v455_v50 = vadd.f32 %v423_v28, %v323_v12  ;;  %v624_v54 = vmul.f32 %v2294_v5, %v2090_v16  ;;  %v723_v56 = vmul.f32 %v2297_v31, %v2095_v20  ;;  %v2414_v61 = vld [vmem:[%s2082_s10 + $0x61] sm:$0xff]  ;;  %v2425_v24 = vld [vmem:[%s2082_s10 + $0x69] sm:$0xff] }
  0x3c   : > { %1967 = vmatmul.mubr.msk.bf16.vlgmr.msra.gmra.mrb[0].mxu0 %vm1311_vm1, %v1295_v27  ;;  %v724_v57 = vmul.f32 %v2308_v40, %v2095_v20  ;;  %v823_v34 = vmul.f32 %v2311_v60, %v2097_v21  ;;  %v1070_v35 = vadd.f32 %v1038_v3, %v970_v49  ;;  %v554_v59 = vadd.f32 %v522_v55, %v454_v37  ;;  %v2428_v12 = vld [vmem:[%s2082_s10 + $0x62] sm:$0xff]  ;;  %v2431_v17 = vld [vmem:[%s2082_s10 + $0x6a] sm:$0xff] }
  0x3d   : > { %v1071_v10 = vadd.f32 %v1039_v63, %v971_v9  ;;  %v555_v39 = vadd.f32 %v523_v33, %v455_v50  ;;  %v824_v2 = vmul.f32 %v2314_v41, %v2097_v21  ;;  %v924_v44 = vmul.f32 %v2408_v42, %v2099_v22 }
  0x3e   : > { %v925_v3 = vmul.f32 %v2411_v43, %v2099_v22  ;;  %v1024_v63 = vmul.f32 %v2414_v61, %v2112_v30  ;;  %v1170_v52 = vadd.f32 %v1138_v46, %v1070_v35  ;;  %v655_v19 = vadd.f32 %v623_v48, %v554_v59 }
  0x3f   : > { %v1171_v11 = vadd.f32 %v1139_v18, %v1071_v10  ;;  %v656_v4 = vadd.f32 %v624_v54, %v555_v39  ;;  %v1025_v26 = vmul.f32 %v2425_v24, %v2112_v30  ;;  %v1124_v25 = vmul.f32 %v2104_v23, %v2428_v12 }
  0x40   : > { %v1125_v28 = vmul.f32 %v2104_v23, %v2431_v17  ;;  %v338_v46 = vmul.f32 %v2222_v45, %v2084_v13  ;;  %v1209_v18 = vmul.f32 %v2258_v53, %v1170_v52  ;;  %v755_v55 = vadd.f32 %v723_v56, %v655_v19 }
  0x41   : > { %v1210_v27 = vmul.f32 %v2258_v53, %v1171_v11  ;;  %v756_v33 = vadd.f32 %v724_v57, %v656_v4  ;;  %v339_v48 = vmul.f32 %v2225_v51, %v2084_v13  ;;  %v438_v49 = vmul.f32 %v2232_v0, %v2086_v14 }
  0x42   : > { %v439_v9 = vmul.f32 %v2235_v1, %v2086_v14  ;;  %v538_v37 = vmul.f32 %v2242_v47, %v2088_v15  ;;  %v1248_v45 = vadd.f32 %v2272_v32, %v1209_v18  ;;  %v855_v54 = vadd.f32 %v823_v34, %v755_v55  ;;  %v2471_v55 = vld [vmem:[%s2082_s10 + $0x128] sm:$0xff] }
  0x43   : > { %v1249_v50 = vadd.f32 %v2272_v32, %v1210_v27  ;;  %v856_v35 = vadd.f32 %v824_v2, %v756_v33  ;;  %v470_v56 = vadd.f32 %v438_v49, %v338_v46  ;;  %v539_v51 = vmul.f32 %v2245_v6, %v2088_v15  ;;  %v2468_v27 = vld [vmem:[%s2082_s10 + $0x120] sm:$0xff] }
  0x44   : > { %v471_v57 = vadd.f32 %v439_v9, %v339_v48  ;;  %v639_v0 = vmul.f32 %v2353_v36, %v2090_v16  ;;  %v1280_v10 = vmax.f32 %v1248_v45, 0.0  ;;  %v956_v59 = vadd.f32 %v924_v44, %v855_v54  ;;  %v2479_v49 = vld [vmem:[%s2082_s10 + $0x121] sm:$0xff]  ;;  %v2482_v9 = vld [vmem:[%s2082_s10 + $0x129] sm:$0xff] }
  0x45   : > { %v1281_v1 = vmax.f32 %v1249_v50, 0.0  ;;  %v957_v47 = vadd.f32 %v925_v3, %v856_v35  ;;  %v570_v39 = vadd.f32 %v538_v37, %v470_v56  ;;  %v640_v34 = vmul.f32 %v2356_v38, %v2090_v16 }
  0x46   : > { %v571_v52 = vadd.f32 %v539_v51, %v471_v57  ;;  %v739_v2 = vmul.f32 %v2363_v58, %v2095_v20  ;;  %v1056_v6 = vadd.f32 %v1024_v63, %v956_v59  ;;  %v740_v4 = vmul.f32 %v2366_v62, %v2095_v20 }
  0x47   : > { %v1303_v11 = vpack.c.bf16 %v1281_v1, %v1280_v10  ;;  %v1057_v19 = vadd.f32 %v1025_v26, %v957_v47  ;;  %v671_v46 = vadd.f32 %v639_v0, %v570_v39  ;;  %v839_v44 = vmul.f32 %v2375_v7, %v2097_v21 }
  0x48   : > { %v672_v18 = vadd.f32 %v640_v34, %v571_v52  ;;  %v840_v3 = vmul.f32 %v2378_v8, %v2097_v21  ;;  %v1156_v63 = vadd.f32 %v1124_v25, %v1056_v6  ;;  %v940_v33 = vmul.f32 %v2468_v27, %v2099_v22  ;;  %v2489_v25 = vld [vmem:[%s2082_s10 + $0x122] sm:$0xff] }
  0x49   : > { %1983 = vmatmul.mubr.msk.bf16.vlgmr.msra.gmra.mrb[0].mxu1 %vm1311_vm1, %v1303_v11  ;;  %v1157_v26 = vadd.f32 %v1125_v28, %v1057_v19  ;;  %v941_v48 = vmul.f32 %v2471_v55, %v2099_v22  ;;  %v771_v37 = vadd.f32 %v739_v2, %v671_v46  ;;  %v1040_v50 = vmul.f32 %v2479_v49, %v2112_v30  ;;  %v2492_v28 = vld [vmem:[%s2082_s10 + $0x12a] sm:$0xff] }
  0x4a   : > { %v772_v45 = vadd.f32 %v740_v4, %v672_v18  ;;  %v1041_v54 = vmul.f32 %v2482_v9, %v2112_v30  ;;  %v1195_v35 = vmul.f32 %v2258_v53, %v1156_v63  ;;  %v1140_v57 = vmul.f32 %v2104_v23, %v2489_v25 }
  0x4b   : > { %v1196_v56 = vmul.f32 %v2258_v53, %v1157_v26  ;;  %v1141_v51 = vmul.f32 %v2104_v23, %v2492_v28  ;;  %v871_v0 = vadd.f32 %v839_v44, %v771_v37  ;;  %v324_v1 = vmul.f32 %v2291_v29, %v2084_v13 }
  0x4c   : > { %v872_v10 = vadd.f32 %v840_v3, %v772_v45  ;;  %v325_v59 = vmul.f32 %v2294_v5, %v2084_v13  ;;  %v1234_v47 = vadd.f32 %v2272_v32, %v1195_v35  ;;  %v424_v52 = vmul.f32 %v2297_v31, %v2086_v14  ;;  %v2525_v45 = vld [vmem:[%s2082_s10 + $0x78] sm:$0xff] }
  0x4d   : > { %v1235_v39 = vadd.f32 %v2272_v32, %v1196_v56  ;;  %v425_v34 = vmul.f32 %v2308_v40, %v2086_v14  ;;  %v972_v2 = vadd.f32 %v940_v33, %v871_v0  ;;  %v524_v6 = vmul.f32 %v2311_v60, %v2088_v15  ;;  %v2531_v56 = vld [vmem:[%s2082_s10 + $0x80] sm:$0xff] }
  0x4e   : > { %v973_v11 = vadd.f32 %v941_v48, %v872_v10  ;;  %v525_v29 = vmul.f32 %v2314_v41, %v2088_v15  ;;  %v1266_v19 = vmax.f32 %v1234_v47, 0.0  ;;  %v456_v4 = vadd.f32 %v424_v52, %v324_v1 }
  0x4f   : > { %v1267_v5 = vmax.f32 %v1235_v39, 0.0  ;;  %v457_v46 = vadd.f32 %v425_v34, %v325_v59  ;;  %v1072_v18 = vadd.f32 %v1040_v50, %v972_v2  ;;  %v625_v31 = vmul.f32 %v2408_v42, %v2090_v16  ;;  %v2543_v59 = vld [vmem:[%s2082_s10 + $0x81] sm:$0xff] }
  0x50   : > { %v1073_v44 = vadd.f32 %v1041_v54, %v973_v11  ;;  %v626_v40 = vmul.f32 %v2411_v43, %v2090_v16  ;;  %v556_v60 = vadd.f32 %v524_v6, %v456_v4  ;;  %v725_v41 = vmul.f32 %v2414_v61, %v2095_v20  ;;  %v2548_v39 = vld [vmem:[%s2082_s10 + $0x7a] sm:$0xff]  ;;  %v2553_v11 = vld [vmem:[%s2082_s10 + $0x82] sm:$0xff] }
  0x51   : > { %v1296_v3 = vpack.c.bf16 %v1267_v5, %v1266_v19  ;;  %v557_v63 = vadd.f32 %v525_v29, %v457_v46  ;;  %v1172_v26 = vadd.f32 %v1140_v57, %v1072_v18  ;;  %v726_v48 = vmul.f32 %v2425_v24, %v2095_v20 }
  0x52   : > { %v1173_v33 = vadd.f32 %v1141_v51, %v1073_v44  ;;  %v825_v37 = vmul.f32 %v2428_v12, %v2097_v21  ;;  %v657_v50 = vadd.f32 %v625_v31, %v556_v60  ;;  %v826_v35 = vmul.f32 %v2431_v17, %v2097_v21  ;;  %v2536_v51 = vld [vmem:[%s2082_s10 + $0x79] sm:$0xff] }
  0x53   : > { %1970 = vmatprep.mubr.msk.bf16.mxu0 %vm1311_vm1, %v1296_v3  ;;  %v658_v54 = vadd.f32 %v626_v40, %v557_v63  ;;  %v926_v57 = vmul.f32 %v2525_v45, %v2099_v22  ;;  %v1211_v0 = vmul.f32 %v2258_v53, %v1172_v26  ;;  %v927_v1 = vmul.f32 %v2531_v56, %v2099_v22 }
  0x54   : > { %v1212_v10 = vmul.f32 %v2258_v53, %v1173_v33  ;;  %v1026_v47 = vmul.f32 %v2536_v51, %v2112_v30  ;;  %v757_v52 = vadd.f32 %v725_v41, %v657_v50  ;;  %v1027_v2 = vmul.f32 %v2543_v59, %v2112_v30 }
  0x55   : > { %v758_v34 = vadd.f32 %v726_v48, %v658_v54  ;;  %v1126_v6 = vmul.f32 %v2104_v23, %v2548_v39  ;;  %v1250_v29 = vadd.f32 %v2272_v32, %v1211_v0  ;;  %v1127_v5 = vmul.f32 %v2104_v23, %v2553_v11 }
  0x56   : > { %v1251_v19 = vadd.f32 %v2272_v32, %v1212_v10  ;;  %v340_v4 = vmul.f32 %v2353_v36, %v2084_v13  ;;  %v857_v46 = vadd.f32 %v825_v37, %v757_v52  ;;  %v341_v44 = vmul.f32 %v2356_v38, %v2084_v13  ;;  %v2587_v10 = vld [vmem:[%s2082_s10 + $0x138] sm:$0xff] }
  0x57   : > { %v858_v18 = vadd.f32 %v826_v35, %v758_v34  ;;  %v440_v31 = vmul.f32 %v2363_v58, %v2086_v14  ;;  %v1282_v40 = vmax.f32 %v1250_v29, 0.0  ;;  %v441_v60 = vmul.f32 %v2366_v62, %v2086_v14  ;;  %v2590_v34 = vld [vmem:[%s2082_s10 + $0x140] sm:$0xff] }
  0x58   : > { %v1283_v3 = vmax.f32 %v1251_v19, 0.0  ;;  %v540_v63 = vmul.f32 %v2375_v7, %v2088_v15  ;;  %v958_v41 = vadd.f32 %v926_v57, %v857_v46  ;;  %v541_v33 = vmul.f32 %v2378_v8, %v2088_v15  ;;  %v2595_v29 = vld [vmem:[%s2082_s10 + $0x139] sm:$0xff]  ;;  %v2598_v19 = vld [vmem:[%s2082_s10 + $0x141] sm:$0xff] }
  0x59   : > { %v959_v26 = vadd.f32 %v927_v1, %v858_v18  ;;  %v472_v36 = vadd.f32 %v440_v31, %v340_v4  ;;  %v473_v38 = vadd.f32 %v441_v60, %v341_v44  ;;  %v641_v58 = vmul.f32 %v2468_v27, %v2090_v16 }
  0x5a   : > { %v1304_v48 = vpack.c.bf16 %v1283_v3, %v1282_v40  ;;  %v642_v37 = vmul.f32 %v2471_v55, %v2090_v16  ;;  %v1058_v62 = vadd.f32 %v1026_v47, %v958_v41  ;;  %v741_v54 = vmul.f32 %v2479_v49, %v2095_v20  ;;  %v2612_v3 = vld [vmem:[%s2082_s10 + $0x142] sm:$0xff] }
  0x5b   : > { %v1059_v7 = vadd.f32 %v1027_v2, %v959_v26  ;;  %v572_v50 = vadd.f32 %v540_v63, %v472_v36  ;;  %v573_v8 = vadd.f32 %v541_v33, %v473_v38  ;;  %v742_v35 = vmul.f32 %v2482_v9, %v2095_v20 }
  0x5c   : > { %1986 = vmatprep.mubr.msk.bf16.mxu1 %vm1311_vm1, %v1304_v48  ;;  %v841_v57 = vmul.f32 %v2489_v25, %v2097_v21  ;;  %v842_v0 = vmul.f32 %v2492_v28, %v2097_v21  ;;  %v1158_v1 = vadd.f32 %v1126_v6, %v1058_v62  ;;  %v942_v2 = vmul.f32 %v2587_v10, %v2099_v22 }
  0x5d   : > { %v1159_v47 = vadd.f32 %v1127_v5, %v1059_v7  ;;  %v673_v52 = vadd.f32 %v641_v58, %v572_v50  ;;  %v674_v4 = vadd.f32 %v642_v37, %v573_v8  ;;  %v943_v46 = vmul.f32 %v2590_v34, %v2099_v22  ;;  %v2607_v5 = vld [vmem:[%s2082_s10 + $0x13a] sm:$0xff] }
  0x5e   : > { %v1042_v18 = vmul.f32 %v2595_v29, %v2112_v30  ;;  %v1043_v6 = vmul.f32 %v2598_v19, %v2112_v30  ;;  %v1197_v44 = vmul.f32 %v2258_v53, %v1158_v1  ;;  %v1142_v60 = vmul.f32 %v2104_v23, %v2607_v5 }
  0x5f   : > { %v1198_v31 = vmul.f32 %v2258_v53, %v1159_v47  ;;  %v773_v40 = vadd.f32 %v741_v54, %v673_v52  ;;  %v774_v63 = vadd.f32 %v742_v35, %v674_v4  ;;  %v1143_v41 = vmul.f32 %v2104_v23, %v2612_v3 }
  0x60   : > { %v326_v26 = vmul.f32 %v2408_v42, %v2084_v13  ;;  %v327_v36 = vmul.f32 %v2411_v43, %v2084_v13  ;;  %v1236_v33 = vadd.f32 %v2272_v32, %v1197_v44  ;;  %v426_v58 = vmul.f32 %v2414_v61, %v2086_v14 }
  0x61   : > { %v1237_v48 = vadd.f32 %v2272_v32, %v1198_v31  ;;  %v873_v38 = vadd.f32 %v841_v57, %v773_v40  ;;  %v874_v37 = vadd.f32 %v842_v0, %v774_v63  ;;  %v427_v62 = vmul.f32 %v2425_v24, %v2086_v14  ;;  %v2649_v40 = vld [vmem:[%s2082_s10 + $0x98] sm:$0xff] }
  0x62   : > { %v526_v7 = vmul.f32 %v2428_v12, %v2088_v15  ;;  %v527_v42 = vmul.f32 %v2431_v17, %v2088_v15  ;;  %v1268_v50 = vmax.f32 %v1236_v33, 0.0  ;;  %v458_v8 = vadd.f32 %v426_v58, %v326_v26  ;;  %v2654_v63 = vld [vmem:[%s2082_s10 + $0x91] sm:$0xff] }
  0x63   : > { %v1269_v43 = vmax.f32 %v1237_v48, 0.0  ;;  %v974_v54 = vadd.f32 %v942_v2, %v873_v38  ;;  %v975_v35 = vadd.f32 %v943_v46, %v874_v37  ;;  %v459_v57 = vadd.f32 %v427_v62, %v327_v36  ;;  %v2643_v46 = vld [vmem:[%s2082_s10 + $0x90] sm:$0xff]  ;;  %v2659_v48 = vld [vmem:[%s2082_s10 + $0x99] sm:$0xff] }
  0x64   : > { %v627_v61 = vmul.f32 %v2525_v45, %v2090_v16  ;;  %v628_v24 = vmul.f32 %v2531_v56, %v2090_v16  ;;  %v558_v1 = vadd.f32 %v526_v7, %v458_v8  ;;  %v727_v17 = vmul.f32 %v2536_v51, %v2095_v20  ;;  %v2664_v38 = vld [vmem:[%s2082_s10 + $0x92] sm:$0xff]  ;;  %v2670_v7 = vld [vmem:[%s2082_s10 + $0x9a] sm:$0xff] }
  0x65   : > { %v1297_v0 = vpack.c.bf16 %v1269_v43, %v1268_v50  ;;  %v1074_v12 = vadd.f32 %v1042_v18, %v974_v54  ;;  %v1075_v47 = vadd.f32 %v1043_v6, %v975_v35  ;;  %v559_v52 = vadd.f32 %v527_v42, %v459_v57 }
  0x66   : > { %v728_v2 = vmul.f32 %v2543_v59, %v2095_v20  ;;  %v827_v4 = vmul.f32 %v2548_v39, %v2097_v21  ;;  %v659_v44 = vadd.f32 %v627_v61, %v558_v1  ;;  %v828_v31 = vmul.f32 %v2553_v11, %v2097_v21 }
  0x67   : > { %1971 = vmatmul.mubr.msk.bf16.gmra.mrb[4].mxu0 %vm1311_vm1, %v1297_v0  ;;  %v1174_v18 = vadd.f32 %v1142_v60, %v1074_v12  ;;  %v928_v6 = vmul.f32 %v2643_v46, %v2099_v22  ;;  %v1175_v26 = vadd.f32 %v1143_v41, %v1075_v47  ;;  %v660_v36 = vadd.f32 %v628_v24, %v559_v52 }
  0x68   : > { %v929_v33 = vmul.f32 %v2649_v40, %v2099_v22  ;;  %v1028_v60 = vmul.f32 %v2654_v63, %v2112_v30  ;;  %v759_v37 = vadd.f32 %v727_v17, %v659_v44  ;;  %v1029_v62 = vmul.f32 %v2659_v48, %v2112_v30 }
  0x69   : > { %v1213_v58 = vmul.f32 %v2258_v53, %v1174_v18  ;;  %v1128_v41 = vmul.f32 %v2104_v23, %v2664_v38  ;;  %v1214_v42 = vmul.f32 %v2258_v53, %v1175_v26  ;;  %v760_v50 = vadd.f32 %v728_v2, %v660_v36 }
  0x6a   : > { %v1129_v43 = vmul.f32 %v2104_v23, %v2670_v7  ;;  %v342_v54 = vmul.f32 %v2468_v27, %v2084_v13  ;;  %v859_v35 = vadd.f32 %v827_v4, %v759_v37  ;;  %v343_v57 = vmul.f32 %v2471_v55, %v2084_v13  ;;  %v2704_v37 = vld [vmem:[%s2082_s10 + $0x150] sm:$0xff] }
  0x6b   : > { %v1252_v8 = vadd.f32 %v2272_v32, %v1213_v58  ;;  %v442_v61 = vmul.f32 %v2479_v49, %v2086_v14  ;;  %v1253_v24 = vadd.f32 %v2272_v32, %v1214_v42  ;;  %v860_v0 = vadd.f32 %v828_v31, %v760_v50  ;;  %v2707_v42 = vld [vmem:[%s2082_s10 + $0x158] sm:$0xff] }
  0x6c   : > { %v443_v12 = vmul.f32 %v2482_v9, %v2086_v14  ;;  %v542_v1 = vmul.f32 %v2489_v25, %v2088_v15  ;;  %v960_v27 = vadd.f32 %v928_v6, %v859_v35  ;;  %v543_v52 = vmul.f32 %v2492_v28, %v2088_v15  ;;  %v2718_v35 = vld [vmem:[%s2082_s10 + $0x159] sm:$0xff] }
  0x6d   : > { %v1284_v17 = vmax.f32 %v1252_v8, 0.0  ;;  %v474_v47 = vadd.f32 %v442_v61, %v342_v54  ;;  %v1285_v2 = vmax.f32 %v1253_v24, 0.0  ;;  %v961_v55 = vadd.f32 %v929_v33, %v860_v0  ;;  %v2715_v8 = vld [vmem:[%s2082_s10 + $0x151] sm:$0xff] }
  0x6e   : > { %v475_v49 = vadd.f32 %v443_v12, %v343_v57  ;;  %v643_v4 = vmul.f32 %v2587_v10, %v2090_v16  ;;  %v1060_v18 = vadd.f32 %v1028_v60, %v960_v27  ;;  %v644_v9 = vmul.f32 %v2590_v34, %v2090_v16  ;;  %v2726_v0 = vld [vmem:[%s2082_s10 + $0x152] sm:$0xff]  ;;  %v2729_v12 = vld [vmem:[%s2082_s10 + $0x15a] sm:$0xff] }
  0x6f   : > { %v574_v44 = vadd.f32 %v542_v1, %v474_v47  ;;  %v743_v25 = vmul.f32 %v2595_v29, %v2095_v20  ;;  %v1305_v31 = vpack.c.bf16 %v1285_v2, %v1284_v17  ;;  %v1061_v28 = vadd.f32 %v1029_v62, %v961_v55 }
  0x70   : > { %v575_v6 = vadd.f32 %v543_v52, %v475_v49  ;;  %v744_v26 = vmul.f32 %v2598_v19, %v2095_v20  ;;  %v1160_v36 = vadd.f32 %v1128_v41, %v1060_v18  ;;  %v843_v60 = vmul.f32 %v2607_v5, %v2097_v21 }
  0x71   : > { %v675_v33 = vadd.f32 %v643_v4, %v574_v44  ;;  %v844_v58 = vmul.f32 %v2612_v3, %v2097_v21  ;;  %1987 = vmatmul.mubr.msk.bf16.gmra.mrb[4].mxu1 %vm1311_vm1, %v1305_v31  ;;  %v1161_v62 = vadd.f32 %v1129_v43, %v1061_v28  ;;  %v944_v41 = vmul.f32 %v2704_v37, %v2099_v22 }
  0x72   : > { %v676_v50 = vadd.f32 %v644_v9, %v575_v6  ;;  %v945_v54 = vmul.f32 %v2707_v42, %v2099_v22  ;;  %v1199_v57 = vmul.f32 %v2258_v53, %v1160_v36  ;;  %v1044_v24 = vmul.f32 %v2715_v8, %v2112_v30 }
  0x73   : > { %v775_v61 = vadd.f32 %v743_v25, %v675_v33  ;;  %v1045_v43 = vmul.f32 %v2718_v35, %v2112_v30  ;;  %v1200_v1 = vmul.f32 %v2258_v53, %v1161_v62  ;;  %v1144_v27 = vmul.f32 %v2104_v23, %v2726_v0 }
  0x74   : > { %v776_v17 = vadd.f32 %v744_v26, %v676_v50  ;;  %v1145_v47 = vmul.f32 %v2104_v23, %v2729_v12  ;;  %v1238_v52 = vadd.f32 %v2272_v32, %v1199_v57  ;;  %v328_v55 = vmul.f32 %v2525_v45, %v2084_v13  ;;  %v2763_v57 = vld [vmem:[%s2082_s10 + $0xa8] sm:$0xff] }
  0x75   : > { %v875_v2 = vadd.f32 %v843_v60, %v775_v61  ;;  %v329_v49 = vmul.f32 %v2531_v56, %v2084_v13  ;;  %v1239_v4 = vadd.f32 %v2272_v32, %v1200_v1  ;;  %v428_v44 = vmul.f32 %v2536_v51, %v2086_v14  ;;  %v2767_v1 = vld [vmem:[%s2082_s10 + $0xb0] sm:$0xff] }
  0x76   : > { %v876_v18 = vadd.f32 %v844_v58, %v776_v17  ;;  %v429_v9 = vmul.f32 %v2543_v59, %v2086_v14  ;;  %v1270_v25 = vmax.f32 %v1238_v52, 0.0  ;;  %v528_v31 = vmul.f32 %v2548_v39, %v2088_v15  ;;  %v2775_v52 = vld [vmem:[%s2082_s10 + $0xb1] sm:$0xff] }
  0x77   : > { %v976_v23 = vadd.f32 %v944_v41, %v875_v2  ;;  %v529_v45 = vmul.f32 %v2553_v11, %v2088_v15  ;;  %v1271_v28 = vmax.f32 %v1239_v4, 0.0  ;;  %v460_v6 = vadd.f32 %v428_v44, %v328_v55  ;;  %v2785_v4 = vld [vmem:[%s2082_s10 + $0xaa] sm:$0xff] }
  0x78   : > { %v977_v56 = vadd.f32 %v945_v54, %v876_v18  ;;  %v461_v26 = vadd.f32 %v429_v9, %v329_v49  ;;  %v629_v51 = vmul.f32 %v2643_v46, %v2090_v16  ;;  %v630_v59 = vmul.f32 %v2649_v40, %v2090_v16 }
  0x79   : > { %v1076_v36 = vadd.f32 %v1044_v24, %v976_v23  ;;  %v729_v33 = vmul.f32 %v2654_v63, %v2095_v20  ;;  %v1298_v39 = vpack.c.bf16 %v1271_v28, %v1270_v25  ;;  %v560_v60 = vadd.f32 %v528_v31, %v460_v6  ;;  %v2789_v25 = vld [vmem:[%s2082_s10 + $0xb2] sm:$0xff]  ;;  %v2794_v23 = vld [vmem:[%s3225_s1 + $0x8] ss:$0 sm:$0xff] }
  0x7a   : > { %v1077_v11 = vadd.f32 %v1045_v43, %v977_v56  ;;  %v561_v58 = vadd.f32 %v529_v45, %v461_v26  ;;  %v730_v50 = vmul.f32 %v2659_v48, %v2095_v20  ;;  %v829_v41 = vmul.f32 %v2664_v38, %v2097_v21 }
  0x7b   : > { %v1176_v62 = vadd.f32 %v1144_v27, %v1076_v36  ;;  %v830_v54 = vmul.f32 %v2670_v7, %v2097_v21  ;;  %1974 = vmatprep.mubr.msk.bf16.mxu0 %vm1311_vm1, %v1298_v39  ;;  %v661_v24 = vadd.f32 %v629_v51, %v560_v60  ;;  %v930_v17 = vmul.f32 %v2763_v57, %v2099_v22  ;;  %v2772_v27 = vld [vmem:[%s2082_s10 + $0xa9] sm:$0xff] }
  0x7c   : > { %v1177_v61 = vadd.f32 %v1145_v47, %v1077_v11  ;;  %v662_v43 = vadd.f32 %v630_v59, %v561_v58  ;;  %v931_v55 = vmul.f32 %v2767_v1, %v2099_v22  ;;  %v1030_v49 = vmul.f32 %v2772_v27, %v2112_v30 }
  0x7d   : > { %v1215_v2 = vmul.f32 %v2258_v53, %v1176_v62  ;;  %v1031_v47 = vmul.f32 %v2775_v52, %v2112_v30  ;;  %v761_v44 = vadd.f32 %v729_v33, %v661_v24  ;;  %v1130_v31 = vmul.f32 %v2794_v23, %v2785_v4 }
  0x7e   : > { %v1216_v18 = vmul.f32 %v2258_v53, %v1177_v61  ;;  %v762_v9 = vadd.f32 %v730_v50, %v662_v43  ;;  %v1131_v28 = vmul.f32 %v2794_v23, %v2789_v25  ;;  %v344_v56 = vmul.f32 %v2587_v10, %v2084_v13 }
  0x7f   : > { %v1254_v45 = vadd.f32 %v2272_v32, %v1215_v2  ;;  %v345_v6 = vmul.f32 %v2590_v34, %v2084_v13  ;;  %v861_v36 = vadd.f32 %v829_v41, %v761_v44  ;;  %v444_v59 = vmul.f32 %v2595_v29, %v2086_v14  ;;  %v2831_v44 = vld [vmem:[%s2082_s10 + $0x170] sm:$0xff] }
  0x80   : > { %v1255_v26 = vadd.f32 %v2272_v32, %v1216_v18  ;;  %v862_v51 = vadd.f32 %v830_v54, %v762_v9  ;;  %v445_v39 = vmul.f32 %v2598_v19, %v2086_v14  ;;  %v544_v11 = vmul.f32 %v2607_v5, %v2088_v15 }
  0x81   : > { %v1286_v33 = vmax.f32 %v1254_v45, 0.0  ;;  %v545_v10 = vmul.f32 %v2612_v3, %v2088_v15  ;;  %v962_v34 = vadd.f32 %v930_v17, %v861_v36  ;;  %v476_v62 = vadd.f32 %v444_v59, %v344_v56  ;;  %v2836_v45 = vld [vmem:[%s2082_s10 + $0x169] sm:$0xff]  ;;  %v2839_v56 = vld [vmem:[%s2082_s10 + $0x171] sm:$0xff] }
  0x82   : > { %v1287_v60 = vmax.f32 %v1255_v26, 0.0  ;;  %v963_v58 = vadd.f32 %v931_v55, %v862_v51  ;;  %v477_v50 = vadd.f32 %v445_v39, %v345_v6  ;;  %v645_v41 = vmul.f32 %v2704_v37, %v2090_v16  ;;  %v2827_v55 = vld [vmem:[%s2082_s10 + $0x168] sm:$0xff]  ;;  %v2853_v39 = vld [vmem:[%s2082_s10 + $0x172] sm:$0xff] }
  0x83   : > { %v646_v29 = vmul.f32 %v2707_v42, %v2090_v16  ;;  %v745_v19 = vmul.f32 %v2715_v8, %v2095_v20  ;;  %v1062_v3 = vadd.f32 %v1030_v49, %v962_v34  ;;  %v576_v61 = vadd.f32 %v544_v11, %v476_v62 }
  0x84   : > { %v1306_v5 = vpack.c.bf16 %v1287_v60, %v1286_v33  ;;  %v1063_v54 = vadd.f32 %v1031_v47, %v963_v58  ;;  %v577_v24 = vadd.f32 %v545_v10, %v477_v50  ;;  %v746_v43 = vmul.f32 %v2718_v35, %v2095_v20 }
  0x85   : > { %v845_v17 = vmul.f32 %v2726_v0, %v2097_v21  ;;  %v846_v2 = vmul.f32 %v2729_v12, %v2097_v21  ;;  %v1162_v18 = vadd.f32 %v1130_v31, %v1062_v3  ;;  %v677_v47 = vadd.f32 %v645_v41, %v576_v61 }
  0x86   : > { %1990 = vmatprep.mubr.msk.bf16.mxu1 %vm1311_vm1, %v1306_v5  ;;  %v1163_v49 = vadd.f32 %v1131_v28, %v1063_v54  ;;  %v946_v9 = vmul.f32 %v2827_v55, %v2099_v22  ;;  %v678_v6 = vadd.f32 %v646_v29, %v577_v24  ;;  %v947_v26 = vmul.f32 %v2831_v44, %v2099_v22  ;;  %v2848_v28 = vld [vmem:[%s2082_s10 + $0x16a] sm:$0xff] }
  0x87   : > { %v1046_v36 = vmul.f32 %v2836_v45, %v2112_v30  ;;  %v1047_v31 = vmul.f32 %v2839_v56, %v2112_v30  ;;  %v1201_v51 = vmul.f32 %v2258_v53, %v1162_v18  ;;  %v777_v33 = vadd.f32 %v745_v19, %v677_v47 }
  0x88   : > { %v1202_v59 = vmul.f32 %v2258_v53, %v1163_v49  ;;  %v1146_v11 = vmul.f32 %v2794_v23, %v2848_v28  ;;  %v778_v10 = vadd.f32 %v746_v43, %v678_v6  ;;  %v1147_v60 = vmul.f32 %v2794_v23, %v2853_v39 }
  0x89   : > { %v330_v34 = vmul.f32 %v2643_v46, %v2084_v13  ;;  %v331_v58 = vmul.f32 %v2649_v40, %v2084_v13  ;;  %v1240_v62 = vadd.f32 %v2272_v32, %v1201_v51  ;;  %v877_v50 = vadd.f32 %v845_v17, %v777_v33  ;;  %v2890_v51 = vld [vmem:[%s2082_s10 + $0xc8] sm:$0xff] }
  0x8a   : > { %v1241_v53 = vadd.f32 %v2272_v32, %v1202_v59  ;;  %v430_v41 = vmul.f32 %v2654_v63, %v2086_v14  ;;  %v878_v29 = vadd.f32 %v846_v2, %v778_v10  ;;  %v431_v19 = vmul.f32 %v2659_v48, %v2086_v14  ;;  %v2895_v59 = vld [vmem:[%s2082_s10 + $0xc1] sm:$0xff] }
  0x8b   : > { %v530_v5 = vmul.f32 %v2664_v38, %v2088_v15  ;;  %v531_v46 = vmul.f32 %v2670_v7, %v2088_v15  ;;  %v1272_v3 = vmax.f32 %v1240_v62, 0.0  ;;  %v978_v54 = vadd.f32 %v946_v9, %v877_v50  ;;  %v2884_v9 = vld [vmem:[%s2082_s10 + $0xc0] sm:$0xff] }
  0x8c   : > { %v1273_v40 = vmax.f32 %v1241_v53, 0.0  ;;  %v462_v61 = vadd.f32 %v430_v41, %v330_v34  ;;  %v979_v32 = vadd.f32 %v947_v26, %v878_v29  ;;  %v463_v24 = vadd.f32 %v431_v19, %v331_v58  ;;  %v2900_v58 = vld [vmem:[%s2082_s10 + $0xc9] sm:$0xff]  ;;  %v2910_v53 = vld [vmem:[%s3226_s2] ss:$0 sm:$0xff] }
  0x8d   : > { %v631_v63 = vmul.f32 %v2763_v57, %v2090_v16  ;;  %v632_v48 = vmul.f32 %v2767_v1, %v2090_v16  ;;  %v1078_v38 = vadd.f32 %v1046_v36, %v978_v54  ;;  %v731_v7 = vmul.f32 %v2772_v27, %v2095_v20  ;;  %v2905_v62 = vld [vmem:[%s2082_s10 + $0xc2] sm:$0xff]  ;;  %v2916_v29 = vld [vmem:[%s2082_s10 + $0xca] sm:$0xff]  ;;  %v2928_v54 = vld [vmem:[%s3227_s3] ss:$0 sm:$0xff] }
  0x8e   : > { %v1299_v43 = vpack.c.bf16 %v1273_v40, %v1272_v3  ;;  %v562_v17 = vadd.f32 %v530_v5, %v462_v61  ;;  %v1079_v2 = vadd.f32 %v1047_v31, %v979_v32  ;;  %v563_v18 = vadd.f32 %v531_v46, %v463_v24 }
  0x8f   : > { %v732_v49 = vmul.f32 %v2775_v52, %v2095_v20  ;;  %v831_v47 = vmul.f32 %v2785_v4, %v2097_v21  ;;  %v1178_v6 = vadd.f32 %v1146_v11, %v1078_v38  ;;  %v832_v36 = vmul.f32 %v2789_v25, %v2097_v21 }
  0x90   : > { %1975 = vmatmul.mubr.msk.bf16.gmra.mrb[8].mxu0 %vm1311_vm1, %v1299_v43  ;;  %v663_v26 = vadd.f32 %v631_v63, %v562_v17  ;;  %v932_v31 = vmul.f32 %v2884_v9, %v2099_v22  ;;  %v1179_v33 = vadd.f32 %v1147_v60, %v1079_v2  ;;  %v664_v10 = vadd.f32 %v632_v48, %v563_v18 }
  0x91   : > { %v933_v34 = vmul.f32 %v2890_v51, %v2099_v22  ;;  %v1032_v11 = vmul.f32 %v2895_v59, %v2112_v30  ;;  %v1217_v50 = vmul.f32 %v2910_v53, %v1178_v6  ;;  %v1033_v60 = vmul.f32 %v2900_v58, %v2112_v30 }
  0x92   : > { %v763_v41 = vadd.f32 %v731_v7, %v663_v26  ;;  %v1132_v19 = vmul.f32 %v2794_v23, %v2905_v62  ;;  %v1218_v5 = vmul.f32 %v2910_v53, %v1179_v33  ;;  %v764_v46 = vadd.f32 %v732_v49, %v664_v10 }
  0x93   : > { %v1133_v3 = vmul.f32 %v2794_v23, %v2916_v29  ;;  %v346_v40 = vmul.f32 %v2704_v37, %v2084_v13  ;;  %v1256_v61 = vadd.f32 %v2928_v54, %v1217_v50  ;;  %v347_v24 = vmul.f32 %v2707_v42, %v2084_v13 }
  0x94   : > { %v863_v32 = vadd.f32 %v831_v47, %v763_v41  ;;  %v446_v63 = vmul.f32 %v2715_v8, %v2086_v14  ;;  %v1257_v48 = vadd.f32 %v2928_v54, %v1218_v5  ;;  %v864_v43 = vadd.f32 %v832_v36, %v764_v46  ;;  %v2955_v41 = vld [vmem:[%s2082_s10 + $0x180] sm:$0xff]  ;;  %v2958_v5 = vld [vmem:[%s2082_s10 + $0x188] sm:$0xff] }
  0x95   : > { %v447_v37 = vmul.f32 %v2718_v35, %v2086_v14  ;;  %v546_v38 = vmul.f32 %v2726_v0, %v2088_v15  ;;  %v1288_v17 = vmax.f32 %v1256_v61, 0.0  ;;  %v547_v18 = vmul.f32 %v2729_v12, %v2088_v15  ;;  %v2966_v61 = vld [vmem:[%s2082_s10 + $0x181] sm:$0xff] }
  0x96   : > { %v964_v7 = vadd.f32 %v932_v31, %v863_v32  ;;  %v478_v2 = vadd.f32 %v446_v63, %v346_v40  ;;  %v1289_v49 = vmax.f32 %v1257_v48, 0.0  ;;  %v965_v42 = vadd.f32 %v933_v34, %v864_v43  ;;  %v2969_v32 = vld [vmem:[%s2082_s10 + $0x189] sm:$0xff] }
  0x97   : > { %v479_v8 = vadd.f32 %v447_v37, %v347_v24  ;;  %v647_v47 = vmul.f32 %v2827_v55, %v2090_v16  ;;  %v648_v35 = vmul.f32 %v2831_v44, %v2090_v16  ;;  %v747_v0 = vmul.f32 %v2836_v45, %v2095_v20  ;;  %v2977_v43 = vld [vmem:[%s2082_s10 + $0x182] sm:$0xff]  ;;  %v2980_v37 = vld [vmem:[%s2082_s10 + $0x18a] sm:$0xff] }
  0x98   : > { %v1064_v6 = vadd.f32 %v1032_v11, %v964_v7  ;;  %v578_v26 = vadd.f32 %v546_v38, %v478_v2  ;;  %v1307_v36 = vpack.c.bf16 %v1289_v49, %v1288_v17  ;;  %v1065_v12 = vadd.f32 %v1033_v60, %v965_v42 }
  0x99   : > { %v579_v31 = vadd.f32 %v547_v18, %v479_v8  ;;  %v748_v33 = vmul.f32 %v2839_v56, %v2095_v20  ;;  %v847_v11 = vmul.f32 %v2848_v28, %v2097_v21  ;;  %v848_v50 = vmul.f32 %v2853_v39, %v2097_v21 }
  0x9a   : > { %v1164_v10 = vadd.f32 %v1132_v19, %v1064_v6  ;;  %v679_v34 = vadd.f32 %v647_v47, %v578_v26  ;;  %1991 = vmatmul.mubr.msk.bf16.gmra.mrb[8].mxu1 %vm1311_vm1, %v1307_v36  ;;  %v1165_v60 = vadd.f32 %v1133_v3, %v1065_v12  ;;  %v948_v19 = vmul.f32 %v2955_v41, %v2099_v22 }
  0x9b   : > { %v680_v46 = vadd.f32 %v648_v35, %v579_v31  ;;  %v949_v40 = vmul.f32 %v2958_v5, %v2099_v22  ;;  %v1048_v48 = vmul.f32 %v2966_v61, %v2112_v30  ;;  %v1049_v3 = vmul.f32 %v2969_v32, %v2112_v30 }
  0x9c   : > { %v1203_v24 = vmul.f32 %v2910_v53, %v1164_v10  ;;  %v779_v63 = vadd.f32 %v747_v0, %v679_v34  ;;  %v1204_v38 = vmul.f32 %v2910_v53, %v1165_v60  ;;  %v1148_v7 = vmul.f32 %v2794_v23, %v2977_v43 }
  0x9d   : > { %v780_v17 = vadd.f32 %v748_v33, %v680_v46  ;;  %v1149_v2 = vmul.f32 %v2794_v23, %v2980_v37  ;;  %v332_v42 = vmul.f32 %v2763_v57, %v2084_v13  ;;  %v333_v8 = vmul.f32 %v2767_v1, %v2084_v13 }
  0x9e   : > { %v1242_v18 = vadd.f32 %v2928_v54, %v1203_v24  ;;  %v879_v49 = vadd.f32 %v847_v11, %v779_v63  ;;  %v1243_v47 = vadd.f32 %v2928_v54, %v1204_v38  ;;  %v432_v26 = vmul.f32 %v2772_v27, %v2086_v14  ;;  %v1841_v11 = vld [vmem:[%s2082_s10 + $0xd8] sm:$0xff]  ;;  %v1874_v24 = vld [vmem:[%s2082_s10 + $0xe1] sm:$0xff] }
  0x9f   : > { %v880_v6 = vadd.f32 %v848_v50, %v780_v17  ;;  %v433_v35 = vmul.f32 %v2775_v52, %v2086_v14  ;;  %v532_v12 = vmul.f32 %v2785_v4, %v2088_v15  ;;  %v533_v57 = vmul.f32 %v2789_v25, %v2088_v15 }
  0xa0   : > { %v1274_v0 = vmax.f32 %v1242_v18, 0.0  ;;  %v980_v36 = vadd.f32 %v948_v19, %v879_v49  ;;  %v1275_v1 = vmax.f32 %v1243_v47, 0.0  ;;  %v464_v33 = vadd.f32 %v432_v26, %v332_v42  ;;  %v1842_v19 = vld [vmem:[%s2082_s10 + $0xe0] sm:$0xff] }
  0xa1   : > { %v981_v31 = vadd.f32 %v949_v40, %v880_v6  ;;  %v465_v10 = vadd.f32 %v433_v35, %v333_v8  ;;  %v633_v27 = vmul.f32 %v2884_v9, %v2090_v16  ;;  %v634_v52 = vmul.f32 %v2890_v51, %v2090_v16  ;;  %v1873_v40 = vld [vmem:[%s2082_s10 + $0xd9] sm:$0xff]  ;;  %v1906_v49 = vld [vmem:[%s2082_s10 + $0xe2] sm:$0xff] }
  0xa2   : > { %v1080_v34 = vadd.f32 %v1048_v48, %v980_v36  ;;  %v733_v4 = vmul.f32 %v2895_v59, %v2095_v20  ;;  %v1300_v50 = vpack.c.bf16 %v1275_v1, %v1274_v0  ;;  %v564_v25 = vadd.f32 %v532_v12, %v464_v33  ;;  %v1905_v59 = vld [vmem:[%s2082_s10 + $0xda] sm:$0xff] }
  0xa3   : > { %v1081_v60 = vadd.f32 %v1049_v3, %v981_v31  ;;  %v565_v46 = vadd.f32 %v533_v57, %v465_v10  ;;  %v734_v48 = vmul.f32 %v2900_v58, %v2095_v20  ;;  %v833_v9 = vmul.f32 %v2905_v62, %v2097_v21 }
  0xa4   : > { %v1180_v63 = vadd.f32 %v1148_v7, %v1080_v34  ;;  %v834_v51 = vmul.f32 %v2916_v29, %v2097_v21  ;;  %1978 = vmatprep.mubr.msk.bf16.mxu0 %vm1311_vm1, %v1300_v50  ;;  %v665_v38 = vadd.f32 %v633_v27, %v564_v25  ;;  %v934_v18 = vmul.f32 %v1841_v11, %v2099_v22 }
  0xa5   : > { %v1181_v3 = vadd.f32 %v1149_v2, %v1081_v60  ;;  %v666_v17 = vadd.f32 %v634_v52, %v565_v46  ;;  %v935_v42 = vmul.f32 %v1842_v19, %v2099_v22  ;;  %v1034_v58 = vmul.f32 %v1873_v40, %v2112_v30  ;;  %v1857_v60 = vld [vmem:[%s2082_s10 + $0x198] sm:$0xff] }
  0xa6   : > { %v1219_v7 = vmul.f32 %v2910_v53, %v1180_v63  ;;  %v1035_v62 = vmul.f32 %v1874_v24, %v2112_v30  ;;  %v765_v29 = vadd.f32 %v733_v4, %v665_v38  ;;  %v1134_v6 = vmul.f32 %v2794_v23, %v1905_v59  ;;  %v1889_v40 = vld [vmem:[%s2082_s10 + $0x199] sm:$0xff] }
  0xa7   : > { %v1220_v8 = vmul.f32 %v2910_v53, %v1181_v3  ;;  %v766_v47 = vadd.f32 %v734_v48, %v666_v17  ;;  %v1135_v26 = vmul.f32 %v2794_v23, %v1906_v49  ;;  %v348_v35 = vmul.f32 %v2827_v55, %v2084_v13  ;;  %v1890_v48 = vld [vmem:[%s2082_s10 + $0x1a1] sm:$0xff] }
  0xa8   : > { %v1258_v2 = vadd.f32 %v2928_v54, %v1219_v7  ;;  %v349_v0 = vmul.f32 %v2831_v44, %v2084_v13  ;;  %v865_v12 = vadd.f32 %v833_v9, %v765_v29  ;;  %v448_v1 = vmul.f32 %v2836_v45, %v2086_v14  ;;  %v1921_v59 = vld [vmem:[%s2082_s10 + $0x19a] sm:$0xff] }
  0xa9   : > { %v1259_v36 = vadd.f32 %v2928_v54, %v1220_v8  ;;  %v866_v57 = vadd.f32 %v834_v51, %v766_v47  ;;  %v449_v33 = vmul.f32 %v2839_v56, %v2086_v14  ;;  %v548_v10 = vmul.f32 %v2848_v28, %v2088_v15 }
  0xaa   : > { %v1290_v31 = vmax.f32 %v1258_v2, 0.0  ;;  %v549_v55 = vmul.f32 %v2853_v39, %v2088_v15  ;;  %v966_v13 = vadd.f32 %v934_v18, %v865_v12  ;;  %v480_v27 = vadd.f32 %v448_v1, %v348_v35 }
  0xab   : > { %v1291_v34 = vmax.f32 %v1259_v36, 0.0  ;;  %v967_v44 = vadd.f32 %v935_v42, %v866_v57  ;;  %v481_v52 = vadd.f32 %v449_v33, %v349_v0  ;;  %v649_v45 = vmul.f32 %v2955_v41, %v2090_v16 }
  0xac   : > { %v650_v4 = vmul.f32 %v2958_v5, %v2090_v16  ;;  %v749_v14 = vmul.f32 %v2966_v61, %v2095_v20  ;;  %v1066_v28 = vadd.f32 %v1034_v58, %v966_v13  ;;  %v580_v15 = vadd.f32 %v548_v10, %v480_v27  ;;  %v1858_v61 = vld [vmem:[%s2082_s10 + $0x1a0] sm:$0xff] }
  0xad   : > { %v1308_v56 = vpack.c.bf16 %v1291_v34, %v1290_v31  ;;  %v1067_v11 = vadd.f32 %v1035_v62, %v967_v44  ;;  %v581_v39 = vadd.f32 %v549_v55, %v481_v52  ;;  %v750_v50 = vmul.f32 %v2969_v32, %v2095_v20  ;;  %v3085_v31 = vld [vmem:[%s3230_s6] ss:$0 sm:$0xff] }
  0xae   : > { %v1166_v41 = vadd.f32 %v1134_v6, %v1066_v28  ;;  %v681_v16 = vadd.f32 %v649_v45, %v580_v15  ;;  %v849_v5 = vmul.f32 %v2977_v43, %v2097_v21  ;;  %v850_v19 = vmul.f32 %v2980_v37, %v2097_v21  ;;  %v1922_v37 = vld [vmem:[%s2082_s10 + $0x1a2] sm:$0xff] }
  0xaf   : > { %1994 = vmatprep.mubr.msk.bf16.mxu1 %vm1311_vm1, %v1308_v56  ;;  %v1167_v25 = vadd.f32 %v1135_v26, %v1067_v11  ;;  %v682_v46 = vadd.f32 %v650_v4, %v581_v39  ;;  %v950_v63 = vmul.f32 %v1857_v60, %v2099_v22  ;;  %v951_v51 = vmul.f32 %v1858_v61, %v2099_v22 }
  0xb0   : > { %v1205_v24 = vmul.f32 %v2910_v53, %v1166_v41  ;;  %v781_v32 = vadd.f32 %v749_v14, %v681_v16  ;;  %v1050_v21 = vmul.f32 %v1889_v40, %v2112_v30  ;;  %v1051_v18 = vmul.f32 %v1890_v48, %v2112_v30 }
  0xb1   : > { %v1206_v20 = vmul.f32 %v2910_v53, %v1167_v25  ;;  %v782_v9 = vadd.f32 %v750_v50, %v682_v46  ;;  %v1150_v58 = vmul.f32 %v2794_v23, %v1921_v59  ;;  %v1151_v22 = vmul.f32 %v2794_v23, %v1922_v37  ;;  %v3080_v23 = vld [vmem:[%s3229_s5] ss:$0 sm:$0xff] }
  0xb2   : > { %v1244_v43 = vadd.f32 %v2928_v54, %v1205_v24  ;;  %v881_v38 = vadd.f32 %v849_v5, %v781_v32 }
  0xb3   : > { %v1245_v3 = vadd.f32 %v2928_v54, %v1206_v20  ;;  %v882_v17 = vadd.f32 %v850_v19, %v782_v9 }
  0xb4   : > { %v1276_v49 = vmax.f32 %v1244_v43, 0.0  ;;  %v982_v42 = vadd.f32 %v950_v63, %v881_v38 }
  0xb5   : > { %v1277_v7 = vmax.f32 %v1245_v3, 0.0  ;;  %v983_v62 = vadd.f32 %v951_v51, %v882_v17 }
  0xb6   : > { %v1082_v29 = vadd.f32 %v1050_v21, %v982_v42 }
  0xb7   : > { %v1301_v8 = vpack.c.bf16 %v1277_v7, %v1276_v49  ;;  %v1083_v47 = vadd.f32 %v1051_v18, %v983_v62 }
  0xb8   : > { %v1182_v6 = vadd.f32 %v1150_v58, %v1082_v29 }
  0xb9   : > { %1979 = vmatmul.mubr.msk.bf16.gmra.mrb[12].mxu0 %vm1311_vm1, %v1301_v8  ;;  %v1183_v2 = vadd.f32 %v1151_v22, %v1083_v47 }
  0xba   : > { %v1221_v26 = vmul.f32 %v2910_v53, %v1182_v6 }
  0xbb   : > { %v1222_v30 = vmul.f32 %v2910_v53, %v1183_v2 }
  0xbc   : > { %v1260_v35 = vadd.f32 %v2928_v54, %v1221_v26 }
  0xbd   : > { %v1261_v0 = vadd.f32 %v2928_v54, %v1222_v30 }
  0xbe   : > { %v1292_v36 = vmax.f32 %v1260_v35, 0.0 }
  0xbf   : > { %v1293_v12 = vmax.f32 %v1261_v0, 0.0 }
  0xc1   : > { %v1309_v57 = vpack.c.bf16 %v1293_v12, %v1292_v36 }
  0xc3   : > { %1995 = vmatmul.mubr.msk.bf16.gmra.mrb[12].mxu1 %vm1311_vm1, %v1309_v57 }
 0x10f   : > { %v1968_v1 = vpop.f32.mrb[0].mxu0 }
 0x110   : > { %v1534_v53 = vmul.f32 %v1968_v1, %v3080_v23  ;;  %v1398_v54 = vpop.f32.mrb[1].mxu0 }
 0x111   : > { %v1532_v33 = vmul.f32 %v3080_v23, %v1398_v54  ;;  %v1969_v10 = vpop.f32.mrb[2].mxu0 }
 0x112   : > { %v1573_v55 = vadd.f32 %v3085_v31, %v1534_v53  ;;  %v1535_v34 = vmul.f32 %v1969_v10, %v3080_v23  ;;  %v1401_v13 = vpop.f32.mrb[3].mxu0 }
 0x113   : > { %v1571_v44 = vadd.f32 %v3085_v31, %v1532_v33  ;;  %v1533_v27 = vmul.f32 %v3080_v23, %v1401_v13 }
 0x114   : > { %v1605_v52 = vmax.f32 %v1573_v55, 0.0  ;;  %v1574_v45 = vadd.f32 %v3085_v31, %v1535_v34 }
 0x115   : > { %v1603_v4 = vmax.f32 %v1571_v44, 0.0  ;;  %v1572_v14 = vadd.f32 %v3085_v31, %v1533_v27 }
 0x116   : > { %1638 = vst.msk [vmem:[%s3095_s9 + $0x10] sm:$0xff] %vm1635_vm2, %v1605_v52  ;;  %v1606_v56 = vmax.f32 %v1574_v45, 0.0 }
 0x117   : > { %1636 = vst.msk [vmem:[%s3095_s9] sm:$0xff] %vm1635_vm2, %v1603_v4  ;;  %v1604_v28 = vmax.f32 %v1572_v14, 0.0 }
 0x118   : > { %1639 = vst.msk [vmem:[%s3095_s9 + $0x18] sm:$0xff] %vm1635_vm2, %v1606_v56 }
 0x119   : > { %1637 = vst.msk [vmem:[%s3095_s9 + $0x8] sm:$0xff] %vm1635_vm2, %v1604_v28 }
 0x11c   : > { %v1984_v11 = vpop.f32.mrb[0].mxu1 }
 0x11d   : > { %v1550_v15 = vmul.f32 %v1984_v11, %v3080_v23  ;;  %v1462_v39 = vpop.f32.mrb[1].mxu1 }
 0x11e   : > { %v1548_v50 = vmul.f32 %v3080_v23, %v1462_v39  ;;  %v1985_v60 = vpop.f32.mrb[2].mxu1 }
 0x11f   : > { %v1589_v41 = vadd.f32 %v3085_v31, %v1550_v15  ;;  %v1551_v25 = vmul.f32 %v1985_v60, %v3080_v23  ;;  %v1465_v16 = vpop.f32.mrb[3].mxu1 }
 0x120   : > { %v1587_v5 = vadd.f32 %v3085_v31, %v1548_v50  ;;  %v1549_v61 = vmul.f32 %v3080_v23, %v1465_v16 }
 0x121   : > { %v1621_v46 = vmax.f32 %v1589_v41, 0.0  ;;  %v1590_v19 = vadd.f32 %v3085_v31, %v1551_v25 }
 0x122   : > { %v1619_v40 = vmax.f32 %v1587_v5, 0.0  ;;  %v1588_v24 = vadd.f32 %v3085_v31, %v1549_v61 }
 0x123   : > { %1654 = vst.msk [vmem:[%s3095_s9 + $0x90] sm:$0xff] %vm1635_vm2, %v1621_v46  ;;  %v1622_v20 = vmax.f32 %v1590_v19, 0.0 }
 0x124   : > { %1652 = vst.msk [vmem:[%s3095_s9 + $0x80] sm:$0xff] %vm1635_vm2, %v1619_v40  ;;  %v1620_v32 = vmax.f32 %v1588_v24, 0.0 }
 0x125   : > { %1655 = vst.msk [vmem:[%s3095_s9 + $0x98] sm:$0xff] %vm1635_vm2, %v1622_v20 }
 0x126   : > { %1653 = vst.msk [vmem:[%s3095_s9 + $0x88] sm:$0xff] %vm1635_vm2, %v1620_v32 }
 0x13a   : > { %v1972_v63 = vpop.f32.mrb[4].mxu0 }
 0x13b   : > { %v1538_v48 = vmul.f32 %v1972_v63, %v3080_v23  ;;  %v1414_v9 = vpop.f32.mrb[5].mxu0 }
 0x13c   : > { %v1536_v51 = vmul.f32 %v3080_v23, %v1414_v9  ;;  %v1973_v59 = vpop.f32.mrb[6].mxu0 }
 0x13d   : > { %v1577_v43 = vadd.f32 %v3085_v31, %v1538_v48  ;;  %v1539_v3 = vmul.f32 %v1973_v59, %v3080_v23  ;;  %v1417_v38 = vpop.f32.mrb[7].mxu0 }
 0x13e   : > { %v1575_v21 = vadd.f32 %v3085_v31, %v1536_v51  ;;  %v1537_v37 = vmul.f32 %v3080_v23, %v1417_v38 }
 0x13f   : > { %v1609_v17 = vmax.f32 %v1577_v43, 0.0  ;;  %v1578_v18 = vadd.f32 %v3085_v31, %v1539_v3 }
 0x140   : > { %v1607_v49 = vmax.f32 %v1575_v21, 0.0  ;;  %v1576_v7 = vadd.f32 %v3085_v31, %v1537_v37 }
 0x141   : > { %1642 = vst.msk [vmem:[%s3095_s9 + $0x30] sm:$0xff] %vm1635_vm2, %v1609_v17  ;;  %v1610_v42 = vmax.f32 %v1578_v18, 0.0 }
 0x142   : > { %1640 = vst.msk [vmem:[%s3095_s9 + $0x20] sm:$0xff] %vm1635_vm2, %v1607_v49  ;;  %v1608_v58 = vmax.f32 %v1576_v7, 0.0 }
 0x143   : > { %1643 = vst.msk [vmem:[%s3095_s9 + $0x38] sm:$0xff] %vm1635_vm2, %v1610_v42 }
 0x144   : > { %1641 = vst.msk [vmem:[%s3095_s9 + $0x28] sm:$0xff] %vm1635_vm2, %v1608_v58  ;;  %v1988_v62 = vpop.f32.mrb[4].mxu1 }
 0x145   : > { %v1554_v22 = vmul.f32 %v1988_v62, %v3080_v23  ;;  %v1478_v8 = vpop.f32.mrb[5].mxu1 }
 0x146   : > { %v1552_v29 = vmul.f32 %v3080_v23, %v1478_v8  ;;  %v1989_v47 = vpop.f32.mrb[6].mxu1 }
 0x147   : > { %v1593_v6 = vadd.f32 %v3085_v31, %v1554_v22  ;;  %v1555_v2 = vmul.f32 %v1989_v47, %v3080_v23  ;;  %v1481_v26 = vpop.f32.mrb[7].mxu1 }
 0x148   : > { %v1591_v30 = vadd.f32 %v3085_v31, %v1552_v29  ;;  %v1553_v35 = vmul.f32 %v3080_v23, %v1481_v26 }
 0x149   : > { %v1625_v0 = vmax.f32 %v1593_v6, 0.0  ;;  %v1594_v36 = vadd.f32 %v3085_v31, %v1555_v2 }
 0x14a   : > { %v1623_v12 = vmax.f32 %v1591_v30, 0.0  ;;  %v1592_v57 = vadd.f32 %v3085_v31, %v1553_v35 }
 0x14b   : > { %1658 = vst.msk [vmem:[%s3095_s9 + $0xb0] sm:$0xff] %vm1635_vm2, %v1625_v0  ;;  %v1626_v1 = vmax.f32 %v1594_v36, 0.0 }
 0x14c   : > { %1656 = vst.msk [vmem:[%s3095_s9 + $0xa0] sm:$0xff] %vm1635_vm2, %v1623_v12  ;;  %v1624_v53 = vmax.f32 %v1592_v57, 0.0 }
 0x14d   : > { %1659 = vst.msk [vmem:[%s3095_s9 + $0xb8] sm:$0xff] %vm1635_vm2, %v1626_v1 }
 0x14e   : > { %1657 = vst.msk [vmem:[%s3095_s9 + $0xa8] sm:$0xff] %vm1635_vm2, %v1624_v53 }
 0x163   : > { %v1976_v54 = vpop.f32.mrb[8].mxu0 }
 0x164   : > { %v1542_v33 = vmul.f32 %v1976_v54, %v3080_v23  ;;  %v1430_v10 = vpop.f32.mrb[9].mxu0 }
 0x165   : > { %v1540_v55 = vmul.f32 %v3080_v23, %v1430_v10  ;;  %v1977_v34 = vpop.f32.mrb[10].mxu0 }
 0x166   : > { %v1581_v13 = vadd.f32 %v3085_v31, %v1542_v33  ;;  %v1543_v44 = vmul.f32 %v1977_v34, %v3080_v23  ;;  %v1433_v27 = vpop.f32.mrb[11].mxu0 }
 0x167   : > { %v1579_v52 = vadd.f32 %v3085_v31, %v1540_v55  ;;  %v1541_v45 = vmul.f32 %v3080_v23, %v1433_v27 }
 0x168   : > { %v1613_v4 = vmax.f32 %v1581_v13, 0.0  ;;  %v1582_v14 = vadd.f32 %v3085_v31, %v1543_v44 }
 0x169   : > { %v1611_v56 = vmax.f32 %v1579_v52, 0.0  ;;  %v1580_v28 = vadd.f32 %v3085_v31, %v1541_v45 }
 0x16a   : > { %1646 = vst.msk [vmem:[%s3095_s9 + $0x50] sm:$0xff] %vm1635_vm2, %v1613_v4  ;;  %v1614_v11 = vmax.f32 %v1582_v14, 0.0 }
 0x16b   : > { %1644 = vst.msk [vmem:[%s3095_s9 + $0x40] sm:$0xff] %vm1635_vm2, %v1611_v56  ;;  %v1612_v15 = vmax.f32 %v1580_v28, 0.0 }
 0x16c   : > { %1647 = vst.msk [vmem:[%s3095_s9 + $0x58] sm:$0xff] %vm1635_vm2, %v1614_v11 }
 0x16d   : > { %1645 = vst.msk [vmem:[%s3095_s9 + $0x48] sm:$0xff] %vm1635_vm2, %v1612_v15  ;;  %v1992_v39 = vpop.f32.mrb[8].mxu1 }
 0x16e   : > { %v1558_v50 = vmul.f32 %v1992_v39, %v3080_v23  ;;  %v1494_v60 = vpop.f32.mrb[9].mxu1 }
 0x16f   : > { %v1556_v41 = vmul.f32 %v3080_v23, %v1494_v60  ;;  %v1993_v25 = vpop.f32.mrb[10].mxu1 }
 0x170   : > { %v1597_v16 = vadd.f32 %v3085_v31, %v1558_v50  ;;  %v1559_v5 = vmul.f32 %v1993_v25, %v3080_v23  ;;  %v1497_v61 = vpop.f32.mrb[11].mxu1 }
 0x171   : > { %v1595_v46 = vadd.f32 %v3085_v31, %v1556_v41  ;;  %v1557_v19 = vmul.f32 %v3080_v23, %v1497_v61 }
 0x172   : > { %v1629_v40 = vmax.f32 %v1597_v16, 0.0  ;;  %v1598_v24 = vadd.f32 %v3085_v31, %v1559_v5 }
 0x173   : > { %v1627_v20 = vmax.f32 %v1595_v46, 0.0  ;;  %v1596_v32 = vadd.f32 %v3085_v31, %v1557_v19 }
 0x174   : > { %1662 = vst.msk [vmem:[%s3095_s9 + $0xd0] sm:$0xff] %vm1635_vm2, %v1629_v40  ;;  %v1630_v63 = vmax.f32 %v1598_v24, 0.0 }
 0x175   : > { %1660 = vst.msk [vmem:[%s3095_s9 + $0xc0] sm:$0xff] %vm1635_vm2, %v1627_v20  ;;  %v1628_v48 = vmax.f32 %v1596_v32, 0.0 }
 0x176   : > { %1663 = vst.msk [vmem:[%s3095_s9 + $0xd8] sm:$0xff] %vm1635_vm2, %v1630_v63 }
 0x177   : > { %1661 = vst.msk [vmem:[%s3095_s9 + $0xc8] sm:$0xff] %vm1635_vm2, %v1628_v48 }
 0x18c   : > { %v1980_v9 = vpop.f32.mrb[12].mxu0 }
 0x18d   : > { %v1546_v51 = vmul.f32 %v1980_v9, %v3080_v23  ;;  %v1446_v59 = vpop.f32.mrb[13].mxu0 }
 0x18e   : > { %v1544_v43 = vmul.f32 %v3080_v23, %v1446_v59  ;;  %v1981_v3 = vpop.f32.mrb[14].mxu0 }
 0x18f   : > { %v1585_v38 = vadd.f32 %v3085_v31, %v1546_v51  ;;  %v1547_v21 = vmul.f32 %v1981_v3, %v3080_v23  ;;  %v1449_v37 = vpop.f32.mrb[15].mxu0 }
 0x190   : > { %v1583_v17 = vadd.f32 %v3085_v31, %v1544_v43  ;;  %v1545_v18 = vmul.f32 %v3080_v23, %v1449_v37 }
 0x191   : > { %v1617_v49 = vmax.f32 %v1585_v38, 0.0  ;;  %v1586_v7 = vadd.f32 %v3085_v31, %v1547_v21 }
 0x192   : > { %v1615_v42 = vmax.f32 %v1583_v17, 0.0  ;;  %v1584_v58 = vadd.f32 %v3085_v31, %v1545_v18 }
 0x193   : > { %1650 = vst.msk [vmem:[%s3095_s9 + $0x70] sm:$0xff] %vm1635_vm2, %v1617_v49  ;;  %v1618_v62 = vmax.f32 %v1586_v7, 0.0 }
 0x194   : > { %1648 = vst.msk [vmem:[%s3095_s9 + $0x60] sm:$0xff] %vm1635_vm2, %v1615_v42  ;;  %v1616_v22 = vmax.f32 %v1584_v58, 0.0 }
 0x195   : > { %1651 = vst.msk [vmem:[%s3095_s9 + $0x78] sm:$0xff] %vm1635_vm2, %v1618_v62 }
 0x196   : > { %1649 = vst.msk [vmem:[%s3095_s9 + $0x68] sm:$0xff] %vm1635_vm2, %v1616_v22  ;;  %v1996_v8 = vpop.f32.mrb[12].mxu1 }
 0x197   : > { %v1562_v29 = vmul.f32 %v1996_v8, %v3080_v23  ;;  %v1510_v47 = vpop.f32.mrb[13].mxu1 }
 0x198   : > { %v1560_v6 = vmul.f32 %v3080_v23, %v1510_v47  ;;  %v1997_v2 = vpop.f32.mrb[14].mxu1 }
 0x199   : > { %v1601_v26 = vadd.f32 %v3085_v31, %v1562_v29  ;;  %v1563_v30 = vmul.f32 %v1997_v2, %v3080_v23  ;;  %v1513_v35 = vpop.f32.mrb[15].mxu1 }
 0x19a   : > { %v1599_v0 = vadd.f32 %v3085_v31, %v1560_v6  ;;  %v1561_v36 = vmul.f32 %v3080_v23, %v1513_v35 }
 0x19b   : > { %v1633_v12 = vmax.f32 %v1601_v26, 0.0  ;;  %v1602_v57 = vadd.f32 %v3085_v31, %v1563_v30 }
 0x19c   : > { %v1631_v1 = vmax.f32 %v1599_v0, 0.0  ;;  %v1600_v53 = vadd.f32 %v3085_v31, %v1561_v36 }
 0x19d   : > { %1666 = vst.msk [vmem:[%s3095_s9 + $0xf0] sm:$0xff] %vm1635_vm2, %v1633_v12  ;;  %v1634_v54 = vmax.f32 %v1602_v57, 0.0 }
 0x19e   : > { %1664 = vst.msk [vmem:[%s3095_s9 + $0xe0] sm:$0xff] %vm1635_vm2, %v1631_v1  ;;  %v1632_v33 = vmax.f32 %v1600_v53, 0.0 }
 0x19f   : > { %1667 = vst.msk [vmem:[%s3095_s9 + $0xf8] sm:$0xff] %vm1635_vm2, %v1634_v54 }
 0x1a0   : > { %1665 = vst.msk [vmem:[%s3095_s9 + $0xe8] sm:$0xff] %vm1635_vm2, %v1632_v33 }
 0x1a1 PF: > { %s17_s24 = sadd.s32 1, %s2020_s24  }
 0x1a2   : > { %p14_p4 = scmp.ge.s32.totalorder %s17_s24, 4  }
 0x1a4   :  { %16 = sbr.rel (!%p14_p4) target bundleno = 1 (0x1), region = 80 }

// kernel: _lambda_.17
= control target key start
LH: loop header
LB: loop body
LE: loop exit
PB: predicated region body
PF: predicated region fallthrough
CT: control target
= control target key end

     0   :  { %s1081_s13 = smov 0   ;;  %s1358_s0 = inlined_call_operand.vmem [shape: f32[2,9,9,16], index: 0, kind: input, shape index: {}]   ;;  %s1359_s1 = inlined_call_operand.vmem [shape: f32[2,9,9,16], index: 1, kind: input, shape index: {}]   ;;  %s1360_s2 = inlined_call_operand.vmem [shape: f32[2,9,9,16], index: 2, kind: input, shape index: {}]   ;;  %s1361_s3 = inlined_call_operand.vmem [shape: f32[2,9,9,16], index: 3, kind: input, shape index: {}]   ;;  %s1362_s4 = inlined_call_operand.vmem [shape: f32[9,16], index: 4, kind: input, shape index: {}]   ;;  %s1363_s5 = inlined_call_operand.vmem [shape: f32[1,16], index: 5, kind: input, shape index: {}]   ;;  %s1364_s6 = inlined_call_operand.vmem [shape: f32[1,16], index: 6, kind: input, shape index: {}]   ;;  %s1365_s7 = inlined_call_operand.vmem [shape: bf16[16,32], index: 7, kind: input, shape index: {}]   ;;  %s1366_s8 = inlined_call_operand.vmem [shape: f32[1,32], index: 8, kind: input, shape index: {}]   ;;  %s1367_s9 = inlined_call_operand.vmem [shape: f32[1,32], index: 9, kind: input, shape index: {}]   ;;  %s1368_s10 = inlined_call_operand.vmem [shape: f32[2,64,32], index: 10, kind: output, shape index: {}]  }
   0x1 LB: > { %s943_s14 = sadd.s32 4294967295, %s1024_s13   ;;  %p947_p0 = scmp.ge.s32.totalorder %s1024_s13, 1  ;;  %s1024_s13 = sphi %s1081_s13, %s20_s13  }
   0x2   : > { %p342_p1 = scmp.lt.s32.totalorder %s1024_s13, 3 }
   0x4   : > { %p343_p2 = pnand %p947_p0, %p342_p1 }
   0x5   : > { %v1017_v0 = vld [vmem:[%s1365_s7] sm:$0xff] (!%p343_p2)   ;;  %p395_p3 = scmp.lt.s32.totalorder (!%p343_p2), %s943_s14, 1  ;;  %v431_v1 = vlaneseq (!%p343_p2)  ;;  %v1138_v22 = vld [vmem:[%s1362_s4 + $0x8] ss:$0 sm:$0xff] (!%p343_p2)  ;;  %vm727_vm0 = vcmask (!%p343_p2), 130048   ;;  %vm843_vm1 = vcmask (!%p343_p2), 261120  }
   0x6   : > { %346 = sbr.rel (%p343_p2) target bundleno = 295 (0x127), region = 60  ;;  %996 = vmatprep.subr.bf16.mxu0 (!%p343_p2), %v1017_v0  ;;  %1006 = vmatprep.subr.bf16.mxu1 (!%p343_p2), %v1017_v0  ;;  %v421_v3 = vld [vmem:[%s1362_s4] sm:$0xff] (!%p343_p2) }
   0x7   : > { %v432_v2 = vshrl.u32 (!%p343_p2), %v431_v1, 7  ;;  %997 = vmatpush3.bf16.msra.mxu0 (!%p343_p2), %v1017_v0  ;;  %1007 = vmatpush3.bf16.msra.mxu1 (!%p343_p2), %v1017_v0 }
   0x9   : > { %v433_v4 = vsub.s32 (!%p343_p2), 0, %v432_v2  ;;  %v461_v5 = vsub.s32 (!%p343_p2), 1, %v432_v2  ;;  %v489_v6 = vsub.s32 (!%p343_p2), 2, %v432_v2  ;;  %v517_v7 = vsub.s32 (!%p343_p2), 3, %v432_v2 }
   0xa   : > { %v545_v8 = vsub.s32 (!%p343_p2), 4, %v432_v2  ;;  %v573_v9 = vsub.s32 (!%p343_p2), 5, %v432_v2  ;;  %v602_v10 = vsub.s32 (!%p343_p2), 6, %v432_v2  ;;  %v631_v11 = vsub.s32 (!%p343_p2), 7, %v432_v2 }
   0xb   : > { %v1108_v12 = vrot.slane (!%p343_p2), %v421_v3, %v433_v4  ;;  %v1110_v13 = vrot.slane (!%p343_p2), %v421_v3, %v461_v5  ;;  %v1112_v14 = vrot.slane (!%p343_p2), %v421_v3, %v489_v6  ;;  %v1114_v15 = vrot.slane (!%p343_p2), %v421_v3, %v517_v7 }
   0xc   : > { %v1129_v19 = vrot.slane (!%p343_p2), %v421_v3, %v545_v8  ;;  %v1131_v20 = vrot.slane (!%p343_p2), %v421_v3, %v573_v9  ;;  %v1133_v21 = vrot.slane (!%p343_p2), %v421_v3, %v602_v10  ;;  %v1146_v29 = vrot.slane (!%p343_p2), %v421_v3, %v631_v11 }
   0xd   : > { %s1370_s14 = smov (!%p395_p3, %s943_s14), 1 }
   0xe   : > { %s1008_s19 = smul.u32 144, %s1370_s14  ;;  %s990_s24 = sshll.u32 %s1370_s14, 6 }
   0xf   : > { %s1337_s27 = scalar_lea.vmem %s1368_s10, %s990_s24 }
  0x10   : > { %s1101_s22 = scalar_lea.vmem %s1358_s0, %s1008_s19  ;;  %s1106_s25 = scalar_lea.vmem %s1359_s1, %s1008_s19 }
  0x11   : > { %s1119_s28 = scalar_lea.vmem %s1360_s2, %s1008_s19  ;;  %s1124_s11 = scalar_lea.vmem %s1361_s3, %s1008_s19  ;;  %v423_v16 = vld [vmem:[%s1101_s22] sm:$0xff]  ;;  %v424_v17 = vld [vmem:[%s1101_s22 + $0x10] sm:$0xff] }
  0x12   : > { %v451_v18 = vld [vmem:[%s1106_s25] sm:$0xff]  ;;  %v435_v23 = vmul.f32 %v1108_v12, %v423_v16  ;;  %v436_v24 = vmul.f32 %v1108_v12, %v424_v17  ;;  %v452_v25 = vld [vmem:[%s1106_s25 + $0x10] sm:$0xff]  ;;  %v604_v36 = vmul.f32 %v1133_v21, %v424_v17 }
  0x13   : > { %v463_v26 = vmul.f32 %v1110_v13, %v451_v18  ;;  %v479_v27 = vld [vmem:[%s1101_s22 + $0x1] sm:$0xff]  ;;  %v480_v28 = vld [vmem:[%s1101_s22 + $0x11] sm:$0xff]  ;;  %v464_v30 = vmul.f32 %v1110_v13, %v452_v25  ;;  %v633_v53 = vmul.f32 %v1146_v29, %v452_v25 }
  0x14   : > { %v491_v31 = vmul.f32 %v1112_v14, %v479_v27  ;;  %v492_v32 = vmul.f32 %v1112_v14, %v480_v28  ;;  %v507_v33 = vld [vmem:[%s1119_s28] sm:$0xff]  ;;  %v508_v34 = vld [vmem:[%s1119_s28 + $0x10] sm:$0xff]  ;;  %v661_v59 = vmul.f32 %v1138_v22, %v480_v28 }
  0x15   : > { %v535_v35 = vld [vmem:[%s1124_s11] sm:$0xff]  ;;  %v471_v37 = vadd.f32 %v463_v26, %v435_v23  ;;  %v519_v38 = vmul.f32 %v1114_v15, %v507_v33  ;;  %v520_v39 = vmul.f32 %v1114_v15, %v508_v34  ;;  %v536_v40 = vld [vmem:[%s1124_s11 + $0x10] sm:$0xff]  ;;  %v472_v44 = vadd.f32 %v464_v30, %v436_v24 }
  0x16   : > { %v547_v41 = vmul.f32 %v1129_v19, %v535_v35  ;;  %v563_v42 = vld [vmem:[%s1119_s28 + $0x1] sm:$0xff]  ;;  %v564_v43 = vld [vmem:[%s1119_s28 + $0x11] sm:$0xff]  ;;  %v548_v45 = vmul.f32 %v1129_v19, %v536_v40 }
  0x17   : > { %v575_v46 = vmul.f32 %v1131_v20, %v563_v42  ;;  %v576_v47 = vmul.f32 %v1131_v20, %v564_v43  ;;  %v955_v48 = vld [vmem:[%s1101_s22 + $0x20] sm:$0xff]  ;;  %v499_v51 = vadd.f32 %v491_v31, %v471_v37  ;;  %v428_v56 = vld [vmem:[%s1101_s22 + $0x50] sm:$0xff]  ;;  %v500_v58 = vadd.f32 %v492_v32, %v472_v44 }
  0x18   : > { %v1166_v49 = vld [vmem:[%s1106_s25 + $0x20] sm:$0xff]  ;;  %v605_v52 = vmul.f32 %v955_v48, %v1133_v21  ;;  %v456_v62 = vld [vmem:[%s1106_s25 + $0x50] sm:$0xff]  ;;  %v440_v2 = vmul.f32 %v1108_v12, %v428_v56 }
  0x19   : > { %v1169_v50 = vld [vmem:[%s1101_s22 + $0x21] sm:$0xff]  ;;  %v634_v54 = vmul.f32 %v1166_v49, %v1146_v29  ;;  %v484_v0 = vld [vmem:[%s1101_s22 + $0x51] sm:$0xff]  ;;  %v527_v1 = vadd.f32 %v519_v38, %v499_v51  ;;  %v468_v4 = vmul.f32 %v1110_v13, %v456_v62  ;;  %v528_v8 = vadd.f32 %v520_v39, %v500_v58 }
  0x1a   : > { %v1176_v55 = vld [vmem:[%s1101_s22 + $0x40] sm:$0xff]  ;;  %v1185_v60 = vmul.f32 %v1138_v22, %v1169_v50  ;;  %v512_v6 = vld [vmem:[%s1119_s28 + $0x50] sm:$0xff]  ;;  %v496_v10 = vmul.f32 %v1112_v14, %v484_v0  ;;  %v608_v39 = vmul.f32 %v1133_v21, %v428_v56  ;;  %v637_v42 = vmul.f32 %v1146_v29, %v456_v62 }
  0x1b   : > { %v1180_v57 = vld [vmem:[%s1106_s25 + $0x40] sm:$0xff]  ;;  %v439_v61 = vmul.f32 %v1108_v12, %v1176_v55  ;;  %v540_v16 = vld [vmem:[%s1124_s11 + $0x50] sm:$0xff]  ;;  %v555_v23 = vadd.f32 %v547_v41, %v527_v1  ;;  %v476_v25 = vadd.f32 %v468_v4, %v440_v2  ;;  %v524_v26 = vmul.f32 %v1114_v15, %v512_v6 }
  0x1c   : > { %v1191_v63 = vld [vmem:[%s1101_s22 + $0x41] sm:$0xff]  ;;  %v467_v3 = vmul.f32 %v1110_v13, %v1180_v57  ;;  %v568_v18 = vld [vmem:[%s1119_s28 + $0x51] sm:$0xff]  ;;  %v556_v27 = vadd.f32 %v548_v45, %v528_v8  ;;  %v552_v30 = vmul.f32 %v1129_v19, %v540_v16  ;;  %v437_v62 = vmul.f32 %v955_v48, %v1108_v12 }
  0x1d   : > { %v511_v5 = vld [vmem:[%s1119_s28 + $0x40] sm:$0xff]  ;;  %v495_v9 = vmul.f32 %v1112_v14, %v1191_v63  ;;  %v583_v32 = vadd.f32 %v575_v46, %v555_v23  ;;  %v504_v34 = vadd.f32 %v496_v10, %v476_v25  ;;  %v580_v35 = vmul.f32 %v1131_v20, %v568_v18  ;;  %v426_v43 = vld [vmem:[%s1101_s22 + $0x30] sm:$0xff] }
  0x1e   : > { %v539_v7 = vld [vmem:[%s1124_s11 + $0x40] sm:$0xff]  ;;  %v523_v11 = vmul.f32 %v1114_v15, %v511_v5  ;;  %v475_v24 = vadd.f32 %v467_v3, %v439_v61  ;;  %v584_v38 = vadd.f32 %v576_v47, %v556_v27  ;;  %v454_v47 = vld [vmem:[%s1106_s25 + $0x30] sm:$0xff]  ;;  %v665_v61 = vmul.f32 %v1138_v22, %v484_v0 }
  0x1f   : > { %v567_v17 = vld [vmem:[%s1119_s28 + $0x41] sm:$0xff]  ;;  %v551_v28 = vmul.f32 %v1129_v19, %v539_v7  ;;  %v612_v44 = vadd.f32 %v604_v36, %v583_v32  ;;  %v532_v46 = vadd.f32 %v524_v26, %v504_v34  ;;  %v482_v2 = vld [vmem:[%s1101_s22 + $0x31] sm:$0xff]  ;;  %v438_v5 = vmul.f32 %v1108_v12, %v426_v43 }
  0x20   : > { %v579_v31 = vmul.f32 %v1131_v20, %v567_v17  ;;  %v503_v33 = vadd.f32 %v495_v9, %v475_v24  ;;  %v1214_v37 = vld [vmem:[%s1101_s22 + $0x60] sm:$0xff]  ;;  %v613_v56 = vadd.f32 %v605_v52, %v584_v38  ;;  %v465_v0 = vmul.f32 %v1166_v49, %v1110_v13  ;;  %v510_v8 = vld [vmem:[%s1119_s28 + $0x30] sm:$0xff] }
  0x21   : > { %v609_v40 = vmul.f32 %v1214_v37, %v1133_v21  ;;  %v1220_v41 = vld [vmem:[%s1106_s25 + $0x60] sm:$0xff]  ;;  %v641_v3 = vadd.f32 %v633_v53, %v612_v44  ;;  %v560_v4 = vadd.f32 %v552_v30, %v532_v46  ;;  %v466_v48 = vmul.f32 %v1110_v13, %v454_v47 }
  0x22   : > { %v531_v45 = vadd.f32 %v523_v11, %v503_v33  ;;  %v638_v51 = vmul.f32 %v1220_v41, %v1146_v29  ;;  %v1227_v58 = vld [vmem:[%s1101_s22 + $0x61] sm:$0xff]  ;;  %v642_v7 = vadd.f32 %v634_v54, %v613_v56  ;;  %v1240_v52 = vld [vmem:[%s1363_s5] ss:$0 sm:$0xff]  ;;  %v493_v53 = vmul.f32 %v1169_v50, %v1112_v14  ;;  %v566_v33 = vld [vmem:[%s1119_s28 + $0x31] sm:$0xff] }
  0x23   : > { %v666_v1 = vmul.f32 %v1138_v22, %v1227_v58  ;;  %v509_v6 = vld [vmem:[%s1119_s28 + $0x20] sm:$0xff]  ;;  %v669_v9 = vadd.f32 %v661_v59, %v641_v3  ;;  %v588_v54 = vadd.f32 %v580_v35, %v560_v4  ;;  %v494_v11 = vmul.f32 %v1112_v14, %v482_v2  ;;  %v538_v59 = vld [vmem:[%s1124_s11 + $0x30] sm:$0xff] }
  0x24   : > { %v559_v36 = vadd.f32 %v551_v28, %v531_v45  ;;  %v537_v16 = vld [vmem:[%s1124_s11 + $0x20] sm:$0xff]  ;;  %v670_v17 = vadd.f32 %v1185_v60, %v642_v7  ;;  %v473_v18 = vadd.f32 %v465_v0, %v437_v62  ;;  %v474_v23 = vadd.f32 %v466_v48, %v438_v5 }
  0x25   : > { %v1254_v49 = vld [vmem:[%s1364_s6] ss:$0 sm:$0xff]  ;;  %v521_v50 = vmul.f32 %v1114_v15, %v509_v6  ;;  %v684_v24 = vmul.f32 %v1240_v52, %v669_v9  ;;  %v617_v26 = vadd.f32 %v609_v40, %v588_v54  ;;  %v522_v27 = vmul.f32 %v1114_v15, %v510_v8  ;;  %v565_v28 = vld [vmem:[%s1119_s28 + $0x21] sm:$0xff] }
  0x26   : > { %v587_v10 = vadd.f32 %v579_v31, %v559_v36  ;;  %v685_v30 = vmul.f32 %v1240_v52, %v670_v17  ;;  %v501_v60 = vadd.f32 %v493_v53, %v473_v18  ;;  %v502_v31 = vadd.f32 %v494_v11, %v474_v23  ;;  %v513_v23 = vld [vmem:[%s1119_s28 + $0x60] sm:$0xff] }
  0x27   : > { %v549_v32 = vmul.f32 %v1129_v19, %v537_v16  ;;  %v699_v34 = vadd.f32 %v1254_v49, %v684_v24  ;;  %v646_v38 = vadd.f32 %v638_v51, %v617_v26  ;;  %v550_v44 = vmul.f32 %v1129_v19, %v538_v59  ;;  %v514_v24 = vld [vmem:[%s1119_s28 + $0x70] sm:$0xff] }
  0x28   : > { %v616_v25 = vadd.f32 %v608_v39, %v587_v10  ;;  %v700_v45 = vadd.f32 %v1254_v49, %v685_v30  ;;  %v529_v39 = vadd.f32 %v521_v50, %v501_v60  ;;  %v530_v40 = vadd.f32 %v522_v27, %v502_v31  ;;  %v458_v10 = vld [vmem:[%s1106_s25 + $0x70] sm:$0xff] }
  0x29   : > { %v577_v46 = vmul.f32 %v1131_v20, %v565_v28  ;;  %v707_v56 = vmax.f32 %v699_v34, 0.0  ;;  %v674_v3 = vadd.f32 %v666_v1, %v646_v38  ;;  %v578_v36 = vmul.f32 %v1131_v20, %v566_v33  ;;  %v541_v28 = vld [vmem:[%s1124_s11 + $0x60] sm:$0xff] }
  0x2a   : > { %v645_v35 = vadd.f32 %v637_v42, %v616_v25  ;;  %v708_v4 = vmax.f32 %v700_v45, 0.0  ;;  %v557_v5 = vadd.f32 %v549_v32, %v529_v39  ;;  %v558_v6 = vadd.f32 %v550_v44, %v530_v40  ;;  %v569_v34 = vld [vmem:[%s1119_s28 + $0x61] sm:$0xff] }
  0x2b   : > { %v606_v42 = vmul.f32 %v1133_v21, %v426_v43  ;;  %v689_v7 = vmul.f32 %v1240_v52, %v674_v3  ;;  %v607_v0 = vmul.f32 %v1133_v21, %v1176_v55  ;;  %v635_v48 = vmul.f32 %v1146_v29, %v454_v47  ;;  %v486_v47 = vld [vmem:[%s1101_s22 + $0x71] sm:$0xff]  ;;  %v961_v40 = vld [vmem:[%s1101_s22 + $0x80] sm:$0xff] }
  0x2c   : > { %v673_v62 = vadd.f32 %v665_v61, %v645_v35  ;;  %v430_v61 = vld [vmem:[%s1101_s22 + $0x70] sm:$0xff]  ;;  %v715_v1 = vpack.c.bf16 %v708_v4, %v707_v56  ;;  %v585_v53 = vadd.f32 %v577_v46, %v557_v5  ;;  %v586_v8 = vadd.f32 %v578_v36, %v558_v6  ;;  %v969_v4 = vld [vmem:[%s1106_s25 + $0x80] sm:$0xff] }
  0x2d   : > { %v636_v9 = vmul.f32 %v1146_v29, %v1180_v57  ;;  %v704_v54 = vadd.f32 %v1254_v49, %v689_v7  ;;  %v663_v11 = vmul.f32 %v1138_v22, %v482_v2  ;;  %v664_v55 = vmul.f32 %v1138_v22, %v1191_v63  ;;  %v570_v35 = vld [vmem:[%s1119_s28 + $0x71] sm:$0xff] }
  0x2e   : > { %v688_v51 = vmul.f32 %v1240_v52, %v673_v62  ;;  %998 = vmatprep.mubr.msk.bf16.mxu0 %vm727_vm0, %v715_v1  ;;  %v614_v16 = vadd.f32 %v606_v42, %v585_v53  ;;  %v615_v17 = vadd.f32 %v607_v0, %v586_v8  ;;  %v441_v57 = vmul.f32 %v1214_v37, %v1108_v12  ;;  %v977_v0 = vld [vmem:[%s1101_s22 + $0x81] sm:$0xff] }
  0x2f   : > { %v442_v18 = vmul.f32 %v1108_v12, %v430_v61  ;;  %v712_v59 = vmax.f32 %v704_v54, 0.0  ;;  %v469_v2 = vmul.f32 %v1220_v41, %v1110_v13  ;;  %v470_v63 = vmul.f32 %v1110_v13, %v458_v10  ;;  %v542_v12 = vld [vmem:[%s1124_s11 + $0x70] sm:$0xff] }
  0x30   : > { %v703_v43 = vadd.f32 %v1254_v49, %v688_v51  ;;  %v643_v25 = vadd.f32 %v635_v48, %v614_v16  ;;  %v644_v26 = vadd.f32 %v636_v9, %v615_v17  ;;  %v497_v27 = vmul.f32 %v1227_v58, %v1112_v14 }
  0x31   : > { %v498_v37 = vmul.f32 %v1112_v14, %v486_v47  ;;  %v477_v60 = vadd.f32 %v469_v2, %v441_v57  ;;  %v478_v31 = vadd.f32 %v470_v63, %v442_v18  ;;  %v525_v41 = vmul.f32 %v1114_v15, %v513_v23 }
  0x32   : > { %v711_v50 = vmax.f32 %v703_v43, 0.0  ;;  %v671_v32 = vadd.f32 %v663_v11, %v643_v25  ;;  %v672_v33 = vadd.f32 %v664_v55, %v644_v26  ;;  %v526_v13 = vmul.f32 %v1114_v15, %v514_v24 }
  0x33   : > { %v505_v58 = vadd.f32 %v497_v27, %v477_v60  ;;  %v506_v38 = vadd.f32 %v498_v37, %v478_v31  ;;  %v553_v14 = vmul.f32 %v1129_v19, %v541_v28  ;;  %v554_v44 = vmul.f32 %v1129_v19, %v542_v12 }
  0x34   : > { %v717_v30 = vpack.c.bf16 %v712_v59, %v711_v50  ;;  %v686_v45 = vmul.f32 %v1240_v52, %v671_v32  ;;  %v687_v39 = vmul.f32 %v1240_v52, %v672_v33  ;;  %v581_v15 = vmul.f32 %v1131_v20, %v569_v34  ;;  %v987_v59 = vld [vmem:[%s1367_s9] ss:$0 sm:$0xff] }
  0x35   : > { %v533_v46 = vadd.f32 %v525_v41, %v505_v58  ;;  %v534_v56 = vadd.f32 %v526_v13, %v506_v38  ;;  %v582_v62 = vmul.f32 %v1131_v20, %v570_v35  ;;  %v610_v19 = vmul.f32 %v1133_v21, %v430_v61 }
  0x36   : > { %1002 = vmatprep.mubr.msk.bf16.mxu1 %vm727_vm0, %v717_v30  ;;  %v701_v3 = vadd.f32 %v1254_v49, %v686_v45  ;;  %v702_v36 = vadd.f32 %v1254_v49, %v687_v39  ;;  %v611_v42 = vmul.f32 %v961_v40, %v1133_v21  ;;  %v639_v53 = vmul.f32 %v1146_v29, %v458_v10 }
  0x37   : > { %v561_v5 = vadd.f32 %v553_v14, %v533_v46  ;;  %v562_v6 = vadd.f32 %v554_v44, %v534_v56  ;;  %v640_v20 = vmul.f32 %v969_v4, %v1146_v29  ;;  %v667_v54 = vmul.f32 %v1138_v22, %v486_v47 }
  0x38   : > { %v709_v51 = vmax.f32 %v701_v3, 0.0  ;;  %v710_v7 = vmax.f32 %v702_v36, 0.0  ;;  %v668_v11 = vmul.f32 %v1138_v22, %v977_v0  ;;  %v986_v22 = vld [vmem:[%s1366_s8] ss:$0 sm:$0xff] }
  0x39   : > { %v589_v48 = vadd.f32 %v581_v15, %v561_v5  ;;  %v590_v1 = vadd.f32 %v582_v62, %v562_v6 }
  0x3a   : > { %v716_v8 = vpack.c.bf16 %v710_v7, %v709_v51 }
  0x3b   : > { %v618_v9 = vadd.f32 %v610_v19, %v589_v48  ;;  %v619_v43 = vadd.f32 %v611_v42, %v590_v1 }
  0x3c   : > { %999 = vmatmul.mubr.msk.bf16.vlgmr.msra.gmra.mrb[0].mxu0 %vm727_vm0, %v716_v8 }
  0x3d   : > { %v647_v21 = vadd.f32 %v639_v53, %v618_v9  ;;  %v648_v61 = vadd.f32 %v640_v20, %v619_v43 }
  0x3f   : > { %v675_v55 = vadd.f32 %v667_v54, %v647_v21  ;;  %v676_v16 = vadd.f32 %v668_v11, %v648_v61 }
  0x41   : > { %v690_v17 = vmul.f32 %v1240_v52, %v675_v55  ;;  %v691_v10 = vmul.f32 %v1240_v52, %v676_v16 }
  0x43   : > { %v705_v29 = vadd.f32 %v1254_v49, %v690_v17  ;;  %v706_v57 = vadd.f32 %v1254_v49, %v691_v10 }
  0x45   : > { %v713_v18 = vmax.f32 %v705_v29, 0.0  ;;  %v714_v23 = vmax.f32 %v706_v57, 0.0 }
  0x47   : > { %v718_v47 = vpack.c.bf16 %v714_v23, %v713_v18 }
  0x49   : > { %1003 = vmatmul.mubr.msk.bf16.vlgmr.msra.gmra.mrb[0].mxu1 %vm727_vm0, %v718_v47 }
 0x10f   : > { %v1000_v50 = vpop.f32.mrb[0].mxu0 }
 0x110   : > { %v814_v52 = vmul.f32 %v1000_v50, %v986_v22  ;;  %v774_v2 = vpop.f32.mrb[1].mxu0 }
 0x111   : > { %v812_v63 = vmul.f32 %v986_v22, %v774_v2  ;;  %v1001_v24 = vpop.f32.mrb[2].mxu0 }
 0x112   : > { %v829_v49 = vadd.f32 %v987_v59, %v814_v52  ;;  %v815_v25 = vmul.f32 %v1001_v24, %v986_v22  ;;  %v777_v26 = vpop.f32.mrb[3].mxu0 }
 0x113   : > { %v827_v27 = vadd.f32 %v987_v59, %v812_v63  ;;  %v813_v37 = vmul.f32 %v986_v22, %v777_v26 }
 0x114   : > { %v837_v28 = vmax.f32 %v829_v49, 0.0  ;;  %v830_v12 = vadd.f32 %v987_v59, %v815_v25 }
 0x115   : > { %v835_v30 = vmax.f32 %v827_v27, 0.0  ;;  %v828_v60 = vadd.f32 %v987_v59, %v813_v37 }
 0x116   : > { %846 = vst.msk [vmem:[%s1337_s27 + $0x10] sm:$0xff] %vm843_vm1, %v837_v28  ;;  %v838_v31 = vmax.f32 %v830_v12, 0.0 }
 0x117   : > { %844 = vst.msk [vmem:[%s1337_s27] sm:$0xff] %vm843_vm1, %v835_v30  ;;  %v836_v41 = vmax.f32 %v828_v60, 0.0 }
 0x118   : > { %847 = vst.msk [vmem:[%s1337_s27 + $0x18] sm:$0xff] %vm843_vm1, %v838_v31 }
 0x119   : > { %845 = vst.msk [vmem:[%s1337_s27 + $0x8] sm:$0xff] %vm843_vm1, %v836_v41 }
 0x11c   : > { %v1004_v32 = vpop.f32.mrb[0].mxu1 }
 0x11d   : > { %v818_v33 = vmul.f32 %v1004_v32, %v986_v22  ;;  %v790_v13 = vpop.f32.mrb[1].mxu1 }
 0x11e   : > { %v816_v34 = vmul.f32 %v986_v22, %v790_v13  ;;  %v1005_v35 = vpop.f32.mrb[2].mxu1 }
 0x11f   : > { %v833_v58 = vadd.f32 %v987_v59, %v818_v33  ;;  %v819_v38 = vmul.f32 %v1005_v35, %v986_v22  ;;  %v793_v14 = vpop.f32.mrb[3].mxu1 }
 0x120   : > { %v831_v44 = vadd.f32 %v987_v59, %v816_v34  ;;  %v817_v45 = vmul.f32 %v986_v22, %v793_v14 }
 0x121   : > { %v841_v39 = vmax.f32 %v833_v58, 0.0  ;;  %v834_v40 = vadd.f32 %v987_v59, %v819_v38 }
 0x122   : > { %v839_v46 = vmax.f32 %v831_v44, 0.0  ;;  %v832_v56 = vadd.f32 %v987_v59, %v817_v45 }
 0x123   : > { %850 = vst.msk [vmem:[%s1337_s27 + $0x30] sm:$0xff] %vm843_vm1, %v841_v39  ;;  %v842_v15 = vmax.f32 %v834_v40, 0.0 }
 0x124   : > { %848 = vst.msk [vmem:[%s1337_s27 + $0x20] sm:$0xff] %vm843_vm1, %v839_v46  ;;  %v840_v62 = vmax.f32 %v832_v56, 0.0 }
 0x125   : > { %851 = vst.msk [vmem:[%s1337_s27 + $0x38] sm:$0xff] %vm843_vm1, %v842_v15 }
 0x126   : > { %849 = vst.msk [vmem:[%s1337_s27 + $0x28] sm:$0xff] %vm843_vm1, %v840_v62 }
 0x127 PF: > { %s20_s13 = sadd.s32 1, %s1024_s13  }
 0x128   : > { %p17_p4 = scmp.ge.s32.totalorder %s20_s13, 4  }
 0x12a   :  { %19 = sbr.rel (!%p17_p4) target bundleno = 1 (0x1), region = 101 }

// kernel: _lambda_.18
= control target key start
LH: loop header
LB: loop body
LE: loop exit
PB: predicated region body
PF: predicated region fallthrough
CT: control target
= control target key end

     0   :  { %s924_s24 = smov 0   ;;  %s1223_s0 = inlined_call_operand.vmem [shape: f32[2,10,10,32], index: 0, kind: input, shape index: {}]   ;;  %s1224_s1 = inlined_call_operand.vmem [shape: f32[9,32], index: 1, kind: input, shape index: {}]   ;;  %s1225_s2 = inlined_call_operand.vmem [shape: f32[1,32], index: 2, kind: input, shape index: {}]   ;;  %s1226_s3 = inlined_call_operand.vmem [shape: f32[1,32], index: 3, kind: input, shape index: {}]   ;;  %s1227_s4 = inlined_call_operand.vmem [shape: bf16[32,32], index: 4, kind: input, shape index: {}]   ;;  %s1228_s5 = inlined_call_operand.vmem [shape: f32[1,32], index: 5, kind: input, shape index: {}]   ;;  %s1229_s6 = inlined_call_operand.vmem [shape: f32[1,32], index: 6, kind: input, shape index: {}]   ;;  %s1230_s7 = inlined_call_operand.vmem [shape: f32[2,64,32], index: 7, kind: output, shape index: {}]  }
   0x1 LB: > { %s773_s25 = sadd.s32 4294967295, %s882_s24   ;;  %p777_p0 = scmp.ge.s32.totalorder %s882_s24, 1  ;;  %s882_s24 = sphi %s924_s24, %s17_s24  }
   0x2   : > { %p237_p1 = scmp.lt.s32.totalorder %s882_s24, 3 }
   0x4   : > { %p238_p2 = pnand %p777_p0, %p237_p1 }
   0x5   : > { %v874_v0 = vld [vmem:[%s1227_s4] sm:$0xff] (!%p238_p2)   ;;  %p269_p3 = scmp.lt.s32.totalorder (!%p238_p2), %s773_s25, 1  ;;  %v290_v1 = vlaneseq (!%p238_p2)  ;;  %v875_v2 = vld [vmem:[%s1227_s4 + $0x8] sm:$0xff] (!%p238_p2)   ;;  %vm594_vm0 = vcmask (!%p238_p2), 261120  }
   0x6   : > { %241 = sbr.rel (%p238_p2) target bundleno = 295 (0x127), region = 48  ;;  %849 = vmatprep.subr.bf16.mxu0 (!%p238_p2), %v874_v0  ;;  %861 = vmatprep.subr.bf16.mxu1 (!%p238_p2), %v874_v0  ;;  %v280_v4 = vld [vmem:[%s1224_s1] sm:$0xff] (!%p238_p2)  ;;  %v976_v30 = vld [vmem:[%s1224_s1 + $0x8] ss:$0 sm:$0xff] (!%p238_p2) }
   0x7   : > { %v291_v3 = vshrl.u32 (!%p238_p2), %v290_v1, 7  ;;  %850 = vmatpush3.bf16.msra.mxu0 (!%p238_p2), %v874_v0  ;;  %863 = vmatpush3.bf16.msra.mxu1 (!%p238_p2), %v874_v0 }
   0x8   : > { %851 = vmatprep.subr.bf16.mxu0 (!%p238_p2), %v875_v2  ;;  %862 = vmatprep.subr.bf16.mxu1 (!%p238_p2), %v875_v2 }
   0x9   : > { %v292_v5 = vsub.s32 (!%p238_p2), 0, %v291_v3  ;;  %v320_v6 = vsub.s32 (!%p238_p2), 1, %v291_v3  ;;  %v348_v7 = vsub.s32 (!%p238_p2), 2, %v291_v3  ;;  %v377_v8 = vsub.s32 (!%p238_p2), 3, %v291_v3 }
   0xa   : > { %v405_v9 = vsub.s32 (!%p238_p2), 4, %v291_v3  ;;  %v433_v10 = vsub.s32 (!%p238_p2), 5, %v291_v3  ;;  %v462_v11 = vsub.s32 (!%p238_p2), 6, %v291_v3  ;;  %v490_v22 = vsub.s32 (!%p238_p2), 7, %v291_v3 }
   0xb   : > { %v949_v12 = vrot.slane (!%p238_p2), %v280_v4, %v292_v5  ;;  %v951_v13 = vrot.slane (!%p238_p2), %v280_v4, %v320_v6  ;;  %v953_v14 = vrot.slane (!%p238_p2), %v280_v4, %v348_v7  ;;  %v955_v15 = vrot.slane (!%p238_p2), %v280_v4, %v377_v8  ;;  %852 = vmatpush3.bf16.msra.mxu0 (!%p238_p2), %v875_v2 }
   0xc   : > { %864 = vmatpush3.bf16.msra.mxu1 (!%p238_p2), %v875_v2  ;;  %v960_v19 = vrot.slane (!%p238_p2), %v280_v4, %v405_v9  ;;  %v962_v20 = vrot.slane (!%p238_p2), %v280_v4, %v433_v10  ;;  %v964_v21 = vrot.slane (!%p238_p2), %v280_v4, %v462_v11  ;;  %v1017_v52 = vrot.slane (!%p238_p2), %v280_v4, %v490_v22 }
   0xd   : > { %s1232_s25 = smov (!%p269_p3, %s773_s25), 1 }
   0xe   : > { %s865_s9 = smul.u32 160, %s1232_s25  ;;  %s842_s23 = sshll.u32 %s1232_s25, 6 }
   0xf   : > { %s1202_s28 = scalar_lea.vmem %s1230_s7, %s842_s23 }
  0x10   : > { %s947_s12 = scalar_lea.vmem %s1223_s0, %s865_s9 }
  0x11   : > { %v282_v16 = vld [vmem:[%s947_s12] sm:$0xff]  ;;  %v283_v17 = vld [vmem:[%s947_s12 + $0x10] sm:$0xff] }
  0x12   : > { %v310_v18 = vld [vmem:[%s947_s12 + $0x1] sm:$0xff]  ;;  %v294_v23 = vmul.f32 %v949_v12, %v282_v16  ;;  %v295_v24 = vmul.f32 %v949_v12, %v283_v17  ;;  %v311_v25 = vld [vmem:[%s947_s12 + $0x11] sm:$0xff]  ;;  %v379_v29 = vmul.f32 %v955_v15, %v283_v17 }
  0x13   : > { %v322_v26 = vmul.f32 %v951_v13, %v310_v18  ;;  %v338_v27 = vld [vmem:[%s947_s12 + $0x2] sm:$0xff]  ;;  %v339_v28 = vld [vmem:[%s947_s12 + $0x12] sm:$0xff]  ;;  %v323_v31 = vmul.f32 %v951_v13, %v311_v25  ;;  %v407_v36 = vmul.f32 %v960_v19, %v311_v25 }
  0x14   : > { %v350_v32 = vmul.f32 %v953_v14, %v338_v27  ;;  %v351_v33 = vmul.f32 %v953_v14, %v339_v28  ;;  %v982_v34 = vld [vmem:[%s947_s12 + $0x20] sm:$0xff]  ;;  %v435_v41 = vmul.f32 %v962_v20, %v339_v28  ;;  %v997_v42 = vld [vmem:[%s947_s12 + $0x30] sm:$0xff] }
  0x15   : > { %v985_v35 = vld [vmem:[%s947_s12 + $0x21] sm:$0xff]  ;;  %v330_v37 = vadd.f32 %v322_v26, %v294_v23  ;;  %v380_v38 = vmul.f32 %v982_v34, %v955_v15  ;;  %v1000_v43 = vld [vmem:[%s947_s12 + $0x32] sm:$0xff]  ;;  %v331_v44 = vadd.f32 %v323_v31, %v295_v24  ;;  %v464_v46 = vmul.f32 %v982_v34, %v964_v21 }
  0x16   : > { %v408_v39 = vmul.f32 %v985_v35, %v960_v19  ;;  %v993_v40 = vld [vmem:[%s947_s12 + $0x22] sm:$0xff]  ;;  %v465_v47 = vmul.f32 %v997_v42, %v964_v21  ;;  %v1012_v49 = vld [vmem:[%s947_s12 + $0x50] sm:$0xff]  ;;  %v521_v54 = vmul.f32 %v976_v30, %v1000_v43  ;;  %v492_v0 = vmul.f32 %v985_v35, %v1017_v52 }
  0x17   : > { %v436_v45 = vmul.f32 %v993_v40, %v962_v20  ;;  %v1009_v48 = vld [vmem:[%s947_s12 + $0x40] sm:$0xff]  ;;  %v358_v51 = vadd.f32 %v350_v32, %v330_v37  ;;  %v520_v53 = vmul.f32 %v976_v30, %v993_v40  ;;  %v1024_v55 = vld [vmem:[%s947_s12 + $0x51] sm:$0xff]  ;;  %v359_v58 = vadd.f32 %v351_v33, %v331_v44 }
  0x18   : > { %v1015_v50 = vld [vmem:[%s947_s12 + $0x41] sm:$0xff]  ;;  %v1030_v57 = vld [vmem:[%s947_s12 + $0x52] sm:$0xff]  ;;  %v298_v60 = vmul.f32 %v949_v12, %v1009_v48  ;;  %v299_v61 = vmul.f32 %v949_v12, %v1012_v49  ;;  %v327_v2 = vmul.f32 %v951_v13, %v1024_v55  ;;  %v383_v10 = vmul.f32 %v955_v15, %v1012_v49 }
  0x19   : > { %v1027_v56 = vld [vmem:[%s947_s12 + $0x42] sm:$0xff]  ;;  %v1033_v59 = vld [vmem:[%s947_s12 + $0x31] sm:$0xff]  ;;  %v326_v62 = vmul.f32 %v951_v13, %v1015_v50  ;;  %v387_v63 = vadd.f32 %v379_v29, %v358_v51  ;;  %v388_v3 = vadd.f32 %v380_v38, %v359_v58  ;;  %v355_v6 = vmul.f32 %v953_v14, %v1030_v57 }
  0x1a   : > { %v493_v1 = vmul.f32 %v1033_v59, %v1017_v52  ;;  %v354_v5 = vmul.f32 %v953_v14, %v1027_v56  ;;  %v1052_v7 = vld [vmem:[%s947_s12 + $0x60] sm:$0xff]  ;;  %v335_v9 = vadd.f32 %v327_v2, %v299_v61  ;;  %v411_v22 = vmul.f32 %v960_v19, %v1024_v55  ;;  %v1073_v29 = vld [vmem:[%s947_s12 + $0x70] sm:$0xff] }
  0x1b   : > { %v334_v4 = vadd.f32 %v326_v62, %v298_v60  ;;  %v415_v8 = vadd.f32 %v407_v36, %v387_v63  ;;  %v384_v11 = vmul.f32 %v1052_v7, %v955_v15  ;;  %v1059_v16 = vld [vmem:[%s947_s12 + $0x61] sm:$0xff]  ;;  %v416_v17 = vadd.f32 %v408_v39, %v388_v3  ;;  %v1080_v37 = vld [vmem:[%s947_s12 + $0x71] sm:$0xff] }
  0x1c   : > { %v412_v23 = vmul.f32 %v1059_v16, %v960_v19  ;;  %v1066_v24 = vld [vmem:[%s947_s12 + $0x62] sm:$0xff]  ;;  %v363_v26 = vadd.f32 %v355_v6, %v335_v9  ;;  %v439_v27 = vmul.f32 %v962_v20, %v1030_v57  ;;  %v468_v33 = vmul.f32 %v1052_v7, %v964_v21  ;;  %v1087_v51 = vld [vmem:[%s947_s12 + $0x72] sm:$0xff] }
  0x1d   : > { %v362_v18 = vadd.f32 %v354_v5, %v334_v4  ;;  %v443_v25 = vadd.f32 %v435_v41, %v415_v8  ;;  %v440_v28 = vmul.f32 %v1066_v24, %v962_v20  ;;  %v444_v31 = vadd.f32 %v436_v45, %v416_v17 }
  0x1e   : > { %v469_v36 = vmul.f32 %v1073_v29, %v964_v21  ;;  %v392_v39 = vadd.f32 %v384_v11, %v363_v26  ;;  %v496_v41 = vmul.f32 %v1059_v16, %v1017_v52  ;;  %v497_v44 = vmul.f32 %v1080_v37, %v1017_v52 }
  0x1f   : > { %v391_v32 = vadd.f32 %v383_v10, %v362_v18  ;;  %v472_v38 = vadd.f32 %v464_v46, %v443_v25  ;;  %v473_v45 = vadd.f32 %v465_v47, %v444_v31  ;;  %v524_v60 = vmul.f32 %v976_v30, %v1066_v24  ;;  %v1100_v47 = vld [vmem:[%s1225_s2] ss:$0 sm:$0xff] }
  0x20   : > { %v525_v61 = vmul.f32 %v976_v30, %v1087_v51  ;;  %v420_v63 = vadd.f32 %v412_v23, %v392_v39  ;;  %v296_v46 = vmul.f32 %v982_v34, %v949_v12  ;;  %v297_v2 = vmul.f32 %v997_v42, %v949_v12  ;;  %v1113_v10 = vld [vmem:[%s1226_s3] ss:$0 sm:$0xff] }
  0x21   : > { %v419_v58 = vadd.f32 %v411_v22, %v391_v32  ;;  %v500_v62 = vadd.f32 %v492_v0, %v472_v38  ;;  %v501_v3 = vadd.f32 %v493_v1, %v473_v45  ;;  %v324_v5 = vmul.f32 %v985_v35, %v951_v13 }
  0x22   : > { %v325_v0 = vmul.f32 %v1033_v59, %v951_v13  ;;  %v448_v8 = vadd.f32 %v440_v28, %v420_v63  ;;  %v352_v34 = vmul.f32 %v993_v40, %v953_v14  ;;  %v353_v1 = vmul.f32 %v1000_v43, %v953_v14 }
  0x23   : > { %v447_v4 = vadd.f32 %v439_v27, %v419_v58  ;;  %v528_v6 = vadd.f32 %v520_v53, %v500_v62  ;;  %v529_v9 = vadd.f32 %v521_v54, %v501_v3  ;;  %v332_v35 = vadd.f32 %v324_v5, %v296_v46 }
  0x24   : > { %v333_v17 = vadd.f32 %v325_v0, %v297_v2  ;;  %v477_v53 = vadd.f32 %v469_v36, %v448_v8  ;;  %v381_v22 = vmul.f32 %v997_v42, %v955_v15  ;;  %v382_v40 = vmul.f32 %v955_v15, %v1009_v48 }
  0x25   : > { %v476_v11 = vadd.f32 %v468_v33, %v447_v4  ;;  %v543_v18 = vmul.f32 %v1100_v47, %v528_v6  ;;  %v544_v23 = vmul.f32 %v1100_v47, %v529_v9  ;;  %v360_v25 = vadd.f32 %v352_v34, %v332_v35 }
  0x26   : > { %v361_v26 = vadd.f32 %v353_v1, %v333_v17  ;;  %v505_v28 = vadd.f32 %v497_v44, %v477_v53  ;;  %v409_v31 = vmul.f32 %v1033_v59, %v960_v19  ;;  %v410_v32 = vmul.f32 %v960_v19, %v1015_v50  ;;  %v796_v53 = vld [vmem:[%s947_s12 + $0x81] sm:$0xff] }
  0x27   : > { %v504_v54 = vadd.f32 %v496_v41, %v476_v11  ;;  %v558_v27 = vadd.f32 %v1113_v10, %v543_v18  ;;  %v559_v33 = vadd.f32 %v1113_v10, %v544_v23  ;;  %v389_v36 = vadd.f32 %v381_v22, %v360_v25  ;;  %v804_v25 = vld [vmem:[%s947_s12 + $0x82] sm:$0xff] }
  0x28   : > { %v390_v38 = vadd.f32 %v382_v40, %v361_v26  ;;  %v533_v45 = vadd.f32 %v525_v61, %v505_v28  ;;  %v437_v41 = vmul.f32 %v1000_v43, %v962_v20  ;;  %v438_v58 = vmul.f32 %v962_v20, %v1027_v56 }
  0x29   : > { %v532_v42 = vadd.f32 %v524_v60, %v504_v54  ;;  %v566_v39 = vmax.f32 %v558_v27, 0.0  ;;  %v567_v44 = vmax.f32 %v559_v33, 0.0  ;;  %v417_v59 = vadd.f32 %v409_v31, %v389_v36  ;;  %v812_v31 = vld [vmem:[%s947_s12 + $0x90] sm:$0xff] }
  0x2a   : > { %v418_v63 = vadd.f32 %v410_v32, %v390_v38  ;;  %v548_v46 = vmul.f32 %v1100_v47, %v533_v45  ;;  %v466_v60 = vmul.f32 %v964_v21, %v1009_v48  ;;  %v467_v2 = vmul.f32 %v964_v21, %v1012_v49 }
  0x2b   : > { %v547_v62 = vmul.f32 %v1100_v47, %v532_v42  ;;  %v494_v61 = vmul.f32 %v1017_v52, %v1015_v50  ;;  %v574_v43 = vpack.c.bf16 %v567_v44, %v566_v39  ;;  %v445_v4 = vadd.f32 %v437_v41, %v417_v59 }
  0x2c   : > { %v446_v5 = vadd.f32 %v438_v58, %v418_v63  ;;  %v563_v0 = vadd.f32 %v1113_v10, %v548_v46  ;;  %v495_v6 = vmul.f32 %v1017_v52, %v1024_v55  ;;  %v522_v48 = vmul.f32 %v976_v30, %v1027_v56 }
  0x2d   : > { %v562_v3 = vadd.f32 %v1113_v10, %v547_v62  ;;  %v523_v49 = vmul.f32 %v976_v30, %v1030_v57  ;;  %853 = vmatprep.mubr.msk.bf16.mxu0 %vm594_vm0, %v574_v43  ;;  %v474_v8 = vadd.f32 %v466_v60, %v445_v4  ;;  %v300_v1 = vmul.f32 %v1052_v7, %v949_v12  ;;  %v788_v57 = vld [vmem:[%s947_s12 + $0x80] sm:$0xff]  ;;  %v828_v62 = vld [vmem:[%s947_s12 + $0x92] sm:$0xff] }
  0x2e   : > { %v475_v34 = vadd.f32 %v467_v2, %v446_v5  ;;  %v571_v9 = vmax.f32 %v563_v0, 0.0  ;;  %v301_v11 = vmul.f32 %v1073_v29, %v949_v12  ;;  %v328_v55 = vmul.f32 %v1059_v16, %v951_v13 }
  0x2f   : > { %v570_v50 = vmax.f32 %v562_v3, 0.0  ;;  %v329_v56 = vmul.f32 %v1080_v37, %v951_v13  ;;  %v502_v35 = vadd.f32 %v494_v61, %v474_v8  ;;  %v356_v18 = vmul.f32 %v1066_v24, %v953_v14 }
  0x30   : > { %v503_v17 = vadd.f32 %v495_v6, %v475_v34  ;;  %v357_v7 = vmul.f32 %v1087_v51, %v953_v14  ;;  %v336_v12 = vadd.f32 %v328_v55, %v300_v1  ;;  %v385_v16 = vmul.f32 %v1073_v29, %v955_v15  ;;  %v839_v1 = vld [vmem:[%s1229_s6] ss:$0 sm:$0xff] }
  0x31   : > { %v576_v22 = vpack.c.bf16 %v571_v9, %v570_v50  ;;  %v337_v40 = vadd.f32 %v329_v56, %v301_v11  ;;  %v530_v23 = vadd.f32 %v522_v48, %v502_v35  ;;  %v386_v13 = vmul.f32 %v788_v57, %v955_v15 }
  0x32   : > { %v531_v54 = vadd.f32 %v523_v49, %v503_v17  ;;  %v364_v24 = vadd.f32 %v356_v18, %v336_v12  ;;  %v413_v14 = vmul.f32 %v1080_v37, %v960_v19  ;;  %v414_v27 = vmul.f32 %v796_v53, %v960_v19  ;;  %v820_v37 = vld [vmem:[%s947_s12 + $0x91] sm:$0xff] }
  0x33   : > { %857 = vmatprep.mubr.msk.bf16.mxu1 %vm594_vm0, %v576_v22  ;;  %v365_v26 = vadd.f32 %v357_v7, %v337_v40  ;;  %v545_v28 = vmul.f32 %v1100_v47, %v530_v23  ;;  %v441_v15 = vmul.f32 %v1087_v51, %v962_v20  ;;  %v442_v42 = vmul.f32 %v804_v25, %v962_v20 }
  0x34   : > { %v546_v29 = vmul.f32 %v1100_v47, %v531_v54  ;;  %v393_v32 = vadd.f32 %v385_v16, %v364_v24  ;;  %v470_v45 = vmul.f32 %v788_v57, %v964_v21  ;;  %v471_v41 = vmul.f32 %v812_v31, %v964_v21 }
  0x35   : > { %v394_v33 = vadd.f32 %v386_v13, %v365_v26  ;;  %v560_v36 = vadd.f32 %v1113_v10, %v545_v28  ;;  %v498_v51 = vmul.f32 %v796_v53, %v1017_v52  ;;  %v499_v20 = vmul.f32 %v820_v37, %v1017_v52 }
  0x36   : > { %v561_v38 = vadd.f32 %v1113_v10, %v546_v29  ;;  %v421_v39 = vadd.f32 %v413_v14, %v393_v32  ;;  %v526_v61 = vmul.f32 %v976_v30, %v804_v25  ;;  %v527_v43 = vmul.f32 %v976_v30, %v828_v62  ;;  %v838_v30 = vld [vmem:[%s1228_s5] ss:$0 sm:$0xff] }
  0x37   : > { %v422_v19 = vadd.f32 %v414_v27, %v394_v33  ;;  %v568_v58 = vmax.f32 %v560_v36, 0.0 }
  0x38   : > { %v569_v44 = vmax.f32 %v561_v38, 0.0  ;;  %v449_v59 = vadd.f32 %v441_v15, %v421_v39 }
  0x39   : > { %v450_v63 = vadd.f32 %v442_v42, %v422_v19 }
  0x3a   : > { %v575_v46 = vpack.c.bf16 %v569_v44, %v568_v58  ;;  %v478_v60 = vadd.f32 %v470_v45, %v449_v59 }
  0x3b   : > { %v479_v2 = vadd.f32 %v471_v41, %v450_v63 }
  0x3c   : > { %854 = vmatmul.mubr.msk.bf16.vlgmr.msra.gmra.mrb[0].mxu0 %vm594_vm0, %v575_v46  ;;  %v506_v21 = vadd.f32 %v498_v51, %v478_v60 }
  0x3d   : > { %v507_v3 = vadd.f32 %v499_v20, %v479_v2 }
  0x3e   : > { %v534_v4 = vadd.f32 %v526_v61, %v506_v21 }
  0x3f   : > { %v535_v5 = vadd.f32 %v527_v43, %v507_v3 }
  0x40   : > { %v549_v0 = vmul.f32 %v1100_v47, %v534_v4 }
  0x41   : > { %v550_v6 = vmul.f32 %v1100_v47, %v535_v5 }
  0x42   : > { %v564_v52 = vadd.f32 %v1113_v10, %v549_v0 }
  0x43   : > { %v565_v48 = vadd.f32 %v1113_v10, %v550_v6 }
  0x44   : > { %v572_v49 = vmax.f32 %v564_v52, 0.0 }
  0x45   : > { %v573_v50 = vmax.f32 %v565_v48, 0.0 }
  0x47   : > { %v577_v8 = vpack.c.bf16 %v573_v50, %v572_v49 }
  0x49   : > { %858 = vmatmul.mubr.msk.bf16.vlgmr.msra.gmra.mrb[0].mxu1 %vm594_vm0, %v577_v8 }
 0x10f   : > { %v855_v34 = vpop.f32.mrb[0].mxu0 }
 0x110   : > { %v681_v47 = vmul.f32 %v855_v34, %v838_v30  ;;  %v641_v9 = vpop.f32.mrb[1].mxu0 }
 0x111   : > { %v679_v11 = vmul.f32 %v838_v30, %v641_v9  ;;  %v856_v55 = vpop.f32.mrb[2].mxu0 }
 0x112   : > { %v696_v10 = vadd.f32 %v839_v1, %v681_v47  ;;  %v682_v56 = vmul.f32 %v856_v55, %v838_v30  ;;  %v644_v57 = vpop.f32.mrb[3].mxu0 }
 0x113   : > { %v694_v35 = vadd.f32 %v839_v1, %v679_v11  ;;  %v680_v17 = vmul.f32 %v838_v30, %v644_v57 }
 0x114   : > { %v704_v18 = vmax.f32 %v696_v10, 0.0  ;;  %v697_v7 = vadd.f32 %v839_v1, %v682_v56 }
 0x115   : > { %v702_v53 = vmax.f32 %v694_v35, 0.0  ;;  %v695_v22 = vadd.f32 %v839_v1, %v680_v17 }
 0x116   : > { %712 = vst.msk [vmem:[%s1202_s28 + $0x10] sm:$0xff] %vm594_vm0, %v704_v18  ;;  %v705_v12 = vmax.f32 %v697_v7, 0.0 }
 0x117   : > { %710 = vst.msk [vmem:[%s1202_s28] sm:$0xff] %vm594_vm0, %v702_v53  ;;  %v703_v40 = vmax.f32 %v695_v22, 0.0 }
 0x118   : > { %713 = vst.msk [vmem:[%s1202_s28 + $0x18] sm:$0xff] %vm594_vm0, %v705_v12 }
 0x119   : > { %711 = vst.msk [vmem:[%s1202_s28 + $0x8] sm:$0xff] %vm594_vm0, %v703_v40 }
 0x11c   : > { %v859_v16 = vpop.f32.mrb[0].mxu1 }
 0x11d   : > { %v685_v23 = vmul.f32 %v859_v16, %v838_v30  ;;  %v657_v54 = vpop.f32.mrb[1].mxu1 }
 0x11e   : > { %v683_v13 = vmul.f32 %v838_v30, %v657_v54  ;;  %v860_v25 = vpop.f32.mrb[2].mxu1 }
 0x11f   : > { %v700_v24 = vadd.f32 %v839_v1, %v685_v23  ;;  %v686_v26 = vmul.f32 %v860_v25, %v838_v30  ;;  %v660_v14 = vpop.f32.mrb[3].mxu1 }
 0x120   : > { %v698_v27 = vadd.f32 %v839_v1, %v683_v13  ;;  %v684_v28 = vmul.f32 %v838_v30, %v660_v14 }
 0x121   : > { %v708_v29 = vmax.f32 %v700_v24, 0.0  ;;  %v701_v31 = vadd.f32 %v839_v1, %v686_v26 }
 0x122   : > { %v706_v32 = vmax.f32 %v698_v27, 0.0  ;;  %v699_v33 = vadd.f32 %v839_v1, %v684_v28 }
 0x123   : > { %716 = vst.msk [vmem:[%s1202_s28 + $0x30] sm:$0xff] %vm594_vm0, %v708_v29  ;;  %v709_v15 = vmax.f32 %v701_v31, 0.0 }
 0x124   : > { %714 = vst.msk [vmem:[%s1202_s28 + $0x20] sm:$0xff] %vm594_vm0, %v706_v32  ;;  %v707_v42 = vmax.f32 %v699_v33, 0.0 }
 0x125   : > { %717 = vst.msk [vmem:[%s1202_s28 + $0x38] sm:$0xff] %vm594_vm0, %v709_v15 }
 0x126   : > { %715 = vst.msk [vmem:[%s1202_s28 + $0x28] sm:$0xff] %vm594_vm0, %v707_v42 }
 0x127 PF: > { %s17_s24 = sadd.s32 1, %s882_s24  }
 0x128   : > { %p14_p4 = scmp.ge.s32.totalorder %s17_s24, 4  }
 0x12a   :  { %16 = sbr.rel (!%p14_p4) target bundleno = 1 (0x1), region = 80 }

// kernel: _lambda_.19
= control target key start
LH: loop header
LB: loop body
LE: loop exit
PB: predicated region body
PF: predicated region fallthrough
CT: control target
= control target key end

     0   :  { %s902_s13 = smov 0   ;;  %s1018_s0 = inlined_call_operand.vmem [shape: f32[2,5,5,32], index: 0, kind: input, shape index: {}]   ;;  %s1019_s1 = inlined_call_operand.vmem [shape: f32[2,5,5,32], index: 1, kind: input, shape index: {}]   ;;  %s1020_s2 = inlined_call_operand.vmem [shape: f32[2,5,5,32], index: 2, kind: input, shape index: {}]   ;;  %s1021_s3 = inlined_call_operand.vmem [shape: f32[2,5,5,32], index: 3, kind: input, shape index: {}]   ;;  %s1022_s4 = inlined_call_operand.vmem [shape: f32[9,32], index: 4, kind: input, shape index: {}]   ;;  %s1023_s5 = inlined_call_operand.vmem [shape: f32[1,32], index: 5, kind: input, shape index: {}]   ;;  %s1024_s6 = inlined_call_operand.vmem [shape: f32[1,32], index: 6, kind: input, shape index: {}]   ;;  %s1025_s7 = inlined_call_operand.vmem [shape: bf16[32,64], index: 7, kind: input, shape index: {}]   ;;  %s1026_s8 = inlined_call_operand.vmem [shape: f32[1,64], index: 8, kind: input, shape index: {}]   ;;  %s1027_s9 = inlined_call_operand.vmem [shape: f32[1,64], index: 9, kind: input, shape index: {}]   ;;  %s1028_s10 = inlined_call_operand.vmem [shape: f32[2,16,64], index: 10, kind: output, shape index: {}]  }
   0x1 LB: > { %s779_s14 = sadd.s32 4294967295, %s843_s13   ;;  %p783_p0 = scmp.ge.s32.totalorder %s843_s13, 1  ;;  %s843_s13 = sphi %s902_s13, %s20_s13  }
   0x2   : > { %p342_p1 = scmp.lt.s32.totalorder %s843_s13, 3 }
   0x4   : > { %p343_p2 = pnand %p783_p0, %p342_p1 }
   0x5   : > { %v835_v0 = vld [vmem:[%s1025_s7] sm:$0xff] (!%p343_p2)   ;;  %v427_v1 = vlaneseq (!%p343_p2)  ;;  %v845_v2 = vmov (!%p343_p2), 0.0   ;;  %v836_v3 = vld [vmem:[%s1025_s7 + $0x8] sm:$0xff] (!%p343_p2)   ;;  %vm846_vm0 = vmmov (!%p343_p2), 0   ;;  %p395_p3 = scmp.lt.s32.totalorder (!%p343_p2), %s779_s14, 1  ;;  %vm620_vm1 = vcmask (!%p343_p2), 261120  }
   0x6   : > { %346 = sbr.rel (%p343_p2) target bundleno = 269 (0x10d), region = 60  ;;  %816 = vmatprep.subr.bf16.mxu0 (!%p343_p2), %v845_v2  ;;  %820 = vmatprep.mubr.msk.bf16.mxu0 (!%p343_p2), %vm846_vm0, %v845_v2  ;;  %v421_v5 = vld [vmem:[%s1022_s4] sm:$0xff] (!%p343_p2)  ;;  %vm685_vm2 = vcmask (!%p343_p2), 523264  }
   0x7   : > { %817 = vmatpush3.bf16.msra.mxu0 (!%p343_p2), %v835_v0  ;;  %v428_v4 = vshrl.u32 (!%p343_p2), %v427_v1, 7 }
   0x8   : > { %818 = vmatprep.subr.bf16.mxu0 (!%p343_p2), %v845_v2 }
   0x9   : > { %v429_v6 = vsub.s32 (!%p343_p2), 0, %v428_v4  ;;  %v445_v7 = vsub.s32 (!%p343_p2), 1, %v428_v4  ;;  %v461_v8 = vsub.s32 (!%p343_p2), 2, %v428_v4  ;;  %v477_v9 = vsub.s32 (!%p343_p2), 3, %v428_v4 }
   0xa   : > { %v493_v10 = vsub.s32 (!%p343_p2), 4, %v428_v4  ;;  %v509_v12 = vsub.s32 (!%p343_p2), 5, %v428_v4  ;;  %v526_v14 = vsub.s32 (!%p343_p2), 6, %v428_v4  ;;  %v543_v16 = vsub.s32 (!%p343_p2), 7, %v428_v4 }
   0xb   : > { %819 = vmatpush3.bf16.msra.mxu0 (!%p343_p2), %v836_v3  ;;  %v430_v11 = vrot.slane (!%p343_p2), %v421_v5, %v429_v6  ;;  %v446_v13 = vrot.slane (!%p343_p2), %v421_v5, %v445_v7  ;;  %v462_v15 = vrot.slane (!%p343_p2), %v421_v5, %v461_v8  ;;  %v478_v20 = vrot.slane (!%p343_p2), %v421_v5, %v477_v9 }
   0xc   : > { %v494_v21 = vrot.slane (!%p343_p2), %v421_v5, %v493_v10  ;;  %v943_v28 = vrot.slane (!%p343_p2), %v421_v5, %v509_v12  ;;  %v953_v35 = vrot.slane (!%p343_p2), %v421_v5, %v526_v14  ;;  %v958_v42 = vrot.slane (!%p343_p2), %v421_v5, %v543_v16 }
   0xd   : > { %s1030_s14 = smov (!%p395_p3, %s779_s14), 1 }
   0xe   : > { %s824_s21 = smul.u32 40, %s1030_s14  ;;  %s812_s26 = sshll.u32 %s1030_s14, 4 }
   0xf   : > { %s419_s29 = scalar_lea.vmem %s1028_s10, %s812_s26 }
  0x10   : > { %s925_s24 = scalar_lea.vmem %s1018_s0, %s824_s21  ;;  %s930_s27 = scalar_lea.vmem %s1019_s1, %s824_s21 }
  0x11   : > { %v423_v17 = vld [vmem:[%s925_s24] sm:$0xf]  ;;  %v424_v18 = vld [vmem:[%s925_s24 + $0x8] sm:$0xf]  ;;  %v425_v19 = vld [vmem:[%s925_s24 + $0x10] sm:$0xf]  ;;  %s938_s30 = scalar_lea.vmem %s1020_s2, %s824_s21  ;;  %s948_s15 = scalar_lea.vmem %s1021_s3, %s824_s21 }
  0x12   : > { %v426_v22 = vld [vmem:[%s925_s24 + $0x18] sm:$0xf]  ;;  %v431_v23 = vmul.f32 %v430_v11, %v423_v17  ;;  %v432_v24 = vmul.f32 %v430_v11, %v424_v18  ;;  %v433_v25 = vmul.f32 %v430_v11, %v425_v19  ;;  %v439_v26 = vld [vmem:[%s930_s27] sm:$0xf]  ;;  %v440_v27 = vld [vmem:[%s930_s27 + $0x8] sm:$0xf] }
  0x13   : > { %v434_v29 = vmul.f32 %v430_v11, %v426_v22  ;;  %v441_v30 = vld [vmem:[%s930_s27 + $0x10] sm:$0xf]  ;;  %v442_v31 = vld [vmem:[%s930_s27 + $0x18] sm:$0xf]  ;;  %v447_v32 = vmul.f32 %v446_v13, %v439_v26  ;;  %v448_v33 = vmul.f32 %v446_v13, %v440_v27  ;;  %v455_v34 = vld [vmem:[%s925_s24 + $0x1] sm:$0xf] }
  0x14   : > { %v449_v36 = vmul.f32 %v446_v13, %v441_v30  ;;  %v450_v37 = vmul.f32 %v446_v13, %v442_v31  ;;  %v456_v38 = vld [vmem:[%s925_s24 + $0x9] sm:$0xf]  ;;  %v457_v39 = vld [vmem:[%s925_s24 + $0x11] sm:$0xf]  ;;  %v458_v40 = vld [vmem:[%s925_s24 + $0x19] sm:$0xf]  ;;  %v463_v41 = vmul.f32 %v462_v15, %v455_v34 }
  0x15   : > { %v451_v43 = vadd.f32 %v447_v32, %v431_v23  ;;  %v452_v44 = vadd.f32 %v448_v33, %v432_v24  ;;  %v464_v45 = vmul.f32 %v462_v15, %v456_v38  ;;  %v465_v46 = vmul.f32 %v462_v15, %v457_v39  ;;  %v471_v47 = vld [vmem:[%s938_s30] sm:$0xf]  ;;  %v472_v48 = vld [vmem:[%s938_s30 + $0x8] sm:$0xf]  ;;  %v473_v49 = vld [vmem:[%s938_s30 + $0x10] sm:$0xf] }
  0x16   : > { %v453_v50 = vadd.f32 %v449_v36, %v433_v25  ;;  %v454_v51 = vadd.f32 %v450_v37, %v434_v29  ;;  %v466_v52 = vmul.f32 %v462_v15, %v458_v40  ;;  %v474_v53 = vld [vmem:[%s938_s30 + $0x18] sm:$0xf]  ;;  %v479_v54 = vmul.f32 %v478_v20, %v471_v47  ;;  %v487_v55 = vld [vmem:[%s948_s15] sm:$0xf]  ;;  %v488_v56 = vld [vmem:[%s948_s15 + $0x8] sm:$0xf] }
  0x17   : > { %v467_v57 = vadd.f32 %v463_v41, %v451_v43  ;;  %v468_v58 = vadd.f32 %v464_v45, %v452_v44  ;;  %v480_v59 = vmul.f32 %v478_v20, %v472_v48  ;;  %v481_v60 = vmul.f32 %v478_v20, %v473_v49  ;;  %v489_v61 = vld [vmem:[%s948_s15 + $0x10] sm:$0xf]  ;;  %v490_v62 = vld [vmem:[%s948_s15 + $0x18] sm:$0xf]  ;;  %v503_v63 = vld [vmem:[%s938_s30 + $0x1] sm:$0xf] }
  0x18   : > { %v469_v0 = vadd.f32 %v465_v46, %v453_v50  ;;  %v470_v1 = vadd.f32 %v466_v52, %v454_v51  ;;  %v482_v2 = vmul.f32 %v478_v20, %v474_v53  ;;  %v495_v3 = vmul.f32 %v494_v21, %v487_v55  ;;  %v504_v4 = vld [vmem:[%s938_s30 + $0x9] sm:$0xf]  ;;  %v505_v5 = vld [vmem:[%s938_s30 + $0x11] sm:$0xf]  ;;  %v506_v10 = vld [vmem:[%s938_s30 + $0x19] sm:$0xf] }
  0x19   : > { %v483_v6 = vadd.f32 %v479_v54, %v467_v57  ;;  %v484_v7 = vadd.f32 %v480_v59, %v468_v58  ;;  %v496_v8 = vmul.f32 %v494_v21, %v488_v56  ;;  %v497_v9 = vmul.f32 %v494_v21, %v489_v61  ;;  %v790_v11 = vld [vmem:[%s925_s24 + $0x8] sm:$0xf]  ;;  %v791_v16 = vld [vmem:[%s925_s24 + $0x10] sm:$0xf]  ;;  %v792_v17 = vld [vmem:[%s925_s24 + $0x18] sm:$0xf] }
  0x1a   : > { %v485_v12 = vadd.f32 %v481_v60, %v469_v0  ;;  %v486_v13 = vadd.f32 %v482_v2, %v470_v1  ;;  %v498_v14 = vmul.f32 %v494_v21, %v490_v62  ;;  %v511_v15 = vmul.f32 %v943_v28, %v503_v63  ;;  %v793_v23 = vld [vmem:[%s925_s24 + $0x20] sm:$0xf]  ;;  %v794_v24 = vld [vmem:[%s930_s27 + $0x8] sm:$0xf]  ;;  %v795_v29 = vld [vmem:[%s930_s27 + $0x10] sm:$0xf] }
  0x1b   : > { %v499_v18 = vadd.f32 %v495_v3, %v483_v6  ;;  %v500_v19 = vadd.f32 %v496_v8, %v484_v7  ;;  %v512_v20 = vmul.f32 %v943_v28, %v504_v4  ;;  %v513_v22 = vmul.f32 %v943_v28, %v505_v5  ;;  %v796_v30 = vld [vmem:[%s930_s27 + $0x18] sm:$0xf]  ;;  %v802_v31 = vld [vmem:[%s1022_s4 + $0x8] ss:$0 sm:$0xff]  ;;  %v797_v37 = vld [vmem:[%s930_s27 + $0x20] sm:$0xf] }
  0x1c   : > { %v501_v25 = vadd.f32 %v497_v9, %v485_v12  ;;  %v502_v26 = vadd.f32 %v498_v14, %v486_v13  ;;  %v514_v27 = vmul.f32 %v943_v28, %v506_v10  ;;  %v528_v21 = vmul.f32 %v790_v11, %v953_v35  ;;  %v798_v38 = vld [vmem:[%s925_s24 + $0x9] sm:$0xf]  ;;  %v799_v43 = vld [vmem:[%s925_s24 + $0x11] sm:$0xf]  ;;  %v800_v44 = vld [vmem:[%s925_s24 + $0x19] sm:$0xf] }
  0x1d   : > { %v515_v32 = vadd.f32 %v511_v15, %v499_v18  ;;  %v516_v33 = vadd.f32 %v512_v20, %v500_v19  ;;  %v529_v34 = vmul.f32 %v791_v16, %v953_v35  ;;  %v530_v36 = vmul.f32 %v792_v17, %v953_v35  ;;  %v801_v49 = vld [vmem:[%s925_s24 + $0x21] sm:$0xf]  ;;  %v803_v60 = vld [vmem:[%s1023_s5] ss:$0 sm:$0xff] }
  0x1e   : > { %v517_v39 = vadd.f32 %v513_v22, %v501_v25  ;;  %v518_v28 = vadd.f32 %v514_v27, %v502_v26  ;;  %v531_v40 = vmul.f32 %v793_v23, %v953_v35  ;;  %v545_v41 = vmul.f32 %v794_v24, %v958_v42  ;;  %v808_v16 = vld [vmem:[%s1026_s8] ss:$0 sm:$0xff] }
  0x1f   : > { %v532_v45 = vadd.f32 %v528_v21, %v515_v32  ;;  %v533_v46 = vadd.f32 %v529_v34, %v516_v33  ;;  %v546_v47 = vmul.f32 %v795_v29, %v958_v42  ;;  %v547_v48 = vmul.f32 %v796_v30, %v958_v42  ;;  %v809_v18 = vld [vmem:[%s1027_s9] ss:$0 sm:$0xff] }
  0x20   : > { %v534_v50 = vadd.f32 %v530_v36, %v517_v39  ;;  %v535_v51 = vadd.f32 %v531_v40, %v518_v28  ;;  %v548_v52 = vmul.f32 %v797_v37, %v958_v42  ;;  %v561_v53 = vmul.f32 %v802_v31, %v798_v38  ;;  %v804_v42 = vld [vmem:[%s1024_s6] ss:$0 sm:$0xff] }
  0x21   : > { %v549_v54 = vadd.f32 %v545_v41, %v532_v45  ;;  %v550_v55 = vadd.f32 %v546_v47, %v533_v46  ;;  %v562_v56 = vmul.f32 %v802_v31, %v799_v43  ;;  %v563_v35 = vmul.f32 %v802_v31, %v800_v44 }
  0x22   : > { %v551_v57 = vadd.f32 %v547_v48, %v534_v50  ;;  %v552_v58 = vadd.f32 %v548_v52, %v535_v51  ;;  %v564_v59 = vmul.f32 %v802_v31, %v801_v49 }
  0x23   : > { %v565_v61 = vadd.f32 %v561_v53, %v549_v54  ;;  %v566_v62 = vadd.f32 %v562_v56, %v550_v55 }
  0x24   : > { %v567_v63 = vadd.f32 %v563_v35, %v551_v57  ;;  %v568_v0 = vadd.f32 %v564_v59, %v552_v58 }
  0x25   : > { %v576_v1 = vmul.f32 %v803_v60, %v565_v61  ;;  %v577_v2 = vmul.f32 %v803_v60, %v566_v62 }
  0x26   : > { %v578_v3 = vmul.f32 %v803_v60, %v567_v63  ;;  %v579_v4 = vmul.f32 %v803_v60, %v568_v0 }
  0x27   : > { %v587_v5 = vadd.f32 %v804_v42, %v576_v1  ;;  %v588_v6 = vadd.f32 %v804_v42, %v577_v2 }
  0x28   : > { %v589_v7 = vadd.f32 %v804_v42, %v578_v3  ;;  %v590_v8 = vadd.f32 %v804_v42, %v579_v4 }
  0x29   : > { %v591_v9 = vmax.f32 %v587_v5, 0.0  ;;  %v592_v10 = vmax.f32 %v588_v6, 0.0 }
  0x2a   : > { %v593_v11 = vmax.f32 %v589_v7, 0.0  ;;  %v594_v12 = vmax.f32 %v590_v8, 0.0 }
  0x2b   : > { %v599_v13 = vcombine.low %v591_v9, %v592_v10 }
  0x2c   : > { %v600_v14 = vcombine.low %v593_v11, %v594_v12 }
  0x2e   : > { %v603_v15 = vpack.c.bf16 %v600_v14, %v599_v13 }
  0x30   : > { %821 = vmatmul.mubr.msk.bf16.vlgmr.msra.gmra.mrb[0].mxu0 %vm620_vm1, %v603_v15 }
 0x103   : > { %v658_v17 = vpop.f32.mrb[0].mxu0 }
 0x104   : > { %v672_v19 = vmul.f32 %v808_v16, %v658_v17  ;;  %v822_v20 = vpop.f32.mrb[1].mxu0 }
 0x105   : > { %v661_v22 = vpop.f32.mrb[2].mxu0 }
 0x106   : > { %v681_v23 = vadd.f32 %v809_v18, %v672_v19  ;;  %v673_v24 = vmul.f32 %v808_v16, %v661_v22  ;;  %v823_v25 = vpop.f32.mrb[3].mxu0 }
 0x108   : > { %v683_v26 = vmax.f32 %v681_v23, 0.0  ;;  %v682_v27 = vadd.f32 %v809_v18, %v673_v24 }
 0x10a   : > { %686 = vst.msk [vmem:[%s419_s29] sm:$0xff] %vm685_vm2, %v683_v26  ;;  %v684_v21 = vmax.f32 %v682_v27, 0.0 }
 0x10c   : > { %687 = vst.msk [vmem:[%s419_s29 + $0x8] sm:$0xff] %vm685_vm2, %v684_v21 }
 0x10d PF: > { %s20_s13 = sadd.s32 1, %s843_s13  }
 0x10e   : > { %p17_p4 = scmp.ge.s32.totalorder %s20_s13, 4  }
 0x110   :  { %19 = sbr.rel (!%p17_p4) target bundleno = 1 (0x1), region = 101 }

// kernel: _lambda_.20
= control target key start
LH: loop header
LB: loop body
LE: loop exit
PB: predicated region body
PF: predicated region fallthrough
CT: control target
= control target key end

     0   :  { %s744_s24 = smov 0   ;;  %s854_s0 = inlined_call_operand.vmem [shape: f32[2,6,6,64], index: 0, kind: input, shape index: {}]   ;;  %s855_s1 = inlined_call_operand.vmem [shape: f32[9,64], index: 1, kind: input, shape index: {}]   ;;  %s856_s2 = inlined_call_operand.vmem [shape: f32[1,64], index: 2, kind: input, shape index: {}]   ;;  %s857_s3 = inlined_call_operand.vmem [shape: f32[1,64], index: 3, kind: input, shape index: {}]   ;;  %s858_s4 = inlined_call_operand.vmem [shape: bf16[64,64], index: 4, kind: input, shape index: {}]   ;;  %s859_s5 = inlined_call_operand.vmem [shape: f32[1,64], index: 5, kind: input, shape index: {}]   ;;  %s860_s6 = inlined_call_operand.vmem [shape: f32[1,64], index: 6, kind: input, shape index: {}]   ;;  %s861_s7 = inlined_call_operand.vmem [shape: f32[2,16,64], index: 7, kind: output, shape index: {}]  }
   0x1 LB: > { %s617_s25 = sadd.s32 4294967295, %s700_s24   ;;  %p621_p0 = scmp.ge.s32.totalorder %s700_s24, 1  ;;  %s700_s24 = sphi %s744_s24, %s17_s24  }
   0x2   : > { %p237_p1 = scmp.lt.s32.totalorder %s700_s24, 3 }
   0x4   : > { %p238_p2 = pnand %p621_p0, %p237_p1 }
   0x5   : > { %v690_v0 = vld [vmem:[%s858_s4] sm:$0xff] (!%p238_p2)   ;;  %v286_v1 = vlaneseq (!%p238_p2)  ;;  %v702_v2 = vmov (!%p238_p2), 0.0   ;;  %v691_v3 = vld [vmem:[%s858_s4 + $0x8] sm:$0xff] (!%p238_p2)   ;;  %vm703_vm0 = vmmov (!%p238_p2), 0   ;;  %p269_p3 = scmp.lt.s32.totalorder (!%p238_p2), %s617_s25, 1  ;;  %v692_v10 = vld [vmem:[%s858_s4 + $0x10] sm:$0xff] (!%p238_p2)  }
   0x6   : > { %241 = sbr.rel (%p238_p2) target bundleno = 269 (0x10d), region = 48  ;;  %667 = vmatprep.subr.bf16.mxu0 (!%p238_p2), %v702_v2  ;;  %675 = vmatprep.mubr.msk.bf16.mxu0 (!%p238_p2), %vm703_vm0, %v702_v2  ;;  %v280_v5 = vld [vmem:[%s855_s1] sm:$0xff] (!%p238_p2)  ;;  %v693_v16 = vld [vmem:[%s858_s4 + $0x18] sm:$0xff] (!%p238_p2)   ;;  %vm495_vm1 = vcmask (!%p238_p2), 523264  }
   0x7   : > { %668 = vmatpush3.bf16.msra.mxu0 (!%p238_p2), %v690_v0  ;;  %v287_v4 = vshrl.u32 (!%p238_p2), %v286_v1, 7 }
   0x8   : > { %669 = vmatprep.subr.bf16.mxu0 (!%p238_p2), %v702_v2 }
   0x9   : > { %v288_v6 = vsub.s32 (!%p238_p2), 0, %v287_v4  ;;  %v304_v7 = vsub.s32 (!%p238_p2), 1, %v287_v4  ;;  %v320_v8 = vsub.s32 (!%p238_p2), 2, %v287_v4  ;;  %v337_v9 = vsub.s32 (!%p238_p2), 3, %v287_v4 }
   0xa   : > { %v353_v11 = vsub.s32 (!%p238_p2), 4, %v287_v4  ;;  %v369_v12 = vsub.s32 (!%p238_p2), 5, %v287_v4  ;;  %v386_v15 = vsub.s32 (!%p238_p2), 6, %v287_v4  ;;  %v402_v18 = vsub.s32 (!%p238_p2), 7, %v287_v4 }
   0xb   : > { %670 = vmatpush3.bf16.msra.mxu0 (!%p238_p2), %v691_v3  ;;  %v289_v13 = vrot.slane (!%p238_p2), %v280_v5, %v288_v6  ;;  %v305_v14 = vrot.slane (!%p238_p2), %v280_v5, %v304_v7  ;;  %v321_v17 = vrot.slane (!%p238_p2), %v280_v5, %v320_v8  ;;  %v338_v22 = vrot.slane (!%p238_p2), %v280_v5, %v337_v9 }
   0xc   : > { %671 = vmatprep.subr.bf16.mxu0 (!%p238_p2), %v702_v2  ;;  %v354_v23 = vrot.slane (!%p238_p2), %v280_v5, %v353_v11  ;;  %v781_v30 = vrot.slane (!%p238_p2), %v280_v5, %v369_v12  ;;  %v786_v37 = vrot.slane (!%p238_p2), %v280_v5, %v386_v15  ;;  %v791_v44 = vrot.slane (!%p238_p2), %v280_v5, %v402_v18 }
   0xd   : > { %s863_s25 = smov (!%p269_p3, %s617_s25), 1 }
   0xe   : > { %s679_s11 = smul.u32 48, %s863_s25  ;;  %s661_s29 = sshll.u32 %s863_s25, 4 }
   0xf   : > { %672 = vmatpush3.bf16.msra.mxu0 %v692_v10  ;;  %s278_s9 = scalar_lea.vmem %s861_s7, %s661_s29 }
  0x10   : > { %s773_s16 = scalar_lea.vmem %s854_s0, %s679_s11  ;;  %673 = vmatprep.subr.bf16.mxu0 %v702_v2 }
  0x11   : > { %v282_v19 = vld [vmem:[%s773_s16] sm:$0xf]  ;;  %v283_v20 = vld [vmem:[%s773_s16 + $0x8] sm:$0xf]  ;;  %v284_v21 = vld [vmem:[%s773_s16 + $0x10] sm:$0xf] }
  0x12   : > { %v285_v24 = vld [vmem:[%s773_s16 + $0x18] sm:$0xf]  ;;  %v290_v25 = vmul.f32 %v289_v13, %v282_v19  ;;  %v291_v26 = vmul.f32 %v289_v13, %v283_v20  ;;  %v292_v27 = vmul.f32 %v289_v13, %v284_v21  ;;  %v298_v28 = vld [vmem:[%s773_s16 + $0x1] sm:$0xf]  ;;  %v299_v29 = vld [vmem:[%s773_s16 + $0x9] sm:$0xf] }
  0x13   : > { %v293_v31 = vmul.f32 %v289_v13, %v285_v24  ;;  %v300_v32 = vld [vmem:[%s773_s16 + $0x11] sm:$0xf]  ;;  %v301_v33 = vld [vmem:[%s773_s16 + $0x19] sm:$0xf]  ;;  %v306_v34 = vmul.f32 %v305_v14, %v298_v28  ;;  %v307_v35 = vmul.f32 %v305_v14, %v299_v29  ;;  %v314_v36 = vld [vmem:[%s773_s16 + $0x2] sm:$0xf]  ;;  %674 = vmatpush3.bf16.msra.mxu0 %v693_v16 }
  0x14   : > { %v308_v38 = vmul.f32 %v305_v14, %v300_v32  ;;  %v309_v39 = vmul.f32 %v305_v14, %v301_v33  ;;  %v315_v40 = vld [vmem:[%s773_s16 + $0xa] sm:$0xf]  ;;  %v316_v41 = vld [vmem:[%s773_s16 + $0x12] sm:$0xf]  ;;  %v317_v42 = vld [vmem:[%s773_s16 + $0x1a] sm:$0xf]  ;;  %v322_v43 = vmul.f32 %v321_v17, %v314_v36 }
  0x15   : > { %v310_v45 = vadd.f32 %v306_v34, %v290_v25  ;;  %v311_v46 = vadd.f32 %v307_v35, %v291_v26  ;;  %v323_v47 = vmul.f32 %v321_v17, %v315_v40  ;;  %v324_v48 = vmul.f32 %v321_v17, %v316_v41  ;;  %v625_v49 = vld [vmem:[%s773_s16 + $0x8] sm:$0xf]  ;;  %v626_v50 = vld [vmem:[%s773_s16 + $0x10] sm:$0xf]  ;;  %v627_v51 = vld [vmem:[%s773_s16 + $0x18] sm:$0xf] }
  0x16   : > { %v312_v52 = vadd.f32 %v308_v38, %v292_v27  ;;  %v313_v53 = vadd.f32 %v309_v39, %v293_v31  ;;  %v325_v54 = vmul.f32 %v321_v17, %v317_v42  ;;  %v628_v55 = vld [vmem:[%s773_s16 + $0x20] sm:$0xf]  ;;  %v339_v56 = vmul.f32 %v625_v49, %v338_v22  ;;  %v629_v57 = vld [vmem:[%s773_s16 + $0x9] sm:$0xf]  ;;  %v630_v58 = vld [vmem:[%s773_s16 + $0x11] sm:$0xf] }
  0x17   : > { %v326_v59 = vadd.f32 %v322_v43, %v310_v45  ;;  %v327_v60 = vadd.f32 %v323_v47, %v311_v46  ;;  %v340_v61 = vmul.f32 %v626_v50, %v338_v22  ;;  %v341_v62 = vmul.f32 %v627_v51, %v338_v22  ;;  %v631_v63 = vld [vmem:[%s773_s16 + $0x19] sm:$0xf]  ;;  %v632_v0 = vld [vmem:[%s773_s16 + $0x21] sm:$0xf]  ;;  %v633_v1 = vld [vmem:[%s773_s16 + $0xa] sm:$0xf] }
  0x18   : > { %v328_v2 = vadd.f32 %v324_v48, %v312_v52  ;;  %v329_v3 = vadd.f32 %v325_v54, %v313_v53  ;;  %v342_v4 = vmul.f32 %v628_v55, %v338_v22  ;;  %v355_v5 = vmul.f32 %v629_v57, %v354_v23  ;;  %v634_v6 = vld [vmem:[%s773_s16 + $0x12] sm:$0xf]  ;;  %v635_v7 = vld [vmem:[%s773_s16 + $0x1a] sm:$0xf]  ;;  %v636_v12 = vld [vmem:[%s773_s16 + $0x22] sm:$0xf] }
  0x19   : > { %v343_v8 = vadd.f32 %v339_v56, %v326_v59  ;;  %v344_v9 = vadd.f32 %v340_v61, %v327_v60  ;;  %v356_v10 = vmul.f32 %v630_v58, %v354_v23  ;;  %v357_v11 = vmul.f32 %v631_v63, %v354_v23  ;;  %v637_v13 = vld [vmem:[%s773_s16 + $0x10] sm:$0xf]  ;;  %v638_v18 = vld [vmem:[%s773_s16 + $0x18] sm:$0xf]  ;;  %v639_v19 = vld [vmem:[%s773_s16 + $0x20] sm:$0xf] }
  0x1a   : > { %v345_v14 = vadd.f32 %v341_v62, %v328_v2  ;;  %v346_v15 = vadd.f32 %v342_v4, %v329_v3  ;;  %v358_v16 = vmul.f32 %v632_v0, %v354_v23  ;;  %v371_v17 = vmul.f32 %v633_v1, %v781_v30  ;;  %v640_v25 = vld [vmem:[%s773_s16 + $0x28] sm:$0xf]  ;;  %v641_v26 = vld [vmem:[%s773_s16 + $0x11] sm:$0xf]  ;;  %v642_v31 = vld [vmem:[%s773_s16 + $0x19] sm:$0xf] }
  0x1b   : > { %v359_v20 = vadd.f32 %v355_v5, %v343_v8  ;;  %v360_v21 = vadd.f32 %v356_v10, %v344_v9  ;;  %v372_v22 = vmul.f32 %v634_v6, %v781_v30  ;;  %v373_v24 = vmul.f32 %v635_v7, %v781_v30  ;;  %v643_v32 = vld [vmem:[%s773_s16 + $0x21] sm:$0xf]  ;;  %v649_v33 = vld [vmem:[%s855_s1 + $0x8] ss:$0 sm:$0xff]  ;;  %v644_v39 = vld [vmem:[%s773_s16 + $0x29] sm:$0xf] }
  0x1c   : > { %v361_v27 = vadd.f32 %v357_v11, %v345_v14  ;;  %v362_v28 = vadd.f32 %v358_v16, %v346_v15  ;;  %v374_v29 = vmul.f32 %v636_v12, %v781_v30  ;;  %v388_v23 = vmul.f32 %v637_v13, %v786_v37  ;;  %v645_v40 = vld [vmem:[%s773_s16 + $0x12] sm:$0xf]  ;;  %v646_v45 = vld [vmem:[%s773_s16 + $0x1a] sm:$0xf]  ;;  %v647_v46 = vld [vmem:[%s773_s16 + $0x22] sm:$0xf] }
  0x1d   : > { %v375_v34 = vadd.f32 %v371_v17, %v359_v20  ;;  %v376_v35 = vadd.f32 %v372_v22, %v360_v21  ;;  %v389_v36 = vmul.f32 %v638_v18, %v786_v37  ;;  %v390_v38 = vmul.f32 %v639_v19, %v786_v37  ;;  %v648_v51 = vld [vmem:[%s773_s16 + $0x2a] sm:$0xf]  ;;  %v650_v62 = vld [vmem:[%s856_s2] ss:$0 sm:$0xff] }
  0x1e   : > { %v377_v41 = vadd.f32 %v373_v24, %v361_v27  ;;  %v378_v30 = vadd.f32 %v374_v29, %v362_v28  ;;  %v391_v42 = vmul.f32 %v640_v25, %v786_v37  ;;  %v404_v43 = vmul.f32 %v641_v26, %v791_v44  ;;  %v657_v18 = vld [vmem:[%s859_s5] ss:$0 sm:$0xff] }
  0x1f   : > { %v392_v47 = vadd.f32 %v388_v23, %v375_v34  ;;  %v393_v48 = vadd.f32 %v389_v36, %v376_v35  ;;  %v405_v49 = vmul.f32 %v642_v31, %v791_v44  ;;  %v406_v50 = vmul.f32 %v643_v32, %v791_v44  ;;  %v658_v20 = vld [vmem:[%s860_s6] ss:$0 sm:$0xff] }
  0x20   : > { %v394_v52 = vadd.f32 %v390_v38, %v377_v41  ;;  %v395_v53 = vadd.f32 %v391_v42, %v378_v30  ;;  %v407_v54 = vmul.f32 %v644_v39, %v791_v44  ;;  %v420_v55 = vmul.f32 %v649_v33, %v645_v40  ;;  %v651_v44 = vld [vmem:[%s857_s3] ss:$0 sm:$0xff] }
  0x21   : > { %v408_v56 = vadd.f32 %v404_v43, %v392_v47  ;;  %v409_v57 = vadd.f32 %v405_v49, %v393_v48  ;;  %v421_v58 = vmul.f32 %v649_v33, %v646_v45  ;;  %v422_v37 = vmul.f32 %v649_v33, %v647_v46 }
  0x22   : > { %v410_v59 = vadd.f32 %v406_v50, %v394_v52  ;;  %v411_v60 = vadd.f32 %v407_v54, %v395_v53  ;;  %v423_v61 = vmul.f32 %v649_v33, %v648_v51 }
  0x23   : > { %v424_v63 = vadd.f32 %v420_v55, %v408_v56  ;;  %v425_v0 = vadd.f32 %v421_v58, %v409_v57 }
  0x24   : > { %v426_v1 = vadd.f32 %v422_v37, %v410_v59  ;;  %v427_v2 = vadd.f32 %v423_v61, %v411_v60 }
  0x25   : > { %v435_v3 = vmul.f32 %v650_v62, %v424_v63  ;;  %v436_v4 = vmul.f32 %v650_v62, %v425_v0 }
  0x26   : > { %v437_v5 = vmul.f32 %v650_v62, %v426_v1  ;;  %v438_v6 = vmul.f32 %v650_v62, %v427_v2 }
  0x27   : > { %v446_v7 = vadd.f32 %v651_v44, %v435_v3  ;;  %v447_v8 = vadd.f32 %v651_v44, %v436_v4 }
  0x28   : > { %v448_v9 = vadd.f32 %v651_v44, %v437_v5  ;;  %v449_v10 = vadd.f32 %v651_v44, %v438_v6 }
  0x29   : > { %v450_v11 = vmax.f32 %v446_v7, 0.0  ;;  %v451_v12 = vmax.f32 %v447_v8, 0.0 }
  0x2a   : > { %v452_v13 = vmax.f32 %v448_v9, 0.0  ;;  %v453_v14 = vmax.f32 %v449_v10, 0.0 }
  0x2b   : > { %v458_v15 = vcombine.low %v450_v11, %v451_v12 }
  0x2c   : > { %v459_v16 = vcombine.low %v452_v13, %v453_v14 }
  0x2e   : > { %v462_v17 = vpack.c.bf16 %v459_v16, %v458_v15 }
  0x30   : > { %676 = vmatmul.mubr.msk.bf16.vlgmr.msra.gmra.mrb[0].mxu0 %vm495_vm1, %v462_v17 }
 0x103   : > { %v533_v19 = vpop.f32.mrb[0].mxu0 }
 0x104   : > { %v547_v21 = vmul.f32 %v657_v18, %v533_v19  ;;  %v677_v22 = vpop.f32.mrb[1].mxu0 }
 0x105   : > { %v536_v24 = vpop.f32.mrb[2].mxu0 }
 0x106   : > { %v556_v25 = vadd.f32 %v658_v20, %v547_v21  ;;  %v548_v26 = vmul.f32 %v657_v18, %v536_v24  ;;  %v678_v27 = vpop.f32.mrb[3].mxu0 }
 0x108   : > { %v558_v28 = vmax.f32 %v556_v25, 0.0  ;;  %v557_v29 = vadd.f32 %v658_v20, %v548_v26 }
 0x10a   : > { %560 = vst.msk [vmem:[%s278_s9] sm:$0xff] %vm495_vm1, %v558_v28  ;;  %v559_v23 = vmax.f32 %v557_v29, 0.0 }
 0x10c   : > { %561 = vst.msk [vmem:[%s278_s9 + $0x8] sm:$0xff] %vm495_vm1, %v559_v23 }
 0x10d PF: > { %s17_s24 = sadd.s32 1, %s700_s24  }
 0x10e   : > { %p14_p4 = scmp.ge.s32.totalorder %s17_s24, 4  }
 0x110   :  { %16 = sbr.rel (!%p14_p4) target bundleno = 1 (0x1), region = 80 }

// kernel: _lambda_.21
= control target key start
LH: loop header
LB: loop body
LE: loop exit
PB: predicated region body
PF: predicated region fallthrough
CT: control target
= control target key end

     0   :  { %s855_s13 = smov 0   ;;  %s948_s0 = inlined_call_operand.vmem [shape: f32[2,3,3,64], index: 0, kind: input, shape index: {}]   ;;  %s949_s1 = inlined_call_operand.vmem [shape: f32[2,3,3,64], index: 1, kind: input, shape index: {}]   ;;  %s950_s2 = inlined_call_operand.vmem [shape: f32[2,3,3,64], index: 2, kind: input, shape index: {}]   ;;  %s951_s3 = inlined_call_operand.vmem [shape: f32[2,3,3,64], index: 3, kind: input, shape index: {}]   ;;  %s952_s4 = inlined_call_operand.vmem [shape: f32[9,64], index: 4, kind: input, shape index: {}]   ;;  %s953_s5 = inlined_call_operand.vmem [shape: f32[1,64], index: 5, kind: input, shape index: {}]   ;;  %s954_s6 = inlined_call_operand.vmem [shape: f32[1,64], index: 6, kind: input, shape index: {}]   ;;  %s955_s7 = inlined_call_operand.vmem [shape: bf16[64,128], index: 7, kind: input, shape index: {}]   ;;  %s956_s8 = inlined_call_operand.vmem [shape: f32[1,128], index: 8, kind: input, shape index: {}]   ;;  %s957_s9 = inlined_call_operand.vmem [shape: f32[1,128], index: 9, kind: input, shape index: {}]   ;;  %s958_s10 = inlined_call_operand.vmem [shape: f32[2,4,128], index: 10, kind: output, shape index: {}]  }
   0x1 LB: > { %s728_s14 = sadd.s32 4294967295, %s795_s13   ;;  %p732_p0 = scmp.ge.s32.totalorder %s795_s13, 1  ;;  %s795_s13 = sphi %s855_s13, %s20_s13  }
   0x2   : > { %p342_p1 = scmp.lt.s32.totalorder %s795_s13, 3 }
   0x4   : > { %p343_p2 = pnand %p732_p0, %p342_p1 }
   0x5   : > { %v785_v0 = vld [vmem:[%s955_s7] sm:$0xff] (!%p343_p2)   ;;  %v423_v1 = vlaneseq (!%p343_p2)  ;;  %v797_v2 = vmov (!%p343_p2), 0.0   ;;  %v786_v3 = vld [vmem:[%s955_s7 + $0x8] sm:$0xff] (!%p343_p2)   ;;  %vm798_vm0 = vmmov (!%p343_p2), 0   ;;  %p394_p3 = scmp.lt.s32.totalorder (!%p343_p2), %s728_s14, 1  ;;  %v787_v10 = vld [vmem:[%s955_s7 + $0x10] sm:$0xff] (!%p343_p2)  }
   0x6   : > { %346 = sbr.rel (%p343_p2) target bundleno = 268 (0x10c), region = 60  ;;  %761 = vmatprep.subr.bf16.mxu0 (!%p343_p2), %v797_v2  ;;  %769 = vmatprep.mubr.msk.bf16.mxu0 (!%p343_p2), %vm798_vm0, %v797_v2  ;;  %v419_v5 = vld [vmem:[%s952_s4] sm:$0xff] (!%p343_p2)  ;;  %v788_v15 = vld [vmem:[%s955_s7 + $0x18] sm:$0xff] (!%p343_p2)   ;;  %v744_v60 = vld [vmem:[%s952_s4 + $0x8] ss:$0 sm:$0xff] (!%p343_p2)  ;;  %vm577_vm1 = vcmask (!%p343_p2), 523264  }
   0x7   : > { %762 = vmatpush3.bf16.msra.mxu0 (!%p343_p2), %v785_v0  ;;  %v869_v4 = vshrl.u32 (!%p343_p2), %v423_v1, 7 }
   0x8   : > { %763 = vmatprep.subr.bf16.mxu0 (!%p343_p2), %v797_v2 }
   0x9   : > { %v425_v6 = vsub.s32 (!%p343_p2), 0, %v869_v4  ;;  %v435_v7 = vsub.s32 (!%p343_p2), 1, %v869_v4  ;;  %v445_v8 = vsub.s32 (!%p343_p2), 2, %v869_v4  ;;  %v455_v9 = vsub.s32 (!%p343_p2), 3, %v869_v4 }
   0xa   : > { %v465_v11 = vsub.s32 (!%p343_p2), 4, %v869_v4  ;;  %v475_v17 = vsub.s32 (!%p343_p2), 5, %v869_v4  ;;  %v486_v18 = vsub.s32 (!%p343_p2), 6, %v869_v4  ;;  %v497_v39 = vsub.s32 (!%p343_p2), 7, %v869_v4 }
   0xb   : > { %764 = vmatpush3.bf16.msra.mxu0 (!%p343_p2), %v786_v3  ;;  %v426_v12 = vrot.slane (!%p343_p2), %v419_v5, %v425_v6  ;;  %v436_v13 = vrot.slane (!%p343_p2), %v419_v5, %v435_v7  ;;  %v446_v14 = vrot.slane (!%p343_p2), %v419_v5, %v445_v8  ;;  %v456_v16 = vrot.slane (!%p343_p2), %v419_v5, %v455_v9 }
   0xc   : > { %765 = vmatprep.subr.bf16.mxu0 (!%p343_p2), %v797_v2  ;;  %v466_v28 = vrot.slane (!%p343_p2), %v419_v5, %v465_v11  ;;  %v476_v38 = vrot.slane (!%p343_p2), %v419_v5, %v475_v17  ;;  %v487_v46 = vrot.slane (!%p343_p2), %v419_v5, %v486_v18  ;;  %v498_v53 = vrot.slane (!%p343_p2), %v419_v5, %v497_v39  ;;  %v746_v17 = vld [vmem:[%s954_s6] ss:$0 sm:$0xff] (!%p343_p2) }
   0xd   : > { %s960_s14 = smov (!%p394_p3, %s728_s14), 1 }
   0xe   : > { %s773_s23 = smul.u32 12, %s960_s14  ;;  %s737_s30 = sshll.u32 %s960_s14, 2 }
   0xf   : > { %766 = vmatpush3.bf16.msra.mxu0 %v787_v10  ;;  %s417_s15 = scalar_lea.vmem %s958_s10, %s737_s30 }
  0x10   : > { %s891_s28 = scalar_lea.vmem %s948_s0, %s773_s23  ;;  %s896_s11 = scalar_lea.vmem %s949_s1, %s773_s23  ;;  %767 = vmatprep.subr.bf16.mxu0 %v797_v2 }
  0x11   : > { %s903_s16 = scalar_lea.vmem %s950_s2, %s773_s23  ;;  %s413_s19 = scalar_lea.vmem %s951_s3, %s773_s23  ;;  %v421_v19 = vld [vmem:[%s891_s28] sm:$0x3]  ;;  %v422_v20 = vld [vmem:[%s891_s28 + $0x4] sm:$0x3]  ;;  %v739_v52 = vld [vmem:[%s891_s28 + $0x8] sm:$0x3] }
  0x12   : > { %v431_v21 = vld [vmem:[%s896_s11] sm:$0x3]  ;;  %v427_v22 = vmul.f32 %v426_v12, %v421_v19  ;;  %v428_v23 = vmul.f32 %v426_v12, %v422_v20  ;;  %v432_v24 = vld [vmem:[%s896_s11 + $0x4] sm:$0x3]  ;;  %v741_v59 = vld [vmem:[%s896_s11 + $0x8] sm:$0x3]  ;;  %v489_v62 = vmul.f32 %v739_v52, %v487_v46 }
  0x13   : > { %v437_v25 = vmul.f32 %v436_v13, %v431_v21  ;;  %v441_v26 = vld [vmem:[%s891_s28 + $0x1] sm:$0x3]  ;;  %v442_v27 = vld [vmem:[%s891_s28 + $0x5] sm:$0x3]  ;;  %v438_v29 = vmul.f32 %v436_v13, %v432_v24  ;;  %768 = vmatpush3.bf16.msra.mxu0 %v788_v15  ;;  %v743_v2 = vld [vmem:[%s891_s28 + $0x9] sm:$0x3]  ;;  %v500_v6 = vmul.f32 %v741_v59, %v498_v53 }
  0x14   : > { %v447_v30 = vmul.f32 %v446_v14, %v441_v26  ;;  %v448_v31 = vmul.f32 %v446_v14, %v442_v27  ;;  %v451_v32 = vld [vmem:[%s903_s16] sm:$0x3]  ;;  %v452_v33 = vld [vmem:[%s903_s16 + $0x4] sm:$0x3]  ;;  %v510_v9 = vmul.f32 %v744_v60, %v743_v2  ;;  %v799_v13 = vmov 1983009808  }
  0x15   : > { %v461_v34 = vld [vmem:[%s413_s19] sm:$0x3]  ;;  %v439_v35 = vadd.f32 %v437_v25, %v427_v22  ;;  %v457_v36 = vmul.f32 %v456_v16, %v451_v32  ;;  %v462_v37 = vld [vmem:[%s413_s19 + $0x4] sm:$0x3]  ;;  %v440_v40 = vadd.f32 %v438_v29, %v428_v23  ;;  %v458_v41 = vmul.f32 %v456_v16, %v452_v33 }
  0x16   : > { %v471_v42 = vld [vmem:[%s903_s16 + $0x1] sm:$0x3]  ;;  %v467_v44 = vmul.f32 %v466_v28, %v461_v34  ;;  %v472_v45 = vld [vmem:[%s903_s16 + $0x5] sm:$0x3]  ;;  %v468_v48 = vmul.f32 %v466_v28, %v462_v37  ;;  %v745_v12 = vld [vmem:[%s953_s5] ss:$0 sm:$0xff]  ;;  %v537_v14 = vunpack.c.l.s4 %v799_v13 }
  0x17   : > { %v449_v43 = vadd.f32 %v447_v30, %v439_v35  ;;  %v450_v47 = vadd.f32 %v448_v31, %v440_v40  ;;  %v738_v49 = vld [vmem:[%s891_s28 + $0x4] sm:$0x3]  ;;  %v477_v51 = vmul.f32 %v476_v38, %v471_v42  ;;  %v478_v55 = vmul.f32 %v476_v38, %v472_v45  ;;  %v752_v29 = vld [vmem:[%s956_s8] ss:$0 sm:$0xff] }
  0x18   : > { %v740_v56 = vld [vmem:[%s896_s11 + $0x4] sm:$0x3]  ;;  %v488_v58 = vmul.f32 %v738_v49, %v487_v46  ;;  %v538_v20 = vunpack.c.0.s8 %v537_v14  ;;  %v753_v31 = vld [vmem:[%s957_s9] ss:$0 sm:$0xff] }
  0x19   : > { %v459_v50 = vadd.f32 %v457_v36, %v449_v43  ;;  %v460_v54 = vadd.f32 %v458_v41, %v450_v47  ;;  %v742_v63 = vld [vmem:[%s891_s28 + $0x5] sm:$0x3]  ;;  %v499_v1 = vmul.f32 %v740_v56, %v498_v53 }
  0x1a   : > { %v509_v5 = vmul.f32 %v744_v60, %v742_v63  ;;  %v541_v25 = vsub.s32 %v538_v20, %v869_v4 }
  0x1b   : > { %v469_v57 = vadd.f32 %v467_v44, %v459_v50  ;;  %v470_v61 = vadd.f32 %v468_v48, %v460_v54 }
  0x1d   : > { %v479_v0 = vadd.f32 %v477_v51, %v469_v57  ;;  %v480_v3 = vadd.f32 %v478_v55, %v470_v61 }
  0x1f   : > { %v490_v7 = vadd.f32 %v488_v58, %v479_v0  ;;  %v491_v8 = vadd.f32 %v489_v62, %v480_v3 }
  0x21   : > { %v501_v10 = vadd.f32 %v499_v1, %v490_v7  ;;  %v502_v11 = vadd.f32 %v500_v6, %v491_v8 }
  0x23   : > { %v511_v15 = vadd.f32 %v509_v5, %v501_v10  ;;  %v512_v16 = vadd.f32 %v510_v9, %v502_v11 }
  0x25   : > { %v520_v18 = vmul.f32 %v745_v12, %v511_v15  ;;  %v521_v19 = vmul.f32 %v745_v12, %v512_v16 }
  0x27   : > { %v529_v21 = vadd.f32 %v746_v17, %v520_v18  ;;  %v530_v22 = vadd.f32 %v746_v17, %v521_v19 }
  0x29   : > { %v531_v23 = vmax.f32 %v529_v21, 0.0  ;;  %v532_v24 = vmax.f32 %v530_v22, 0.0 }
  0x2b   : > { %v535_v26 = vcombine.low %v531_v23, %v532_v24 }
  0x2d   : > { %v542_v27 = vrot.slane %v535_v26, %v541_v25 }
  0x2f   : > { %v544_v28 = vpack.c.bf16 %v542_v27, %v542_v27 }
  0x31   : > { %770 = vmatmul.mubr.msk.bf16.vlgmr.msra.gmra.mrb[0].mxu0 %vm577_vm1, %v544_v28 }
 0x104   : > { %v615_v30 = vpop.f32.mrb[0].mxu0 }
 0x105   : > { %v628_v32 = vmul.f32 %v752_v29, %v615_v30  ;;  %v771_v33 = vpop.f32.mrb[1].mxu0 }
 0x106   : > { %v618_v34 = vpop.f32.mrb[2].mxu0 }
 0x107   : > { %v636_v35 = vadd.f32 %v753_v31, %v628_v32  ;;  %v772_v4 = vpop.f32.mrb[3].mxu0 }
 0x109   : > { %v637_v36 = vmax.f32 %v636_v35, 0.0 }
 0x10b   : > { %638 = vst [vmem:[%s417_s15] sm:$0xf] %v637_v36 }
 0x10c PF: > { %s20_s13 = sadd.s32 1, %s795_s13  }
 0x10d   : > { %p17_p4 = scmp.ge.s32.totalorder %s20_s13, 4  }
 0x10f   :  { %19 = sbr.rel (!%p17_p4) target bundleno = 1 (0x1), region = 101 }

// kernel: _lambda_.22
= control target key start
LH: loop header
LB: loop body
LE: loop exit
PB: predicated region body
PF: predicated region fallthrough
CT: control target
= control target key end

     0   :  { %s714_s24 = smov 0   ;;  %s817_s0 = inlined_call_operand.vmem [shape: f32[2,4,4,128], index: 0, kind: input, shape index: {}]   ;;  %s818_s1 = inlined_call_operand.vmem [shape: f32[9,128], index: 1, kind: input, shape index: {}]   ;;  %s819_s2 = inlined_call_operand.vmem [shape: f32[1,128], index: 2, kind: input, shape index: {}]   ;;  %s820_s3 = inlined_call_operand.vmem [shape: f32[1,128], index: 3, kind: input, shape index: {}]   ;;  %s821_s4 = inlined_call_operand.vmem [shape: bf16[128,128], index: 4, kind: input, shape index: {}]   ;;  %s822_s5 = inlined_call_operand.vmem [shape: f32[1,128], index: 5, kind: input, shape index: {}]   ;;  %s823_s6 = inlined_call_operand.vmem [shape: f32[1,128], index: 6, kind: input, shape index: {}]   ;;  %s824_s7 = inlined_call_operand.vmem [shape: f32[2,4,128], index: 7, kind: output, shape index: {}]  }
   0x1 LB: > { %s579_s25 = sadd.s32 4294967295, %s669_s24   ;;  %p583_p0 = scmp.ge.s32.totalorder %s669_s24, 1  ;;  %s669_s24 = sphi %s714_s24, %s17_s24  }
   0x2   : > { %p237_p1 = scmp.lt.s32.totalorder %s669_s24, 3 }
   0x4   : > { %p238_p2 = pnand %p583_p0, %p237_p1 }
   0x5   : > { %v655_v0 = vld [vmem:[%s821_s4] sm:$0xff] (!%p238_p2)   ;;  %v282_v1 = vlaneseq (!%p238_p2)  ;;  %v671_v2 = vmov (!%p238_p2), 0.0   ;;  %v656_v3 = vld [vmem:[%s821_s4 + $0x8] sm:$0xff] (!%p238_p2)   ;;  %vm672_vm0 = vmmov (!%p238_p2), 0   ;;  %p268_p3 = scmp.lt.s32.totalorder (!%p238_p2), %s579_s25, 1  ;;  %v657_v6 = vld [vmem:[%s821_s4 + $0x10] sm:$0xff] (!%p238_p2)  }
   0x6   : > { %241 = sbr.rel (%p238_p2) target bundleno = 267 (0x10b), region = 48  ;;  %624 = vmatprep.subr.bf16.mxu0 (!%p238_p2), %v671_v2  ;;  %640 = vmatprep.mubr.msk.bf16.mxu0 (!%p238_p2), %vm672_vm0, %v671_v2  ;;  %v278_v8 = vld [vmem:[%s818_s1] sm:$0xff] (!%p238_p2)  ;;  %v658_v16 = vld [vmem:[%s821_s4 + $0x18] sm:$0xff] (!%p238_p2)   ;;  %v660_v53 = vld [vmem:[%s821_s4 + $0x28] sm:$0xff] (!%p238_p2)  }
   0x7   : > { %625 = vmatpush3.bf16.msra.mxu0 (!%p238_p2), %v655_v0  ;;  %v731_v4 = vshrl.u32 (!%p238_p2), %v282_v1, 7  ;;  %v659_v36 = vld [vmem:[%s821_s4 + $0x20] sm:$0xff] (!%p238_p2)   ;;  %v599_v0 = vld [vmem:[%s818_s1 + $0x8] ss:$0 sm:$0xff] (!%p238_p2) }
   0x8   : > { %626 = vmatprep.subr.bf16.mxu0 (!%p238_p2), %v671_v2 }
   0x9   : > { %v284_v5 = vsub.s32 (!%p238_p2), 0, %v731_v4  ;;  %v294_v7 = vsub.s32 (!%p238_p2), 1, %v731_v4  ;;  %v304_v10 = vsub.s32 (!%p238_p2), 2, %v731_v4  ;;  %v315_v28 = vsub.s32 (!%p238_p2), 3, %v731_v4 }
   0xa   : > { %v325_v29 = vsub.s32 (!%p238_p2), 4, %v731_v4  ;;  %v335_v34 = vsub.s32 (!%p238_p2), 5, %v731_v4  ;;  %v346_v35 = vsub.s32 (!%p238_p2), 6, %v731_v4  ;;  %v356_v40 = vsub.s32 (!%p238_p2), 7, %v731_v4 }
   0xb   : > { %627 = vmatpush3.bf16.msra.mxu0 (!%p238_p2), %v656_v3  ;;  %v285_v12 = vrot.slane (!%p238_p2), %v278_v8, %v284_v5  ;;  %v295_v15 = vrot.slane (!%p238_p2), %v278_v8, %v294_v7  ;;  %v305_v19 = vrot.slane (!%p238_p2), %v278_v8, %v304_v10  ;;  %v316_v37 = vrot.slane (!%p238_p2), %v278_v8, %v315_v28  ;;  %v661_v5 = vld [vmem:[%s821_s4 + $0x30] sm:$0xff] (!%p238_p2)  }
   0xc   : > { %628 = vmatprep.subr.bf16.mxu0 (!%p238_p2), %v671_v2  ;;  %v326_v38 = vrot.slane (!%p238_p2), %v278_v8, %v325_v29  ;;  %v336_v44 = vrot.slane (!%p238_p2), %v278_v8, %v335_v34  ;;  %v347_v45 = vrot.slane (!%p238_p2), %v278_v8, %v346_v35  ;;  %v357_v57 = vrot.slane (!%p238_p2), %v278_v8, %v356_v40  ;;  %v611_v35 = vld [vmem:[%s823_s6] ss:$0 sm:$0xff] (!%p238_p2) }
   0xd   : > { %s826_s25 = smov (!%p268_p3, %s579_s25), 1 }
   0xe   : > { %s614_s9 = sshll.u32 %s826_s25, 4  ;;  %s586_s14 = sshll.u32 %s826_s25, 2 }
   0xf   : > { %s744_s12 = scalar_lea.vmem %s817_s0, %s614_s9  ;;  %629 = vmatpush3.bf16.msra.mxu0 %v657_v6  ;;  %s276_s17 = scalar_lea.vmem %s824_s7, %s586_s14 }
  0x10   : > { %v280_v9 = vld [vmem:[%s744_s12] sm:$0x3]  ;;  %v281_v11 = vld [vmem:[%s744_s12 + $0x4] sm:$0x3]  ;;  %v300_v17 = vld [vmem:[%s744_s12 + $0x2] sm:$0x3]  ;;  %630 = vmatprep.subr.bf16.mxu0 %v671_v2 }
  0x11   : > { %v290_v13 = vld [vmem:[%s744_s12 + $0x1] sm:$0x3]  ;;  %v291_v14 = vld [vmem:[%s744_s12 + $0x5] sm:$0x3]  ;;  %v286_v20 = vmul.f32 %v285_v12, %v280_v9  ;;  %v287_v21 = vmul.f32 %v285_v12, %v281_v11  ;;  %v306_v24 = vmul.f32 %v305_v19, %v300_v17  ;;  %v588_v27 = vld [vmem:[%s744_s12 + $0x8] sm:$0x3] }
  0x12   : > { %v301_v18 = vld [vmem:[%s744_s12 + $0x6] sm:$0x3]  ;;  %v296_v22 = vmul.f32 %v295_v15, %v290_v13  ;;  %v297_v23 = vmul.f32 %v295_v15, %v291_v14  ;;  %v587_v26 = vld [vmem:[%s744_s12 + $0x4] sm:$0x3]  ;;  %v590_v33 = vld [vmem:[%s744_s12 + $0x9] sm:$0x3]  ;;  %v318_v47 = vmul.f32 %v588_v27, %v316_v37 }
  0x13   : > { %v307_v25 = vmul.f32 %v305_v19, %v301_v18  ;;  %v589_v32 = vld [vmem:[%s744_s12 + $0x5] sm:$0x3]  ;;  %631 = vmatpush3.bf16.msra.mxu0 %v658_v16  ;;  %v592_v43 = vld [vmem:[%s744_s12 + $0xa] sm:$0x3]  ;;  %v317_v46 = vmul.f32 %v587_v26, %v316_v37  ;;  %v328_v49 = vmul.f32 %v590_v33, %v326_v38  ;;  %v593_v51 = vld [vmem:[%s744_s12 + $0x8] sm:$0x3] }
  0x14   : > { %v298_v30 = vadd.f32 %v296_v22, %v286_v20  ;;  %v299_v31 = vadd.f32 %v297_v23, %v287_v21  ;;  %v591_v39 = vld [vmem:[%s744_s12 + $0x6] sm:$0x3]  ;;  %632 = vmatprep.subr.bf16.mxu0 %v671_v2  ;;  %v327_v48 = vmul.f32 %v589_v32, %v326_v38  ;;  %v594_v52 = vld [vmem:[%s744_s12 + $0xc] sm:$0x3]  ;;  %v338_v56 = vmul.f32 %v592_v43, %v336_v44  ;;  %v595_v58 = vld [vmem:[%s744_s12 + $0x9] sm:$0x3] }
  0x15   : > { %v337_v50 = vmul.f32 %v591_v39, %v336_v44  ;;  %v596_v59 = vld [vmem:[%s744_s12 + $0xd] sm:$0x3]  ;;  %v348_v62 = vmul.f32 %v593_v51, %v347_v45  ;;  %v349_v63 = vmul.f32 %v594_v52, %v347_v45  ;;  %v597_v1 = vld [vmem:[%s744_s12 + $0xa] sm:$0x3]  ;;  %v358_v8 = vmul.f32 %v595_v58, %v357_v57  ;;  %v662_v14 = vld [vmem:[%s821_s4 + $0x38] sm:$0xff]  }
  0x16   : > { %v308_v41 = vadd.f32 %v306_v24, %v298_v30  ;;  %v309_v42 = vadd.f32 %v307_v25, %v299_v31  ;;  %v598_v3 = vld [vmem:[%s744_s12 + $0xe] sm:$0x3]  ;;  %v359_v9 = vmul.f32 %v596_v59, %v357_v57  ;;  %v368_v12 = vmul.f32 %v599_v0, %v597_v1  ;;  %v600_v19 = vld [vmem:[%s819_s2] ss:$0 sm:$0xff] }
  0x17   : > { %633 = vmatpush3.bf16.msra.mxu0 %v659_v36  ;;  %v369_v13 = vmul.f32 %v599_v0, %v598_v3  ;;  %v673_v17 = vmov 1983009808   ;;  %v601_v22 = vld [vmem:[%s820_s3] ss:$0 sm:$0xff] }
  0x18   : > { %v319_v54 = vadd.f32 %v317_v46, %v308_v41  ;;  %v320_v55 = vadd.f32 %v318_v47, %v309_v42  ;;  %634 = vmatprep.subr.bf16.mxu0 %v671_v2  ;;  %v396_v18 = vunpack.c.l.s4 %v673_v17  ;;  %v610_v33 = vld [vmem:[%s822_s5] ss:$0 sm:$0xff] }
  0x1a   : > { %v329_v60 = vadd.f32 %v327_v48, %v319_v54  ;;  %v330_v61 = vadd.f32 %v328_v49, %v320_v55  ;;  %v397_v25 = vunpack.c.0.s8 %v396_v18 }
  0x1b   : > { %635 = vmatpush3.bf16.msra.mxu0 %v660_v53 }
  0x1c   : > { %v339_v6 = vadd.f32 %v337_v50, %v329_v60  ;;  %v340_v7 = vadd.f32 %v338_v56, %v330_v61  ;;  %636 = vmatprep.subr.bf16.mxu0 %v671_v2 }
  0x1e   : > { %v350_v10 = vadd.f32 %v348_v62, %v339_v6  ;;  %v351_v11 = vadd.f32 %v349_v63, %v340_v7 }
  0x1f   : > { %637 = vmatpush3.bf16.msra.mxu0 %v661_v5 }
  0x20   : > { %v360_v15 = vadd.f32 %v358_v8, %v350_v10  ;;  %v361_v16 = vadd.f32 %v359_v9, %v351_v11  ;;  %638 = vmatprep.subr.bf16.mxu0 %v671_v2  ;;  %v400_v2 = vsub.s32 %v397_v25, %v731_v4 }
  0x22   : > { %v370_v20 = vadd.f32 %v368_v12, %v360_v15  ;;  %v371_v21 = vadd.f32 %v369_v13, %v361_v16 }
  0x23   : > { %639 = vmatpush3.bf16.msra.mxu0 %v662_v14 }
  0x24   : > { %v379_v23 = vmul.f32 %v600_v19, %v370_v20  ;;  %v380_v24 = vmul.f32 %v600_v19, %v371_v21 }
  0x26   : > { %v388_v26 = vadd.f32 %v601_v22, %v379_v23  ;;  %v389_v27 = vadd.f32 %v601_v22, %v380_v24 }
  0x28   : > { %v390_v28 = vmax.f32 %v388_v26, 0.0  ;;  %v391_v29 = vmax.f32 %v389_v27, 0.0 }
  0x2a   : > { %v394_v30 = vcombine.low %v390_v28, %v391_v29 }
  0x2c   : > { %v401_v31 = vrot.slane %v394_v30, %v400_v2 }
  0x2e   : > { %v403_v32 = vpack.c.bf16 %v401_v31, %v401_v31 }
  0x30   : > { %641 = vmatmul.mubr.bf16.vlgmr.msra.gmra.mrb[0].mxu0 %v403_v32 }
 0x103   : > { %v502_v34 = vpop.f32.mrb[0].mxu0 }
 0x104   : > { %v515_v36 = vmul.f32 %v610_v33, %v502_v34  ;;  %v642_v37 = vpop.f32.mrb[1].mxu0 }
 0x105   : > { %v505_v38 = vpop.f32.mrb[2].mxu0 }
 0x106   : > { %v523_v39 = vadd.f32 %v611_v35, %v515_v36  ;;  %v643_v40 = vpop.f32.mrb[3].mxu0 }
 0x108   : > { %v524_v4 = vmax.f32 %v523_v39, 0.0 }
 0x10a   : > { %525 = vst [vmem:[%s276_s17] sm:$0xf] %v524_v4 }
 0x10b PF: > { %s17_s24 = sadd.s32 1, %s669_s24  }
 0x10c   : > { %p14_p4 = scmp.ge.s32.totalorder %s17_s24, 4  }
 0x10e   :  { %16 = sbr.rel (!%p14_p4) target bundleno = 1 (0x1), region = 80 }

// kernel: _lambda_.27
= control target key start
LH: loop header
LB: loop body
LE: loop exit
PB: predicated region body
PF: predicated region fallthrough
CT: control target
= control target key end

     0   :  { %s888_s13 = smov 0   ;;  %s994_s0 = inlined_call_operand.vmem [shape: f32[2,2,2,128], index: 0, kind: input, shape index: {}]   ;;  %s995_s1 = inlined_call_operand.vmem [shape: f32[2,2,2,128], index: 1, kind: input, shape index: {}]   ;;  %s996_s2 = inlined_call_operand.vmem [shape: f32[2,2,2,128], index: 2, kind: input, shape index: {}]   ;;  %s997_s3 = inlined_call_operand.vmem [shape: f32[2,2,2,128], index: 3, kind: input, shape index: {}]   ;;  %s998_s4 = inlined_call_operand.vmem [shape: f32[9,128], index: 4, kind: input, shape index: {}]   ;;  %s999_s5 = inlined_call_operand.vmem [shape: f32[1,128], index: 5, kind: input, shape index: {}]   ;;  %s1000_s6 = inlined_call_operand.vmem [shape: f32[1,128], index: 6, kind: input, shape index: {}]   ;;  %s1001_s7 = inlined_call_operand.vmem [shape: bf16[128,256], index: 7, kind: input, shape index: {}]   ;;  %s1002_s8 = inlined_call_operand.vmem [shape: f32[1,256], index: 8, kind: input, shape index: {}]   ;;  %s1003_s9 = inlined_call_operand.vmem [shape: f32[1,256], index: 9, kind: input, shape index: {}]   ;;  %s1004_s10 = inlined_call_operand.vmem [shape: f32[2,1,256], index: 10, kind: output, shape index: {}]  }
   0x1 LB: > { %s750_s14 = sadd.s32 4294967295, %s829_s13   ;;  %p754_p0 = scmp.ge.s32.totalorder %s829_s13, 1  ;;  %s829_s13 = sphi %s888_s13, %s20_s13  }
   0x2   : > { %p342_p1 = scmp.lt.s32.totalorder %s829_s13, 3 }
   0x4   : > { %p343_p2 = pnand %p754_p0, %p342_p1 }
   0x5   : > { %v799_v0 = vld [vmem:[%s1001_s7 + $0x4] ss:$8 sps:$4 sm:$0xff] (!%p343_p2)   ;;  %p394_p3 = scmp.lt.s32.totalorder (!%p343_p2), %s750_s14, 1  ;;  %v801_v1 = vld [vmem:[%s1001_s7] ss:$8 sps:$4 sm:$0xff] (!%p343_p2)   ;;  %v831_v2 = vmov (!%p343_p2), 0   ;;  %v610_v58 = vlaneseq (!%p343_p2) }
   0x6   : > { %346 = sbr.rel (%p343_p2) target bundleno = 270 (0x10e), region = 60  ;;  %599 = vmatprep.mubr.bf16.mxu0 (!%p343_p2), %v831_v2  ;;  %567 = vmatprep.subr.bf16.mxu0 (!%p343_p2), %v799_v0  ;;  %v802_v3 = vld [vmem:[%s1001_s7 + $0x14] ss:$8 sps:$4 sm:$0xff] (!%p343_p2)   ;;  %v804_v4 = vld [vmem:[%s1001_s7 + $0x10] ss:$8 sps:$4 sm:$0xff] (!%p343_p2)   ;;  %v419_v8 = vld [vmem:[%s998_s4] sm:$0xff] (!%p343_p2) }
   0x7   : > { %568 = vmatpush1.bf16.msra.mxu0 (!%p343_p2), %v801_v1  ;;  %v805_v5 = vld [vmem:[%s1001_s7 + $0x24] ss:$8 sps:$4 sm:$0xff] (!%p343_p2)   ;;  %v807_v6 = vld [vmem:[%s1001_s7 + $0x20] ss:$8 sps:$4 sm:$0xff] (!%p343_p2)   ;;  %v808_v7 = vld [vmem:[%s1001_s7 + $0x34] ss:$8 sps:$4 sm:$0xff] (!%p343_p2)  }
   0x8   : > { %569 = vmatprep.subr.bf16.mxu0 (!%p343_p2), %v802_v3  ;;  %v810_v9 = vld [vmem:[%s1001_s7 + $0x30] ss:$8 sps:$4 sm:$0xff] (!%p343_p2)   ;;  %v811_v12 = vld [vmem:[%s1001_s7 + $0x44] ss:$8 sps:$4 sm:$0xff] (!%p343_p2)   ;;  %v426_v14 = vrot.slane (!%p343_p2), %v419_v8, 1  ;;  %v431_v16 = vrot.slane (!%p343_p2), %v419_v8, 2 }
   0x9   : > { %v436_v18 = vrot.slane (!%p343_p2), %v419_v8, 3  ;;  %v441_v21 = vrot.slane (!%p343_p2), %v419_v8, 4  ;;  %v813_v22 = vld [vmem:[%s1001_s7 + $0x40] ss:$8 sps:$4 sm:$0xff] (!%p343_p2)   ;;  %v814_v24 = vld [vmem:[%s1001_s7 + $0x54] ss:$8 sps:$4 sm:$0xff] (!%p343_p2)  }
   0xa   : > { %v446_v27 = vrot.slane (!%p343_p2), %v419_v8, 5  ;;  %v452_v31 = vrot.slane (!%p343_p2), %v419_v8, 6  ;;  %v816_v32 = vld [vmem:[%s1001_s7 + $0x50] ss:$8 sps:$4 sm:$0xff] (!%p343_p2)   ;;  %v817_v34 = vld [vmem:[%s1001_s7 + $0x64] ss:$8 sps:$4 sm:$0xff] (!%p343_p2)  }
   0xb   : > { %570 = vmatpush1.bf16.msra.mxu0 (!%p343_p2), %v804_v4  ;;  %v458_v37 = vrot.slane (!%p343_p2), %v419_v8, 7  ;;  %v819_v41 = vld [vmem:[%s1001_s7 + $0x60] ss:$8 sps:$4 sm:$0xff] (!%p343_p2)   ;;  %v820_v44 = vld [vmem:[%s1001_s7 + $0x74] ss:$8 sps:$4 sm:$0xff] (!%p343_p2)   ;;  %v611_v59 = vshrl.u32 (!%p343_p2), %v610_v58, 7 }
   0xc   : > { %571 = vmatprep.subr.bf16.mxu0 (!%p343_p2), %v805_v5  ;;  %v420_v42 = vld [vmem:[%s998_s4 + $0x8] sm:$0x1] (!%p343_p2)  ;;  %v822_v49 = vld [vmem:[%s1001_s7 + $0x70] ss:$8 sps:$4 sm:$0xff] (!%p343_p2)   ;;  %v465_v51 = vld [vmem:[%s999_s5] sm:$0x1] (!%p343_p2) }
   0xd   : > { %s1006_s14 = smov (!%p394_p3, %s750_s14), 1  ;;  %v467_v53 = vld [vmem:[%s1000_s6] sm:$0x1]  ;;  %v612_v60 = vsub.s32 0, %v611_v59  ;;  %v616_v62 = vsub.s32 1, %v611_v59  ;;  %vm658_vm0 = vcmp.lt.s32.totalorder %v610_v58, 256 }
   0xe   : > { %s785_s25 = sshll.u32 %s1006_s14, 2  ;;  %v608_v61 = vld [vmem:[%s1002_s8] sm:$0x3]  ;;  %v832_v2 = vmov 1966171168   ;;  %s763_s21 = sshll.u32 %s1006_s14, 1 }
   0xf   : > { %s923_s12 = scalar_lea.vmem %s994_s0, %s785_s25  ;;  %s928_s17 = scalar_lea.vmem %s995_s1, %s785_s25  ;;  %572 = vmatpush1.bf16.msra.mxu0 %v807_v6  ;;  %v622_v63 = vld [vmem:[%s1003_s9] sm:$0x3]  ;;  %v613_v0 = vrot.slane %v608_v61, %v612_v60  ;;  %v617_v1 = vrot.slane %v608_v61, %v616_v62  ;;  %v642_v3 = vunpack.c.l.s4 %v832_v2 }
  0x10   : > { %s408_s20 = scalar_lea.vmem %s996_s2, %s785_s25  ;;  %v421_v10 = vld [vmem:[%s923_s12] sm:$0x1]  ;;  %573 = vmatprep.subr.bf16.mxu0 %v808_v7  ;;  %s413_s30 = scalar_lea.vmem %s997_s3, %s785_s25  ;;  %v430_v15 = vld [vmem:[%s923_s12 + $0x1] sm:$0x1]  ;;  %v764_v33 = vld [vmem:[%s923_s12 + $0x2] sm:$0x1]  ;;  %v627_v4 = vrot.slane %v622_v63, %v612_v60  ;;  %v631_v6 = vrot.slane %v622_v63, %v616_v62 }
  0x11   : > { %v424_v11 = vld [vmem:[%s928_s17] sm:$0x1]  ;;  %v422_v13 = vmul.f32 %v421_v10, %v419_v8  ;;  %v433_v20 = vmul.f32 %v431_v16, %v430_v15  ;;  %v445_v28 = vld [vmem:[%s408_s20 + $0x1] sm:$0x1]  ;;  %v765_v38 = vld [vmem:[%s928_s17 + $0x2] sm:$0x1]  ;;  %v454_v40 = vmul.f32 %v764_v33, %v452_v31  ;;  %v643_v10 = vunpack.c.0.s8 %v642_v3  ;;  %s417_s23 = scalar_lea.vmem %s1004_s10, %s763_s21 }
  0x12   : > { %v435_v17 = vld [vmem:[%s408_s20] sm:$0x1]  ;;  %v428_v19 = vmul.f32 %v426_v14, %v424_v11  ;;  %v448_v36 = vmul.f32 %v446_v27, %v445_v28  ;;  %v766_v43 = vld [vmem:[%s923_s12 + $0x3] sm:$0x1]  ;;  %v460_v46 = vmul.f32 %v765_v38, %v458_v37 }
  0x13   : > { %574 = vmatpush1.bf16.msra.mxu0 %v810_v9  ;;  %v440_v23 = vld [vmem:[%s413_s30] sm:$0x1]  ;;  %v438_v26 = vmul.f32 %v436_v18, %v435_v17  ;;  %v463_v48 = vmul.f32 %v766_v43, %v420_v42  ;;  %v646_v17 = vsub.s32 %v643_v10, %v611_v59 }
  0x14   : > { %575 = vmatprep.subr.bf16.mxu0 %v811_v12  ;;  %v429_v25 = vadd.f32 %v428_v19, %v422_v13  ;;  %v443_v30 = vmul.f32 %v441_v21, %v440_v23 }
  0x16   : > { %v434_v29 = vadd.f32 %v433_v20, %v429_v25 }
  0x17   : > { %576 = vmatpush1.bf16.msra.mxu0 %v813_v22 }
  0x18   : > { %577 = vmatprep.subr.bf16.mxu0 %v814_v24  ;;  %v439_v35 = vadd.f32 %v438_v26, %v434_v29 }
  0x1a   : > { %v444_v39 = vadd.f32 %v443_v30, %v439_v35 }
  0x1b   : > { %578 = vmatpush1.bf16.msra.mxu0 %v816_v32 }
  0x1c   : > { %579 = vmatprep.subr.bf16.mxu0 %v817_v34  ;;  %v449_v45 = vadd.f32 %v448_v36, %v444_v39 }
  0x1e   : > { %v455_v47 = vadd.f32 %v454_v40, %v449_v45 }
  0x1f   : > { %580 = vmatpush1.bf16.msra.mxu0 %v819_v41 }
  0x20   : > { %581 = vmatprep.subr.bf16.mxu0 %v820_v44  ;;  %v461_v50 = vadd.f32 %v460_v46, %v455_v47 }
  0x22   : > { %v464_v52 = vadd.f32 %v463_v48, %v461_v50 }
  0x23   : > { %582 = vmatpush1.bf16.msra.mxu0 %v822_v49 }
  0x24   : > { %v466_v54 = vmul.f32 %v465_v51, %v464_v52 }
  0x26   : > { %v468_v55 = vadd.f32 %v467_v53, %v466_v54 }
  0x28   : > { %v469_v56 = vmax.f32 %v468_v55, 0.0 }
  0x2a   : > { %v470_v57 = vpack.c.bf16 %v469_v56, %v469_v56 }
  0x2c   : > { %600 = vmatmul.mubr.bf16.vlgmr.msra.gmra.mrb[0].mxu0 %v470_v57 }
  0xff   : > { %v601_v5 = vpop.f32.mrb[0].mxu0 }
 0x100   : > { %v620_v7 = vmul.f32 %v613_v0, %v601_v5  ;;  %v603_v8 = vpop.f32.mrb[1].mxu0 }
 0x101   : > { %v621_v9 = vmul.f32 %v617_v1, %v603_v8  ;;  %v605_v11 = vpop.f32.mrb[2].mxu0 }
 0x102   : > { %v634_v12 = vadd.f32 %v627_v4, %v620_v7  ;;  %v606_v13 = vpop.f32.mrb[3].mxu0 }
 0x103   : > { %v635_v14 = vadd.f32 %v631_v6, %v621_v9 }
 0x104   : > { %v636_v15 = vmax.f32 %v634_v12, 0.0 }
 0x105   : > { %v637_v16 = vmax.f32 %v635_v14, 0.0 }
 0x107   : > { %v640_v18 = vcombine.low %v636_v15, %v637_v16 }
 0x109   : > { %v647_v19 = vrot.slane %v640_v18, %v646_v17 }
 0x10b   : > { %v654_v20 = vrot.slane %v647_v19, %v646_v17 }
 0x10d   : > { %660 = vst.msk [vmem:[%s417_s23] sm:$0x3] %vm658_vm0, %v654_v20 }
 0x10e PF: > { %s20_s13 = sadd.s32 1, %s829_s13  }
 0x10f   : > { %p17_p4 = scmp.ge.s32.totalorder %s20_s13, 4  }
 0x111   :  { %19 = sbr.rel (!%p17_p4) target bundleno = 1 (0x1), region = 101 }

// kernel: _lambda_.29
= control target key start
LH: loop header
LB: loop body
LE: loop exit
PB: predicated region body
PF: predicated region fallthrough
CT: control target
= control target key end

     0   :  { %v22_v5 = vlaneseq  ;;  %s424_s0 = inlined_call_operand.vmem [shape: f32[2,1,256], index: 0, kind: input, shape index: {}]   ;;  %s425_s1 = inlined_call_operand.vmem [shape: bf16[256,16], index: 1, kind: input, shape index: {}]   ;;  %s426_s2 = inlined_call_operand.vmem [shape: f32[1,16], index: 2, kind: input, shape index: {}]   ;;  %s427_s3 = inlined_call_operand.hbm [shape: f32[2,16], index: 3, kind: output, shape index: {}]  }
   0x1   :  { %v294_v0 = vld [vmem:[%s425_s1 + $0x40] sm:$0xff]   ;;  %v296_v2 = vld [vmem:[%s425_s1 + $0x48] sm:$0xff]   ;;  %v298_v4 = vld [vmem:[%s425_s1 + $0x50] sm:$0xff]  }
   0x2   :  { %v295_v1 = vld [vmem:[%s425_s1] sm:$0xff]   ;;  %271 = vmatprep.subr.bf16.mxu0 %v294_v0  ;;  %v297_v3 = vld [vmem:[%s425_s1 + $0x8] sm:$0xff]   ;;  %v299_v6 = vld [vmem:[%s425_s1 + $0x10] sm:$0xff]   ;;  %v23_v8 = vshrl.u32 %v22_v5, 7 }
   0x3   :  { %272 = vmatpush3.bf16.msra.mxu0 %v295_v1  ;;  %v300_v7 = vld [vmem:[%s425_s1 + $0x58] sm:$0xff]   ;;  %v302_v10 = vld [vmem:[%s425_s1 + $0x60] sm:$0xff]   ;;  %v304_v14 = vld [vmem:[%s425_s1 + $0x68] sm:$0xff]  }
   0x4   :  { %273 = vmatprep.subr.bf16.mxu0 %v296_v2  ;;  %v301_v9 = vld [vmem:[%s425_s1 + $0x18] sm:$0xff]   ;;  %v24_v11 = vsub.s32 0, %v23_v8  ;;  %v28_v12 = vsub.s32 1, %v23_v8  ;;  %v303_v13 = vld [vmem:[%s425_s1 + $0x20] sm:$0xff]  }
   0x5   :  { %v16_v15 = vld [vmem:[%s424_s0] sm:$0x3]  ;;  %v17_v16 = vld [vmem:[%s424_s0 + $0x2] sm:$0x3] }
   0x7   :  { %274 = vmatpush3.bf16.msra.mxu0 %v297_v3 }
   0x8   :  { %275 = vmatprep.subr.bf16.mxu0 %v298_v4 }
   0xb   :  { %276 = vmatpush3.bf16.msra.mxu0 %v299_v6 }
   0xc   :  { %277 = vmatprep.subr.bf16.mxu0 %v300_v7 }
   0xf   :  { %278 = vmatpush3.bf16.msra.mxu0 %v301_v9 }
  0x10   :  { %279 = vmatprep.subr.bf16.mxu0 %v302_v10 }
  0x11   :  { %8 = vsyncpa [#allocation3], 0  ;;  %v25_v17 = vrot.slane %v16_v15, %v24_v11  ;;  %v29_v18 = vrot.slane %v16_v15, %v28_v12  ;;  %v33_v19 = vrot.slane %v17_v16, %v24_v11  ;;  %v37_v20 = vrot.slane %v17_v16, %v28_v12  ;;  %v305_v21 = vld [vmem:[%s425_s1 + $0x28] sm:$0xff]   ;;  %v306_v26 = vld [vmem:[%s425_s1 + $0x70] sm:$0xff]   ;;  %s334_s22 = smov [#allocation2]  }
  0x12   :  { %vm94_vm0 = vcmask 1041409   ;;  %v307_v30 = vld [vmem:[%s425_s1 + $0x30] sm:$0xff]   ;;  %v308_v34 = vld [vmem:[%s425_s1 + $0x78] sm:$0xff]   ;;  %v254_v41 = vld [vmem:[%s426_s2] ss:$0 sm:$0xff]  ;;  %s246_s23 = sshll.u32 %s334_s22, 4  ;;  %s247_s23 = int_to_ptr.vmem [resolvable:$true] %s246_s23 }
  0x13   :  { %280 = vmatpush3.bf16.msra.mxu0 %v303_v13  ;;  %v42_v22 = vpack.c.bf16 %v25_v17, %v25_v17  ;;  %v43_v23 = vpack.c.bf16 %v29_v18, %v29_v18  ;;  %v44_v24 = vpack.c.bf16 %v33_v19, %v33_v19  ;;  %v45_v25 = vpack.c.bf16 %v37_v20, %v37_v20  ;;  %v309_v37 = vld [vmem:[%s425_s1 + $0x38] sm:$0xff]   ;;  %s310_s1 = scalar_lea.vmem %s247_s23, 32  ;;  %p315_p1 = scmp.lt.s32.totalorder %s247_s23, %s247_s23 }
  0x14   :  { %281 = vmatprep.subr.bf16.mxu0 %v304_v14  ;;  %vm238_vm1 = vcmask 123904   ;;  %p311_p0 = scmp.ne.s32.totalorder %s247_s23, %s310_s1  ;;  %p316_p2 = scmp.lt.s32.totalorder %s310_s1, %s310_s1 }
  0x15   :  { %v90_v27 = vunpack.c.l.b16 %v43_v23  ;;  %v92_v28 = vunpack.c.l.b16 %v45_v25  ;;  %v91_v29 = vunpack.c.l.b16 %v44_v24  ;;  %v89_v32 = vunpack.c.l.b16 %v42_v22 }
  0x16   :  { %p317_p3 = por %p316_p2, %p315_p1 }
  0x17   :  { %282 = vmatpush3.bf16.msra.mxu0 %v305_v21  ;;  %v96_v31 = vrot.slane %v92_v28, 7  ;;  %v93_v33 = vrot.slane %v91_v29, 7 }
  0x18   :  { %283 = vmatprep.subr.bf16.mxu0 %v306_v26  ;;  %p318_p4 = pnand %p317_p3, %p311_p0 }
  0x19   :  { %v97_v35 = vsel %vm94_vm0, %v96_v31, %v90_v27  ;;  %v95_v38 = vsel %vm94_vm0, %v93_v33, %v89_v32 }
  0x1a   :  { %v99_v36 = vpack.c.b16 %v97_v35, %v97_v35  ;;  %v98_v39 = vpack.c.b16 %v95_v38, %v95_v38 }
  0x1b   :  { %284 = vmatpush3.bf16.msra.mxu0 %v307_v30 }
  0x1c   :  { %285 = vmatprep.subr.bf16.mxu0 %v308_v34  ;;  %230 = vmatprep.mubr.bf16.mxu0 %v99_v36 }
  0x1f   :  { %286 = vmatpush3.bf16.msra.mxu0 %v309_v37 }
  0x22   :  { %231 = vmatmul.mubr.bf16.vlgmr.msra.gmra.mrb[0].mxu0 %v98_v39 }
  0xf5   :  { %v287_v40 = vpop.f32.mrb[0].mxu0 }
  0xf6   :  { %v288_v42 = vpop.f32.mrb[1].mxu0 }
  0xf7   :  { %v289_v43 = vadd.f32 %v288_v42, %v287_v40  ;;  %v290_v44 = vpop.f32.mrb[2].mxu0 }
  0xf8   :  { %v291_v45 = vpop.f32.mrb[3].mxu0 }
  0xf9   :  { %v233_v46 = vadd.f32 %v289_v43, %v254_v41 }
  0xfb   :  { %239 = vst.msk [vmem:[#allocation2] sm:$0x3] %vm238_vm1, %v233_v46 }
  0xfc   :  { %321 = shalt.err (!%p318_p4)
}
  0xfd   :  { %s322_s2 = scalar_lea.hbm %s427_s3, 32 }
  0xfe   :  { %p323_p5 = scmp.ne.s32.totalorder %s427_s3, %s322_s2  ;;  %p326_p6 = scmp.lt.u32.totalorder %s322_s2, %s427_s3 }
 0x100   :  { %p328_p7 = pnand %p326_p6, %p323_p5 }
 0x102   :  { %331 = shalt.err (!%p328_p7)
}
 0x103   :  { %249 = dma.vmem_to_hbm [thread:$0]  %s247_s23, 32, %s427_s3, [#allocation3]  }
 0x104   :  { %332 = dma.done.wait [#allocation3], 32  }
 0x105   :  { %333 = vsyncadd [#allocation3], 4294967264 }
 0x106   :  { %253 = vsyncpa [#allocation3], 1 }

// kernel: _lambda_.28
= control target key start
LH: loop header
LB: loop body
LE: loop exit
PB: predicated region body
PF: predicated region fallthrough
CT: control target
= control target key end

     0   :  { %s915_s24 = smov 0   ;;  %s1083_s0 = inlined_call_operand.vmem [shape: f32[2,3,3,256], index: 0, kind: input, shape index: {}]   ;;  %s1084_s1 = inlined_call_operand.vmem [shape: f32[9,256], index: 1, kind: input, shape index: {}]   ;;  %s1085_s2 = inlined_call_operand.vmem [shape: f32[1,256], index: 2, kind: input, shape index: {}]   ;;  %s1086_s3 = inlined_call_operand.vmem [shape: f32[1,256], index: 3, kind: input, shape index: {}]   ;;  %s1087_s4 = inlined_call_operand.vmem [shape: bf16[256,256], index: 4, kind: input, shape index: {}]   ;;  %s1088_s5 = inlined_call_operand.vmem [shape: f32[1,256], index: 5, kind: input, shape index: {}]   ;;  %s1089_s6 = inlined_call_operand.vmem [shape: f32[1,256], index: 6, kind: input, shape index: {}]   ;;  %s1090_s7 = inlined_call_operand.vmem [shape: f32[2,1,256], index: 7, kind: output, shape index: {}]  }
   0x1 LB: > { %s755_s25 = sadd.s32 4294967295, %s872_s24   ;;  %p759_p0 = scmp.ge.s32.totalorder %s872_s24, 1  ;;  %s872_s24 = sphi %s915_s24, %s17_s24  }
   0x2   : > { %p237_p1 = scmp.lt.s32.totalorder %s872_s24, 3 }
   0x4   : > { %p238_p2 = pnand %p759_p0, %p237_p1 }
   0x5   : > { %v814_v0 = vld [vmem:[%s1087_s4 + $0x4] ss:$8 sps:$4 sm:$0xff] (!%p238_p2)   ;;  %v816_v1 = vld [vmem:[%s1087_s4] ss:$8 sps:$4 sm:$0xff] (!%p238_p2)   ;;  %v817_v2 = vld [vmem:[%s1087_s4 + $0x14] ss:$8 sps:$4 sm:$0xff] (!%p238_p2)   ;;  %v288_v11 = vlaneseq (!%p238_p2) }
   0x6   : > { %241 = sbr.rel (%p238_p2) target bundleno = 296 (0x128), region = 48  ;;  %604 = vmatprep.subr.bf16.mxu0 (!%p238_p2), %v814_v0  ;;  %v819_v3 = vld [vmem:[%s1087_s4 + $0x10] ss:$8 sps:$4 sm:$0xff] (!%p238_p2)   ;;  %v820_v4 = vld [vmem:[%s1087_s4 + $0x24] ss:$8 sps:$4 sm:$0xff] (!%p238_p2)   ;;  %p268_p3 = scmp.lt.s32.totalorder (!%p238_p2), %s755_s25, 1 }
   0x7   : > { %605 = vmatpush1.bf16.msra.mxu0 (!%p238_p2), %v816_v1  ;;  %v822_v5 = vld [vmem:[%s1087_s4 + $0x20] ss:$8 sps:$4 sm:$0xff] (!%p238_p2)   ;;  %v823_v6 = vld [vmem:[%s1087_s4 + $0x34] ss:$8 sps:$4 sm:$0xff] (!%p238_p2)   ;;  %v825_v7 = vld [vmem:[%s1087_s4 + $0x30] ss:$8 sps:$4 sm:$0xff] (!%p238_p2)  }
   0x8   : > { %606 = vmatprep.subr.bf16.mxu0 (!%p238_p2), %v817_v2  ;;  %v826_v8 = vld [vmem:[%s1087_s4 + $0x44] ss:$8 sps:$4 sm:$0xff] (!%p238_p2)   ;;  %v874_v9 = vmov (!%p238_p2), 1966171168   ;;  %v828_v12 = vld [vmem:[%s1087_s4 + $0x40] ss:$8 sps:$4 sm:$0xff] (!%p238_p2)  }
   0x9   : > { %v286_v10 = vunpack.c.l.s4 (!%p238_p2), %v874_v9  ;;  %v829_v13 = vld [vmem:[%s1087_s4 + $0x54] ss:$8 sps:$4 sm:$0xff] (!%p238_p2)   ;;  %v959_v15 = vshrl.u32 (!%p238_p2), %v288_v11, 7  ;;  %v831_v16 = vld [vmem:[%s1087_s4 + $0x50] ss:$8 sps:$4 sm:$0xff] (!%p238_p2)   ;;  %vm695_vm0 = vcmp.lt.s32.totalorder (!%p238_p2), %v288_v11, 256 }
   0xa   : > { %v832_v17 = vld [vmem:[%s1087_s4 + $0x64] ss:$8 sps:$4 sm:$0xff] (!%p238_p2)   ;;  %v862_v19 = vld [vmem:[%s1084_s1] ss:$8 sps:$4 sm:$0xff] (!%p238_p2)   ;;  %v835_v21 = vld [vmem:[%s1087_s4 + $0x74] ss:$8 sps:$4 sm:$0xff] (!%p238_p2)  }
   0xb   : > { %607 = vmatpush1.bf16.msra.mxu0 (!%p238_p2), %v819_v3  ;;  %v287_v14 = vunpack.c.0.s8 (!%p238_p2), %v286_v10  ;;  %v834_v20 = vld [vmem:[%s1087_s4 + $0x60] ss:$8 sps:$4 sm:$0xff] (!%p238_p2)   ;;  %v864_v24 = vld [vmem:[%s1084_s1 + $0x4] ss:$8 sps:$4 sm:$0xff] (!%p238_p2)   ;;  %v837_v25 = vld [vmem:[%s1087_s4 + $0x70] ss:$8 sps:$4 sm:$0xff] (!%p238_p2)  }
   0xc   : > { %608 = vmatprep.subr.bf16.mxu0 (!%p238_p2), %v820_v4  ;;  %v838_v31 = vld [vmem:[%s1087_s4 + $0x84] ss:$8 sps:$4 sm:$0xff] (!%p238_p2)   ;;  %v865_v41 = vld [vmem:[%s1084_s1 + $0x10] ss:$8 sps:$4 sm:$0x11] (!%p238_p2)  }
   0xd   : > { %s1092_s25 = smov (!%p268_p3, %s755_s25), 1  ;;  %v969_v18 = vsub.s32 %v287_v14, %v959_v15  ;;  %v840_v42 = vld [vmem:[%s1087_s4 + $0x80] ss:$8 sps:$4 sm:$0xff]   ;;  %v841_v44 = vld [vmem:[%s1087_s4 + $0x94] ss:$8 sps:$4 sm:$0xff]  }
   0xe   : > { %s804_s27 = smul.u32 24, %s1092_s25  ;;  %v843_v53 = vld [vmem:[%s1087_s4 + $0x90] ss:$8 sps:$4 sm:$0xff]   ;;  %v844_v55 = vld [vmem:[%s1087_s4 + $0xa4] ss:$8 sps:$4 sm:$0xff]   ;;  %s761_s22 = sshll.u32 %s1092_s25, 1 }
   0xf   : > { %609 = vmatpush1.bf16.msra.mxu0 %v822_v5  ;;  %v291_v22 = vrot.slane %v862_v19, %v969_v18  ;;  %v336_v30 = vrot.slane %v864_v24, %v969_v18  ;;  %v383_v52 = vrot.slane %v865_v41, %v969_v18  ;;  %v846_v63 = vld [vmem:[%s1087_s4 + $0xa0] ss:$8 sps:$4 sm:$0xff]   ;;  %v847_v1 = vld [vmem:[%s1087_s4 + $0xb4] ss:$8 sps:$4 sm:$0xff]   ;;  %v406_v19 = vsub.s32 1, %v959_v15 }
  0x10   : > { %610 = vmatprep.subr.bf16.mxu0 %v823_v6  ;;  %s974_s11 = scalar_lea.vmem %s1083_s0, %s804_s27  ;;  %v849_v6 = vld [vmem:[%s1087_s4 + $0xb0] ss:$8 sps:$4 sm:$0xff]   ;;  %v394_v9 = vld [vmem:[%s1085_s2] sm:$0x3]  ;;  %v853_v14 = vld [vmem:[%s1087_s4 + $0xd4] ss:$8 sps:$4 sm:$0xff]   ;;  %s276_s27 = scalar_lea.vmem %s1090_s7, %s761_s22 }
  0x11   : > { %v281_v23 = vld [vmem:[%s974_s11] ss:$4 sm:$0x3]  ;;  %v298_v26 = vrot.slane %v291_v22, %v969_v18  ;;  %v304_v27 = vcombine.high %v291_v22, %v291_v22  ;;  %v762_v28 = vld [vmem:[%s974_s11 + $0x1] ss:$4 sm:$0x3]  ;;  %v349_v36 = vcombine.high %v336_v30, %v336_v30  ;;  %v343_v40 = vrot.slane %v336_v30, %v969_v18 }
  0x12   : > { %v763_v29 = vld [vmem:[%s974_s11 + $0x2] ss:$4 sm:$0x3]  ;;  %v764_v35 = vld [vmem:[%s974_s11 + $0x8] ss:$4 sm:$0x3]  ;;  %v390_v62 = vrot.slane %v383_v52, %v969_v18 }
  0x13   : > { %611 = vmatpush1.bf16.msra.mxu0 %v825_v7  ;;  %v300_v32 = vmul.f32 %v298_v26, %v281_v23  ;;  %v311_v33 = vrot.slane %v304_v27, %v969_v18  ;;  %v317_v34 = vcombine.high %v298_v26, %v298_v26  ;;  %v765_v43 = vld [vmem:[%s974_s11 + $0x9] ss:$4 sm:$0x3]  ;;  %v356_v47 = vrot.slane %v349_v36, %v969_v18  ;;  %v766_v48 = vld [vmem:[%s974_s11 + $0xa] ss:$4 sm:$0x3] }
  0x14   : > { %612 = vmatprep.subr.bf16.mxu0 %v826_v8  ;;  %v345_v50 = vmul.f32 %v765_v43, %v343_v40  ;;  %v362_v51 = vcombine.high %v343_v40, %v343_v40  ;;  %v767_v54 = vld [vmem:[%s974_s11 + $0x10] ss:$4 sm:$0x3]  ;;  %v768_v59 = vld [vmem:[%s974_s11 + $0x11] ss:$4 sm:$0x3] }
  0x15   : > { %v313_v37 = vmul.f32 %v762_v28, %v311_v33  ;;  %v319_v38 = vmul.f32 %v763_v29, %v317_v34  ;;  %v323_v39 = vcombine.high %v311_v33, %v311_v33  ;;  %v358_v57 = vmul.f32 %v766_v48, %v356_v47  ;;  %v769_v0 = vld [vmem:[%s974_s11 + $0x12] ss:$4 sm:$0x3]  ;;  %v850_v7 = vld [vmem:[%s1087_s4 + $0xc4] ss:$8 sps:$4 sm:$0xff]  }
  0x16   : > { %v368_v58 = vcombine.high %v356_v47, %v356_v47  ;;  %v364_v61 = vmul.f32 %v767_v54, %v362_v51  ;;  %v392_v5 = vmul.f32 %v769_v0, %v390_v62  ;;  %v402_v24 = vsub.s32 0, %v959_v15  ;;  %v859_v26 = vld [vmem:[%s1087_s4 + $0xf4] ss:$8 sps:$4 sm:$0xff]   ;;  %v861_v29 = vld [vmem:[%s1087_s4 + $0xf0] ss:$8 sps:$4 sm:$0xff]  }
  0x17   : > { %613 = vmatpush1.bf16.msra.mxu0 %v828_v12  ;;  %v314_v45 = vadd.f32 %v313_v37, %v300_v32  ;;  %v325_v46 = vmul.f32 %v764_v35, %v323_v39  ;;  %v852_v12 = vld [vmem:[%s1087_s4 + $0xc0] ss:$8 sps:$4 sm:$0xff]  }
  0x18   : > { %614 = vmatprep.subr.bf16.mxu0 %v829_v13  ;;  %v370_v3 = vmul.f32 %v768_v59, %v368_v58  ;;  %v396_v13 = vld [vmem:[%s1086_s3] sm:$0x3] }
  0x19   : > { %v320_v49 = vadd.f32 %v319_v38, %v314_v45  ;;  %v645_v30 = vld [vmem:[%s1088_s5] sm:$0x3] }
  0x1a   : > { %v650_v32 = vrot.slane %v645_v30, %v402_v24  ;;  %v654_v33 = vrot.slane %v645_v30, %v406_v19 }
  0x1b   : > { %615 = vmatpush1.bf16.msra.mxu0 %v831_v16  ;;  %v326_v56 = vadd.f32 %v325_v46, %v320_v49 }
  0x1c   : > { %616 = vmatprep.subr.bf16.mxu0 %v832_v17 }
  0x1d   : > { %v346_v60 = vadd.f32 %v345_v50, %v326_v56 }
  0x1f   : > { %617 = vmatpush1.bf16.msra.mxu0 %v834_v20  ;;  %v359_v2 = vadd.f32 %v358_v57, %v346_v60  ;;  %v855_v20 = vld [vmem:[%s1087_s4 + $0xd0] ss:$8 sps:$4 sm:$0xff]  }
  0x20   : > { %618 = vmatprep.subr.bf16.mxu0 %v835_v21  ;;  %v856_v21 = vld [vmem:[%s1087_s4 + $0xe4] ss:$8 sps:$4 sm:$0xff]  }
  0x21   : > { %v365_v4 = vadd.f32 %v364_v61, %v359_v2 }
  0x23   : > { %619 = vmatpush1.bf16.msra.mxu0 %v837_v25  ;;  %v371_v8 = vadd.f32 %v370_v3, %v365_v4  ;;  %v858_v25 = vld [vmem:[%s1087_s4 + $0xe0] ss:$8 sps:$4 sm:$0xff]  }
  0x24   : > { %620 = vmatprep.subr.bf16.mxu0 %v838_v31  ;;  %v659_v31 = vld [vmem:[%s1089_s6] sm:$0x3] }
  0x25   : > { %v393_v10 = vadd.f32 %v392_v5, %v371_v8  ;;  %v664_v34 = vrot.slane %v659_v31, %v402_v24  ;;  %v668_v36 = vrot.slane %v659_v31, %v406_v19 }
  0x27   : > { %621 = vmatpush1.bf16.msra.mxu0 %v840_v42  ;;  %v395_v16 = vmul.f32 %v394_v9, %v393_v10 }
  0x28   : > { %622 = vmatprep.subr.bf16.mxu0 %v841_v44 }
  0x29   : > { %v397_v17 = vadd.f32 %v396_v13, %v395_v16 }
  0x2b   : > { %623 = vmatpush1.bf16.msra.mxu0 %v843_v53  ;;  %v398_v22 = vmax.f32 %v397_v17, 0.0 }
  0x2c   : > { %624 = vmatprep.subr.bf16.mxu0 %v844_v55 }
  0x2d   : > { %v407_v23 = vrot.slane %v398_v22, %v406_v19  ;;  %v403_v28 = vrot.slane %v398_v22, %v402_v24 }
  0x2f   : > { %625 = vmatpush1.bf16.msra.mxu0 %v846_v63  ;;  %v411_v27 = vpack.c.bf16 %v407_v23, %v407_v23  ;;  %v410_v15 = vpack.c.bf16 %v403_v28, %v403_v28 }
  0x30   : > { %626 = vmatprep.subr.bf16.mxu0 %v847_v1 }
  0x31   : > { %636 = vmatprep.mubr.bf16.mxu0 %v411_v27 }
  0x33   : > { %627 = vmatpush1.bf16.msra.mxu0 %v849_v6 }
  0x34   : > { %628 = vmatprep.subr.bf16.mxu0 %v850_v7 }
  0x37   : > { %629 = vmatpush1.bf16.msra.mxu0 %v852_v12 }
  0x38   : > { %630 = vmatprep.subr.bf16.mxu0 %v853_v14 }
  0x3b   : > { %631 = vmatpush1.bf16.msra.mxu0 %v855_v20 }
  0x3c   : > { %632 = vmatprep.subr.bf16.mxu0 %v856_v21 }
  0x3f   : > { %633 = vmatpush1.bf16.msra.mxu0 %v858_v25 }
  0x40   : > { %634 = vmatprep.subr.bf16.mxu0 %v859_v26 }
  0x43   : > { %635 = vmatpush1.bf16.msra.mxu0 %v861_v29 }
  0x46   : > { %637 = vmatmul.mubr.bf16.vlgmr.msra.gmra.mrb[0].mxu0 %v410_v15 }
 0x119   : > { %v638_v35 = vpop.f32.mrb[0].mxu0 }
 0x11a   : > { %v657_v37 = vmul.f32 %v650_v32, %v638_v35  ;;  %v640_v38 = vpop.f32.mrb[1].mxu0 }
 0x11b   : > { %v658_v39 = vmul.f32 %v654_v33, %v640_v38  ;;  %v642_v40 = vpop.f32.mrb[2].mxu0 }
 0x11c   : > { %v671_v41 = vadd.f32 %v664_v34, %v657_v37  ;;  %v643_v42 = vpop.f32.mrb[3].mxu0 }
 0x11d   : > { %v672_v43 = vadd.f32 %v668_v36, %v658_v39 }
 0x11e   : > { %v673_v44 = vmax.f32 %v671_v41, 0.0 }
 0x11f   : > { %v674_v45 = vmax.f32 %v672_v43, 0.0 }
 0x121   : > { %v677_v46 = vcombine.low %v673_v44, %v674_v45 }
 0x123   : > { %v684_v47 = vrot.slane %v677_v46, %v969_v18 }
 0x125   : > { %v691_v48 = vrot.slane %v684_v47, %v969_v18 }
 0x127   : > { %697 = vst.msk [vmem:[%s276_s27] sm:$0x3] %vm695_vm0, %v691_v48 }
 0x128 PF: > { %s17_s24 = sadd.s32 1, %s872_s24  }
 0x129   : > { %p14_p4 = scmp.ge.s32.totalorder %s17_s24, 4  }
 0x12b   :  { %16 = sbr.rel (!%p14_p4) target bundleno = 1 (0x1), region = 86 }

</bundles_post_ra>
